<compile_context>
chip_gen: v7x
topology: tpu7x:2x2x1
jax: 0.10.0
libtpu: 0.0.40
codegen_flags: <defaults>
</compile_context>

<pallas_src>
import functools

import jax
import jax.numpy as jnp
from jax.experimental import pallas as pl
from jax.experimental.pallas import tpu as pltpu

NEG_SLOPE = 0.2    # nn.LeakyReLU(0.2)
GN_EPS = 1e-5      # nn.GroupNorm default eps
GN_GROUPS = 2      # nn.GroupNorm(2, C_out)


def stride_generator(N, reverse=False):
    strides = [1, 2] * 10
    if reverse:
        return list(reversed(strides[:N]))
    return strides[:N]


# ----------------------------------------------------------------------------
# Pallas kernel: one ConvSC layer for one batch element.
#   x_ref : (1, L_in, K)   flattened, padded sample (bf16); K = Cin (stride 1)
#                          or 4*Cin (stride 2, phases folded onto channels)
#   w_ref : (T, K, Cout)   per-tap matmul weights (bf16)
#   m_ref : (L_out, 1)     1.0 on real pixels, 0.0 on padding columns (f32)
#   b/g/bt: (1, Cout)      conv bias, GN gamma, GN beta (f32)
#   o_ref : (1, L_out, Cout)  bf16
# Fuses: T shifted-window MXU matmuls (f32 accum) + bias + GroupNorm(2) + LeakyReLU.
# ----------------------------------------------------------------------------
def convsc_kernel(x_ref, w_ref, m_ref, b_ref, g_ref, bt_ref, o_ref,
                  *, tap_offsets, n_valid):
    _, l_out, cout = o_ref.shape
    c2 = cout // GN_GROUPS

    # Hoisted parameter loads (used once, reused below).
    bias = b_ref[...]                                  # (1, C) f32
    gamma = g_ref[...]
    beta = bt_ref[...]
    mask = m_ref[...]                                  # (L_out, 1) f32

    # One aligned bf16 load of the whole flattened sample, staged to f32 so the
    # shifted tap windows below are plain 32-bit sublane slices (robust, cheap).
    xv = x_ref[0].astype(jnp.float32)                  # (L_in, K)

    # 3x3 conv as `len(tap_offsets)` accumulated MXU matmuls (bf16 in, f32 accum).
    acc = None
    for t, off in enumerate(tap_offsets):              # static unroll
        tap = xv[off:off + l_out, :].astype(jnp.bfloat16)          # (L_out, K) bf16
        part = jnp.dot(tap, w_ref[t], preferred_element_type=jnp.float32)
        acc = part if acc is None else acc + part
    y = acc + bias                                     # (L_out, C) f32

    # GroupNorm(2): single-pass column sums / sums-of-squares (sublane reduces),
    # then tiny per-group lane reduces.  Padding columns excluded via the mask.
    s = jnp.sum(y * mask, axis=0, keepdims=True)       # (1, C)
    q = jnp.sum(y * y * mask, axis=0, keepdims=True)   # (1, C)
    inv_n = 1.0 / float(n_valid * c2)
    m0 = jnp.sum(s[:, :c2], axis=1, keepdims=True) * inv_n          # (1, 1)
    m1 = jnp.sum(s[:, c2:], axis=1, keepdims=True) * inv_n
    v0 = jnp.maximum(jnp.sum(q[:, :c2], axis=1, keepdims=True) * inv_n - m0 * m0, 0.0)
    v1 = jnp.maximum(jnp.sum(q[:, c2:], axis=1, keepdims=True) * inv_n - m1 * m1, 0.0)

    ch = jax.lax.broadcasted_iota(jnp.int32, (1, cout), 1)
    in_g0 = ch < c2
    mean = jnp.where(in_g0, m0, m1)                                  # (1, C)
    rstd = jnp.where(in_g0, jax.lax.rsqrt(v0 + GN_EPS), jax.lax.rsqrt(v1 + GN_EPS))
    scale = gamma * rstd                                             # (1, C)
    shift = beta - mean * scale                                      # (1, C)

    yn = y * scale + shift                             # normalize + affine in one pass
    o_ref[0] = jnp.where(yn > 0, yn, NEG_SLOPE * yn).astype(o_ref.dtype)   # LeakyReLU


# ---------------------------- layer glue (plain JAX) -------------------------
def _prep_stride1(x):
    """Pad by 1, flatten HW keeping the width padding in-row, append one zero row.

    Returns (x_flat, tap_offsets, valid_mask, l_out, (h_out, w_out, w_row)).
    """
    b, h, w, c = x.shape
    hp, wp = h + 2, w + 2
    xp = jnp.pad(x, ((0, 0), (1, 1), (1, 1), (0, 0)))
    xf = xp.reshape(b, hp * wp, c)
    xf = jnp.pad(xf, ((0, 0), (0, wp), (0, 0)))          # headroom for bottom-right taps
    l_out = h * wp
    offs = tuple(ky * wp + kx for ky in range(3) for kx in range(3))
    mask = ((jnp.arange(l_out) % wp) < w).astype(jnp.float32).reshape(l_out, 1)
    return xf, offs, mask, l_out, (h, w, wp)


def _prep_stride2(x):
    """Space-to-depth (2x2 phases -> channels), pad, flatten, append one zero row."""
    b, h, w, c = x.shape
    assert h % 2 == 0 and w % 2 == 0, "stride-2 ConvSC expects even spatial dims"
    ho, wo = h // 2, w // 2
    hq, wq = ho + 1, wo + 1
    xp = jnp.pad(x, ((0, 0), (1, 1), (1, 1), (0, 0)))    # (b, 2*hq, 2*wq, c)
    xp = xp.reshape(b, hq, 2, wq, 2, c)
    xph = xp.transpose(0, 1, 3, 2, 4, 5).reshape(b, hq, wq, 4 * c)   # phase p = py*2+px
    xf = xph.reshape(b, hq * wq, 4 * c)
    xf = jnp.pad(xf, ((0, 0), (0, wq), (0, 0)))
    l_out = ho * wq
    offs = tuple(dy * wq + dx for dy in range(2) for dx in range(2))
    mask = ((jnp.arange(l_out) % wq) < wo).astype(jnp.float32).reshape(l_out, 1)
    return xf, offs, mask, l_out, (ho, wo, wq)


def _weight_stride1(w):
    kh, kw, cin, cout = w.shape
    return w.reshape(kh * kw, cin, cout)                 # tap t = ky*3+kx


def _weight_stride2(w):
    """Fold the 3x3/stride-2 kernel into 4 (dy,dx) groups over 4*Cin phase channels."""
    _, _, cin, cout = w.shape
    wp = jnp.pad(w, ((0, 1), (0, 1), (0, 0), (0, 0)))    # zero taps at ky==3 / kx==3
    wg = wp.reshape(2, 2, 2, 2, cin, cout).transpose(0, 2, 1, 3, 4, 5)  # [dy,dx,py,px,ci,co]
    return wg.reshape(4, 4 * cin, cout)                  # group g = dy*2+dx, row = p*cin+ci


def convsc_forward(x_nhwc, params, stride):
    """One ConvSC layer: Conv2d(3x3, stride, pad=1) + GroupNorm(2) + LeakyReLU(0.2)."""
    w, bias, gamma, beta = params                        # w: (3,3,Cin,Cout) f32
    b = x_nhwc.shape[0]
    cout = w.shape[-1]
    x_bf16 = x_nhwc.astype(jnp.bfloat16)                 # bf16 activations in HBM

    if stride == 1:
        xf, offs, mask, l_out, (h_out, w_out, w_row) = _prep_stride1(x_bf16)
        wmat = _weight_stride1(w).astype(jnp.bfloat16)
    elif stride == 2:
        xf, offs, mask, l_out, (h_out, w_out, w_row) = _prep_stride2(x_bf16)
        wmat = _weight_stride2(w).astype(jnp.bfloat16)
    else:
        raise ValueError(f"unsupported stride {stride}")

    l_in, k = xf.shape[1], xf.shape[2]
    n_taps = len(offs)

    kernel = functools.partial(convsc_kernel, tap_offsets=offs, n_valid=h_out * w_out)
    out = pl.pallas_call(
        kernel,
        out_shape=jax.ShapeDtypeStruct((b, l_out, cout), jnp.bfloat16),
        grid=(b,),
        in_specs=[
            pl.BlockSpec((1, l_in, k), lambda i: (i, 0, 0)),
            pl.BlockSpec((n_taps, k, cout), lambda i: (0, 0, 0)),
            pl.BlockSpec((l_out, 1), lambda i: (0, 0)),
            pl.BlockSpec((1, cout), lambda i: (0, 0)),
            pl.BlockSpec((1, cout), lambda i: (0, 0)),
            pl.BlockSpec((1, cout), lambda i: (0, 0)),
        ],
        out_specs=pl.BlockSpec((1, l_out, cout), lambda i: (i, 0, 0)),
        compiler_params=pltpu.CompilerParams(
            dimension_semantics=("parallel",),            # batch across megacore TCs
            vmem_limit_bytes=32 * 1024 * 1024),
    )(xf, wmat, mask,
      bias.reshape(1, cout), gamma.reshape(1, cout), beta.reshape(1, cout))

    # Strip the width-padding columns and restore (B, Ho, Wo, C).
    # NOTE: for large H*W, add an HW-tile grid axis with a two-pass GroupNorm so each
    # block stays within the v7x 64 MiB VMEM budget.
    return out.reshape(b, h_out, w_row, cout)[:, :, :w_out, :]


def init_encoder_params(key, c_in, c_hid, n_s):
    """Deterministic synthetic parameters (shapes follow Encoder.__init__)."""
    strides = stride_generator(n_s)
    params = []
    cin = c_in
    for _ in strides:
        key, kw, kb, kg, kbt = jax.random.split(key, 5)
        w = jax.random.normal(kw, (3, 3, cin, c_hid), jnp.float32) * 0.1
        bias = jax.random.normal(kb, (c_hid,), jnp.float32) * 0.05
        gamma = 1.0 + 0.1 * jax.random.normal(kg, (c_hid,), jnp.float32)
        beta = 0.05 * jax.random.normal(kbt, (c_hid,), jnp.float32)
        params.append((w, bias, gamma, beta))
        cin = c_hid
    return params, strides


@functools.partial(jax.jit, static_argnums=(2,))
def encoder_forward(x_nchw, params, strides):
    """Encoder.forward: returns (latent, enc1), both NCHW like PyTorch."""
    x = jnp.transpose(x_nchw, (0, 2, 3, 1))              # NCHW -> NHWC
    enc1 = convsc_forward(x, params[0], strides[0])
    latent = enc1
    for i in range(1, len(params)):
        latent = convsc_forward(latent, params[i], strides[i])
    return (jnp.transpose(latent, (0, 3, 1, 2)).astype(jnp.float32),
            jnp.transpose(enc1, (0, 3, 1, 2)).astype(jnp.float32))


# -------------------------- pure-JAX reference -------------------------------
# Mirrors the kernel's precision choices: bf16 conv inputs, f32 accumulation,
# f32 GroupNorm / activation, bf16 between layers.
def _ref_convsc(x_nhwc, params, stride):
    w, bias, gamma, beta = params
    y = jax.lax.conv_general_dilated(
        x_nhwc.astype(jnp.bfloat16), w.astype(jnp.bfloat16),
        window_strides=(stride, stride), padding=((1, 1), (1, 1)),
        dimension_numbers=("NHWC", "HWIO", "NHWC"),
        preferred_element_type=jnp.float32)
    y = y + bias
    b, h, wd, c = y.shape
    yg = y.reshape(b, h * wd, GN_GROUPS, c // GN_GROUPS)
    mean = yg.mean(axis=(1, 3), keepdims=True)
    var = ((yg - mean) ** 2).mean(axis=(1, 3), keepdims=True)
    yn = ((yg - mean) * jax.lax.rsqrt(var + GN_EPS)).reshape(b, h, wd, c)
    yn = yn * gamma + beta
    act = jnp.where(yn > 0, yn, NEG_SLOPE * yn)
    return act.astype(jnp.bfloat16)


def _ref_encoder(x_nchw, params, strides):
    x = jnp.transpose(x_nchw, (0, 2, 3, 1))
    enc1 = _ref_convsc(x, params[0], strides[0])
    latent = enc1
    for i in range(1, len(params)):
        latent = _ref_convsc(latent, params[i], strides[i])
    return (jnp.transpose(latent, (0, 3, 1, 2)).astype(jnp.float32),
            jnp.transpose(enc1, (0, 3, 1, 2)).astype(jnp.float32))


if __name__ == "__main__":
    B, C_IN, H, W = 2, 4, 16, 16
    C_HID, N_S = 32, 4

    key = jax.random.PRNGKey(0)
    key, kx = jax.random.split(key)
    x = jax.random.normal(kx, (B, C_IN, H, W), jnp.float32)

    params, strides = init_encoder_params(key, C_IN, C_HID, N_S)

    latent, enc1 = encoder_forward(x, params, tuple(strides))
    jax.block_until_ready((latent, enc1))

    # Sanity check against a plain-JAX reference with matching bf16/f32 precision.
    ref_latent, ref_enc1 = _ref_encoder(x, params, strides)
    assert latent.shape == (B, C_HID, H // 4, W // 4), latent.shape
    assert enc1.shape == (B, C_HID, H, W), enc1.shape
    assert bool(jnp.all(jnp.isfinite(latent))) and bool(jnp.all(jnp.isfinite(enc1)))
    assert jnp.allclose(enc1, ref_enc1, atol=3e-2, rtol=3e-2)
    assert jnp.allclose(latent, ref_latent, atol=3e-2, rtol=3e-2)

    print("KERNEL_OK")
</pallas_src>

<mosaic_0001>
module attributes {stable_mosaic.version = 11 : i64} {
  func.func @convsc_kernel(%arg0: i32, %arg1: memref<1x342x4xbf16, #tpu.memory_space<vmem>>, %arg2: memref<9x4x32xbf16, #tpu.memory_space<vmem>>, %arg3: memref<288x1xf32, #tpu.memory_space<vmem>>, %arg4: memref<1x32xf32, #tpu.memory_space<vmem>>, %arg5: memref<1x32xf32, #tpu.memory_space<vmem>>, %arg6: memref<1x32xf32, #tpu.memory_space<vmem>>, %arg7: memref<1x288x32xbf16, #tpu.memory_space<vmem>>) attributes {dimension_semantics = [#tpu.dimension_semantics<parallel>], iteration_bounds = array<i64: 2>, scalar_prefetch = 0 : i64, scratch_operands = 0 : i64, tpu.core_type = #tpu.core_type<tc>, window_params = [{transform_indices = @transform_0, window_bounds = array<i64: 1, 342, 4>}, {pipeline_mode = #tpu.pipeline_mode<synchronous>, transform_indices = @transform_1, window_bounds = array<i64: 9, 4, 32>}, {pipeline_mode = #tpu.pipeline_mode<synchronous>, transform_indices = @transform_2, window_bounds = array<i64: 288, 1>}, {pipeline_mode = #tpu.pipeline_mode<synchronous>, transform_indices = @transform_3, window_bounds = array<i64: 1, 32>}, {pipeline_mode = #tpu.pipeline_mode<synchronous>, transform_indices = @transform_4, window_bounds = array<i64: 1, 32>}, {pipeline_mode = #tpu.pipeline_mode<synchronous>, transform_indices = @transform_5, window_bounds = array<i64: 1, 32>}, {transform_indices = @transform_6, window_bounds = array<i64: 1, 288, 32>}]} {
    %c0 = arith.constant 0 : index
    %c0_0 = arith.constant 0 : index
    %0 = vector.load %arg4[%c0, %c0_0] : memref<1x32xf32, #tpu.memory_space<vmem>>, vector<1x32xf32>
    %c0_1 = arith.constant 0 : index
    %c0_2 = arith.constant 0 : index
    %1 = vector.load %arg5[%c0_1, %c0_2] : memref<1x32xf32, #tpu.memory_space<vmem>>, vector<1x32xf32>
    %c0_3 = arith.constant 0 : index
    %c0_4 = arith.constant 0 : index
    %2 = vector.load %arg6[%c0_3, %c0_4] : memref<1x32xf32, #tpu.memory_space<vmem>>, vector<1x32xf32>
    %c0_5 = arith.constant 0 : index
    %c0_6 = arith.constant 0 : index
    %3 = vector.load %arg3[%c0_5, %c0_6] : memref<288x1xf32, #tpu.memory_space<vmem>>, vector<288x1xf32>
    %c0_7 = arith.constant 0 : index
    %c0_8 = arith.constant 0 : index
    %c0_9 = arith.constant 0 : index
    %4 = vector.load %arg1[%c0_7, %c0_8, %c0_9] : memref<1x342x4xbf16, #tpu.memory_space<vmem>>, vector<1x342x4xbf16>
    %5 = vector.shape_cast %4 : vector<1x342x4xbf16> to vector<342x4xbf16>
    %6 = arith.extf %5 : vector<342x4xbf16> to vector<342x4xf32>
    %7 = vector.extract_strided_slice %6 {offsets = [0, 0], sizes = [288, 4], strides = [1, 1]} : vector<342x4xf32> to vector<288x4xf32>
    %8 = arith.truncf %7 : vector<288x4xf32> to vector<288x4xbf16>
    %c0_10 = arith.constant 0 : index
    %c0_11 = arith.constant 0 : index
    %c0_12 = arith.constant 0 : index
    %9 = vector.load %arg2[%c0_10, %c0_11, %c0_12] : memref<9x4x32xbf16, #tpu.memory_space<vmem>>, vector<1x4x32xbf16>
    %10 = vector.shape_cast %9 : vector<1x4x32xbf16> to vector<4x32xbf16>
    %cst = arith.constant dense<0.000000e+00> : vector<288x32xf32>
    %11 = tpu.matmul %8, %10, %cst {dimension_numbers = #tpu.dot_dimension_numbers<[1], [0], [0], [1], [0, 0, 1, 1], [], []>} : vector<288x4xbf16>, vector<4x32xbf16>, vector<288x32xf32> -> vector<288x32xf32>
    %12 = vector.extract_strided_slice %6 {offsets = [1, 0], sizes = [288, 4], strides = [1, 1]} : vector<342x4xf32> to vector<288x4xf32>
    %13 = arith.truncf %12 : vector<288x4xf32> to vector<288x4xbf16>
    %c1 = arith.constant 1 : index
    %c0_13 = arith.constant 0 : index
    %c0_14 = arith.constant 0 : index
    %14 = vector.load %arg2[%c1, %c0_13, %c0_14] : memref<9x4x32xbf16, #tpu.memory_space<vmem>>, vector<1x4x32xbf16>
    %15 = vector.shape_cast %14 : vector<1x4x32xbf16> to vector<4x32xbf16>
    %cst_15 = arith.constant dense<0.000000e+00> : vector<288x32xf32>
    %16 = tpu.matmul %13, %15, %cst_15 {dimension_numbers = #tpu.dot_dimension_numbers<[1], [0], [0], [1], [0, 0, 1, 1], [], []>} : vector<288x4xbf16>, vector<4x32xbf16>, vector<288x32xf32> -> vector<288x32xf32>
    %17 = arith.addf %11, %16 : vector<288x32xf32>
    %18 = vector.extract_strided_slice %6 {offsets = [2, 0], sizes = [288, 4], strides = [1, 1]} : vector<342x4xf32> to vector<288x4xf32>
    %19 = arith.truncf %18 : vector<288x4xf32> to vector<288x4xbf16>
    %c2 = arith.constant 2 : index
    %c0_16 = arith.constant 0 : index
    %c0_17 = arith.constant 0 : index
    %20 = vector.load %arg2[%c2, %c0_16, %c0_17] : memref<9x4x32xbf16, #tpu.memory_space<vmem>>, vector<1x4x32xbf16>
    %21 = vector.shape_cast %20 : vector<1x4x32xbf16> to vector<4x32xbf16>
    %cst_18 = arith.constant dense<0.000000e+00> : vector<288x32xf32>
    %22 = tpu.matmul %19, %21, %cst_18 {dimension_numbers = #tpu.dot_dimension_numbers<[1], [0], [0], [1], [0, 0, 1, 1], [], []>} : vector<288x4xbf16>, vector<4x32xbf16>, vector<288x32xf32> -> vector<288x32xf32>
    %23 = arith.addf %17, %22 : vector<288x32xf32>
    %24 = vector.extract_strided_slice %6 {offsets = [18, 0], sizes = [288, 4], strides = [1, 1]} : vector<342x4xf32> to vector<288x4xf32>
    %25 = arith.truncf %24 : vector<288x4xf32> to vector<288x4xbf16>
    %c3 = arith.constant 3 : index
    %c0_19 = arith.constant 0 : index
    %c0_20 = arith.constant 0 : index
    %26 = vector.load %arg2[%c3, %c0_19, %c0_20] : memref<9x4x32xbf16, #tpu.memory_space<vmem>>, vector<1x4x32xbf16>
    %27 = vector.shape_cast %26 : vector<1x4x32xbf16> to vector<4x32xbf16>
    %cst_21 = arith.constant dense<0.000000e+00> : vector<288x32xf32>
    %28 = tpu.matmul %25, %27, %cst_21 {dimension_numbers = #tpu.dot_dimension_numbers<[1], [0], [0], [1], [0, 0, 1, 1], [], []>} : vector<288x4xbf16>, vector<4x32xbf16>, vector<288x32xf32> -> vector<288x32xf32>
    %29 = arith.addf %23, %28 : vector<288x32xf32>
    %30 = vector.extract_strided_slice %6 {offsets = [19, 0], sizes = [288, 4], strides = [1, 1]} : vector<342x4xf32> to vector<288x4xf32>
    %31 = arith.truncf %30 : vector<288x4xf32> to vector<288x4xbf16>
    %c4 = arith.constant 4 : index
    %c0_22 = arith.constant 0 : index
    %c0_23 = arith.constant 0 : index
    %32 = vector.load %arg2[%c4, %c0_22, %c0_23] : memref<9x4x32xbf16, #tpu.memory_space<vmem>>, vector<1x4x32xbf16>
    %33 = vector.shape_cast %32 : vector<1x4x32xbf16> to vector<4x32xbf16>
    %cst_24 = arith.constant dense<0.000000e+00> : vector<288x32xf32>
    %34 = tpu.matmul %31, %33, %cst_24 {dimension_numbers = #tpu.dot_dimension_numbers<[1], [0], [0], [1], [0, 0, 1, 1], [], []>} : vector<288x4xbf16>, vector<4x32xbf16>, vector<288x32xf32> -> vector<288x32xf32>
    %35 = arith.addf %29, %34 : vector<288x32xf32>
    %36 = vector.extract_strided_slice %6 {offsets = [20, 0], sizes = [288, 4], strides = [1, 1]} : vector<342x4xf32> to vector<288x4xf32>
    %37 = arith.truncf %36 : vector<288x4xf32> to vector<288x4xbf16>
    %c5 = arith.constant 5 : index
    %c0_25 = arith.constant 0 : index
    %c0_26 = arith.constant 0 : index
    %38 = vector.load %arg2[%c5, %c0_25, %c0_26] : memref<9x4x32xbf16, #tpu.memory_space<vmem>>, vector<1x4x32xbf16>
    %39 = vector.shape_cast %38 : vector<1x4x32xbf16> to vector<4x32xbf16>
    %cst_27 = arith.constant dense<0.000000e+00> : vector<288x32xf32>
    %40 = tpu.matmul %37, %39, %cst_27 {dimension_numbers = #tpu.dot_dimension_numbers<[1], [0], [0], [1], [0, 0, 1, 1], [], []>} : vector<288x4xbf16>, vector<4x32xbf16>, vector<288x32xf32> -> vector<288x32xf32>
    %41 = arith.addf %35, %40 : vector<288x32xf32>
    %42 = vector.extract_strided_slice %6 {offsets = [36, 0], sizes = [288, 4], strides = [1, 1]} : vector<342x4xf32> to vector<288x4xf32>
    %43 = arith.truncf %42 : vector<288x4xf32> to vector<288x4xbf16>
    %c6 = arith.constant 6 : index
    %c0_28 = arith.constant 0 : index
    %c0_29 = arith.constant 0 : index
    %44 = vector.load %arg2[%c6, %c0_28, %c0_29] : memref<9x4x32xbf16, #tpu.memory_space<vmem>>, vector<1x4x32xbf16>
    %45 = vector.shape_cast %44 : vector<1x4x32xbf16> to vector<4x32xbf16>
    %cst_30 = arith.constant dense<0.000000e+00> : vector<288x32xf32>
    %46 = tpu.matmul %43, %45, %cst_30 {dimension_numbers = #tpu.dot_dimension_numbers<[1], [0], [0], [1], [0, 0, 1, 1], [], []>} : vector<288x4xbf16>, vector<4x32xbf16>, vector<288x32xf32> -> vector<288x32xf32>
    %47 = arith.addf %41, %46 : vector<288x32xf32>
    %48 = vector.extract_strided_slice %6 {offsets = [37, 0], sizes = [288, 4], strides = [1, 1]} : vector<342x4xf32> to vector<288x4xf32>
    %49 = arith.truncf %48 : vector<288x4xf32> to vector<288x4xbf16>
    %c7 = arith.constant 7 : index
    %c0_31 = arith.constant 0 : index
    %c0_32 = arith.constant 0 : index
    %50 = vector.load %arg2[%c7, %c0_31, %c0_32] : memref<9x4x32xbf16, #tpu.memory_space<vmem>>, vector<1x4x32xbf16>
    %51 = vector.shape_cast %50 : vector<1x4x32xbf16> to vector<4x32xbf16>
    %cst_33 = arith.constant dense<0.000000e+00> : vector<288x32xf32>
    %52 = tpu.matmul %49, %51, %cst_33 {dimension_numbers = #tpu.dot_dimension_numbers<[1], [0], [0], [1], [0, 0, 1, 1], [], []>} : vector<288x4xbf16>, vector<4x32xbf16>, vector<288x32xf32> -> vector<288x32xf32>
    %53 = arith.addf %47, %52 : vector<288x32xf32>
    %54 = vector.extract_strided_slice %6 {offsets = [38, 0], sizes = [288, 4], strides = [1, 1]} : vector<342x4xf32> to vector<288x4xf32>
    %55 = arith.truncf %54 : vector<288x4xf32> to vector<288x4xbf16>
    %c8 = arith.constant 8 : index
    %c0_34 = arith.constant 0 : index
    %c0_35 = arith.constant 0 : index
    %56 = vector.load %arg2[%c8, %c0_34, %c0_35] : memref<9x4x32xbf16, #tpu.memory_space<vmem>>, vector<1x4x32xbf16>
    %57 = vector.shape_cast %56 : vector<1x4x32xbf16> to vector<4x32xbf16>
    %cst_36 = arith.constant dense<0.000000e+00> : vector<288x32xf32>
    %58 = tpu.matmul %55, %57, %cst_36 {dimension_numbers = #tpu.dot_dimension_numbers<[1], [0], [0], [1], [0, 0, 1, 1], [], []>} : vector<288x4xbf16>, vector<4x32xbf16>, vector<288x32xf32> -> vector<288x32xf32>
    %59 = arith.addf %53, %58 : vector<288x32xf32>
    %60 = vector.broadcast %0 : vector<1x32xf32> to vector<288x32xf32>
    %61 = arith.addf %59, %60 : vector<288x32xf32>
    %62 = vector.broadcast %3 : vector<288x1xf32> to vector<288x32xf32>
    %63 = arith.mulf %61, %62 : vector<288x32xf32>
    %cst_37 = arith.constant dense<0.000000e+00> : vector<32xf32>
    %64 = vector.multi_reduction <add>, %63, %cst_37 [0] : vector<288x32xf32> to vector<32xf32>
    %65 = vector.shape_cast %64 : vector<32xf32> to vector<1x32xf32>
    %66 = arith.mulf %61, %61 : vector<288x32xf32>
    %67 = vector.broadcast %3 : vector<288x1xf32> to vector<288x32xf32>
    %68 = arith.mulf %66, %67 : vector<288x32xf32>
    %cst_38 = arith.constant dense<0.000000e+00> : vector<32xf32>
    %69 = vector.multi_reduction <add>, %68, %cst_38 [0] : vector<288x32xf32> to vector<32xf32>
    %70 = vector.shape_cast %69 : vector<32xf32> to vector<1x32xf32>
    %71 = vector.extract_strided_slice %65 {offsets = [0, 0], sizes = [1, 16], strides = [1, 1]} : vector<1x32xf32> to vector<1x16xf32>
    %cst_39 = arith.constant dense<0.000000e+00> : vector<1xf32>
    %72 = vector.multi_reduction <add>, %71, %cst_39 [1] : vector<1x16xf32> to vector<1xf32>
    %73 = vector.shape_cast %72 : vector<1xf32> to vector<1x1xf32>
    %cst_40 = arith.constant 2.44140625E-4 : f32
    %74 = vector.broadcast %cst_40 : f32 to vector<1x1xf32>
    %75 = arith.mulf %73, %74 : vector<1x1xf32>
    %76 = vector.extract_strided_slice %65 {offsets = [0, 16], sizes = [1, 16], strides = [1, 1]} : vector<1x32xf32> to vector<1x16xf32>
    %cst_41 = arith.constant dense<0.000000e+00> : vector<1xf32>
    %77 = vector.multi_reduction <add>, %76, %cst_41 [1] : vector<1x16xf32> to vector<1xf32>
    %78 = vector.shape_cast %77 : vector<1xf32> to vector<1x1xf32>
    %cst_42 = arith.constant 2.44140625E-4 : f32
    %79 = vector.broadcast %cst_42 : f32 to vector<1x1xf32>
    %80 = arith.mulf %78, %79 : vector<1x1xf32>
    %81 = vector.extract_strided_slice %70 {offsets = [0, 0], sizes = [1, 16], strides = [1, 1]} : vector<1x32xf32> to vector<1x16xf32>
    %cst_43 = arith.constant dense<0.000000e+00> : vector<1xf32>
    %82 = vector.multi_reduction <add>, %81, %cst_43 [1] : vector<1x16xf32> to vector<1xf32>
    %83 = vector.shape_cast %82 : vector<1xf32> to vector<1x1xf32>
    %cst_44 = arith.constant 2.44140625E-4 : f32
    %84 = vector.broadcast %cst_44 : f32 to vector<1x1xf32>
    %85 = arith.mulf %83, %84 : vector<1x1xf32>
    %86 = arith.mulf %75, %75 : vector<1x1xf32>
    %87 = arith.subf %85, %86 : vector<1x1xf32>
    %cst_45 = arith.constant 0.000000e+00 : f32
    %88 = vector.broadcast %cst_45 : f32 to vector<1x1xf32>
    %89 = arith.maximumf %87, %88 : vector<1x1xf32>
    %90 = vector.extract_strided_slice %70 {offsets = [0, 16], sizes = [1, 16], strides = [1, 1]} : vector<1x32xf32> to vector<1x16xf32>
    %cst_46 = arith.constant dense<0.000000e+00> : vector<1xf32>
    %91 = vector.multi_reduction <add>, %90, %cst_46 [1] : vector<1x16xf32> to vector<1xf32>
    %92 = vector.shape_cast %91 : vector<1xf32> to vector<1x1xf32>
    %cst_47 = arith.constant 2.44140625E-4 : f32
    %93 = vector.broadcast %cst_47 : f32 to vector<1x1xf32>
    %94 = arith.mulf %92, %93 : vector<1x1xf32>
    %95 = arith.mulf %80, %80 : vector<1x1xf32>
    %96 = arith.subf %94, %95 : vector<1x1xf32>
    %cst_48 = arith.constant 0.000000e+00 : f32
    %97 = vector.broadcast %cst_48 : f32 to vector<1x1xf32>
    %98 = arith.maximumf %96, %97 : vector<1x1xf32>
    %99 = tpu.iota {dimensions = array<i32: 1>} : vector<1x32xi32>
    %c16_i32 = arith.constant 16 : i32
    %100 = vector.broadcast %c16_i32 : i32 to vector<1x32xi32>
    %101 = arith.cmpi slt, %99, %100 : vector<1x32xi32>
    %102 = vector.shape_cast %75 : vector<1x1xf32> to vector<1x1xf32>
    %103 = vector.broadcast %102 : vector<1x1xf32> to vector<1x32xf32>
    %104 = vector.shape_cast %80 : vector<1x1xf32> to vector<1x1xf32>
    %105 = vector.broadcast %104 : vector<1x1xf32> to vector<1x32xf32>
    %106 = arith.select %101, %103, %105 : vector<1x32xi1>, vector<1x32xf32>
    %cst_49 = arith.constant 9.99999974E-6 : f32
    %107 = vector.broadcast %cst_49 : f32 to vector<1x1xf32>
    %108 = arith.addf %89, %107 : vector<1x1xf32>
    %109 = math.rsqrt %108 : vector<1x1xf32>
    %cst_50 = arith.constant 9.99999974E-6 : f32
    %110 = vector.broadcast %cst_50 : f32 to vector<1x1xf32>
    %111 = arith.addf %98, %110 : vector<1x1xf32>
    %112 = math.rsqrt %111 : vector<1x1xf32>
    %113 = vector.shape_cast %109 : vector<1x1xf32> to vector<1x1xf32>
    %114 = vector.broadcast %113 : vector<1x1xf32> to vector<1x32xf32>
    %115 = vector.shape_cast %112 : vector<1x1xf32> to vector<1x1xf32>
    %116 = vector.broadcast %115 : vector<1x1xf32> to vector<1x32xf32>
    %117 = arith.select %101, %114, %116 : vector<1x32xi1>, vector<1x32xf32>
    %118 = arith.mulf %1, %117 : vector<1x32xf32>
    %119 = arith.mulf %106, %118 : vector<1x32xf32>
    %120 = arith.subf %2, %119 : vector<1x32xf32>
    %121 = vector.broadcast %118 : vector<1x32xf32> to vector<288x32xf32>
    %122 = arith.mulf %61, %121 : vector<288x32xf32>
    %123 = vector.broadcast %120 : vector<1x32xf32> to vector<288x32xf32>
    %124 = arith.addf %122, %123 : vector<288x32xf32>
    %cst_51 = arith.constant 0.000000e+00 : f32
    %125 = vector.broadcast %cst_51 : f32 to vector<288x32xf32>
    %126 = arith.cmpf ogt, %124, %125 : vector<288x32xf32>
    %cst_52 = arith.constant 2.000000e-01 : f32
    %127 = vector.broadcast %cst_52 : f32 to vector<288x32xf32>
    %128 = arith.mulf %127, %124 : vector<288x32xf32>
    %129 = arith.select %126, %124, %128 : vector<288x32xi1>, vector<288x32xf32>
    %130 = arith.truncf %129 : vector<288x32xf32> to vector<288x32xbf16>
    %c0_53 = arith.constant 0 : index
    %c0_54 = arith.constant 0 : index
    %c0_55 = arith.constant 0 : index
    %131 = vector.load %arg7[%c0_53, %c0_54, %c0_55] : memref<1x288x32xbf16, #tpu.memory_space<vmem>>, vector<1x288x32xbf16>
    %132 = vector.shape_cast %131 : vector<1x288x32xbf16> to vector<288x32xbf16>
    %133 = vector.shape_cast %130 : vector<288x32xbf16> to vector<1x288x32xbf16>
    tpu.vector_store %arg7[%c0_53, %c0_54, %c0_55], %133 {strides = array<i32>} : memref<1x288x32xbf16, #tpu.memory_space<vmem>>, vector<1x288x32xbf16>,
    return
  }
  func.func @transform_0(%arg0: i32) -> (i32, i32, i32) {
    %c0_i32 = arith.constant 0 : i32
    %c0_i32_0 = arith.constant 0 : i32
    %c0_i32_1 = arith.constant 0 : i32
    return %arg0, %c0_i32, %c0_i32_0 : i32, i32, i32
  }
  func.func @transform_1(%arg0: i32) -> (i32, i32, i32) {
    %c0_i32 = arith.constant 0 : i32
    %c0_i32_0 = arith.constant 0 : i32
    %c0_i32_1 = arith.constant 0 : i32
    %c0_i32_2 = arith.constant 0 : i32
    return %c0_i32, %c0_i32_0, %c0_i32_1 : i32, i32, i32
  }
  func.func @transform_2(%arg0: i32) -> (i32, i32) {
    %c0_i32 = arith.constant 0 : i32
    %c0_i32_0 = arith.constant 0 : i32
    %c0_i32_1 = arith.constant 0 : i32
    return %c0_i32, %c0_i32_0 : i32, i32
  }
  func.func @transform_3(%arg0: i32) -> (i32, i32) {
    %c0_i32 = arith.constant 0 : i32
    %c0_i32_0 = arith.constant 0 : i32
    %c0_i32_1 = arith.constant 0 : i32
    return %c0_i32, %c0_i32_0 : i32, i32
  }
  func.func @transform_4(%arg0: i32) -> (i32, i32) {
    %c0_i32 = arith.constant 0 : i32
    %c0_i32_0 = arith.constant 0 : i32
    %c0_i32_1 = arith.constant 0 : i32
    return %c0_i32, %c0_i32_0 : i32, i32
  }
  func.func @transform_5(%arg0: i32) -> (i32, i32) {
    %c0_i32 = arith.constant 0 : i32
    %c0_i32_0 = arith.constant 0 : i32
    %c0_i32_1 = arith.constant 0 : i32
    return %c0_i32, %c0_i32_0 : i32, i32
  }
  func.func @transform_6(%arg0: i32) -> (i32, i32, i32) {
    %c0_i32 = arith.constant 0 : i32
    %c0_i32_0 = arith.constant 0 : i32
    %c0_i32_1 = arith.constant 0 : i32
    return %arg0, %c0_i32, %c0_i32_0 : i32, i32, i32
  }
}

module attributes {stable_mosaic.version = 11 : i64} {
  func.func @convsc_kernel(%arg0: i32, %arg1: memref<1x90x128xbf16, #tpu.memory_space<vmem>>, %arg2: memref<4x128x32xbf16, #tpu.memory_space<vmem>>, %arg3: memref<72x1xf32, #tpu.memory_space<vmem>>, %arg4: memref<1x32xf32, #tpu.memory_space<vmem>>, %arg5: memref<1x32xf32, #tpu.memory_space<vmem>>, %arg6: memref<1x32xf32, #tpu.memory_space<vmem>>, %arg7: memref<1x72x32xbf16, #tpu.memory_space<vmem>>) attributes {dimension_semantics = [#tpu.dimension_semantics<parallel>], iteration_bounds = array<i64: 2>, scalar_prefetch = 0 : i64, scratch_operands = 0 : i64, tpu.core_type = #tpu.core_type<tc>, window_params = [{transform_indices = @transform_0, window_bounds = array<i64: 1, 90, 128>}, {pipeline_mode = #tpu.pipeline_mode<synchronous>, transform_indices = @transform_1, window_bounds = array<i64: 4, 128, 32>}, {pipeline_mode = #tpu.pipeline_mode<synchronous>, transform_indices = @transform_2, window_bounds = array<i64: 72, 1>}, {pipeline_mode = #tpu.pipeline_mode<synchronous>, transform_indices = @transform_3, window_bounds = array<i64: 1, 32>}, {pipeline_mode = #tpu.pipeline_mode<synchronous>, transform_indices = @transform_4, window_bounds = array<i64: 1, 32>}, {pipeline_mode = #tpu.pipeline_mode<synchronous>, transform_indices = @transform_5, window_bounds = array<i64: 1, 32>}, {transform_indices = @transform_6, window_bounds = array<i64: 1, 72, 32>}]} {
    %c0 = arith.constant 0 : index
    %c0_0 = arith.constant 0 : index
    %0 = vector.load %arg4[%c0, %c0_0] : memref<1x32xf32, #tpu.memory_space<vmem>>, vector<1x32xf32>
    %c0_1 = arith.constant 0 : index
    %c0_2 = arith.constant 0 : index
    %1 = vector.load %arg5[%c0_1, %c0_2] : memref<1x32xf32, #tpu.memory_space<vmem>>, vector<1x32xf32>
    %c0_3 = arith.constant 0 : index
    %c0_4 = arith.constant 0 : index
    %2 = vector.load %arg6[%c0_3, %c0_4] : memref<1x32xf32, #tpu.memory_space<vmem>>, vector<1x32xf32>
    %c0_5 = arith.constant 0 : index
    %c0_6 = arith.constant 0 : index
    %3 = vector.load %arg3[%c0_5, %c0_6] : memref<72x1xf32, #tpu.memory_space<vmem>>, vector<72x1xf32>
    %c0_7 = arith.constant 0 : index
    %c0_8 = arith.constant 0 : index
    %c0_9 = arith.constant 0 : index
    %4 = vector.load %arg1[%c0_7, %c0_8, %c0_9] : memref<1x90x128xbf16, #tpu.memory_space<vmem>>, vector<1x90x128xbf16>
    %5 = vector.shape_cast %4 : vector<1x90x128xbf16> to vector<90x128xbf16>
    %6 = arith.extf %5 : vector<90x128xbf16> to vector<90x128xf32>
    %7 = vector.extract_strided_slice %6 {offsets = [0, 0], sizes = [72, 128], strides = [1, 1]} : vector<90x128xf32> to vector<72x128xf32>
    %8 = arith.truncf %7 : vector<72x128xf32> to vector<72x128xbf16>
    %c0_10 = arith.constant 0 : index
    %c0_11 = arith.constant 0 : index
    %c0_12 = arith.constant 0 : index
    %9 = vector.load %arg2[%c0_10, %c0_11, %c0_12] : memref<4x128x32xbf16, #tpu.memory_space<vmem>>, vector<1x128x32xbf16>
    %10 = vector.shape_cast %9 : vector<1x128x32xbf16> to vector<128x32xbf16>
    %cst = arith.constant dense<0.000000e+00> : vector<72x32xf32>
    %11 = tpu.matmul %8, %10, %cst {dimension_numbers = #tpu.dot_dimension_numbers<[1], [0], [0], [1], [0, 0, 1, 1], [], []>} : vector<72x128xbf16>, vector<128x32xbf16>, vector<72x32xf32> -> vector<72x32xf32>
    %12 = vector.extract_strided_slice %6 {offsets = [1, 0], sizes = [72, 128], strides = [1, 1]} : vector<90x128xf32> to vector<72x128xf32>
    %13 = arith.truncf %12 : vector<72x128xf32> to vector<72x128xbf16>
    %c1 = arith.constant 1 : index
    %c0_13 = arith.constant 0 : index
    %c0_14 = arith.constant 0 : index
    %14 = vector.load %arg2[%c1, %c0_13, %c0_14] : memref<4x128x32xbf16, #tpu.memory_space<vmem>>, vector<1x128x32xbf16>
    %15 = vector.shape_cast %14 : vector<1x128x32xbf16> to vector<128x32xbf16>
    %cst_15 = arith.constant dense<0.000000e+00> : vector<72x32xf32>
    %16 = tpu.matmul %13, %15, %cst_15 {dimension_numbers = #tpu.dot_dimension_numbers<[1], [0], [0], [1], [0, 0, 1, 1], [], []>} : vector<72x128xbf16>, vector<128x32xbf16>, vector<72x32xf32> -> vector<72x32xf32>
    %17 = arith.addf %11, %16 : vector<72x32xf32>
    %18 = vector.extract_strided_slice %6 {offsets = [9, 0], sizes = [72, 128], strides = [1, 1]} : vector<90x128xf32> to vector<72x128xf32>
    %19 = arith.truncf %18 : vector<72x128xf32> to vector<72x128xbf16>
    %c2 = arith.constant 2 : index
    %c0_16 = arith.constant 0 : index
    %c0_17 = arith.constant 0 : index
    %20 = vector.load %arg2[%c2, %c0_16, %c0_17] : memref<4x128x32xbf16, #tpu.memory_space<vmem>>, vector<1x128x32xbf16>
    %21 = vector.shape_cast %20 : vector<1x128x32xbf16> to vector<128x32xbf16>
    %cst_18 = arith.constant dense<0.000000e+00> : vector<72x32xf32>
    %22 = tpu.matmul %19, %21, %cst_18 {dimension_numbers = #tpu.dot_dimension_numbers<[1], [0], [0], [1], [0, 0, 1, 1], [], []>} : vector<72x128xbf16>, vector<128x32xbf16>, vector<72x32xf32> -> vector<72x32xf32>
    %23 = arith.addf %17, %22 : vector<72x32xf32>
    %24 = vector.extract_strided_slice %6 {offsets = [10, 0], sizes = [72, 128], strides = [1, 1]} : vector<90x128xf32> to vector<72x128xf32>
    %25 = arith.truncf %24 : vector<72x128xf32> to vector<72x128xbf16>
    %c3 = arith.constant 3 : index
    %c0_19 = arith.constant 0 : index
    %c0_20 = arith.constant 0 : index
    %26 = vector.load %arg2[%c3, %c0_19, %c0_20] : memref<4x128x32xbf16, #tpu.memory_space<vmem>>, vector<1x128x32xbf16>
    %27 = vector.shape_cast %26 : vector<1x128x32xbf16> to vector<128x32xbf16>
    %cst_21 = arith.constant dense<0.000000e+00> : vector<72x32xf32>
    %28 = tpu.matmul %25, %27, %cst_21 {dimension_numbers = #tpu.dot_dimension_numbers<[1], [0], [0], [1], [0, 0, 1, 1], [], []>} : vector<72x128xbf16>, vector<128x32xbf16>, vector<72x32xf32> -> vector<72x32xf32>
    %29 = arith.addf %23, %28 : vector<72x32xf32>
    %30 = vector.broadcast %0 : vector<1x32xf32> to vector<72x32xf32>
    %31 = arith.addf %29, %30 : vector<72x32xf32>
    %32 = vector.broadcast %3 : vector<72x1xf32> to vector<72x32xf32>
    %33 = arith.mulf %31, %32 : vector<72x32xf32>
    %cst_22 = arith.constant dense<0.000000e+00> : vector<32xf32>
    %34 = vector.multi_reduction <add>, %33, %cst_22 [0] : vector<72x32xf32> to vector<32xf32>
    %35 = vector.shape_cast %34 : vector<32xf32> to vector<1x32xf32>
    %36 = arith.mulf %31, %31 : vector<72x32xf32>
    %37 = vector.broadcast %3 : vector<72x1xf32> to vector<72x32xf32>
    %38 = arith.mulf %36, %37 : vector<72x32xf32>
    %cst_23 = arith.constant dense<0.000000e+00> : vector<32xf32>
    %39 = vector.multi_reduction <add>, %38, %cst_23 [0] : vector<72x32xf32> to vector<32xf32>
    %40 = vector.shape_cast %39 : vector<32xf32> to vector<1x32xf32>
    %41 = vector.extract_strided_slice %35 {offsets = [0, 0], sizes = [1, 16], strides = [1, 1]} : vector<1x32xf32> to vector<1x16xf32>
    %cst_24 = arith.constant dense<0.000000e+00> : vector<1xf32>
    %42 = vector.multi_reduction <add>, %41, %cst_24 [1] : vector<1x16xf32> to vector<1xf32>
    %43 = vector.shape_cast %42 : vector<1xf32> to vector<1x1xf32>
    %cst_25 = arith.constant 9.765625E-4 : f32
    %44 = vector.broadcast %cst_25 : f32 to vector<1x1xf32>
    %45 = arith.mulf %43, %44 : vector<1x1xf32>
    %46 = vector.extract_strided_slice %35 {offsets = [0, 16], sizes = [1, 16], strides = [1, 1]} : vector<1x32xf32> to vector<1x16xf32>
    %cst_26 = arith.constant dense<0.000000e+00> : vector<1xf32>
    %47 = vector.multi_reduction <add>, %46, %cst_26 [1] : vector<1x16xf32> to vector<1xf32>
    %48 = vector.shape_cast %47 : vector<1xf32> to vector<1x1xf32>
    %cst_27 = arith.constant 9.765625E-4 : f32
    %49 = vector.broadcast %cst_27 : f32 to vector<1x1xf32>
    %50 = arith.mulf %48, %49 : vector<1x1xf32>
    %51 = vector.extract_strided_slice %40 {offsets = [0, 0], sizes = [1, 16], strides = [1, 1]} : vector<1x32xf32> to vector<1x16xf32>
    %cst_28 = arith.constant dense<0.000000e+00> : vector<1xf32>
    %52 = vector.multi_reduction <add>, %51, %cst_28 [1] : vector<1x16xf32> to vector<1xf32>
    %53 = vector.shape_cast %52 : vector<1xf32> to vector<1x1xf32>
    %cst_29 = arith.constant 9.765625E-4 : f32
    %54 = vector.broadcast %cst_29 : f32 to vector<1x1xf32>
    %55 = arith.mulf %53, %54 : vector<1x1xf32>
    %56 = arith.mulf %45, %45 : vector<1x1xf32>
    %57 = arith.subf %55, %56 : vector<1x1xf32>
    %cst_30 = arith.constant 0.000000e+00 : f32
    %58 = vector.broadcast %cst_30 : f32 to vector<1x1xf32>
    %59 = arith.maximumf %57, %58 : vector<1x1xf32>
    %60 = vector.extract_strided_slice %40 {offsets = [0, 16], sizes = [1, 16], strides = [1, 1]} : vector<1x32xf32> to vector<1x16xf32>
    %cst_31 = arith.constant dense<0.000000e+00> : vector<1xf32>
    %61 = vector.multi_reduction <add>, %60, %cst_31 [1] : vector<1x16xf32> to vector<1xf32>
    %62 = vector.shape_cast %61 : vector<1xf32> to vector<1x1xf32>
    %cst_32 = arith.constant 9.765625E-4 : f32
    %63 = vector.broadcast %cst_32 : f32 to vector<1x1xf32>
    %64 = arith.mulf %62, %63 : vector<1x1xf32>
    %65 = arith.mulf %50, %50 : vector<1x1xf32>
    %66 = arith.subf %64, %65 : vector<1x1xf32>
    %cst_33 = arith.constant 0.000000e+00 : f32
    %67 = vector.broadcast %cst_33 : f32 to vector<1x1xf32>
    %68 = arith.maximumf %66, %67 : vector<1x1xf32>
    %69 = tpu.iota {dimensions = array<i32: 1>} : vector<1x32xi32>
    %c16_i32 = arith.constant 16 : i32
    %70 = vector.broadcast %c16_i32 : i32 to vector<1x32xi32>
    %71 = arith.cmpi slt, %69, %70 : vector<1x32xi32>
    %72 = vector.shape_cast %45 : vector<1x1xf32> to vector<1x1xf32>
    %73 = vector.broadcast %72 : vector<1x1xf32> to vector<1x32xf32>
    %74 = vector.shape_cast %50 : vector<1x1xf32> to vector<1x1xf32>
    %75 = vector.broadcast %74 : vector<1x1xf32> to vector<1x32xf32>
    %76 = arith.select %71, %73, %75 : vector<1x32xi1>, vector<1x32xf32>
    %cst_34 = arith.constant 9.99999974E-6 : f32
    %77 = vector.broadcast %cst_34 : f32 to vector<1x1xf32>
    %78 = arith.addf %59, %77 : vector<1x1xf32>
    %79 = math.rsqrt %78 : vector<1x1xf32>
    %cst_35 = arith.constant 9.99999974E-6 : f32
    %80 = vector.broadcast %cst_35 : f32 to vector<1x1xf32>
    %81 = arith.addf %68, %80 : vector<1x1xf32>
    %82 = math.rsqrt %81 : vector<1x1xf32>
    %83 = vector.shape_cast %79 : vector<1x1xf32> to vector<1x1xf32>
    %84 = vector.broadcast %83 : vector<1x1xf32> to vector<1x32xf32>
    %85 = vector.shape_cast %82 : vector<1x1xf32> to vector<1x1xf32>
    %86 = vector.broadcast %85 : vector<1x1xf32> to vector<1x32xf32>
    %87 = arith.select %71, %84, %86 : vector<1x32xi1>, vector<1x32xf32>
    %88 = arith.mulf %1, %87 : vector<1x32xf32>
    %89 = arith.mulf %76, %88 : vector<1x32xf32>
    %90 = arith.subf %2, %89 : vector<1x32xf32>
    %91 = vector.broadcast %88 : vector<1x32xf32> to vector<72x32xf32>
    %92 = arith.mulf %31, %91 : vector<72x32xf32>
    %93 = vector.broadcast %90 : vector<1x32xf32> to vector<72x32xf32>
    %94 = arith.addf %92, %93 : vector<72x32xf32>
    %cst_36 = arith.constant 0.000000e+00 : f32
    %95 = vector.broadcast %cst_36 : f32 to vector<72x32xf32>
    %96 = arith.cmpf ogt, %94, %95 : vector<72x32xf32>
    %cst_37 = arith.constant 2.000000e-01 : f32
    %97 = vector.broadcast %cst_37 : f32 to vector<72x32xf32>
    %98 = arith.mulf %97, %94 : vector<72x32xf32>
    %99 = arith.select %96, %94, %98 : vector<72x32xi1>, vector<72x32xf32>
    %100 = arith.truncf %99 : vector<72x32xf32> to vector<72x32xbf16>
    %c0_38 = arith.constant 0 : index
    %c0_39 = arith.constant 0 : index
    %c0_40 = arith.constant 0 : index
    %101 = vector.load %arg7[%c0_38, %c0_39, %c0_40] : memref<1x72x32xbf16, #tpu.memory_space<vmem>>, vector<1x72x32xbf16>
    %102 = vector.shape_cast %101 : vector<1x72x32xbf16> to vector<72x32xbf16>
    %103 = vector.shape_cast %100 : vector<72x32xbf16> to vector<1x72x32xbf16>
    tpu.vector_store %arg7[%c0_38, %c0_39, %c0_40], %103 {strides = array<i32>} : memref<1x72x32xbf16, #tpu.memory_space<vmem>>, vector<1x72x32xbf16>,
    return
  }
  func.func @transform_0(%arg0: i32) -> (i32, i32, i32) {
    %c0_i32 = arith.constant 0 : i32
    %c0_i32_0 = arith.constant 0 : i32
    %c0_i32_1 = arith.constant 0 : i32
    return %arg0, %c0_i32, %c0_i32_0 : i32, i32, i32
  }
  func.func @transform_1(%arg0: i32) -> (i32, i32, i32) {
    %c0_i32 = arith.constant 0 : i32
    %c0_i32_0 = arith.constant 0 : i32
    %c0_i32_1 = arith.constant 0 : i32
    %c0_i32_2 = arith.constant 0 : i32
    return %c0_i32, %c0_i32_0, %c0_i32_1 : i32, i32, i32
  }
  func.func @transform_2(%arg0: i32) -> (i32, i32) {
    %c0_i32 = arith.constant 0 : i32
    %c0_i32_0 = arith.constant 0 : i32
    %c0_i32_1 = arith.constant 0 : i32
    return %c0_i32, %c0_i32_0 : i32, i32
  }
  func.func @transform_3(%arg0: i32) -> (i32, i32) {
    %c0_i32 = arith.constant 0 : i32
    %c0_i32_0 = arith.constant 0 : i32
    %c0_i32_1 = arith.constant 0 : i32
    return %c0_i32, %c0_i32_0 : i32, i32
  }
  func.func @transform_4(%arg0: i32) -> (i32, i32) {
    %c0_i32 = arith.constant 0 : i32
    %c0_i32_0 = arith.constant 0 : i32
    %c0_i32_1 = arith.constant 0 : i32
    return %c0_i32, %c0_i32_0 : i32, i32
  }
  func.func @transform_5(%arg0: i32) -> (i32, i32) {
    %c0_i32 = arith.constant 0 : i32
    %c0_i32_0 = arith.constant 0 : i32
    %c0_i32_1 = arith.constant 0 : i32
    return %c0_i32, %c0_i32_0 : i32, i32
  }
  func.func @transform_6(%arg0: i32) -> (i32, i32, i32) {
    %c0_i32 = arith.constant 0 : i32
    %c0_i32_0 = arith.constant 0 : i32
    %c0_i32_1 = arith.constant 0 : i32
    return %arg0, %c0_i32, %c0_i32_0 : i32, i32, i32
  }
}

module attributes {stable_mosaic.version = 11 : i64} {
  func.func @convsc_kernel(%arg0: i32, %arg1: memref<1x110x32xbf16, #tpu.memory_space<vmem>>, %arg2: memref<9x32x32xbf16, #tpu.memory_space<vmem>>, %arg3: memref<80x1xf32, #tpu.memory_space<vmem>>, %arg4: memref<1x32xf32, #tpu.memory_space<vmem>>, %arg5: memref<1x32xf32, #tpu.memory_space<vmem>>, %arg6: memref<1x32xf32, #tpu.memory_space<vmem>>, %arg7: memref<1x80x32xbf16, #tpu.memory_space<vmem>>) attributes {dimension_semantics = [#tpu.dimension_semantics<parallel>], iteration_bounds = array<i64: 2>, scalar_prefetch = 0 : i64, scratch_operands = 0 : i64, tpu.core_type = #tpu.core_type<tc>, window_params = [{transform_indices = @transform_0, window_bounds = array<i64: 1, 110, 32>}, {pipeline_mode = #tpu.pipeline_mode<synchronous>, transform_indices = @transform_1, window_bounds = array<i64: 9, 32, 32>}, {pipeline_mode = #tpu.pipeline_mode<synchronous>, transform_indices = @transform_2, window_bounds = array<i64: 80, 1>}, {pipeline_mode = #tpu.pipeline_mode<synchronous>, transform_indices = @transform_3, window_bounds = array<i64: 1, 32>}, {pipeline_mode = #tpu.pipeline_mode<synchronous>, transform_indices = @transform_4, window_bounds = array<i64: 1, 32>}, {pipeline_mode = #tpu.pipeline_mode<synchronous>, transform_indices = @transform_5, window_bounds = array<i64: 1, 32>}, {transform_indices = @transform_6, window_bounds = array<i64: 1, 80, 32>}]} {
    %c0 = arith.constant 0 : index
    %c0_0 = arith.constant 0 : index
    %0 = vector.load %arg4[%c0, %c0_0] : memref<1x32xf32, #tpu.memory_space<vmem>>, vector<1x32xf32>
    %c0_1 = arith.constant 0 : index
    %c0_2 = arith.constant 0 : index
    %1 = vector.load %arg5[%c0_1, %c0_2] : memref<1x32xf32, #tpu.memory_space<vmem>>, vector<1x32xf32>
    %c0_3 = arith.constant 0 : index
    %c0_4 = arith.constant 0 : index
    %2 = vector.load %arg6[%c0_3, %c0_4] : memref<1x32xf32, #tpu.memory_space<vmem>>, vector<1x32xf32>
    %c0_5 = arith.constant 0 : index
    %c0_6 = arith.constant 0 : index
    %3 = vector.load %arg3[%c0_5, %c0_6] : memref<80x1xf32, #tpu.memory_space<vmem>>, vector<80x1xf32>
    %c0_7 = arith.constant 0 : index
    %c0_8 = arith.constant 0 : index
    %c0_9 = arith.constant 0 : index
    %4 = vector.load %arg1[%c0_7, %c0_8, %c0_9] : memref<1x110x32xbf16, #tpu.memory_space<vmem>>, vector<1x110x32xbf16>
    %5 = vector.shape_cast %4 : vector<1x110x32xbf16> to vector<110x32xbf16>
    %6 = arith.extf %5 : vector<110x32xbf16> to vector<110x32xf32>
    %7 = vector.extract_strided_slice %6 {offsets = [0, 0], sizes = [80, 32], strides = [1, 1]} : vector<110x32xf32> to vector<80x32xf32>
    %8 = arith.truncf %7 : vector<80x32xf32> to vector<80x32xbf16>
    %c0_10 = arith.constant 0 : index
    %c0_11 = arith.constant 0 : index
    %c0_12 = arith.constant 0 : index
    %9 = vector.load %arg2[%c0_10, %c0_11, %c0_12] : memref<9x32x32xbf16, #tpu.memory_space<vmem>>, vector<1x32x32xbf16>
    %10 = vector.shape_cast %9 : vector<1x32x32xbf16> to vector<32x32xbf16>
    %cst = arith.constant dense<0.000000e+00> : vector<80x32xf32>
    %11 = tpu.matmul %8, %10, %cst {dimension_numbers = #tpu.dot_dimension_numbers<[1], [0], [0], [1], [0, 0, 1, 1], [], []>} : vector<80x32xbf16>, vector<32x32xbf16>, vector<80x32xf32> -> vector<80x32xf32>
    %12 = vector.extract_strided_slice %6 {offsets = [1, 0], sizes = [80, 32], strides = [1, 1]} : vector<110x32xf32> to vector<80x32xf32>
    %13 = arith.truncf %12 : vector<80x32xf32> to vector<80x32xbf16>
    %c1 = arith.constant 1 : index
    %c0_13 = arith.constant 0 : index
    %c0_14 = arith.constant 0 : index
    %14 = vector.load %arg2[%c1, %c0_13, %c0_14] : memref<9x32x32xbf16, #tpu.memory_space<vmem>>, vector<1x32x32xbf16>
    %15 = vector.shape_cast %14 : vector<1x32x32xbf16> to vector<32x32xbf16>
    %cst_15 = arith.constant dense<0.000000e+00> : vector<80x32xf32>
    %16 = tpu.matmul %13, %15, %cst_15 {dimension_numbers = #tpu.dot_dimension_numbers<[1], [0], [0], [1], [0, 0, 1, 1], [], []>} : vector<80x32xbf16>, vector<32x32xbf16>, vector<80x32xf32> -> vector<80x32xf32>
    %17 = arith.addf %11, %16 : vector<80x32xf32>
    %18 = vector.extract_strided_slice %6 {offsets = [2, 0], sizes = [80, 32], strides = [1, 1]} : vector<110x32xf32> to vector<80x32xf32>
    %19 = arith.truncf %18 : vector<80x32xf32> to vector<80x32xbf16>
    %c2 = arith.constant 2 : index
    %c0_16 = arith.constant 0 : index
    %c0_17 = arith.constant 0 : index
    %20 = vector.load %arg2[%c2, %c0_16, %c0_17] : memref<9x32x32xbf16, #tpu.memory_space<vmem>>, vector<1x32x32xbf16>
    %21 = vector.shape_cast %20 : vector<1x32x32xbf16> to vector<32x32xbf16>
    %cst_18 = arith.constant dense<0.000000e+00> : vector<80x32xf32>
    %22 = tpu.matmul %19, %21, %cst_18 {dimension_numbers = #tpu.dot_dimension_numbers<[1], [0], [0], [1], [0, 0, 1, 1], [], []>} : vector<80x32xbf16>, vector<32x32xbf16>, vector<80x32xf32> -> vector<80x32xf32>
    %23 = arith.addf %17, %22 : vector<80x32xf32>
    %24 = vector.extract_strided_slice %6 {offsets = [10, 0], sizes = [80, 32], strides = [1, 1]} : vector<110x32xf32> to vector<80x32xf32>
    %25 = arith.truncf %24 : vector<80x32xf32> to vector<80x32xbf16>
    %c3 = arith.constant 3 : index
    %c0_19 = arith.constant 0 : index
    %c0_20 = arith.constant 0 : index
    %26 = vector.load %arg2[%c3, %c0_19, %c0_20] : memref<9x32x32xbf16, #tpu.memory_space<vmem>>, vector<1x32x32xbf16>
    %27 = vector.shape_cast %26 : vector<1x32x32xbf16> to vector<32x32xbf16>
    %cst_21 = arith.constant dense<0.000000e+00> : vector<80x32xf32>
    %28 = tpu.matmul %25, %27, %cst_21 {dimension_numbers = #tpu.dot_dimension_numbers<[1], [0], [0], [1], [0, 0, 1, 1], [], []>} : vector<80x32xbf16>, vector<32x32xbf16>, vector<80x32xf32> -> vector<80x32xf32>
    %29 = arith.addf %23, %28 : vector<80x32xf32>
    %30 = vector.extract_strided_slice %6 {offsets = [11, 0], sizes = [80, 32], strides = [1, 1]} : vector<110x32xf32> to vector<80x32xf32>
    %31 = arith.truncf %30 : vector<80x32xf32> to vector<80x32xbf16>
    %c4 = arith.constant 4 : index
    %c0_22 = arith.constant 0 : index
    %c0_23 = arith.constant 0 : index
    %32 = vector.load %arg2[%c4, %c0_22, %c0_23] : memref<9x32x32xbf16, #tpu.memory_space<vmem>>, vector<1x32x32xbf16>
    %33 = vector.shape_cast %32 : vector<1x32x32xbf16> to vector<32x32xbf16>
    %cst_24 = arith.constant dense<0.000000e+00> : vector<80x32xf32>
    %34 = tpu.matmul %31, %33, %cst_24 {dimension_numbers = #tpu.dot_dimension_numbers<[1], [0], [0], [1], [0, 0, 1, 1], [], []>} : vector<80x32xbf16>, vector<32x32xbf16>, vector<80x32xf32> -> vector<80x32xf32>
    %35 = arith.addf %29, %34 : vector<80x32xf32>
    %36 = vector.extract_strided_slice %6 {offsets = [12, 0], sizes = [80, 32], strides = [1, 1]} : vector<110x32xf32> to vector<80x32xf32>
    %37 = arith.truncf %36 : vector<80x32xf32> to vector<80x32xbf16>
    %c5 = arith.constant 5 : index
    %c0_25 = arith.constant 0 : index
    %c0_26 = arith.constant 0 : index
    %38 = vector.load %arg2[%c5, %c0_25, %c0_26] : memref<9x32x32xbf16, #tpu.memory_space<vmem>>, vector<1x32x32xbf16>
    %39 = vector.shape_cast %38 : vector<1x32x32xbf16> to vector<32x32xbf16>
    %cst_27 = arith.constant dense<0.000000e+00> : vector<80x32xf32>
    %40 = tpu.matmul %37, %39, %cst_27 {dimension_numbers = #tpu.dot_dimension_numbers<[1], [0], [0], [1], [0, 0, 1, 1], [], []>} : vector<80x32xbf16>, vector<32x32xbf16>, vector<80x32xf32> -> vector<80x32xf32>
    %41 = arith.addf %35, %40 : vector<80x32xf32>
    %42 = vector.extract_strided_slice %6 {offsets = [20, 0], sizes = [80, 32], strides = [1, 1]} : vector<110x32xf32> to vector<80x32xf32>
    %43 = arith.truncf %42 : vector<80x32xf32> to vector<80x32xbf16>
    %c6 = arith.constant 6 : index
    %c0_28 = arith.constant 0 : index
    %c0_29 = arith.constant 0 : index
    %44 = vector.load %arg2[%c6, %c0_28, %c0_29] : memref<9x32x32xbf16, #tpu.memory_space<vmem>>, vector<1x32x32xbf16>
    %45 = vector.shape_cast %44 : vector<1x32x32xbf16> to vector<32x32xbf16>
    %cst_30 = arith.constant dense<0.000000e+00> : vector<80x32xf32>
    %46 = tpu.matmul %43, %45, %cst_30 {dimension_numbers = #tpu.dot_dimension_numbers<[1], [0], [0], [1], [0, 0, 1, 1], [], []>} : vector<80x32xbf16>, vector<32x32xbf16>, vector<80x32xf32> -> vector<80x32xf32>
    %47 = arith.addf %41, %46 : vector<80x32xf32>
    %48 = vector.extract_strided_slice %6 {offsets = [21, 0], sizes = [80, 32], strides = [1, 1]} : vector<110x32xf32> to vector<80x32xf32>
    %49 = arith.truncf %48 : vector<80x32xf32> to vector<80x32xbf16>
    %c7 = arith.constant 7 : index
    %c0_31 = arith.constant 0 : index
    %c0_32 = arith.constant 0 : index
    %50 = vector.load %arg2[%c7, %c0_31, %c0_32] : memref<9x32x32xbf16, #tpu.memory_space<vmem>>, vector<1x32x32xbf16>
    %51 = vector.shape_cast %50 : vector<1x32x32xbf16> to vector<32x32xbf16>
    %cst_33 = arith.constant dense<0.000000e+00> : vector<80x32xf32>
    %52 = tpu.matmul %49, %51, %cst_33 {dimension_numbers = #tpu.dot_dimension_numbers<[1], [0], [0], [1], [0, 0, 1, 1], [], []>} : vector<80x32xbf16>, vector<32x32xbf16>, vector<80x32xf32> -> vector<80x32xf32>
    %53 = arith.addf %47, %52 : vector<80x32xf32>
    %54 = vector.extract_strided_slice %6 {offsets = [22, 0], sizes = [80, 32], strides = [1, 1]} : vector<110x32xf32> to vector<80x32xf32>
    %55 = arith.truncf %54 : vector<80x32xf32> to vector<80x32xbf16>
    %c8 = arith.constant 8 : index
    %c0_34 = arith.constant 0 : index
    %c0_35 = arith.constant 0 : index
    %56 = vector.load %arg2[%c8, %c0_34, %c0_35] : memref<9x32x32xbf16, #tpu.memory_space<vmem>>, vector<1x32x32xbf16>
    %57 = vector.shape_cast %56 : vector<1x32x32xbf16> to vector<32x32xbf16>
    %cst_36 = arith.constant dense<0.000000e+00> : vector<80x32xf32>
    %58 = tpu.matmul %55, %57, %cst_36 {dimension_numbers = #tpu.dot_dimension_numbers<[1], [0], [0], [1], [0, 0, 1, 1], [], []>} : vector<80x32xbf16>, vector<32x32xbf16>, vector<80x32xf32> -> vector<80x32xf32>
    %59 = arith.addf %53, %58 : vector<80x32xf32>
    %60 = vector.broadcast %0 : vector<1x32xf32> to vector<80x32xf32>
    %61 = arith.addf %59, %60 : vector<80x32xf32>
    %62 = vector.broadcast %3 : vector<80x1xf32> to vector<80x32xf32>
    %63 = arith.mulf %61, %62 : vector<80x32xf32>
    %cst_37 = arith.constant dense<0.000000e+00> : vector<32xf32>
    %64 = vector.multi_reduction <add>, %63, %cst_37 [0] : vector<80x32xf32> to vector<32xf32>
    %65 = vector.shape_cast %64 : vector<32xf32> to vector<1x32xf32>
    %66 = arith.mulf %61, %61 : vector<80x32xf32>
    %67 = vector.broadcast %3 : vector<80x1xf32> to vector<80x32xf32>
    %68 = arith.mulf %66, %67 : vector<80x32xf32>
    %cst_38 = arith.constant dense<0.000000e+00> : vector<32xf32>
    %69 = vector.multi_reduction <add>, %68, %cst_38 [0] : vector<80x32xf32> to vector<32xf32>
    %70 = vector.shape_cast %69 : vector<32xf32> to vector<1x32xf32>
    %71 = vector.extract_strided_slice %65 {offsets = [0, 0], sizes = [1, 16], strides = [1, 1]} : vector<1x32xf32> to vector<1x16xf32>
    %cst_39 = arith.constant dense<0.000000e+00> : vector<1xf32>
    %72 = vector.multi_reduction <add>, %71, %cst_39 [1] : vector<1x16xf32> to vector<1xf32>
    %73 = vector.shape_cast %72 : vector<1xf32> to vector<1x1xf32>
    %cst_40 = arith.constant 9.765625E-4 : f32
    %74 = vector.broadcast %cst_40 : f32 to vector<1x1xf32>
    %75 = arith.mulf %73, %74 : vector<1x1xf32>
    %76 = vector.extract_strided_slice %65 {offsets = [0, 16], sizes = [1, 16], strides = [1, 1]} : vector<1x32xf32> to vector<1x16xf32>
    %cst_41 = arith.constant dense<0.000000e+00> : vector<1xf32>
    %77 = vector.multi_reduction <add>, %76, %cst_41 [1] : vector<1x16xf32> to vector<1xf32>
    %78 = vector.shape_cast %77 : vector<1xf32> to vector<1x1xf32>
    %cst_42 = arith.constant 9.765625E-4 : f32
    %79 = vector.broadcast %cst_42 : f32 to vector<1x1xf32>
    %80 = arith.mulf %78, %79 : vector<1x1xf32>
    %81 = vector.extract_strided_slice %70 {offsets = [0, 0], sizes = [1, 16], strides = [1, 1]} : vector<1x32xf32> to vector<1x16xf32>
    %cst_43 = arith.constant dense<0.000000e+00> : vector<1xf32>
    %82 = vector.multi_reduction <add>, %81, %cst_43 [1] : vector<1x16xf32> to vector<1xf32>
    %83 = vector.shape_cast %82 : vector<1xf32> to vector<1x1xf32>
    %cst_44 = arith.constant 9.765625E-4 : f32
    %84 = vector.broadcast %cst_44 : f32 to vector<1x1xf32>
    %85 = arith.mulf %83, %84 : vector<1x1xf32>
    %86 = arith.mulf %75, %75 : vector<1x1xf32>
    %87 = arith.subf %85, %86 : vector<1x1xf32>
    %cst_45 = arith.constant 0.000000e+00 : f32
    %88 = vector.broadcast %cst_45 : f32 to vector<1x1xf32>
    %89 = arith.maximumf %87, %88 : vector<1x1xf32>
    %90 = vector.extract_strided_slice %70 {offsets = [0, 16], sizes = [1, 16], strides = [1, 1]} : vector<1x32xf32> to vector<1x16xf32>
    %cst_46 = arith.constant dense<0.000000e+00> : vector<1xf32>
    %91 = vector.multi_reduction <add>, %90, %cst_46 [1] : vector<1x16xf32> to vector<1xf32>
    %92 = vector.shape_cast %91 : vector<1xf32> to vector<1x1xf32>
    %cst_47 = arith.constant 9.765625E-4 : f32
    %93 = vector.broadcast %cst_47 : f32 to vector<1x1xf32>
    %94 = arith.mulf %92, %93 : vector<1x1xf32>
    %95 = arith.mulf %80, %80 : vector<1x1xf32>
    %96 = arith.subf %94, %95 : vector<1x1xf32>
    %cst_48 = arith.constant 0.000000e+00 : f32
    %97 = vector.broadcast %cst_48 : f32 to vector<1x1xf32>
    %98 = arith.maximumf %96, %97 : vector<1x1xf32>
    %99 = tpu.iota {dimensions = array<i32: 1>} : vector<1x32xi32>
    %c16_i32 = arith.constant 16 : i32
    %100 = vector.broadcast %c16_i32 : i32 to vector<1x32xi32>
    %101 = arith.cmpi slt, %99, %100 : vector<1x32xi32>
    %102 = vector.shape_cast %75 : vector<1x1xf32> to vector<1x1xf32>
    %103 = vector.broadcast %102 : vector<1x1xf32> to vector<1x32xf32>
    %104 = vector.shape_cast %80 : vector<1x1xf32> to vector<1x1xf32>
    %105 = vector.broadcast %104 : vector<1x1xf32> to vector<1x32xf32>
    %106 = arith.select %101, %103, %105 : vector<1x32xi1>, vector<1x32xf32>
    %cst_49 = arith.constant 9.99999974E-6 : f32
    %107 = vector.broadcast %cst_49 : f32 to vector<1x1xf32>
    %108 = arith.addf %89, %107 : vector<1x1xf32>
    %109 = math.rsqrt %108 : vector<1x1xf32>
    %cst_50 = arith.constant 9.99999974E-6 : f32
    %110 = vector.broadcast %cst_50 : f32 to vector<1x1xf32>
    %111 = arith.addf %98, %110 : vector<1x1xf32>
    %112 = math.rsqrt %111 : vector<1x1xf32>
    %113 = vector.shape_cast %109 : vector<1x1xf32> to vector<1x1xf32>
    %114 = vector.broadcast %113 : vector<1x1xf32> to vector<1x32xf32>
    %115 = vector.shape_cast %112 : vector<1x1xf32> to vector<1x1xf32>
    %116 = vector.broadcast %115 : vector<1x1xf32> to vector<1x32xf32>
    %117 = arith.select %101, %114, %116 : vector<1x32xi1>, vector<1x32xf32>
    %118 = arith.mulf %1, %117 : vector<1x32xf32>
    %119 = arith.mulf %106, %118 : vector<1x32xf32>
    %120 = arith.subf %2, %119 : vector<1x32xf32>
    %121 = vector.broadcast %118 : vector<1x32xf32> to vector<80x32xf32>
    %122 = arith.mulf %61, %121 : vector<80x32xf32>
    %123 = vector.broadcast %120 : vector<1x32xf32> to vector<80x32xf32>
    %124 = arith.addf %122, %123 : vector<80x32xf32>
    %cst_51 = arith.constant 0.000000e+00 : f32
    %125 = vector.broadcast %cst_51 : f32 to vector<80x32xf32>
    %126 = arith.cmpf ogt, %124, %125 : vector<80x32xf32>
    %cst_52 = arith.constant 2.000000e-01 : f32
    %127 = vector.broadcast %cst_52 : f32 to vector<80x32xf32>
    %128 = arith.mulf %127, %124 : vector<80x32xf32>
    %129 = arith.select %126, %124, %128 : vector<80x32xi1>, vector<80x32xf32>
    %130 = arith.truncf %129 : vector<80x32xf32> to vector<80x32xbf16>
    %c0_53 = arith.constant 0 : index
    %c0_54 = arith.constant 0 : index
    %c0_55 = arith.constant 0 : index
    %131 = vector.load %arg7[%c0_53, %c0_54, %c0_55] : memref<1x80x32xbf16, #tpu.memory_space<vmem>>, vector<1x80x32xbf16>
    %132 = vector.shape_cast %131 : vector<1x80x32xbf16> to vector<80x32xbf16>
    %133 = vector.shape_cast %130 : vector<80x32xbf16> to vector<1x80x32xbf16>
    tpu.vector_store %arg7[%c0_53, %c0_54, %c0_55], %133 {strides = array<i32>} : memref<1x80x32xbf16, #tpu.memory_space<vmem>>, vector<1x80x32xbf16>,
    return
  }
  func.func @transform_0(%arg0: i32) -> (i32, i32, i32) {
    %c0_i32 = arith.constant 0 : i32
    %c0_i32_0 = arith.constant 0 : i32
    %c0_i32_1 = arith.constant 0 : i32
    return %arg0, %c0_i32, %c0_i32_0 : i32, i32, i32
  }
  func.func @transform_1(%arg0: i32) -> (i32, i32, i32) {
    %c0_i32 = arith.constant 0 : i32
    %c0_i32_0 = arith.constant 0 : i32
    %c0_i32_1 = arith.constant 0 : i32
    %c0_i32_2 = arith.constant 0 : i32
    return %c0_i32, %c0_i32_0, %c0_i32_1 : i32, i32, i32
  }
  func.func @transform_2(%arg0: i32) -> (i32, i32) {
    %c0_i32 = arith.constant 0 : i32
    %c0_i32_0 = arith.constant 0 : i32
    %c0_i32_1 = arith.constant 0 : i32
    return %c0_i32, %c0_i32_0 : i32, i32
  }
  func.func @transform_3(%arg0: i32) -> (i32, i32) {
    %c0_i32 = arith.constant 0 : i32
    %c0_i32_0 = arith.constant 0 : i32
    %c0_i32_1 = arith.constant 0 : i32
    return %c0_i32, %c0_i32_0 : i32, i32
  }
  func.func @transform_4(%arg0: i32) -> (i32, i32) {
    %c0_i32 = arith.constant 0 : i32
    %c0_i32_0 = arith.constant 0 : i32
    %c0_i32_1 = arith.constant 0 : i32
    return %c0_i32, %c0_i32_0 : i32, i32
  }
  func.func @transform_5(%arg0: i32) -> (i32, i32) {
    %c0_i32 = arith.constant 0 : i32
    %c0_i32_0 = arith.constant 0 : i32
    %c0_i32_1 = arith.constant 0 : i32
    return %c0_i32, %c0_i32_0 : i32, i32
  }
  func.func @transform_6(%arg0: i32) -> (i32, i32, i32) {
    %c0_i32 = arith.constant 0 : i32
    %c0_i32_0 = arith.constant 0 : i32
    %c0_i32_1 = arith.constant 0 : i32
    return %arg0, %c0_i32, %c0_i32_0 : i32, i32, i32
  }
}

module attributes {stable_mosaic.version = 11 : i64} {
  func.func @convsc_kernel(%arg0: i32, %arg1: memref<1x30x128xbf16, #tpu.memory_space<vmem>>, %arg2: memref<4x128x32xbf16, #tpu.memory_space<vmem>>, %arg3: memref<20x1xf32, #tpu.memory_space<vmem>>, %arg4: memref<1x32xf32, #tpu.memory_space<vmem>>, %arg5: memref<1x32xf32, #tpu.memory_space<vmem>>, %arg6: memref<1x32xf32, #tpu.memory_space<vmem>>, %arg7: memref<1x20x32xbf16, #tpu.memory_space<vmem>>) attributes {dimension_semantics = [#tpu.dimension_semantics<parallel>], iteration_bounds = array<i64: 2>, scalar_prefetch = 0 : i64, scratch_operands = 0 : i64, tpu.core_type = #tpu.core_type<tc>, window_params = [{transform_indices = @transform_0, window_bounds = array<i64: 1, 30, 128>}, {pipeline_mode = #tpu.pipeline_mode<synchronous>, transform_indices = @transform_1, window_bounds = array<i64: 4, 128, 32>}, {pipeline_mode = #tpu.pipeline_mode<synchronous>, transform_indices = @transform_2, window_bounds = array<i64: 20, 1>}, {pipeline_mode = #tpu.pipeline_mode<synchronous>, transform_indices = @transform_3, window_bounds = array<i64: 1, 32>}, {pipeline_mode = #tpu.pipeline_mode<synchronous>, transform_indices = @transform_4, window_bounds = array<i64: 1, 32>}, {pipeline_mode = #tpu.pipeline_mode<synchronous>, transform_indices = @transform_5, window_bounds = array<i64: 1, 32>}, {transform_indices = @transform_6, window_bounds = array<i64: 1, 20, 32>}]} {
    %c0 = arith.constant 0 : index
    %c0_0 = arith.constant 0 : index
    %0 = vector.load %arg4[%c0, %c0_0] : memref<1x32xf32, #tpu.memory_space<vmem>>, vector<1x32xf32>
    %c0_1 = arith.constant 0 : index
    %c0_2 = arith.constant 0 : index
    %1 = vector.load %arg5[%c0_1, %c0_2] : memref<1x32xf32, #tpu.memory_space<vmem>>, vector<1x32xf32>
    %c0_3 = arith.constant 0 : index
    %c0_4 = arith.constant 0 : index
    %2 = vector.load %arg6[%c0_3, %c0_4] : memref<1x32xf32, #tpu.memory_space<vmem>>, vector<1x32xf32>
    %c0_5 = arith.constant 0 : index
    %c0_6 = arith.constant 0 : index
    %3 = vector.load %arg3[%c0_5, %c0_6] : memref<20x1xf32, #tpu.memory_space<vmem>>, vector<20x1xf32>
    %c0_7 = arith.constant 0 : index
    %c0_8 = arith.constant 0 : index
    %c0_9 = arith.constant 0 : index
    %4 = vector.load %arg1[%c0_7, %c0_8, %c0_9] : memref<1x30x128xbf16, #tpu.memory_space<vmem>>, vector<1x30x128xbf16>
    %5 = vector.shape_cast %4 : vector<1x30x128xbf16> to vector<30x128xbf16>
    %6 = arith.extf %5 : vector<30x128xbf16> to vector<30x128xf32>
    %7 = vector.extract_strided_slice %6 {offsets = [0, 0], sizes = [20, 128], strides = [1, 1]} : vector<30x128xf32> to vector<20x128xf32>
    %8 = arith.truncf %7 : vector<20x128xf32> to vector<20x128xbf16>
    %c0_10 = arith.constant 0 : index
    %c0_11 = arith.constant 0 : index
    %c0_12 = arith.constant 0 : index
    %9 = vector.load %arg2[%c0_10, %c0_11, %c0_12] : memref<4x128x32xbf16, #tpu.memory_space<vmem>>, vector<1x128x32xbf16>
    %10 = vector.shape_cast %9 : vector<1x128x32xbf16> to vector<128x32xbf16>
    %cst = arith.constant dense<0.000000e+00> : vector<20x32xf32>
    %11 = tpu.matmul %8, %10, %cst {dimension_numbers = #tpu.dot_dimension_numbers<[1], [0], [0], [1], [0, 0, 1, 1], [], []>} : vector<20x128xbf16>, vector<128x32xbf16>, vector<20x32xf32> -> vector<20x32xf32>
    %12 = vector.extract_strided_slice %6 {offsets = [1, 0], sizes = [20, 128], strides = [1, 1]} : vector<30x128xf32> to vector<20x128xf32>
    %13 = arith.truncf %12 : vector<20x128xf32> to vector<20x128xbf16>
    %c1 = arith.constant 1 : index
    %c0_13 = arith.constant 0 : index
    %c0_14 = arith.constant 0 : index
    %14 = vector.load %arg2[%c1, %c0_13, %c0_14] : memref<4x128x32xbf16, #tpu.memory_space<vmem>>, vector<1x128x32xbf16>
    %15 = vector.shape_cast %14 : vector<1x128x32xbf16> to vector<128x32xbf16>
    %cst_15 = arith.constant dense<0.000000e+00> : vector<20x32xf32>
    %16 = tpu.matmul %13, %15, %cst_15 {dimension_numbers = #tpu.dot_dimension_numbers<[1], [0], [0], [1], [0, 0, 1, 1], [], []>} : vector<20x128xbf16>, vector<128x32xbf16>, vector<20x32xf32> -> vector<20x32xf32>
    %17 = arith.addf %11, %16 : vector<20x32xf32>
    %18 = vector.extract_strided_slice %6 {offsets = [5, 0], sizes = [20, 128], strides = [1, 1]} : vector<30x128xf32> to vector<20x128xf32>
    %19 = arith.truncf %18 : vector<20x128xf32> to vector<20x128xbf16>
    %c2 = arith.constant 2 : index
    %c0_16 = arith.constant 0 : index
    %c0_17 = arith.constant 0 : index
    %20 = vector.load %arg2[%c2, %c0_16, %c0_17] : memref<4x128x32xbf16, #tpu.memory_space<vmem>>, vector<1x128x32xbf16>
    %21 = vector.shape_cast %20 : vector<1x128x32xbf16> to vector<128x32xbf16>
    %cst_18 = arith.constant dense<0.000000e+00> : vector<20x32xf32>
    %22 = tpu.matmul %19, %21, %cst_18 {dimension_numbers = #tpu.dot_dimension_numbers<[1], [0], [0], [1], [0, 0, 1, 1], [], []>} : vector<20x128xbf16>, vector<128x32xbf16>, vector<20x32xf32> -> vector<20x32xf32>
    %23 = arith.addf %17, %22 : vector<20x32xf32>
    %24 = vector.extract_strided_slice %6 {offsets = [6, 0], sizes = [20, 128], strides = [1, 1]} : vector<30x128xf32> to vector<20x128xf32>
    %25 = arith.truncf %24 : vector<20x128xf32> to vector<20x128xbf16>
    %c3 = arith.constant 3 : index
    %c0_19 = arith.constant 0 : index
    %c0_20 = arith.constant 0 : index
    %26 = vector.load %arg2[%c3, %c0_19, %c0_20] : memref<4x128x32xbf16, #tpu.memory_space<vmem>>, vector<1x128x32xbf16>
    %27 = vector.shape_cast %26 : vector<1x128x32xbf16> to vector<128x32xbf16>
    %cst_21 = arith.constant dense<0.000000e+00> : vector<20x32xf32>
    %28 = tpu.matmul %25, %27, %cst_21 {dimension_numbers = #tpu.dot_dimension_numbers<[1], [0], [0], [1], [0, 0, 1, 1], [], []>} : vector<20x128xbf16>, vector<128x32xbf16>, vector<20x32xf32> -> vector<20x32xf32>
    %29 = arith.addf %23, %28 : vector<20x32xf32>
    %30 = vector.broadcast %0 : vector<1x32xf32> to vector<20x32xf32>
    %31 = arith.addf %29, %30 : vector<20x32xf32>
    %32 = vector.broadcast %3 : vector<20x1xf32> to vector<20x32xf32>
    %33 = arith.mulf %31, %32 : vector<20x32xf32>
    %cst_22 = arith.constant dense<0.000000e+00> : vector<32xf32>
    %34 = vector.multi_reduction <add>, %33, %cst_22 [0] : vector<20x32xf32> to vector<32xf32>
    %35 = vector.shape_cast %34 : vector<32xf32> to vector<1x32xf32>
    %36 = arith.mulf %31, %31 : vector<20x32xf32>
    %37 = vector.broadcast %3 : vector<20x1xf32> to vector<20x32xf32>
    %38 = arith.mulf %36, %37 : vector<20x32xf32>
    %cst_23 = arith.constant dense<0.000000e+00> : vector<32xf32>
    %39 = vector.multi_reduction <add>, %38, %cst_23 [0] : vector<20x32xf32> to vector<32xf32>
    %40 = vector.shape_cast %39 : vector<32xf32> to vector<1x32xf32>
    %41 = vector.extract_strided_slice %35 {offsets = [0, 0], sizes = [1, 16], strides = [1, 1]} : vector<1x32xf32> to vector<1x16xf32>
    %cst_24 = arith.constant dense<0.000000e+00> : vector<1xf32>
    %42 = vector.multi_reduction <add>, %41, %cst_24 [1] : vector<1x16xf32> to vector<1xf32>
    %43 = vector.shape_cast %42 : vector<1xf32> to vector<1x1xf32>
    %cst_25 = arith.constant 3.906250e-03 : f32
    %44 = vector.broadcast %cst_25 : f32 to vector<1x1xf32>
    %45 = arith.mulf %43, %44 : vector<1x1xf32>
    %46 = vector.extract_strided_slice %35 {offsets = [0, 16], sizes = [1, 16], strides = [1, 1]} : vector<1x32xf32> to vector<1x16xf32>
    %cst_26 = arith.constant dense<0.000000e+00> : vector<1xf32>
    %47 = vector.multi_reduction <add>, %46, %cst_26 [1] : vector<1x16xf32> to vector<1xf32>
    %48 = vector.shape_cast %47 : vector<1xf32> to vector<1x1xf32>
    %cst_27 = arith.constant 3.906250e-03 : f32
    %49 = vector.broadcast %cst_27 : f32 to vector<1x1xf32>
    %50 = arith.mulf %48, %49 : vector<1x1xf32>
    %51 = vector.extract_strided_slice %40 {offsets = [0, 0], sizes = [1, 16], strides = [1, 1]} : vector<1x32xf32> to vector<1x16xf32>
    %cst_28 = arith.constant dense<0.000000e+00> : vector<1xf32>
    %52 = vector.multi_reduction <add>, %51, %cst_28 [1] : vector<1x16xf32> to vector<1xf32>
    %53 = vector.shape_cast %52 : vector<1xf32> to vector<1x1xf32>
    %cst_29 = arith.constant 3.906250e-03 : f32
    %54 = vector.broadcast %cst_29 : f32 to vector<1x1xf32>
    %55 = arith.mulf %53, %54 : vector<1x1xf32>
    %56 = arith.mulf %45, %45 : vector<1x1xf32>
    %57 = arith.subf %55, %56 : vector<1x1xf32>
    %cst_30 = arith.constant 0.000000e+00 : f32
    %58 = vector.broadcast %cst_30 : f32 to vector<1x1xf32>
    %59 = arith.maximumf %57, %58 : vector<1x1xf32>
    %60 = vector.extract_strided_slice %40 {offsets = [0, 16], sizes = [1, 16], strides = [1, 1]} : vector<1x32xf32> to vector<1x16xf32>
    %cst_31 = arith.constant dense<0.000000e+00> : vector<1xf32>
    %61 = vector.multi_reduction <add>, %60, %cst_31 [1] : vector<1x16xf32> to vector<1xf32>
    %62 = vector.shape_cast %61 : vector<1xf32> to vector<1x1xf32>
    %cst_32 = arith.constant 3.906250e-03 : f32
    %63 = vector.broadcast %cst_32 : f32 to vector<1x1xf32>
    %64 = arith.mulf %62, %63 : vector<1x1xf32>
    %65 = arith.mulf %50, %50 : vector<1x1xf32>
    %66 = arith.subf %64, %65 : vector<1x1xf32>
    %cst_33 = arith.constant 0.000000e+00 : f32
    %67 = vector.broadcast %cst_33 : f32 to vector<1x1xf32>
    %68 = arith.maximumf %66, %67 : vector<1x1xf32>
    %69 = tpu.iota {dimensions = array<i32: 1>} : vector<1x32xi32>
    %c16_i32 = arith.constant 16 : i32
    %70 = vector.broadcast %c16_i32 : i32 to vector<1x32xi32>
    %71 = arith.cmpi slt, %69, %70 : vector<1x32xi32>
    %72 = vector.shape_cast %45 : vector<1x1xf32> to vector<1x1xf32>
    %73 = vector.broadcast %72 : vector<1x1xf32> to vector<1x32xf32>
    %74 = vector.shape_cast %50 : vector<1x1xf32> to vector<1x1xf32>
    %75 = vector.broadcast %74 : vector<1x1xf32> to vector<1x32xf32>
    %76 = arith.select %71, %73, %75 : vector<1x32xi1>, vector<1x32xf32>
    %cst_34 = arith.constant 9.99999974E-6 : f32
    %77 = vector.broadcast %cst_34 : f32 to vector<1x1xf32>
    %78 = arith.addf %59, %77 : vector<1x1xf32>
    %79 = math.rsqrt %78 : vector<1x1xf32>
    %cst_35 = arith.constant 9.99999974E-6 : f32
    %80 = vector.broadcast %cst_35 : f32 to vector<1x1xf32>
    %81 = arith.addf %68, %80 : vector<1x1xf32>
    %82 = math.rsqrt %81 : vector<1x1xf32>
    %83 = vector.shape_cast %79 : vector<1x1xf32> to vector<1x1xf32>
    %84 = vector.broadcast %83 : vector<1x1xf32> to vector<1x32xf32>
    %85 = vector.shape_cast %82 : vector<1x1xf32> to vector<1x1xf32>
    %86 = vector.broadcast %85 : vector<1x1xf32> to vector<1x32xf32>
    %87 = arith.select %71, %84, %86 : vector<1x32xi1>, vector<1x32xf32>
    %88 = arith.mulf %1, %87 : vector<1x32xf32>
    %89 = arith.mulf %76, %88 : vector<1x32xf32>
    %90 = arith.subf %2, %89 : vector<1x32xf32>
    %91 = vector.broadcast %88 : vector<1x32xf32> to vector<20x32xf32>
    %92 = arith.mulf %31, %91 : vector<20x32xf32>
    %93 = vector.broadcast %90 : vector<1x32xf32> to vector<20x32xf32>
    %94 = arith.addf %92, %93 : vector<20x32xf32>
    %cst_36 = arith.constant 0.000000e+00 : f32
    %95 = vector.broadcast %cst_36 : f32 to vector<20x32xf32>
    %96 = arith.cmpf ogt, %94, %95 : vector<20x32xf32>
    %cst_37 = arith.constant 2.000000e-01 : f32
    %97 = vector.broadcast %cst_37 : f32 to vector<20x32xf32>
    %98 = arith.mulf %97, %94 : vector<20x32xf32>
    %99 = arith.select %96, %94, %98 : vector<20x32xi1>, vector<20x32xf32>
    %100 = arith.truncf %99 : vector<20x32xf32> to vector<20x32xbf16>
    %c0_38 = arith.constant 0 : index
    %c0_39 = arith.constant 0 : index
    %c0_40 = arith.constant 0 : index
    %101 = vector.load %arg7[%c0_38, %c0_39, %c0_40] : memref<1x20x32xbf16, #tpu.memory_space<vmem>>, vector<1x20x32xbf16>
    %102 = vector.shape_cast %101 : vector<1x20x32xbf16> to vector<20x32xbf16>
    %103 = vector.shape_cast %100 : vector<20x32xbf16> to vector<1x20x32xbf16>
    tpu.vector_store %arg7[%c0_38, %c0_39, %c0_40], %103 {strides = array<i32>} : memref<1x20x32xbf16, #tpu.memory_space<vmem>>, vector<1x20x32xbf16>,
    return
  }
  func.func @transform_0(%arg0: i32) -> (i32, i32, i32) {
    %c0_i32 = arith.constant 0 : i32
    %c0_i32_0 = arith.constant 0 : i32
    %c0_i32_1 = arith.constant 0 : i32
    return %arg0, %c0_i32, %c0_i32_0 : i32, i32, i32
  }
  func.func @transform_1(%arg0: i32) -> (i32, i32, i32) {
    %c0_i32 = arith.constant 0 : i32
    %c0_i32_0 = arith.constant 0 : i32
    %c0_i32_1 = arith.constant 0 : i32
    %c0_i32_2 = arith.constant 0 : i32
    return %c0_i32, %c0_i32_0, %c0_i32_1 : i32, i32, i32
  }
  func.func @transform_2(%arg0: i32) -> (i32, i32) {
    %c0_i32 = arith.constant 0 : i32
    %c0_i32_0 = arith.constant 0 : i32
    %c0_i32_1 = arith.constant 0 : i32
    return %c0_i32, %c0_i32_0 : i32, i32
  }
  func.func @transform_3(%arg0: i32) -> (i32, i32) {
    %c0_i32 = arith.constant 0 : i32
    %c0_i32_0 = arith.constant 0 : i32
    %c0_i32_1 = arith.constant 0 : i32
    return %c0_i32, %c0_i32_0 : i32, i32
  }
  func.func @transform_4(%arg0: i32) -> (i32, i32) {
    %c0_i32 = arith.constant 0 : i32
    %c0_i32_0 = arith.constant 0 : i32
    %c0_i32_1 = arith.constant 0 : i32
    return %c0_i32, %c0_i32_0 : i32, i32
  }
  func.func @transform_5(%arg0: i32) -> (i32, i32) {
    %c0_i32 = arith.constant 0 : i32
    %c0_i32_0 = arith.constant 0 : i32
    %c0_i32_1 = arith.constant 0 : i32
    return %c0_i32, %c0_i32_0 : i32, i32
  }
  func.func @transform_6(%arg0: i32) -> (i32, i32, i32) {
    %c0_i32 = arith.constant 0 : i32
    %c0_i32_0 = arith.constant 0 : i32
    %c0_i32_1 = arith.constant 0 : i32
    return %arg0, %c0_i32, %c0_i32_0 : i32, i32, i32
  }
}

</mosaic_0001>

<bundles_post_ra>
// kernel: encoder_forward.4
= control target key start
LH: loop header
LB: loop body
LE: loop exit
PB: predicated region body
PF: predicated region fallthrough
CT: control target
= control target key end

     0   :  { %s5264_s21 = smov 0   ;;  %s7246_s0 = inlined_call_operand.vmem [shape: bf16[2,342,4], index: 0, kind: input, shape index: {}]   ;;  %s7247_s1 = inlined_call_operand.vmem [shape: bf16[9,4,32], index: 1, kind: input, shape index: {}]   ;;  %s7248_s2 = inlined_call_operand.vmem [shape: f32[288,1], index: 2, kind: input, shape index: {}]   ;;  %s7249_s3 = inlined_call_operand.vmem [shape: f32[1,32], index: 3, kind: input, shape index: {}]   ;;  %s7250_s4 = inlined_call_operand.vmem [shape: f32[1,32], index: 4, kind: input, shape index: {}]   ;;  %s7251_s5 = inlined_call_operand.vmem [shape: f32[1,32], index: 5, kind: input, shape index: {}]   ;;  %s7252_s6 = inlined_call_operand.vmem [shape: bf16[2,288,32], index: 6, kind: output, shape index: {}]  }
   0x1 LB: > { %s4082_s22 = sadd.s32 4294967295, %s5225_s21   ;;  %p4086_p0 = scmp.ge.s32.totalorder %s5225_s21, 1  ;;  %s5225_s21 = sphi %s5264_s21, %s16_s21  }
   0x2   : > { %p212_p1 = scmp.lt.s32.totalorder %s5225_s21, 3 }
   0x4   : > { %p213_p2 = pnand %p4086_p0, %p212_p1 }
   0x6   : > { %216 = sbr.rel (%p213_p2) target bundleno = 949 (0x3b5), region = 44 }
   0xd   : > { %vm600_vm0 = vcmask 1041408   ;;  %v5275_v0 = vld [vmem:[%s7247_s1 + $0x8] sm:$0x3]  ;;  %v4108_v1 = vld [vmem:[%s7247_s1 + $0x2] sm:$0x3]  ;;  %p242_p3 = scmp.lt.s32.totalorder %s4082_s22, 1 }
   0xe   : > { %5164 = vmatprep.subr.msk.bf16.mxu0 %vm600_vm0, %v5275_v0  ;;  %5160 = vmatprep.subr.msk.bf16.mxu1 %vm600_vm0, %v4108_v1  ;;  %v5285_v2 = vsel %vm600_vm0, %v5275_v0, 0  ;;  %v602_v3 = vsel %vm600_vm0, %v4108_v1, 0  ;;  %v4204_v4 = vld [vmem:[%s7247_s1 + $0xa] sm:$0x3]  ;;  %v392_v5 = vld [vmem:[%s7247_s1] sm:$0x3] }
   0xf   : > { %7287 = vst [vmem:[#allocation2_spill] sm:$0xff] %v5285_v2  ;;  %4681 = vmatpush3.bf16.msra.mxu0 %v5285_v2  ;;  %4529 = vmatpush3.bf16.msra.mxu1 %v602_v3  ;;  %s7354_s22 = smov (!%p242_p3, %s4082_s22), 1  ;;  %vm396_vm1 = vsmask.f32 7424  ;;  %vm1560_vm2 = vsmask.f32 6400 }
  0x10   : > { %5166 = vmatprep.subr.msk.bf16.mxu0 %vm600_vm0, %v4204_v4  ;;  %s5170_s7 = smul.u32 172, %s7354_s22  ;;  %5161 = vmatprep.subr.msk.bf16.mxu1 %vm600_vm0, %v392_v5  ;;  %vm545_vm3 = vcmask 31744   ;;  %v2011_v8 = vsel %vm600_vm0, %v4204_v4, 0  ;;  %v818_v10 = vsel %vm600_vm0, %v392_v5, 0  ;;  %v5350_v36 = vld [vmem:[%s7247_s1 + $0x4] sm:$0x3] }
  0x11   : > { %v5381_v51 = vld [vmem:[%s7247_s1 + $0xc] sm:$0x3]  ;;  %vm1918_vm4 = vcmask 1045504   ;;  %vm2460_vm5 = vsmask.f32 5376  ;;  %vm1018_vm6 = vcmask 1046528  }
  0x12   : > { %s5303_s10 = scalar_lea.vmem %s7246_s0, %s5170_s7  ;;  %vm2818_vm7 = vcmask 1044480   ;;  %vm3384_vm8 = vcmask 261120   ;;  %s5228_s9 = smov 112   ;;  %vm3611_vm9 = vcmask 130048  }
  0x13   : > { %v5306_v6 = vld [vmem:[%s5303_s10] sm:$0xff]   ;;  %v5309_v7 = vld [vmem:[%s5303_s10 + $0x8] sm:$0xff]   ;;  %v5313_v9 = vld [vmem:[%s5303_s10 + $0x10] sm:$0xff]   ;;  %s5171_s15 = smul.u32 144, %s7354_s22 }
  0x14   : > { %v398_v11 = vshrl.u32 %v5306_v6, 16  ;;  %v400_v12 = vshll.u32 %v5306_v6, 16  ;;  %v405_v13 = vshll.u32 %v5309_v7, 16  ;;  %v409_v14 = vshrl.u32 %v5309_v7, 16  ;;  %v5327_v17 = vld [vmem:[%s5303_s10 + $0x18] sm:$0xff]   ;;  %v5330_v18 = vld [vmem:[%s5303_s10 + $0x20] sm:$0xff]  }
  0x15   : > { %v5321_v15 = vshll.u32 %v5313_v9, 16  ;;  %v5324_v16 = vshrl.u32 %v5313_v9, 16  ;;  %v5336_v26 = vshll.u32 %v5327_v17, 16  ;;  %v5339_v30 = vshrl.u32 %v5327_v17, 16  ;;  %v5342_v31 = vld [vmem:[%s5303_s10 + $0x28] sm:$0xff]   ;;  %v5359_v41 = vld [vmem:[%s5303_s10 + $0x30] sm:$0xff]   ;;  %s7079_s17 = scalar_lea.vmem %s7252_s6, %s5171_s15 }
  0x16   : > { %v402_v19 = vrot.slane %v400_v12, 1  ;;  %v407_v20 = vrot.slane %v405_v13, 1  ;;  %v1561_v21 = vrot.slane %v409_v14, 1  ;;  %v1562_v22 = vrot.slane %v405_v13, 2  ;;  %v5376_v50 = vld [vmem:[%s5303_s10 + $0x38] sm:$0xff]   ;;  %v5404_v63 = vld [vmem:[%s5303_s10 + $0x40] sm:$0xff]  }
  0x17   : > { %v1564_v23 = vrot.slane %v5324_v16, 1  ;;  %v1565_v24 = vrot.slane %v5321_v15, 2  ;;  %v415_v25 = vrot.slane %v5321_v15, 1  ;;  %v1569_v33 = vrot.slane %v5336_v26, 2 }
  0x18   : > { %v403_v27 = vor.u32 %v402_v19, %v398_v11  ;;  %v411_v28 = vor.u32 %v409_v14, %v407_v20  ;;  %v1563_v29 = vor.u32 %v1562_v22, %v1561_v21  ;;  %v423_v35 = vrot.slane %v5336_v26, 1 }
  0x19   : > { %v1566_v32 = vor.u32 %v1565_v24, %v1564_v23  ;;  %v419_v34 = vor.u32 %v5324_v16, %v415_v25  ;;  %v1568_v39 = vrot.slane %v5339_v30, 1  ;;  %v5356_v40 = vshll.u32 %v5330_v18, 16  ;;  %v5431_v23 = vld [vmem:[%s5303_s10 + $0x48] sm:$0xff]  }
  0x1a   : > { %v408_v37 = vsel %vm396_vm1, %v403_v27, %v407_v20  ;;  %v416_v38 = vsel %vm396_vm1, %v411_v28, %v415_v25  ;;  %v5365_v44 = vshrl.u32 %v5330_v18, 16  ;;  %v427_v45 = vor.u32 %v5339_v30, %v423_v35  ;;  %v5438_v28 = vld [vmem:[%s5303_s10 + $0x50] sm:$0xff]  }
  0x1b   : > { %4530 = vmatprep.mubr.msk.bf16.mxu1 %vm545_vm3, %v408_v37  ;;  %v1567_v42 = vsel %vm1560_vm2, %v1563_v29, %v1566_v32  ;;  %v424_v43 = vsel %vm396_vm1, %v419_v34, %v423_v35  ;;  %v1570_v46 = vor.u32 %v1569_v33, %v1568_v39  ;;  %v1573_v47 = vrot.slane %v5356_v40, 2 }
  0x1c   : > { %4682 = vmatprep.mubr.msk.bf16.mxu0 %vm545_vm3, %v1567_v42  ;;  %4531 = vmatmul.mubr.msk.bf16.vlgmr.msra.gmra.mrb[0].mxu1 %vm545_vm3, %v416_v38  ;;  %v431_v48 = vrot.slane %v5356_v40, 1  ;;  %v5373_v49 = vshll.u32 %v5342_v31, 16  ;;  %v1572_v52 = vrot.slane %v5365_v44, 1  ;;  %v5386_v53 = vshrl.u32 %v5342_v31, 16 }
  0x1d   : > { %4534 = vmatprep.mubr.msk.bf16.mxu1 %vm545_vm3, %v424_v43  ;;  %4567 = vmatpush3.bf16.msra.mxu1 %v818_v10  ;;  %v5389_v54 = vshll.u32 %v5359_v41, 16  ;;  %v5392_v55 = vshrl.u32 %v5359_v41, 16  ;;  %v1571_v56 = vsel %vm1560_vm2, %v1566_v32, %v1570_v46  ;;  %v5408_v3 = vshll.u32 %v5376_v50, 16 }
  0x1e   : > { %v1577_v57 = vrot.slane %v5373_v49, 2  ;;  %v435_v58 = vor.u32 %v5365_v44, %v431_v48  ;;  %5162 = vmatprep.subr.msk.bf16.mxu1 %vm600_vm0, %v5350_v36  ;;  %4683 = vmatmul.mubr.msk.bf16.vlgmr.msra.gmra.mrb[0].mxu0 %vm545_vm3, %v1571_v56  ;;  %v1574_v59 = vor.u32 %v1573_v47, %v1572_v52  ;;  %v1576_v60 = vrot.slane %v5386_v53, 1  ;;  %v5465_v56 = vld [vmem:[%s5303_s10 + $0x58] sm:$0xff]  }
  0x1f   : > { %v439_v61 = vrot.slane %v5373_v49, 1  ;;  %v1580_v62 = vrot.slane %v5392_v55, 1  ;;  %4719 = vmatpush3.bf16.msra.mxu0 %v2011_v8  ;;  %v1581_v1 = vrot.slane %v5389_v54, 2  ;;  %v5411_v4 = vshrl.u32 %v5376_v50, 16 }
  0x20   : > { %v1575_v5 = vsel %vm1560_vm2, %v1570_v46, %v1574_v59  ;;  %v432_v10 = vsel %vm396_vm1, %v427_v45, %v431_v48  ;;  %v1578_v11 = vor.u32 %v1577_v57, %v1576_v60  ;;  %5167 = vmatprep.subr.msk.bf16.mxu0 %vm600_vm0, %v5381_v51  ;;  %v447_v13 = vrot.slane %v5389_v54, 1 }
  0x21   : > { %4686 = vmatprep.mubr.msk.bf16.mxu0 %vm545_vm3, %v1575_v5  ;;  %v440_v8 = vsel %vm396_vm1, %v435_v58, %v439_v61  ;;  %v1582_v12 = vor.u32 %v1581_v1, %v1580_v62  ;;  %v5421_v14 = vshll.u32 %v5404_v63, 16  ;;  %v1584_v20 = vrot.slane %v5411_v4, 1 }
  0x22   : > { %v1579_v19 = vsel %vm1560_vm2, %v1574_v59, %v1578_v11  ;;  %v1585_v21 = vrot.slane %v5408_v3, 2  ;;  %v5428_v22 = vshrl.u32 %v5404_v63, 16  ;;  %v443_v25 = vor.u32 %v5386_v53, %v439_v61 }
  0x23   : > { %v1583_v24 = vsel %vm1560_vm2, %v1578_v11, %v1582_v12  ;;  %v1589_v27 = vrot.slane %v5421_v14, 2  ;;  %v451_v29 = vor.u32 %v5392_v55, %v447_v13  ;;  %v455_v32 = vrot.slane %v5408_v3, 1 }
  0x24   : > { %4535 = vmatmul.mubr.msk.bf16.gmra.mrb[4].mxu1 %vm545_vm3, %v432_v10  ;;  %v1588_v33 = vrot.slane %v5428_v22, 1  ;;  %v1586_v34 = vor.u32 %v1585_v21, %v1584_v20  ;;  %v5446_v35 = vshll.u32 %v5431_v23, 16  ;;  %v5449_v37 = vshrl.u32 %v5431_v23, 16 }
  0x25   : > { %4538 = vmatprep.mubr.msk.bf16.mxu1 %vm545_vm3, %v440_v8  ;;  %v448_v38 = vsel %vm396_vm1, %v443_v25, %v447_v13  ;;  %v5453_v42 = vshll.u32 %v5438_v28, 16  ;;  %v5456_v43 = vshrl.u32 %v5438_v28, 16  ;;  %v456_v45 = vsel %vm396_vm1, %v451_v29, %v455_v32  ;;  %v5485_v13 = vld [vmem:[%s5303_s10 + $0x88] sm:$0xff]   ;;  %v5493_v25 = vld [vmem:[%s5303_s10 + $0x60] sm:$0xff]  }
  0x26   : > { %4687 = vmatmul.mubr.msk.bf16.gmra.mrb[4].mxu0 %vm545_vm3, %v1579_v19  ;;  %v1590_v39 = vor.u32 %v1589_v27, %v1588_v33  ;;  %v1587_v46 = vsel %vm1560_vm2, %v1582_v12, %v1586_v34  ;;  %v463_v47 = vrot.slane %v5421_v14, 1  ;;  %v1592_v48 = vrot.slane %v5449_v37, 1  ;;  %v328_v27 = vld [vmem:[%s5303_s10 + $0x90] sm:$0xf] }
  0x27   : > { %4690 = vmatprep.mubr.msk.bf16.mxu0 %vm545_vm3, %v1583_v24  ;;  %v1593_v52 = vrot.slane %v5446_v35, 2  ;;  %v459_v58 = vor.u32 %v5411_v4, %v455_v32  ;;  %v1596_v59 = vrot.slane %v5456_v43, 1  ;;  %v1597_v60 = vrot.slane %v5453_v42, 2 }
  0x28   : > { %v1591_v57 = vsel %vm1560_vm2, %v1586_v34, %v1590_v39  ;;  %v467_v61 = vor.u32 %v5428_v22, %v463_v47  ;;  %v471_v62 = vrot.slane %v5446_v35, 1  ;;  %v5477_v5 = vshll.u32 %v5465_v56, 16 }
  0x29   : > { %v1594_v1 = vor.u32 %v1593_v52, %v1592_v48  ;;  %v5480_v10 = vshrl.u32 %v5465_v56, 16  ;;  %v464_v11 = vsel %vm396_vm1, %v459_v58, %v463_v47  ;;  %v1598_v8 = vor.u32 %v1597_v60, %v1596_v59 }
  0x2a   : > { %7288 = vst [vmem:[#allocation3_spill] sm:$0xff] %v5477_v5  ;;  %v472_v12 = vsel %vm396_vm1, %v467_v61, %v471_v62  ;;  %v479_v20 = vrot.slane %v5453_v42, 1  ;;  %v1601_v24 = vrot.slane %v5477_v5, 2  ;;  %v475_v32 = vor.u32 %v5449_v37, %v471_v62 }
  0x2b   : > { %7289 = vst [vmem:[#allocation4_spill] sm:$0xff] %v5480_v10  ;;  %v1595_v19 = vsel %vm1560_vm2, %v1590_v39, %v1594_v1  ;;  %v1600_v21 = vrot.slane %v5480_v10, 1  ;;  %v1599_v29 = vsel %vm1560_vm2, %v1594_v1, %v1598_v8  ;;  %v487_v34 = vrot.slane %v5477_v5, 1 }
  0x2c   : > { %4539 = vmatmul.mubr.msk.bf16.gmra.mrb[8].mxu1 %vm545_vm3, %v448_v38  ;;  %v483_v33 = vor.u32 %v5456_v43, %v479_v20  ;;  %v5502_v38 = vld [vmem:[%s5303_s10 + $0x68] sm:$0xff]   ;;  %v5505_v39 = vshll.u32 %v5485_v13, 16  ;;  %v5517_v48 = vshll.u32 %v5493_v25, 16  ;;  %v1919_v58 = vrot.slane %v5309_v7, 2 }
  0x2d   : > { %4542 = vmatprep.mubr.msk.bf16.mxu1 %vm545_vm3, %v456_v45  ;;  %v5508_v45 = vcombine.low %v328_v27, %v328_v27  ;;  %v5514_v47 = vor.u32 %v1601_v24, %v1600_v21  ;;  %v1920_v59 = vrot.slane %v5313_v9, 2  ;;  %v5526_v62 = vshrl.u32 %v5493_v25, 16  ;;  %v5539_v21 = vld [vmem:[%s5303_s10 + $0x70] sm:$0xff]  }
  0x2e   : > { %4691 = vmatmul.mubr.msk.bf16.gmra.mrb[8].mxu0 %vm545_vm3, %v1587_v46  ;;  %v5511_v46 = vshrl.u32 %v5485_v13, 16  ;;  %7293 = vst [vmem:[#allocation8_spill] sm:$0xff] %v5517_v48  ;;  %v7253_v52 = vrot.slane %v5505_v39, 1  ;;  %v488_v61 = vsel %vm396_vm1, %v483_v33, %v487_v34  ;;  %v5529_v1 = vshll.u32 %v5502_v38, 16 }
  0x2f   : > { %4694 = vmatprep.mubr.msk.bf16.mxu0 %vm545_vm3, %v1591_v57  ;;  %7290 = vst [vmem:[#allocation5_spill] sm:$0xff] %v5508_v45  ;;  %7292 = vst [vmem:[#allocation7_spill] sm:$0xff] %v5514_v47  ;;  %v480_v57 = vsel %vm396_vm1, %v475_v32, %v479_v20  ;;  %v541_v60 = vshll.u32 %v5508_v45, 16  ;;  %v495_v20 = vrot.slane %v5517_v48, 1  ;;  %v1921_v24 = vsel %vm1918_vm4, %v1919_v58, %v1920_v59 }
  0x30   : > { %7291 = vst [vmem:[#allocation6_spill] sm:$0xff] %v5511_v46  ;;  %7294 = vst [vmem:[#allocation9_spill] sm:$0xff] %v5526_v62  ;;  %v5556_v58 = vshll.u32 %v5539_v21, 16  ;;  %v7304_v5 = vrot.slane %v5505_v39, 1  ;;  %v2469_v45 = vrot.slane %v5356_v40, 3  ;;  %v1934_v40 = vrot.slane %v5431_v23, 2 }
  0x31   : > { %7295 = vst [vmem:[#allocation10_spill] sm:$0xff] %v5529_v1  ;;  %v499_v33 = vor.u32 %v5526_v62, %v495_v20 }
  0x32   : > { %7296 = vst [vmem:[#allocation11_spill] sm:$0xff] %v5556_v58 }
  0x34   : > { %4543 = vmatmul.mubr.msk.bf16.gmra.mrb[12].mxu1 %vm545_vm3, %v464_v11  ;;  %v539_v11 = vor.u32 %v5511_v46, %v7253_v52  ;;  %v5565_v52 = vshrl.u32 %v5539_v21, 16 }
  0x35   : > { %4546 = vmatprep.mubr.msk.bf16.mxu1 %vm545_vm3, %v472_v12  ;;  %v543_v12 = vrot.slane %v541_v60, 1  ;;  %v1922_v60 = vrot.slane %v5327_v17, 2 }
  0x36   : > { %4695 = vmatmul.mubr.msk.bf16.gmra.mrb[12].mxu0 %vm545_vm3, %v1595_v19  ;;  %v1603_v19 = vsel %vm1560_vm2, %v1598_v8, %v5514_v47  ;;  %v5550_v8 = vld [vmem:[%s5303_s10 + $0x78] sm:$0xff]   ;;  %7298 = vst [vmem:[#allocation13_spill] sm:$0xff] %v5565_v52  ;;  %v5577_v47 = vld [vmem:[%s5303_s10 + $0x80] sm:$0xff]  }
  0x37   : > { %4698 = vmatprep.mubr.msk.bf16.mxu0 %vm545_vm3, %v1599_v29  ;;  %v491_v29 = vor.u32 %v5480_v10, %v487_v34  ;;  %v5545_v32 = vsel %vm396_vm1, %v539_v11, %v543_v12  ;;  %v5561_v11 = vshrl.u32 %v5502_v38, 16  ;;  %v2468_v10 = vrot.slane %v5365_v44, 2 }
  0x38   : > { %v2472_v44 = vrot.slane %v5386_v53, 2 }
  0x39   : > { %v496_v34 = vsel %vm396_vm1, %v491_v29, %v495_v20  ;;  %7297 = vst [vmem:[#allocation12_spill] sm:$0xff] %v5561_v11  ;;  %v5573_v20 = vsel %vm1918_vm4, %v1920_v59, %v1922_v60  ;;  %v511_v29 = vrot.slane %v5556_v58, 1  ;;  %v5593_v58 = vld [vmem:[%s7247_s1 + $0xe] sm:$0x3] }
  0x3c   : > { %4547 = vmatmul.mubr.msk.bf16.gmra.mrb[16].mxu1 %vm545_vm3, %v480_v57  ;;  %v503_v57 = vrot.slane %v5529_v1, 1  ;;  %v515_v1 = vor.u32 %v5565_v52, %v511_v29  ;;  %v5613_v52 = vshrl.u32 %v5550_v8, 16 }
  0x3d   : > { %4550 = vmatprep.mubr.msk.bf16.mxu1 %vm545_vm3, %v488_v61  ;;  %v1924_v61 = vrot.slane %v5330_v18, 2 }
  0x3e   : > { %4699 = vmatmul.mubr.msk.bf16.gmra.mrb[16].mxu0 %vm545_vm3, %v1603_v19  ;;  %v504_v12 = vsel %vm396_vm1, %v499_v33, %v503_v57  ;;  %v5568_v19 = vshll.u32 %v5550_v8, 16  ;;  %v2243_v33 = vsel %vm600_vm0, %v5381_v51, 0  ;;  %v507_v2 = vor.u32 %v5561_v11, %v503_v57  ;;  %v5598_v51 = vld [vmem:[%s5303_s10 + $0x98] sm:$0xf]  ;;  %7302 = vst [vmem:[#allocation17_spill] sm:$0xff] %v5613_v52 }
  0x3f   : > { %4720 = vmatprep.mubr.msk.bf16.mxu0 %vm545_vm3, %v1921_v24  ;;  %v329_v24 = vld [vmem:[%s5303_s10 + $0x94] sm:$0xf]  ;;  %v5583_v46 = vsel %vm1918_vm4, %v1922_v60, %v1924_v61  ;;  %v331_v60 = vld [vmem:[%s5303_s10 + $0x9c] sm:$0xf]  ;;  %v1926_v57 = vrot.slane %v5342_v31, 2  ;;  %v5619_v11 = vshrl.u32 %v5577_v47, 16 }
  0x40   : > { %7299 = vst [vmem:[#allocation14_spill] sm:$0xff] %v5568_v19  ;;  %v5588_v59 = vcombine.low %v328_v27, %v329_v24  ;;  %v5605_v27 = vshll.u32 %v5577_v47, 16  ;;  %v512_v24 = vsel %vm396_vm1, %v507_v2, %v511_v29 }
  0x41   : > { %7303 = vst [vmem:[#allocation18_spill] sm:$0xff] %v5619_v11  ;;  %v5627_v2 = vsel %vm1918_vm4, %v1924_v61, %v1926_v57  ;;  %v2461_v61 = vrot.slane %v5324_v16, 2 }
  0x42   : > { %7300 = vst [vmem:[#allocation15_spill] sm:$0xff] %v5588_v59  ;;  %7301 = vst [vmem:[#allocation16_spill] sm:$0xff] %v5605_v27  ;;  %v5622_v48 = vrot.slane %v5588_v59, 2  ;;  %v527_v29 = vrot.slane %v5605_v27, 1  ;;  %v2462_v27 = vrot.slane %v5321_v15, 3 }
  0x44   : > { %4551 = vmatmul.mubr.msk.bf16.gmra.mrb[20].mxu1 %vm545_vm3, %v496_v34  ;;  %v519_v34 = vrot.slane %v5568_v19, 1  ;;  %v1928_v19 = vrot.slane %v5359_v41, 2 }
  0x45   : > { %4554 = vmatprep.mubr.msk.bf16.mxu1 %vm545_vm3, %v504_v12  ;;  %v5608_v12 = vcombine.low %v5598_v51, %v331_v60 }
  0x46   : > { %4721 = vmatmul.mubr.msk.bf16.vlgmr.msra.gmra.mrb[0].mxu0 %vm545_vm3, %v5573_v20  ;;  %v5638_v59 = vsel %vm1918_vm4, %v1926_v57, %v1928_v19  ;;  %v523_v62 = vor.u32 %v5613_v52, %v519_v34  ;;  %v2465_v57 = vrot.slane %v5336_v26, 3  ;;  %v2463_v52 = vor.u32 %v2462_v27, %v2461_v61 }
  0x47   : > { %4757 = vmatpush3.bf16.msra.mxu0 %v2243_v33  ;;  %4724 = vmatprep.mubr.msk.bf16.mxu0 %vm545_vm3, %v5583_v46  ;;  %v520_v33 = vsel %vm396_vm1, %v515_v1, %v519_v34  ;;  %v7276_v60 = vrot.slane %v5608_v12, 2  ;;  %v1940_v61 = vrot.slane %v5493_v25, 2 }
  0x48   : > { %5168 = vmatprep.subr.msk.bf16.mxu0 %vm600_vm0, %v5593_v58  ;;  %v528_v34 = vsel %vm396_vm1, %v523_v62, %v527_v29  ;;  %v2470_v62 = vor.u32 %v2469_v45, %v2468_v10  ;;  %v2473_v10 = vrot.slane %v5373_v49, 3  ;;  %v1936_v45 = vrot.slane %v5438_v28, 2 }
  0x49   : > { %v5634_v1 = vsel %vm1918_vm4, %v5622_v48, %v7276_v60  ;;  %v1930_v60 = vrot.slane %v5376_v50, 2 }
  0x4a   : > { %v5693_v49 = vsel %vm1918_vm4, %v1934_v40, %v1936_v45 }
  0x4c   : > { %4555 = vmatmul.mubr.msk.bf16.gmra.mrb[24].mxu1 %vm545_vm3, %v512_v24  ;;  %v531_v24 = vor.u32 %v5619_v11, %v527_v29  ;;  %v1932_v11 = vrot.slane %v5404_v63, 2 }
  0x4d   : > { %4558 = vmatprep.mubr.msk.bf16.mxu1 %vm545_vm3, %v520_v33  ;;  %v2464_v33 = vrot.slane %v5339_v30, 2  ;;  %v5660_v30 = vsel %vm1918_vm4, %v1928_v19, %v1930_v60  ;;  %v2476_v19 = vrot.slane %v5392_v55, 2  ;;  %v2480_v55 = vrot.slane %v5411_v4, 2  ;;  %v5713_v4 = vld [vmem:[%s7247_s1 + $0x6] sm:$0x3] }
  0x4e   : > { %4725 = vmatmul.mubr.msk.bf16.gmra.mrb[4].mxu0 %vm545_vm3, %v5627_v2  ;;  %v536_v16 = vsel %vm396_vm1, %v531_v24, %v7304_v5  ;;  %v5667_v27 = vsel %vm1918_vm4, %v1930_v60, %v1932_v11  ;;  %v2477_v60 = vrot.slane %v5389_v54, 3  ;;  %v5685_v29 = vsel %vm1918_vm4, %v1932_v11, %v1934_v40 }
  0x4f   : > { %4728 = vmatprep.mubr.msk.bf16.mxu0 %vm545_vm3, %v5638_v59  ;;  %v2466_v15 = vor.u32 %v2465_v57, %v2464_v33  ;;  %v1938_v11 = vrot.slane %v5465_v56, 2  ;;  %v1111_v57 = vsel %vm600_vm0, %v5350_v36, 0  ;;  %v2489_v40 = vrot.slane %v5446_v35, 3 }
  0x50   : > { %v2478_v53 = vor.u32 %v2477_v60, %v2476_v19  ;;  %v2493_v19 = vrot.slane %v5453_v42, 3 }
  0x51   : > { %v5663_v26 = vsel %vm2460_vm5, %v2463_v52, %v2466_v15  ;;  %v5670_v5 = vsel %vm2460_vm5, %v2466_v15, %v2470_v62  ;;  %v2474_v52 = vor.u32 %v2473_v10, %v2472_v44  ;;  %v5721_v15 = vsel %vm1918_vm4, %v1936_v45, %v1938_v11 }
  0x52   : > { %v5726_v36 = vsel %vm1918_vm4, %v1938_v11, %v1940_v61  ;;  %v1942_v44 = vrot.slane %v5502_v38, 2  ;;  %v1944_v10 = vrot.slane %v5539_v21, 2 }
  0x53   : > { %v5688_v24 = vsel %vm2460_vm5, %v2470_v62, %v2474_v52  ;;  %v5698_v54 = vsel %vm2460_vm5, %v2474_v52, %v2478_v53  ;;  %v2492_v52 = vrot.slane %v5456_v43, 2  ;;  %v1946_v43 = vrot.slane %v5550_v8, 2 }
  0x54   : > { %4559 = vmatmul.mubr.msk.bf16.gmra.mrb[28].mxu1 %vm545_vm3, %v528_v34  ;;  %v2484_v34 = vrot.slane %v5428_v22, 2  ;;  %v2488_v22 = vrot.slane %v5449_v37, 2  ;;  %v5749_v35 = vsel %vm1918_vm4, %v1940_v61, %v1942_v44  ;;  %v1950_v61 = vrot.slane %v5485_v13, 2 }
  0x55   : > { %4562 = vmatprep.mubr.msk.bf16.mxu1 %vm545_vm3, %v536_v16  ;;  %v2485_v16 = vrot.slane %v5421_v14, 3  ;;  %v5751_v37 = vor.u32 %v2493_v19, %v2492_v52  ;;  %v263_v52 = vld [vmem:[%s7248_s2 + $0x38] sm:$0xff]  ;;  %v264_v19 = vld [vmem:[%s7248_s2 + $0x40] sm:$0xff] }
  0x56   : > { %4729 = vmatmul.mubr.msk.bf16.gmra.mrb[8].mxu0 %vm545_vm3, %v5660_v30  ;;  %v2490_v45 = vor.u32 %v2489_v40, %v2488_v22  ;;  %v260_v22 = vld [vmem:[%s7248_s2 + $0x20] sm:$0xff] }
  0x57   : > { %4732 = vmatprep.mubr.msk.bf16.mxu0 %vm545_vm3, %v5667_v27  ;;  %v2486_v62 = vor.u32 %v2485_v16, %v2484_v34  ;;  %v5796_v34 = vsel %vm1918_vm4, %v1950_v61, %v5622_v48 }
  0x58   : > { %v5760_v42 = vsel %vm2460_vm5, %v2490_v45, %v5751_v37 }
  0x59   : > { %v5744_v60 = vsel %vm2460_vm5, %v2486_v62, %v2490_v45  ;;  %v1036_v45 = vrot.slane %v5431_v23, 1 }
  0x5c   : > { %4563 = vmatmul.mubr.msk.bf16.gmra.mrb[32].mxu1 %vm545_vm3, %v5545_v32  ;;  %v2481_v32 = vrot.slane %v5408_v3, 3 }
  0x5d   : > { %4568 = vmatprep.mubr.msk.bf16.mxu1 %vm545_vm3, %v5306_v6 }
  0x5e   : > { %4733 = vmatmul.mubr.msk.bf16.gmra.mrb[12].mxu0 %vm545_vm3, %v5685_v29  ;;  %v2482_v33 = vor.u32 %v2481_v32, %v2480_v55  ;;  %v1948_v55 = vrot.slane %v5577_v47, 2  ;;  %v5771_v32 = vsel %vm1918_vm4, %v1944_v10, %v1946_v43 }
  0x5f   : > { %4736 = vmatprep.mubr.msk.bf16.mxu0 %vm545_vm3, %v5693_v49 }
  0x60   : > { %v5716_v3 = vsel %vm2460_vm5, %v2478_v53, %v2482_v33  ;;  %v5731_v14 = vsel %vm2460_vm5, %v2482_v33, %v2486_v62  ;;  %v5756_v53 = vsel %vm1918_vm4, %v1942_v44, %v1944_v10  ;;  %v5776_v11 = vsel %vm1918_vm4, %v1946_v43, %v1948_v55  ;;  %v262_v44 = vld [vmem:[%s7248_s2 + $0x30] sm:$0xff] }
  0x61   : > { %v5786_v33 = vsel %vm1918_vm4, %v1948_v55, %v1950_v61  ;;  %v2601_v62 = vsel %vm600_vm0, %v5593_v58, 0  ;;  %v1020_v58 = vrot.slane %v5309_v7, 1  ;;  %v1034_v10 = vrot.slane %v5404_v63, 1  ;;  %v266_v43 = vld [vmem:[%s7248_s2 + $0x50] sm:$0xff]  ;;  %v5951_v55 = vld [vmem:[%s5303_s10 + $0xa0] ss:$0 sps:$4 sm:$0xff]  }
  0x62   : > { %v267_v61 = vld [vmem:[%s7248_s2 + $0x58] sm:$0xff] }
  0x64   : > { %4569 = vmatmul.mubr.msk.bf16.vlgmr.msra.gmra.mrb[0].mxu1 %vm545_vm3, %v5309_v7 }
  0x65   : > { %4572 = vmatprep.mubr.msk.bf16.mxu1 %vm545_vm3, %v5313_v9  ;;  %4605 = vmatpush3.bf16.msra.mxu1 %v1111_v57  ;;  %v5790_v57 = vcombine.low %v5598_v51, %v5598_v51 }
  0x66   : > { %5163 = vmatprep.subr.msk.bf16.mxu1 %vm600_vm0, %v5713_v4  ;;  %4737 = vmatmul.mubr.msk.bf16.gmra.mrb[16].mxu0 %vm545_vm3, %v5721_v15 }
  0x67   : > { %4740 = vmatprep.mubr.msk.bf16.mxu0 %vm545_vm3, %v5726_v36  ;;  %v1954_v16 = vrot.slane %v5790_v57, 2 }
  0x69   : > { %v1955_v51 = vsel %vm1918_vm4, %v5622_v48, %v1954_v16  ;;  %v5821_v48 = vld [vmem:[%s7247_s1 + $0x10] sm:$0x3]  ;;  %v2234_v16 = vrot.slane %v5951_v55, 2 }
  0x6c   : > { %4573 = vmatmul.mubr.msk.bf16.gmra.mrb[4].mxu1 %vm545_vm3, %v5327_v17 }
  0x6d   : > { %4576 = vmatprep.mubr.msk.bf16.mxu1 %vm545_vm3, %v5330_v18 }
  0x6e   : > { %4741 = vmatmul.mubr.msk.bf16.gmra.mrb[20].mxu0 %vm545_vm3, %v5749_v35 }
  0x6f   : > { %4744 = vmatprep.mubr.msk.bf16.mxu0 %vm545_vm3, %v5756_v53 }
  0x74   : > { %4577 = vmatmul.mubr.msk.bf16.gmra.mrb[8].mxu1 %vm545_vm3, %v5342_v31 }
  0x75   : > { %4580 = vmatprep.mubr.msk.bf16.mxu1 %vm545_vm3, %v5359_v41 }
  0x76   : > { %4745 = vmatmul.mubr.msk.bf16.gmra.mrb[24].mxu0 %vm545_vm3, %v5771_v32 }
  0x77   : > { %4748 = vmatprep.mubr.msk.bf16.mxu0 %vm545_vm3, %v5776_v11 }
  0x7c   : > { %4581 = vmatmul.mubr.msk.bf16.gmra.mrb[12].mxu1 %vm545_vm3, %v5376_v50 }
  0x7d   : > { %4584 = vmatprep.mubr.msk.bf16.mxu1 %vm545_vm3, %v5404_v63 }
  0x7e   : > { %4749 = vmatmul.mubr.msk.bf16.gmra.mrb[28].mxu0 %vm545_vm3, %v5786_v33 }
  0x7f   : > { %4752 = vmatprep.mubr.msk.bf16.mxu0 %vm545_vm3, %v5796_v34 }
  0x84   : > { %4585 = vmatmul.mubr.msk.bf16.gmra.mrb[16].mxu1 %vm545_vm3, %v5431_v23 }
  0x85   : > { %4588 = vmatprep.mubr.msk.bf16.mxu1 %vm545_vm3, %v5438_v28 }
  0x86   : > { %4753 = vmatmul.mubr.msk.bf16.gmra.mrb[32].mxu0 %vm545_vm3, %v1955_v51 }
  0x87   : > { %4758 = vmatprep.mubr.msk.bf16.mxu0 %vm545_vm3, %v5573_v20 }
  0x8c   : > { %4589 = vmatmul.mubr.msk.bf16.gmra.mrb[20].mxu1 %vm545_vm3, %v5465_v56 }
  0x8d   : > { %4592 = vmatprep.mubr.msk.bf16.mxu1 %vm545_vm3, %v5493_v25 }
  0x8e   : > { %4759 = vmatmul.mubr.msk.bf16.vlgmr.msra.gmra.mrb[0].mxu0 %vm545_vm3, %v5583_v46  ;;  %v1019_v46 = vrot.slane %v5306_v6, 1  ;;  %v1024_v6 = vrot.slane %v5327_v17, 1  ;;  %v1028_v17 = vrot.slane %v5342_v31, 1 }
  0x8f   : > { %4795 = vmatpush3.bf16.msra.mxu0 %v2601_v62  ;;  %4762 = vmatprep.mubr.msk.bf16.mxu0 %vm545_vm3, %v5627_v2 }
  0x90   : > { %5169 = vmatprep.subr.msk.bf16.mxu0 %vm600_vm0, %v5821_v48  ;;  %v1021_v20 = vsel %vm1018_vm6, %v1019_v46, %v1020_v58  ;;  %v270_v46 = vld [vmem:[%s7248_s2 + $0x70] sm:$0xff] }
  0x94   : > { %4593 = vmatmul.mubr.msk.bf16.gmra.mrb[24].mxu1 %vm545_vm3, %v5502_v38 }
  0x95   : > { %4596 = vmatprep.mubr.msk.bf16.mxu1 %vm545_vm3, %v5539_v21 }
  0x96   : > { %4763 = vmatmul.mubr.msk.bf16.gmra.mrb[4].mxu0 %vm545_vm3, %v5638_v59  ;;  %v1022_v59 = vrot.slane %v5313_v9, 1  ;;  %v1026_v9 = vrot.slane %v5330_v18, 1  ;;  %v5227_v18 = vmov 0  }
  0x97   : > { %4766 = vmatprep.mubr.msk.bf16.mxu0 %vm545_vm3, %v5660_v30  ;;  %v1343_v30 = vsel %vm600_vm0, %v5713_v4, 0  ;;  %5182 = vset.pattern.permute.xlu0 %v5227_v18  ;;  %v1030_v4 = vrot.slane %v5359_v41, 1 }
  0x98   : > { %v5858_v7 = vsel %vm1018_vm6, %v1020_v58, %v1022_v59  ;;  %v5861_v2 = vsel %vm1018_vm6, %v1022_v59, %v1024_v6  ;;  %v5884_v31 = vsel %vm1018_vm6, %v1024_v6, %v1026_v9  ;;  %5183 = vset.pattern.permute.xlu1 %v5227_v18  ;;  %v1044_v59 = vrot.slane %v5502_v38, 1  ;;  %v271_v6 = vld [vmem:[%s7248_s2 + $0x78] sm:$0xff] }
  0x99   : > { %v5909_v41 = vsel %vm1018_vm6, %v1028_v17, %v1030_v4  ;;  %v1046_v18 = vrot.slane %v5539_v21, 1 }
  0x9c   : > { %4597 = vmatmul.mubr.msk.bf16.gmra.mrb[28].mxu1 %vm545_vm3, %v5550_v8 }
  0x9d   : > { %4600 = vmatprep.mubr.msk.bf16.mxu1 %vm545_vm3, %v5577_v47 }
  0x9e   : > { %4767 = vmatmul.mubr.msk.bf16.gmra.mrb[8].mxu0 %vm545_vm3, %v5667_v27  ;;  %v256_v27 = vld [vmem:[%s7248_s2] sm:$0xff] }
  0x9f   : > { %4770 = vmatprep.mubr.msk.bf16.mxu0 %vm545_vm3, %v5685_v29  ;;  %v258_v29 = vld [vmem:[%s7248_s2 + $0x10] sm:$0xff]  ;;  %3170 = vperm.xlu0 %5182, %v256_v27  }
  0xa0   : > { %3180 = vperm.xlu1 %5183, %v258_v29   ;;  %v274_v29 = vld [vmem:[%s7248_s2 + $0x90] sm:$0xff] }
  0xa4   : > { %4601 = vmatmul.mubr.msk.bf16.gmra.mrb[32].mxu1 %vm545_vm3, %v5485_v13 }
  0xa5   : > { %4606 = vmatprep.mubr.msk.bf16.mxu1 %vm545_vm3, %v1021_v20  ;;  %v1042_v20 = vrot.slane %v5493_v25, 1 }
  0xa6   : > { %4771 = vmatmul.mubr.msk.bf16.gmra.mrb[12].mxu0 %vm545_vm3, %v5693_v49  ;;  %v257_v49 = vld [vmem:[%s7248_s2 + $0x8] sm:$0xff] }
  0xa7   : > { %4774 = vmatprep.mubr.msk.bf16.mxu0 %vm545_vm3, %v5721_v15  ;;  %3175 = vperm.xlu0 %5182, %v257_v49   ;;  %v1032_v15 = vrot.slane %v5376_v50, 1  ;;  %v261_v50 = vld [vmem:[%s7248_s2 + $0x28] sm:$0xff]  ;;  %v6005_v27 = vsel %vm1018_vm6, %v1042_v20, %v1044_v59  ;;  %v1048_v49 = vrot.slane %v5550_v8, 1 }
  0xa9   : > { %v5915_v40 = vsel %vm1018_vm6, %v1030_v4, %v1032_v15  ;;  %v5937_v63 = vsel %vm1018_vm6, %v1032_v15, %v1034_v10  ;;  %v275_v4 = vld [vmem:[%s7248_s2 + $0x98] sm:$0xff]  ;;  %v276_v15 = vld [vmem:[%s7248_s2 + $0xa0] sm:$0xff] }
  0xab   : > { %3190 = vperm.xlu0 %5182, %v260_v22   ;;  %v278_v22 = vld [vmem:[%s7248_s2 + $0xb0] sm:$0xff] }
  0xac   : > { %4607 = vmatmul.mubr.msk.bf16.vlgmr.msra.gmra.mrb[0].mxu1 %vm545_vm3, %v5858_v7 }
  0xad   : > { %4610 = vmatprep.mubr.msk.bf16.mxu1 %vm545_vm3, %v5861_v2  ;;  %4643 = vmatpush3.bf16.msra.mxu1 %v1343_v30  ;;  %v272_v30 = vld [vmem:[%s7248_s2 + $0x80] sm:$0xff] }
  0xae   : > { %5165 = vmatprep.subr.msk.bf16.mxu1 %vm600_vm0, %v5275_v0  ;;  %4775 = vmatmul.mubr.msk.bf16.gmra.mrb[16].mxu0 %vm545_vm3, %v5726_v36  ;;  %v5887_v0 = vsel %vm1018_vm6, %v1026_v9, %v1028_v17  ;;  %v259_v36 = vld [vmem:[%s7248_s2 + $0x18] sm:$0xff]  ;;  %v273_v17 = vld [vmem:[%s7248_s2 + $0x88] sm:$0xff] }
  0xaf   : > { %4778 = vmatprep.mubr.msk.bf16.mxu0 %vm545_vm3, %v5749_v35  ;;  %3185 = vperm.xlu1 %5183, %v259_v36   ;;  %v265_v35 = vld [vmem:[%s7248_s2 + $0x48] sm:$0xff]  ;;  %v6032_v36 = vsel %vm1018_vm6, %v1046_v18, %v1048_v49 }
  0xb0   : > { %3200 = vperm.xlu0 %5182, %v262_v44   ;;  %v279_v44 = vld [vmem:[%s7248_s2 + $0xb8] sm:$0xff] }
  0xb3   : > { %3195 = vperm.xlu1 %5183, %v261_v50   ;;  %v6046_v50 = vrot.slane %v5485_v13, 1 }
  0xb4   : > { %4611 = vmatmul.mubr.msk.bf16.gmra.mrb[4].mxu1 %vm545_vm3, %v5884_v31  ;;  %3210 = vperm.xlu0 %5182, %v264_v19  }
  0xb5   : > { %4614 = vmatprep.mubr.msk.bf16.mxu1 %vm545_vm3, %v5887_v0 }
  0xb6   : > { %4779 = vmatmul.mubr.msk.bf16.gmra.mrb[20].mxu0 %vm545_vm3, %v5756_v53  ;;  %v5943_v53 = vsel %vm1018_vm6, %v1034_v10, %v1036_v45  ;;  %v280_v10 = vld [vmem:[%s7248_s2 + $0xc0] sm:$0xff] }
  0xb7   : > { %4782 = vmatprep.mubr.msk.bf16.mxu0 %vm545_vm3, %v5771_v32  ;;  %3205 = vperm.xlu1 %5183, %v263_v52   ;;  %v1038_v32 = vrot.slane %v5438_v28, 1  ;;  %v282_v52 = vld [vmem:[%s7248_s2 + $0xd0] sm:$0xff] }
  0xb8   : > { %3220 = vperm.xlu0 %5182, %v266_v43  }
  0xb9   : > { %v5969_v51 = vsel %vm1018_vm6, %v1036_v45, %v1038_v32 }
  0xbb   : > { %3215 = vperm.xlu1 %5183, %v265_v35   ;;  %v7307_v35 = vld [vmem:[#allocation4_spill] sm:$0xff] }
  0xbc   : > { %4615 = vmatmul.mubr.msk.bf16.gmra.mrb[8].mxu1 %vm545_vm3, %v5909_v41  ;;  %v2496_v43 = vrot.slane %v7307_v35, 2 }
  0xbd   : > { %4618 = vmatprep.mubr.msk.bf16.mxu1 %vm545_vm3, %v5915_v40 }
  0xbe   : > { %4783 = vmatmul.mubr.msk.bf16.gmra.mrb[24].mxu0 %vm545_vm3, %v5776_v11  ;;  %v1040_v11 = vrot.slane %v5465_v56, 1 }
  0xbf   : > { %4786 = vmatprep.mubr.msk.bf16.mxu0 %vm545_vm3, %v5786_v33  ;;  %v268_v33 = vld [vmem:[%s7248_s2 + $0x60] sm:$0xff]  ;;  %3225 = vperm.xlu1 %5183, %v267_v61   ;;  %v283_v61 = vld [vmem:[%s7248_s2 + $0xd8] sm:$0xff] }
  0xc0   : > { %3230 = vperm.xlu0 %5182, %v268_v33   ;;  %v5975_v62 = vsel %vm1018_vm6, %v1038_v32, %v1040_v11  ;;  %v5999_v9 = vsel %vm1018_vm6, %v1040_v11, %v1042_v20  ;;  %v7308_v32 = vld [vmem:[#allocation3_spill] sm:$0xff]  ;;  %v284_v33 = vld [vmem:[%s7248_s2 + $0xe0] sm:$0xff]  ;;  %v7310_v20 = vld [vmem:[#allocation8_spill] sm:$0xff] }
  0xc1   : > { %v2497_v11 = vrot.slane %v7308_v32, 3  ;;  %v7318_v32 = vld [vmem:[#allocation18_spill] sm:$0xff] }
  0xc4   : > { %4619 = vmatmul.mubr.msk.bf16.gmra.mrb[12].mxu1 %vm545_vm3, %v5937_v63  ;;  %3240 = vperm.xlu0 %5182, %v270_v46   ;;  %v285_v46 = vld [vmem:[%s7248_s2 + $0xe8] sm:$0xff] }
  0xc5   : > { %4622 = vmatprep.mubr.msk.bf16.mxu1 %vm545_vm3, %v5943_v53 }
  0xc6   : > { %4787 = vmatmul.mubr.msk.bf16.gmra.mrb[28].mxu0 %vm545_vm3, %v5796_v34  ;;  %v269_v34 = vld [vmem:[%s7248_s2 + $0x68] sm:$0xff] }
  0xc7   : > { %4790 = vmatprep.mubr.msk.bf16.mxu0 %vm545_vm3, %v5634_v1  ;;  %v7305_v1 = vrot.slane %v5608_v12, 2  ;;  %3235 = vperm.xlu1 %5183, %v269_v34   ;;  %v2498_v34 = vor.u32 %v2497_v11, %v2496_v43  ;;  %v2516_v11 = vrot.slane %v7318_v32, 2 }
  0xc8   : > { %3250 = vperm.xlu0 %5182, %v272_v30  }
  0xc9   : > { %v2235_v58 = vsel %vm1918_vm4, %v7305_v1, %v2234_v16  ;;  %v7309_v1 = vld [vmem:[#allocation9_spill] sm:$0xff] }
  0xcb   : > { %3245 = vperm.xlu1 %5183, %v271_v6   ;;  %v7311_v6 = vld [vmem:[#allocation12_spill] sm:$0xff] }
  0xcc   : > { %4623 = vmatmul.mubr.msk.bf16.gmra.mrb[16].mxu1 %vm545_vm3, %v5969_v51  ;;  %3260 = vperm.xlu0 %5182, %v274_v29   ;;  %v2504_v30 = vrot.slane %v7311_v6, 2 }
  0xcd   : > { %4626 = vmatprep.mubr.msk.bf16.mxu1 %vm545_vm3, %v5975_v62 }
  0xce   : > { %4791 = vmatmul.mubr.msk.bf16.gmra.mrb[32].mxu0 %vm545_vm3, %v2235_v58  ;;  %v2500_v58 = vrot.slane %v7309_v1, 2 }
  0xcf   : > { %4796 = vmatprep.mubr.msk.bf16.mxu0 %vm545_vm3, %v5663_v26  ;;  %3255 = vperm.xlu1 %5183, %v273_v17   ;;  %v2911_v26 = vsel %vm600_vm0, %v5821_v48, 0  ;;  %v6029_v48 = vsel %vm1018_vm6, %v1044_v59, %v1046_v18  ;;  %v2499_v59 = vsel %vm2460_vm5, %v5751_v37, %v2498_v34  ;;  %v7312_v17 = vld [vmem:[#allocation10_spill] sm:$0xff] }
  0xd0   : > { %3270 = vperm.xlu0 %5182, %v276_v15   ;;  %v2505_v29 = vrot.slane %v7312_v17, 3  ;;  %v7313_v15 = vld [vmem:[#allocation13_spill] sm:$0xff] }
  0xd2   : > { %v2506_v18 = vor.u32 %v2505_v29, %v2504_v30  ;;  %v2529_v29 = vshrl.u32 %v5608_v12, 16 }
  0xd3   : > { %3265 = vperm.xlu1 %5183, %v275_v4   ;;  %v290_v4 = vld [vmem:[%s7248_s2 + $0x110] sm:$0xff] }
  0xd4   : > { %4627 = vmatmul.mubr.msk.bf16.gmra.mrb[20].mxu1 %vm545_vm3, %v5999_v9  ;;  %3280 = vperm.xlu0 %5182, %v278_v22   ;;  %v7314_v22 = vld [vmem:[#allocation11_spill] sm:$0xff] }
  0xd5   : > { %4630 = vmatprep.mubr.msk.bf16.mxu1 %vm545_vm3, %v6005_v27 }
  0xd6   : > { %4797 = vmatmul.mubr.msk.bf16.vlgmr.msra.gmra.mrb[0].mxu0 %vm545_vm3, %v5670_v5  ;;  %v277_v5 = vld [vmem:[%s7248_s2 + $0xa8] sm:$0xff] }
  0xd7   : > { %4833 = vmatpush3.bf16.msra.mxu0 %v2911_v26  ;;  %4800 = vmatprep.mubr.msk.bf16.mxu0 %vm545_vm3, %v5688_v24  ;;  %v1050_v24 = vrot.slane %v5577_v47, 1  ;;  %v287_v26 = vld [vmem:[%s7248_s2 + $0xf8] sm:$0xff] }
  0xd8   : > { %3275 = vperm.xlu1 %5183, %v277_v5   ;;  %3290 = vperm.xlu0 %5182, %v280_v10   ;;  %v2508_v5 = vrot.slane %v7313_v15, 2  ;;  %v7315_v10 = vld [vmem:[#allocation2_spill] sm:$0xff] }
  0xd9   : > { %v6059_v45 = vsel %vm1018_vm6, %v1048_v49, %v1050_v24  ;;  %v6063_v13 = vsel %vm1018_vm6, %v1050_v24, %v6046_v50  ;;  %v289_v49 = vld [vmem:[%s7248_s2 + $0x108] sm:$0xff]  ;;  %v2509_v24 = vrot.slane %v7314_v22, 3 }
  0xdb   : > { %v2510_v35 = vor.u32 %v2509_v24, %v2508_v5  ;;  %v2541_v5 = vshll.u32 %v5951_v55, 16 }
  0xdc   : > { %4631 = vmatmul.mubr.msk.bf16.gmra.mrb[24].mxu1 %vm545_vm3, %v6029_v48  ;;  %3285 = vperm.xlu1 %5183, %v279_v44  }
  0xdd   : > { %4634 = vmatprep.mubr.msk.bf16.mxu1 %vm545_vm3, %v6032_v36  ;;  %3300 = vperm.xlu0 %5182, %v282_v52   ;;  %v2511_v43 = vsel %vm2460_vm5, %v2506_v18, %v2510_v35 }
  0xde   : > { %4801 = vmatmul.mubr.msk.bf16.gmra.mrb[4].mxu0 %vm545_vm3, %v5698_v54  ;;  %v281_v54 = vld [vmem:[%s7248_s2 + $0xc8] sm:$0xff] }
  0xdf   : > { %4804 = vmatprep.mubr.msk.bf16.mxu0 %vm545_vm3, %v5716_v3  ;;  %v7306_v3 = vld [vmem:[#allocation5_spill] sm:$0xff] }
  0xe0   : > { %v1054_v19 = vrot.slane %v7306_v3, 1  ;;  %3295 = vperm.xlu1 %5183, %v281_v54   ;;  %v7316_v54 = vld [vmem:[#allocation17_spill] sm:$0xff]  ;;  %v7317_v3 = vld [vmem:[#allocation14_spill] sm:$0xff] }
  0xe1   : > { %3310 = vperm.xlu0 %5182, %v284_v33   ;;  %v2512_v52 = vrot.slane %v7316_v54, 2 }
  0xe2   : > { %v1055_v16 = vsel %vm1018_vm6, %v6046_v50, %v1054_v19  ;;  %v2513_v19 = vrot.slane %v7317_v3, 3 }
  0xe4   : > { %4635 = vmatmul.mubr.msk.bf16.gmra.mrb[28].mxu1 %vm545_vm3, %v6059_v45  ;;  %3305 = vperm.xlu1 %5183, %v283_v61   ;;  %v7319_v61 = vld [vmem:[#allocation16_spill] sm:$0xff] }
  0xe5   : > { %4638 = vmatprep.mubr.msk.bf16.mxu1 %vm545_vm3, %v6063_v13  ;;  %v2517_v33 = vrot.slane %v7319_v61, 3 }
  0xe6   : > { %4805 = vmatmul.mubr.msk.bf16.gmra.mrb[8].mxu0 %vm545_vm3, %v5731_v14  ;;  %v286_v14 = vld [vmem:[%s7248_s2 + $0xf0] sm:$0xff] }
  0xe7   : > { %4808 = vmatprep.mubr.msk.bf16.mxu0 %vm545_vm3, %v5744_v60  ;;  %v2501_v60 = vrot.slane %v7310_v20, 3  ;;  %3320 = vperm.xlu0 %5182, %v286_v14   ;;  %v2521_v14 = vrot.slane %v5505_v39, 3 }
  0xe8   : > { %3315 = vperm.xlu1 %5183, %v285_v46  }
  0xe9   : > { %v2502_v37 = vor.u32 %v2501_v60, %v2500_v58  ;;  %v7321_v58 = vld [vmem:[#allocation15_spill] sm:$0xff] }
  0xea   : > { %v1629_v60 = vshrl.u32 %v7321_v58, 16 }
  0xeb   : > { %v2507_v44 = vsel %vm2460_vm5, %v2502_v37, %v2506_v18 }
  0xec   : > { %4639 = vmatmul.mubr.msk.bf16.gmra.mrb[32].mxu1 %vm545_vm3, %v1055_v16  ;;  %3325 = vperm.xlu1 %5183, %v287_v26  }
  0xed   : > { %4644 = vmatprep.mubr.msk.bf16.mxu1 %vm545_vm3, %v5858_v7  ;;  %v288_v7 = vld [vmem:[%s7248_s2 + $0x100] sm:$0xff] }
  0xee   : > { %4809 = vmatmul.mubr.msk.bf16.gmra.mrb[12].mxu0 %vm545_vm3, %v5760_v42  ;;  %3330 = vperm.xlu0 %5182, %v288_v7   ;;  %v2503_v42 = vsel %vm2460_vm5, %v2498_v34, %v2502_v37  ;;  %v7320_v34 = vld [vmem:[#allocation6_spill] sm:$0xff]  ;;  %v2524_v7 = vrot.slane %v1629_v60, 2 }
  0xef   : > { %4812 = vmatprep.mubr.msk.bf16.mxu0 %vm545_vm3, %v2499_v59  ;;  %v2520_v46 = vrot.slane %v7320_v34, 2  ;;  %v1632_v59 = vshll.u32 %v7321_v58, 16 }
  0xf0   : > { %3335 = vperm.xlu1 %5183, %v289_v49   ;;  %v2531_v49 = vrot.slane %v2529_v29, 2 }
  0xf1   : > { %v2522_v30 = vor.u32 %v2521_v14, %v2520_v46  ;;  %v2525_v37 = vrot.slane %v1632_v59, 3  ;;  %v5215_v14 = vld [vmem:[%s5303_s10 + $0x30] sm:$0xff]  }
  0xf2   : > { %3340 = vperm.xlu0 %5182, %v290_v4  }
  0xf4   : > { %4645 = vmatmul.mubr.msk.bf16.vlgmr.msra.gmra.mrb[0].mxu1 %vm545_vm3, %v5861_v2  ;;  %v291_v2 = vld [vmem:[%s7248_s2 + $0x118] sm:$0xff] }
  0xf5   : > { %4648 = vmatprep.mubr.msk.bf16.mxu1 %vm545_vm3, %v5884_v31  ;;  %4871 = vmatpush3.bf16.msra.mxu1 %v7315_v10  ;;  %v2514_v31 = vor.u32 %v2513_v19, %v2512_v52  ;;  %v2543_v10 = vrot.slane %v2541_v5, 3  ;;  %v7322_v5 = vld [vmem:[#allocation7_spill] sm:$0xff] }
  0xf6   : > { %4813 = vmatmul.mubr.msk.bf16.gmra.mrb[16].mxu0 %vm545_vm3, %v2503_v42  ;;  %3345 = vperm.xlu1 %5183, %v291_v2   ;;  %v2538_v42 = vshrl.u32 %v5951_v55, 16  ;;  %v5211_v2 = vld [vmem:[%s5303_s10 + $0x10] sm:$0xff]  }
  0xf7   : > { %4816 = vmatprep.mubr.msk.bf16.mxu0 %vm545_vm3, %v2507_v44  ;;  %v2515_v16 = vsel %vm2460_vm5, %v2510_v35, %v2514_v31  ;;  %v2819_v35 = vrot.slane %v5211_v2, 3 }
  0xf8   : > { %v2540_v44 = vrot.slane %v2538_v42, 2 }
  0xfa   : > { %v2544_v19 = vor.u32 %v2543_v10, %v2540_v44  ;;  %v1613_v44 = vrot.slane %v7314_v22, 2  ;;  %v1616_v22 = vrot.slane %v7316_v54, 1  ;;  %v2842_v54 = vrot.slane %v5539_v21, 3 }
  0xfc   : > { %4649 = vmatmul.mubr.msk.bf16.gmra.mrb[4].mxu1 %vm545_vm3, %v5887_v0  ;;  %v2518_v0 = vor.u32 %v2517_v33, %v2516_v11  ;;  %v5213_v11 = vld [vmem:[%s5303_s10 + $0x20] sm:$0xff]  }
  0xfd   : > { %4652 = vmatprep.mubr.msk.bf16.mxu1 %vm545_vm3, %v5909_v41  ;;  %v2532_v41 = vshll.u32 %v5608_v12, 16  ;;  %v2822_v33 = vrot.slane %v5213_v11, 3 }
  0xfe   : > { %4817 = vmatmul.mubr.msk.bf16.gmra.mrb[20].mxu0 %vm545_vm3, %v2511_v43  ;;  %v2519_v26 = vsel %vm2460_vm5, %v2514_v31, %v2518_v0  ;;  %v2523_v18 = vsel %vm2460_vm5, %v2518_v0, %v2522_v30  ;;  %v5212_v31 = vld [vmem:[%s5303_s10 + $0x18] sm:$0xff]   ;;  %v2826_v0 = vrot.slane %v5215_v14, 3 }
  0xff   : > { %4820 = vmatprep.mubr.msk.bf16.mxu0 %vm545_vm3, %v2515_v16  ;;  %v2534_v4 = vrot.slane %v2532_v41, 3  ;;  %v5214_v16 = vld [vmem:[%s5303_s10 + $0x28] sm:$0xff]   ;;  %v1332_v41 = vrot.slane %v7321_v58, 1 }
 0x100   : > { %v2824_v46 = vrot.slane %v5214_v16, 3  ;;  %v1634_v16 = vrot.slane %v1632_v59, 2 }
 0x101   : > { %v2535_v24 = vor.u32 %v2534_v4, %v2531_v49  ;;  %v1605_v49 = vrot.slane %v7310_v20, 2  ;;  %v1609_v20 = vrot.slane %v7312_v17, 2 }
 0x104   : > { %4653 = vmatmul.mubr.msk.bf16.gmra.mrb[8].mxu1 %vm545_vm3, %v5915_v40  ;;  %v2526_v40 = vor.u32 %v2525_v37, %v2524_v7  ;;  %v2832_v37 = vrot.slane %v5431_v23, 3  ;;  %v2834_v23 = vrot.slane %v5438_v28, 3 }
 0x105   : > { %4656 = vmatprep.mubr.msk.bf16.mxu1 %vm545_vm3, %v5937_v63 }
 0x106   : > { %4821 = vmatmul.mubr.msk.bf16.gmra.mrb[24].mxu0 %vm545_vm3, %v2519_v26  ;;  %v2527_v63 = vsel %vm2460_vm5, %v2522_v30, %v2526_v40  ;;  %v2536_v52 = vsel %vm2460_vm5, %v2526_v40, %v2535_v24  ;;  %v5216_v30 = vld [vmem:[%s5303_s10 + $0x38] sm:$0xff]   ;;  %v5217_v26 = vld [vmem:[%s5303_s10 + $0x40] sm:$0xff]   ;;  %v1334_v40 = vrot.slane %v5790_v57, 1  ;;  %v2835_v10 = vsel %vm2818_vm7, %v2832_v37, %v2834_v23 }
 0x107   : > { %4824 = vmatprep.mubr.msk.bf16.mxu0 %vm545_vm3, %v2523_v18  ;;  %v2828_v29 = vrot.slane %v5216_v30, 3  ;;  %v2830_v7 = vrot.slane %v5217_v26, 3  ;;  %v1604_v18 = vrot.slane %v7309_v1, 1  ;;  %v2836_v1 = vrot.slane %v5465_v56, 3 }
 0x108   : > { %v2852_v26 = vrot.slane %v5608_v12, 3 }
 0x109   : > { %v2833_v4 = vsel %vm2818_vm7, %v2830_v7, %v2832_v37  ;;  %v1606_v42 = vor.u32 %v1605_v49, %v1604_v18  ;;  %v2837_v28 = vsel %vm2818_vm7, %v2834_v23, %v2836_v1 }
 0x10c   : > { %4657 = vmatmul.mubr.msk.bf16.gmra.mrb[12].mxu1 %vm545_vm3, %v5943_v53  ;;  %v2820_v53 = vrot.slane %v5212_v31, 3  ;;  %v1621_v31 = vrot.slane %v7319_v61, 2  ;;  %v1624_v61 = vrot.slane %v7320_v34, 1 }
 0x10d   : > { %4660 = vmatprep.mubr.msk.bf16.mxu1 %vm545_vm3, %v5969_v51  ;;  %v2545_v51 = vsel %vm2460_vm5, %v2535_v24, %v2544_v19  ;;  %v1607_v24 = vsel %vm1560_vm2, %v7322_v5, %v1606_v42  ;;  %v1617_v19 = vrot.slane %v7317_v3, 2 }
 0x10e   : > { %4825 = vmatmul.mubr.msk.bf16.gmra.mrb[28].mxu0 %vm545_vm3, %v2527_v63  ;;  %v2821_v43 = vsel %vm2818_vm7, %v2819_v35, %v2820_v53  ;;  %v1612_v63 = vrot.slane %v7313_v15, 1  ;;  %v2840_v15 = vrot.slane %v5502_v38, 3  ;;  %v1620_v35 = vrot.slane %v7318_v32, 1 }
 0x10f   : > { %4828 = vmatprep.mubr.msk.bf16.mxu0 %vm545_vm3, %v2536_v52  ;;  %v2844_v32 = vrot.slane %v5550_v8, 3 }
 0x110   : > { %v1614_v52 = vor.u32 %v1613_v44, %v1612_v63  ;;  %v1622_v38 = vor.u32 %v1621_v31, %v1620_v35  ;;  %v2843_v21 = vsel %vm2818_vm7, %v2840_v15, %v2842_v54  ;;  %v6324_v31 = vld [vmem:[%s7249_s3] ss:$0 sm:$0xff] }
 0x111   : > { %v2845_v8 = vsel %vm2818_vm7, %v2842_v54, %v2844_v32 }
 0x114   : > { %4661 = vmatmul.mubr.msk.bf16.gmra.mrb[16].mxu1 %vm545_vm3, %v5975_v62  ;;  %v2823_v62 = vsel %vm2818_vm7, %v2820_v53, %v2822_v33 }
 0x115   : > { %4664 = vmatprep.mubr.msk.bf16.mxu1 %vm545_vm3, %v5999_v9  ;;  %v2825_v9 = vsel %vm2818_vm7, %v2822_v33, %v2824_v46  ;;  %v1631_v33 = vrot.slane %v1629_v60, 1  ;;  %v2846_v60 = vrot.slane %v5577_v47, 3  ;;  %v2850_v47 = vrot.slane %v7321_v58, 3 }
 0x116   : > { %4829 = vmatmul.mubr.msk.bf16.gmra.mrb[32].mxu0 %vm545_vm3, %v2545_v51  ;;  %v1618_v51 = vor.u32 %v1617_v19, %v1616_v22 }
 0x117   : > { %4834 = vmatprep.mubr.msk.bf16.mxu0 %vm545_vm3, %v2821_v43  ;;  %v1625_v43 = vrot.slane %v5505_v39, 2  ;;  %v1638_v39 = vshrl.u32 %v5790_v57, 16  ;;  %v2853_v37 = vsel %vm2818_vm7, %v2850_v47, %v2852_v26 }
 0x118   : > { %v1619_v3 = vsel %vm1560_vm2, %v1614_v52, %v1618_v51  ;;  %v1623_v11 = vsel %vm1560_vm2, %v1618_v51, %v1622_v38 }
 0x119   : > { %v1626_v34 = vor.u32 %v1625_v43, %v1624_v61 }
 0x11b   : > { %v1627_v59 = vsel %vm1560_vm2, %v1622_v38, %v1626_v34 }
 0x11c   : > { %4665 = vmatmul.mubr.msk.bf16.gmra.mrb[20].mxu1 %vm545_vm3, %v6005_v27  ;;  %v2827_v27 = vsel %vm2818_vm7, %v2824_v46, %v2826_v0  ;;  %v1641_v46 = vshll.u32 %v5790_v57, 16 }
 0x11d   : > { %4668 = vmatprep.mubr.msk.bf16.mxu1 %vm545_vm3, %v6029_v48  ;;  %v2829_v48 = vsel %vm2818_vm7, %v2826_v0, %v2828_v29  ;;  %v1640_v0 = vrot.slane %v1638_v39, 1 }
 0x11e   : > { %4835 = vmatmul.mubr.msk.bf16.vlgmr.msra.gmra.mrb[0].mxu0 %vm545_vm3, %v2823_v62  ;;  %v1635_v62 = vor.u32 %v1634_v16, %v1631_v33  ;;  %v1643_v30 = vrot.slane %v1641_v46, 2 }
 0x11f   : > { %4838 = vmatprep.mubr.msk.bf16.mxu0 %vm545_vm3, %v2825_v9  ;;  %v5218_v9 = vld [vmem:[%s5303_s10 + $0x88] sm:$0xff]   ;;  %v3181_v5 = vpop.permute.xlu1 %3180 }
 0x120   : > { %v2848_v14 = vrot.slane %v5218_v9, 3 }
 0x122   : > { %v2849_v57 = vsel %vm2818_vm7, %v2846_v60, %v2848_v14 }
 0x124   : > { %4669 = vmatmul.mubr.msk.bf16.gmra.mrb[24].mxu1 %vm545_vm3, %v6032_v36  ;;  %v1333_v36 = vsel %vm1018_vm6, %v6046_v50, %v1332_v41  ;;  %v1335_v50 = vsel %vm1018_vm6, %v1332_v41, %v1334_v40 }
 0x125   : > { %4672 = vmatprep.mubr.msk.bf16.mxu1 %vm545_vm3, %v6059_v45  ;;  %v2831_v45 = vsel %vm2818_vm7, %v2828_v29, %v2830_v7  ;;  %v1636_v29 = vsel %vm1560_vm2, %v1626_v34, %v1635_v62  ;;  %v2851_v7 = vsel %vm2818_vm7, %v2848_v14, %v2850_v47 }
 0x126   : > { %4839 = vmatmul.mubr.msk.bf16.gmra.mrb[4].mxu0 %vm545_vm3, %v2827_v27  ;;  %v2847_v27 = vsel %vm2818_vm7, %v2844_v32, %v2846_v60 }
 0x127   : > { %4842 = vmatprep.mubr.msk.bf16.mxu0 %vm545_vm3, %v2829_v48  ;;  %v1644_v48 = vor.u32 %v1643_v30, %v1640_v0 }
 0x129   : > { %v1645_v41 = vsel %vm1560_vm2, %v1635_v62, %v1644_v48 }
 0x12c   : > { %4673 = vmatmul.mubr.msk.bf16.gmra.mrb[28].mxu1 %vm545_vm3, %v6063_v13  ;;  %v1608_v13 = vrot.slane %v7311_v6, 1  ;;  %v2838_v6 = vrot.slane %v5493_v25, 3 }
 0x12d   : > { %4676 = vmatprep.mubr.msk.bf16.mxu1 %vm545_vm3, %v1333_v36  ;;  %v2854_v36 = vrot.slane %v5951_v55, 3 }
 0x12e   : > { %4843 = vmatmul.mubr.msk.bf16.gmra.mrb[8].mxu0 %vm545_vm3, %v2831_v45  ;;  %v1610_v56 = vor.u32 %v1609_v20, %v1608_v13  ;;  %v2839_v53 = vsel %vm2818_vm7, %v2836_v1, %v2838_v6  ;;  %v2841_v25 = vsel %vm2818_vm7, %v2838_v6, %v2840_v15  ;;  %v3171_v20 = vpop.permute.xlu0 %3170 }
 0x12f   : > { %4846 = vmatprep.mubr.msk.bf16.mxu0 %vm545_vm3, %v2833_v4  ;;  %v2855_v18 = vsel %vm2818_vm7, %v2852_v26, %v2854_v36 }
 0x130   : > { %v1611_v17 = vsel %vm1560_vm2, %v1606_v42, %v1610_v56  ;;  %v1615_v2 = vsel %vm1560_vm2, %v1610_v56, %v1614_v52  ;;  %v3186_v56 = vpop.permute.xlu1 %3185 }
 0x132   : > { %v3176_v44 = vpop.permute.xlu0 %3175 }
 0x134   : > { %4677 = vmatmul.mubr.msk.bf16.gmra.mrb[32].mxu1 %vm545_vm3, %v1335_v50  ;;  %v6311_v15 = vpop.permute.xlu1 %3195 }
 0x135   : > { %4702 = vmatprep.mubr.msk.bf16.mxu1 %vm545_vm3, %v1607_v24 }
 0x136   : > { %4847 = vmatmul.mubr.msk.bf16.gmra.mrb[12].mxu0 %vm545_vm3, %v2835_v10  ;;  %v6305_v52 = vpop.permute.xlu0 %3190 }
 0x137   : > { %4850 = vmatprep.mubr.msk.bf16.mxu0 %vm545_vm3, %v2837_v28 }
 0x138   : > { %v6319_v35 = vpop.permute.xlu1 %3205 }
 0x13c   : > { %4703 = vmatmul.mubr.msk.bf16.vlgmr.msra.gmra.mrb[20].mxu1 %vm545_vm3, %v1611_v17  ;;  %v6328_v32 = vpop.permute.xlu1 %3215 }
 0x13d   : > { %4706 = vmatprep.mubr.msk.bf16.mxu1 %vm545_vm3, %v1615_v2  ;;  %v6317_v2 = vpop.permute.xlu0 %3200 }
 0x13e   : > { %4851 = vmatmul.mubr.msk.bf16.gmra.mrb[16].mxu0 %vm545_vm3, %v2839_v53 }
 0x13f   : > { %4854 = vmatprep.mubr.msk.bf16.mxu0 %vm545_vm3, %v2841_v25 }
 0x141   : > { %v6326_v25 = vpop.permute.xlu0 %3210 }
 0x144   : > { %4707 = vmatmul.mubr.msk.bf16.gmra.mrb[24].mxu1 %vm545_vm3, %v1619_v3 }
 0x145   : > { %4710 = vmatprep.mubr.msk.bf16.mxu1 %vm545_vm3, %v1623_v11  ;;  %v6348_v60 = vpop.permute.xlu0 %3220 }
 0x146   : > { %4855 = vmatmul.mubr.msk.bf16.gmra.mrb[20].mxu0 %vm545_vm3, %v2843_v21 }
 0x147   : > { %4858 = vmatprep.mubr.msk.bf16.mxu0 %vm545_vm3, %v2845_v8 }
 0x14c   : > { %4711 = vmatmul.mubr.msk.bf16.gmra.mrb[28].mxu1 %vm545_vm3, %v1627_v59 }
 0x14d   : > { %4714 = vmatprep.mubr.msk.bf16.mxu1 %vm545_vm3, %v1636_v29  ;;  %v6355_v29 = vpop.permute.xlu1 %3225 }
 0x14e   : > { %4859 = vmatmul.mubr.msk.bf16.gmra.mrb[24].mxu0 %vm545_vm3, %v2847_v27 }
 0x14f   : > { %4862 = vmatprep.mubr.msk.bf16.mxu0 %vm545_vm3, %v2849_v57 }
 0x154   : > { %4715 = vmatmul.mubr.msk.bf16.gmra.mrb[32].mxu1 %vm545_vm3, %v1645_v41 }
 0x156   : > { %4863 = vmatmul.mubr.msk.bf16.gmra.mrb[28].mxu0 %vm545_vm3, %v2851_v7 }
 0x157   : > { %4866 = vmatprep.mubr.msk.bf16.mxu0 %vm545_vm3, %v2853_v37 }
 0x15e   : > { %4867 = vmatmul.mubr.msk.bf16.gmra.mrb[32].mxu0 %vm545_vm3, %v2855_v18 }
 0x1c7   : > { %v4646_v58 = vpop.f32.mrb[0].mxu1 }
 0x1c8   : > { %v1379_v49 = vpop.f32.mrb[1].mxu1 }
 0x1c9   : > { %v4647_v45 = vpop.f32.mrb[2].mxu1 }
 0x1ca   : > { %v1382_v12 = vpop.f32.mrb[3].mxu1 }
 0x1cf   : > { %v4650_v4 = vpop.f32.mrb[4].mxu1 }
 0x1d0   : > { %v1395_v40 = vpop.f32.mrb[5].mxu1 }
 0x1d1   : > { %v4651_v42 = vpop.f32.mrb[6].mxu1 }
 0x1d2   : > { %v6287_v23 = vpop.f32.mrb[7].mxu1 }
 0x1d7   : > { %v6289_v50 = vpop.f32.mrb[8].mxu1 }
 0x1d8   : > { %v6291_v1 = vpop.f32.mrb[9].mxu1 }
 0x1d9   : > { %v6293_v13 = vpop.f32.mrb[10].mxu1 }
 0x1da   : > { %v6295_v55 = vpop.f32.mrb[11].mxu1 }
 0x1df   : > { %v6297_v24 = vpop.f32.mrb[12].mxu1 }
 0x1e0   : > { %v6299_v63 = vpop.f32.mrb[13].mxu1 }
 0x1e1   : > { %v6301_v10 = vpop.f32.mrb[14].mxu1 }
 0x1e2   : > { %v6303_v28 = vpop.f32.mrb[15].mxu1 }
 0x1e7   : > { %v6307_v6 = vpop.f32.mrb[16].mxu1 }
 0x1e8   : > { %v6309_v17 = vpop.f32.mrb[17].mxu1 }
 0x1e9   : > { %v6313_v22 = vpop.f32.mrb[18].mxu1 }
 0x1ea   : > { %v6315_v19 = vpop.f32.mrb[19].mxu1 }
 0x1f1   : > { %v4836_v53 = vpop.f32.mrb[0].mxu0 }
 0x1f2   : > { %v4872_v51 = vadd.f32 %v4836_v53, %v4646_v58  ;;  %v2947_v38 = vpop.f32.mrb[1].mxu0 }
 0x1f3   : > { %v4873_v54 = vadd.f32 %v2947_v38, %v1379_v49  ;;  %v4837_v3 = vpop.f32.mrb[2].mxu0  ;;  %v6370_v38 = vpop.permute.xlu0 %3230 }
 0x1f4   : > { %v6331_v61 = vadd.f32 %v4872_v51, %v6324_v31  ;;  %v4874_v43 = vadd.f32 %v4837_v3, %v4647_v45  ;;  %v2950_v11 = vpop.f32.mrb[3].mxu0 }
 0x1f5   : > { %v6334_v33 = vadd.f32 %v4873_v54, %v6324_v31  ;;  %v4875_v16 = vadd.f32 %v2950_v11, %v1382_v12 }
 0x1f6   : > { %v3350_v21 = vmul.f32 %v3181_v5, %v6331_v61  ;;  %v3464_v8 = vmul.f32 %v6331_v61, %v6331_v61  ;;  %v6340_v34 = vadd.f32 %v4874_v43, %v6324_v31 }
 0x1f7   : > { %v3348_v39 = vmul.f32 %v3171_v20, %v6334_v33  ;;  %v3462_v46 = vmul.f32 %v6334_v33, %v6334_v33  ;;  %v6346_v62 = vadd.f32 %v4875_v16, %v6324_v31 }
 0x1f8   : > { %v3465_v59 = vmul.f32 %v6340_v34, %v6340_v34  ;;  %v3388_v27 = vsel %vm3384_vm8, %v3350_v21, 0.0  ;;  %v3500_v57 = vmul.f32 %v3464_v8, %v3181_v5  ;;  %v3351_v48 = vmul.f32 %v3186_v56, %v6340_v34 }
 0x1f9   : > { %v3498_v9 = vmul.f32 %v3462_v46, %v3171_v20  ;;  %v3349_v14 = vmul.f32 %v3176_v44, %v6346_v62  ;;  %v3463_v0 = vmul.f32 %v6346_v62, %v6346_v62  ;;  %v4840_v30 = vpop.f32.mrb[4].mxu0  ;;  %v3385_v26 = vsel %vm3384_vm8, %v3348_v39, 0.0 }
 0x1fa   : > { %v4876_v47 = vadd.f32 %v4840_v30, %v4650_v4  ;;  %v2963_v41 = vpop.f32.mrb[5].mxu0  ;;  %v3501_v49 = vmul.f32 %v3465_v59, %v3186_v56 }
 0x1fb   : > { %v3386_v7 = vsel %vm3384_vm8, %v3349_v14, 0.0  ;;  %v3499_v37 = vmul.f32 %v3463_v0, %v3176_v44  ;;  %v4877_v36 = vadd.f32 %v2963_v41, %v1395_v40  ;;  %v4841_v18 = vpop.f32.mrb[6].mxu0  ;;  %v3534_v58 = vsel %vm3384_vm8, %v3498_v9, 0.0 }
 0x1fc   : > { %v3387_v45 = vadd.f32 %v3386_v7, %v3385_v26  ;;  %v4878_v12 = vadd.f32 %v4841_v18, %v4651_v42  ;;  %v2966_v20 = vpop.f32.mrb[7].mxu0  ;;  %v6364_v5 = vadd.f32 %v4876_v47, %v6324_v31  ;;  %v3537_v40 = vsel %vm3384_vm8, %v3500_v57, 0.0  ;;  %v6402_v7 = vpop.permute.xlu0 %3240 }
 0x1fd   : > { %v3535_v53 = vsel %vm3384_vm8, %v3499_v37, 0.0  ;;  %v6367_v4 = vadd.f32 %v4877_v36, %v6324_v31  ;;  %v4879_v51 = vadd.f32 %v2966_v20, %v6287_v23  ;;  %v3390_v44 = vsel %vm3384_vm8, %v3351_v48, 0.0  ;;  %v6384_v23 = vpop.permute.xlu1 %3235 }
 0x1fe   : > { %v3389_v56 = vadd.f32 %v3388_v27, %v3387_v45  ;;  %v3536_v54 = vadd.f32 %v3535_v53, %v3534_v58  ;;  %v6379_v43 = vadd.f32 %v4878_v12, %v6324_v31  ;;  %v3539_v8 = vsel %vm3384_vm8, %v3501_v49, 0.0 }
 0x1ff   : > { %v3352_v42 = vmul.f32 %v6305_v52, %v6367_v4  ;;  %v3466_v3 = vmul.f32 %v6367_v4, %v6367_v4  ;;  %v6382_v11 = vadd.f32 %v4879_v51, %v6324_v31  ;;  %v3468_v39 = vmul.f32 %v6364_v5, %v6364_v5 }
 0x200   : > { %v3538_v16 = vadd.f32 %v3537_v40, %v3536_v54  ;;  %v3391_v21 = vadd.f32 %v3390_v44, %v3389_v56  ;;  %v3354_v14 = vmul.f32 %v6317_v2, %v6364_v5  ;;  %v3355_v47 = vmul.f32 %v6319_v35, %v6379_v43 }
 0x201   : > { %v3392_v46 = vsel %vm3384_vm8, %v3352_v42, 0.0  ;;  %v3502_v59 = vmul.f32 %v3466_v3, %v6305_v52  ;;  %v4844_v9 = vpop.f32.mrb[8].mxu0  ;;  %v3353_v27 = vmul.f32 %v6311_v15, %v6382_v11  ;;  %v3469_v41 = vmul.f32 %v6379_v43, %v6379_v43  ;;  %v6410_v51 = vpop.permute.xlu1 %3245 }
 0x202   : > { %v3393_v0 = vadd.f32 %v3392_v46, %v3391_v21  ;;  %v3540_v30 = vadd.f32 %v3539_v8, %v3538_v16  ;;  %v2979_v57 = vpop.f32.mrb[9].mxu0  ;;  %v3467_v52 = vmul.f32 %v6382_v11, %v6382_v11  ;;  %v4880_v18 = vadd.f32 %v4844_v9, %v6289_v50 }
 0x203   : > { %v3541_v48 = vsel %vm3384_vm8, %v3502_v59, 0.0  ;;  %v4845_v26 = vpop.f32.mrb[10].mxu0  ;;  %v3394_v36 = vsel %vm3384_vm8, %v3353_v27, 0.0  ;;  %v4881_v58 = vadd.f32 %v2979_v57, %v6291_v1  ;;  %v3504_v45 = vmul.f32 %v3468_v39, %v6317_v2  ;;  %v6433_v39 = vpop.permute.xlu0 %3250 }
 0x204   : > { %v3542_v37 = vadd.f32 %v3541_v48, %v3540_v30  ;;  %v2982_v49 = vpop.f32.mrb[11].mxu0  ;;  %v3395_v12 = vadd.f32 %v3394_v36, %v3393_v0  ;;  %v3503_v20 = vmul.f32 %v3467_v52, %v6311_v15  ;;  %v4882_v53 = vadd.f32 %v4845_v26, %v6293_v13 }
 0x205   : > { %v3396_v40 = vsel %vm3384_vm8, %v3354_v14, 0.0  ;;  %v6414_v44 = vadd.f32 %v4880_v18, %v6324_v31  ;;  %v6417_v56 = vadd.f32 %v4881_v58, %v6324_v31  ;;  %v4883_v50 = vadd.f32 %v2982_v49, %v6295_v55 }
 0x206   : > { %v3505_v1 = vmul.f32 %v3469_v41, %v6319_v35  ;;  %v3397_v2 = vadd.f32 %v3396_v40, %v3395_v12  ;;  %v3543_v54 = vsel %vm3384_vm8, %v3503_v20, 0.0  ;;  %v6423_v15 = vadd.f32 %v4882_v53, %v6324_v31 }
 0x207   : > { %v3398_v13 = vsel %vm3384_vm8, %v3355_v47, 0.0  ;;  %v3544_v42 = vadd.f32 %v3543_v54, %v3542_v37  ;;  %v3472_v3 = vmul.f32 %v6414_v44, %v6414_v44  ;;  %v3356_v16 = vmul.f32 %v6326_v25, %v6417_v56  ;;  %v6444_v47 = vpop.permute.xlu1 %3255 }
 0x208   : > { %v3545_v21 = vsel %vm3384_vm8, %v3504_v45, 0.0  ;;  %v3399_v55 = vadd.f32 %v3398_v13, %v3397_v2  ;;  %v3470_v35 = vmul.f32 %v6417_v56, %v6417_v56  ;;  %v3473_v9 = vmul.f32 %v6423_v15, %v6423_v15 }
 0x209   : > { %v4848_v8 = vpop.f32.mrb[12].mxu0  ;;  %v3546_v46 = vadd.f32 %v3545_v21, %v3544_v42  ;;  %v3400_v59 = vsel %vm3384_vm8, %v3356_v16, 0.0  ;;  %v3547_v0 = vsel %vm3384_vm8, %v3505_v1, 0.0  ;;  %v3358_v30 = vmul.f32 %v6348_v60, %v6414_v44 }
 0x20a   : > { %v2995_v14 = vpop.f32.mrb[13].mxu0  ;;  %v3506_v27 = vmul.f32 %v3470_v35, %v6326_v25  ;;  %v3359_v57 = vmul.f32 %v6355_v29, %v6423_v15  ;;  %v3508_v41 = vmul.f32 %v3472_v3, %v6348_v60  ;;  %v6448_v26 = vadd.f32 %v4883_v50, %v6324_v31  ;;  %v6473_v50 = vpop.permute.xlu0 %3260 }
 0x20b   : > { %v4849_v48 = vpop.f32.mrb[14].mxu0  ;;  %v3548_v52 = vadd.f32 %v3547_v0, %v3546_v46  ;;  %v4884_v37 = vadd.f32 %v4848_v8, %v6297_v24  ;;  %v3401_v18 = vadd.f32 %v3400_v59, %v3399_v55  ;;  %v4885_v25 = vadd.f32 %v2995_v14, %v6299_v63  ;;  %v6489_v8 = vpop.permute.xlu1 %3265 }
 0x20c   : > { %v2998_v36 = vpop.f32.mrb[15].mxu0  ;;  %v3549_v58 = vsel %vm3384_vm8, %v3506_v27, 0.0  ;;  %v4886_v49 = vadd.f32 %v4849_v48, %v6301_v10  ;;  %v3509_v45 = vmul.f32 %v3473_v9, %v6355_v29  ;;  %v3357_v12 = vmul.f32 %v6328_v32, %v6448_v26 }
 0x20d   : > { %v3471_v60 = vmul.f32 %v6448_v26, %v6448_v26  ;;  %v6460_v20 = vadd.f32 %v4884_v37, %v6324_v31  ;;  %v3550_v53 = vadd.f32 %v3549_v58, %v3548_v52  ;;  %v6465_v40 = vadd.f32 %v4885_v25, %v6324_v31 }
 0x20e   : > { %v6468_v63 = vadd.f32 %v4886_v49, %v6324_v31  ;;  %v4887_v10 = vadd.f32 %v2998_v36, %v6303_v28  ;;  %v3404_v1 = vsel %vm3384_vm8, %v3358_v30, 0.0  ;;  %v3402_v2 = vsel %vm3384_vm8, %v3357_v12, 0.0  ;;  %v6508_v12 = vpop.permute.xlu0 %3270 }
 0x20f   : > { %v6462_v24 = vpop.f32.mrb[20].mxu1  ;;  %v3507_v54 = vmul.f32 %v3471_v60, %v6328_v32  ;;  %v3476_v13 = vmul.f32 %v6460_v20, %v6460_v20  ;;  %v3406_v3 = vsel %vm3384_vm8, %v3359_v57, 0.0  ;;  %v3403_v16 = vadd.f32 %v3402_v2, %v3401_v18 }
 0x210   : > { %v6471_v29 = vpop.f32.mrb[21].mxu1  ;;  %v3360_v28 = vmul.f32 %v6370_v38, %v6465_v40  ;;  %v3474_v21 = vmul.f32 %v6465_v40, %v6465_v40  ;;  %v3553_v32 = vsel %vm3384_vm8, %v3508_v41, 0.0  ;;  %v3555_v46 = vsel %vm3384_vm8, %v3509_v45, 0.0 }
 0x211   : > { %v6480_v42 = vpop.f32.mrb[22].mxu1  ;;  %v4852_v55 = vpop.f32.mrb[16].mxu0  ;;  %v3551_v59 = vsel %vm3384_vm8, %v3507_v54, 0.0  ;;  %v3477_v9 = vmul.f32 %v6468_v63, %v6468_v63  ;;  %v3405_v0 = vadd.f32 %v3404_v1, %v3403_v16  ;;  %v3362_v27 = vmul.f32 %v6402_v7, %v6460_v20 }
 0x212   : > { %v6487_v35 = vpop.f32.mrb[23].mxu1  ;;  %v3011_v14 = vpop.f32.mrb[17].mxu0  ;;  %v3552_v30 = vadd.f32 %v3551_v59, %v3550_v53  ;;  %v3510_v57 = vmul.f32 %v3474_v21, %v6370_v38  ;;  %v3512_v52 = vmul.f32 %v3476_v13, %v6402_v7  ;;  %v3408_v41 = vsel %vm3384_vm8, %v3360_v28, 0.0 }
 0x213   : > { %v4853_v48 = vpop.f32.mrb[18].mxu0  ;;  %v3363_v37 = vmul.f32 %v6410_v51, %v6468_v63  ;;  %v6504_v36 = vadd.f32 %v4887_v10, %v6324_v31  ;;  %v3407_v25 = vadd.f32 %v3406_v3, %v3405_v0  ;;  %v3513_v49 = vmul.f32 %v3477_v9, %v6410_v51  ;;  %v6524_v13 = vpop.permute.xlu1 %3275 }
 0x214   : > { %v3014_v18 = vpop.f32.mrb[19].mxu0  ;;  %v3554_v58 = vadd.f32 %v3553_v32, %v3552_v30  ;;  %v4888_v45 = vadd.f32 %v4852_v55, %v6307_v6  ;;  %v3557_v38 = vsel %vm3384_vm8, %v3510_v57, 0.0  ;;  %v4889_v53 = vadd.f32 %v3011_v14, %v6309_v17 }
 0x215   : > { %v3361_v7 = vmul.f32 %v6384_v23, %v6504_v36  ;;  %v3475_v60 = vmul.f32 %v6504_v36, %v6504_v36  ;;  %v3409_v1 = vadd.f32 %v3408_v41, %v3407_v25  ;;  %v4890_v6 = vadd.f32 %v4853_v48, %v6313_v22 }
 0x216   : > { %v3556_v2 = vadd.f32 %v3555_v46, %v3554_v58  ;;  %v6519_v51 = vadd.f32 %v4888_v45, %v6324_v31  ;;  %v6529_v28 = vadd.f32 %v4889_v53, %v6324_v31  ;;  %v4891_v17 = vadd.f32 %v3014_v18, %v6315_v19  ;;  %v3281_v58 = vpop.permute.xlu0 %3280 }
 0x217   : > { %v6516_v10 = vpop.f32.mrb[24].mxu1  ;;  %v3410_v3 = vsel %vm3384_vm8, %v3361_v7, 0.0  ;;  %v3511_v16 = vmul.f32 %v3475_v60, %v6384_v23  ;;  %v3412_v55 = vsel %vm3384_vm8, %v3362_v27, 0.0  ;;  %v6545_v0 = vadd.f32 %v4890_v6, %v6324_v31 }
 0x218   : > { %v6522_v54 = vpop.f32.mrb[25].mxu1  ;;  %v3558_v32 = vadd.f32 %v3557_v38, %v3556_v2  ;;  %v3411_v46 = vadd.f32 %v3410_v3, %v3409_v1  ;;  %v3480_v22 = vmul.f32 %v6519_v51, %v6519_v51  ;;  %v3364_v23 = vmul.f32 %v6433_v39, %v6529_v28 }
 0x219   : > { %v6532_v21 = vpop.f32.mrb[26].mxu1  ;;  %v4856_v59 = vpop.f32.mrb[20].mxu0  ;;  %v3559_v14 = vsel %vm3384_vm8, %v3511_v16, 0.0  ;;  %v3478_v19 = vmul.f32 %v6529_v28, %v6529_v28  ;;  %v3561_v27 = vsel %vm3384_vm8, %v3512_v52, 0.0  ;;  %v3414_v57 = vsel %vm3384_vm8, %v3363_v37, 0.0 }
 0x21a   : > { %v6537_v9 = vpop.f32.mrb[27].mxu1  ;;  %v3027_v30 = vpop.f32.mrb[21].mxu0  ;;  %v3413_v48 = vadd.f32 %v3412_v55, %v3411_v46  ;;  %v3560_v41 = vadd.f32 %v3559_v14, %v3558_v32  ;;  %v3563_v25 = vsel %vm3384_vm8, %v3513_v49, 0.0  ;;  %v3416_v45 = vsel %vm3384_vm8, %v3364_v23, 0.0 }
 0x21b   : > { %v4857_v18 = vpop.f32.mrb[22].mxu0  ;;  %v3514_v38 = vmul.f32 %v3478_v19, %v6433_v39  ;;  %v3481_v7 = vmul.f32 %v6545_v0, %v6545_v0  ;;  %v3366_v52 = vmul.f32 %v6473_v50, %v6519_v51  ;;  %v6557_v37 = vadd.f32 %v4891_v17, %v6324_v31  ;;  %v6566_v16 = vpop.permute.xlu1 %3285 }
 0x21c   : > { %v3030_v60 = vpop.f32.mrb[23].mxu0  ;;  %v3562_v53 = vadd.f32 %v3561_v27, %v3560_v41  ;;  %v3415_v1 = vadd.f32 %v3414_v57, %v3413_v48  ;;  %v3516_v2 = vmul.f32 %v3480_v22, %v6473_v50  ;;  %v3367_v6 = vmul.f32 %v6489_v8, %v6545_v0 }
 0x21d   : > { %v3565_v49 = vsel %vm3384_vm8, %v3514_v38, 0.0  ;;  %v4892_v39 = vadd.f32 %v4856_v59, %v6462_v24  ;;  %v3365_v46 = vmul.f32 %v6444_v47, %v6557_v37  ;;  %v3479_v17 = vmul.f32 %v6557_v37, %v6557_v37 }
 0x21e   : > { %v3417_v55 = vadd.f32 %v3416_v45, %v3415_v1  ;;  %v3564_v32 = vadd.f32 %v3563_v25, %v3562_v53  ;;  %v3517_v22 = vmul.f32 %v3481_v7, %v6489_v8  ;;  %v4893_v24 = vadd.f32 %v3027_v30, %v6471_v29  ;;  %v6587_v8 = vpop.permute.xlu0 %3290 }
 0x21f   : > { %v6564_v3 = vpop.f32.mrb[28].mxu1  ;;  %v6576_v14 = vadd.f32 %v4892_v39, %v6324_v31  ;;  %v4894_v59 = vadd.f32 %v4857_v18, %v6480_v42  ;;  %v3418_v27 = vsel %vm3384_vm8, %v3365_v46, 0.0  ;;  %v3515_v57 = vmul.f32 %v3479_v17, %v6444_v47  ;;  %v6604_v39 = vpop.permute.xlu1 %3295 }
 0x220   : > { %v6572_v50 = vpop.f32.mrb[29].mxu1  ;;  %v3566_v19 = vadd.f32 %v3565_v49, %v3564_v32  ;;  %v4895_v48 = vadd.f32 %v3030_v60, %v6487_v35  ;;  %v3420_v45 = vsel %vm3384_vm8, %v3366_v52, 0.0  ;;  %v3419_v38 = vadd.f32 %v3418_v27, %v3417_v55 }
 0x221   : > { %7323 = vst [vmem:[#allocation5_spill] sm:$0xff] %v6576_v14  ;;  %v6580_v23 = vpop.f32.mrb[30].mxu1  ;;  %v4860_v41 = vpop.f32.mrb[24].mxu0  ;;  %v3484_v29 = vmul.f32 %v6576_v14, %v6576_v14  ;;  %v6593_v42 = vadd.f32 %v4893_v24, %v6324_v31  ;;  %v3567_v18 = vsel %vm3384_vm8, %v3515_v57, 0.0  ;;  %v6597_v47 = vadd.f32 %v4894_v59, %v6324_v31 }
 0x222   : > { %v6585_v25 = vpop.f32.mrb[31].mxu1  ;;  %v3043_v30 = vpop.f32.mrb[25].mxu0  ;;  %v6600_v35 = vadd.f32 %v4895_v48, %v6324_v31  ;;  %v4896_v7 = vadd.f32 %v4860_v41, %v6516_v10  ;;  %v3569_v53 = vsel %vm3384_vm8, %v3516_v2, 0.0  ;;  %v3421_v52 = vadd.f32 %v3420_v45, %v3419_v38 }
 0x223   : > { %7324 = vst [vmem:[#allocation4_spill] sm:$0xff] %v6597_v47  ;;  %v4861_v60 = vpop.f32.mrb[26].mxu0  ;;  %v3568_v1 = vadd.f32 %v3567_v18, %v3566_v19  ;;  %v3422_v55 = vsel %vm3384_vm8, %v3367_v6, 0.0  ;;  %v3571_v32 = vsel %vm3384_vm8, %v3517_v22, 0.0  ;;  %v3368_v46 = vmul.f32 %v6508_v12, %v6593_v42  ;;  %v3301_v41 = vpop.permute.xlu0 %3300 }
 0x224   : > { %v3046_v49 = vpop.f32.mrb[27].mxu0  ;;  %v3482_v17 = vmul.f32 %v6593_v42, %v6593_v42  ;;  %v3370_v10 = vmul.f32 %v3281_v58, %v6576_v14  ;;  %v3423_v59 = vadd.f32 %v3422_v55, %v3421_v52  ;;  %v3369_v2 = vmul.f32 %v6524_v13, %v6600_v35 }
 0x225   : > { %v3570_v24 = vadd.f32 %v3569_v53, %v3568_v1  ;;  %v3520_v27 = vmul.f32 %v3484_v29, %v3281_v58  ;;  %v3424_v6 = vsel %vm3384_vm8, %v3368_v46, 0.0  ;;  %v3485_v57 = vmul.f32 %v6597_v47, %v6597_v47 }
 0x226   : > { %v3518_v22 = vmul.f32 %v3482_v17, %v6508_v12  ;;  %v3425_v45 = vadd.f32 %v3424_v6, %v3423_v59  ;;  %v3426_v18 = vsel %vm3384_vm8, %v3369_v2, 0.0  ;;  %v3483_v53 = vmul.f32 %v6600_v35, %v6600_v35  ;;  %v3306_v6 = vpop.permute.xlu1 %3305 }
 0x227   : > { %v6615_v19 = vpop.f32.mrb[32].mxu1  ;;  %v3572_v38 = vadd.f32 %v3571_v32, %v3570_v24  ;;  %v3371_v12 = vmul.f32 %v6566_v16, %v6597_v47  ;;  %v6632_v29 = vadd.f32 %v4896_v7, %v6324_v31  ;;  %v4897_v1 = vadd.f32 %v3043_v30, %v6522_v54 }
 0x228   : > { %v6621_v48 = vpop.f32.mrb[33].mxu1  ;;  %v3573_v58 = vsel %vm3384_vm8, %v3518_v22, 0.0  ;;  %v3427_v17 = vadd.f32 %v3426_v18, %v3425_v45  ;;  %v3519_v24 = vmul.f32 %v3483_v53, %v6524_v13  ;;  %v4898_v59 = vadd.f32 %v4861_v60, %v6532_v21 }
 0x229   : > { %v6626_v52 = vpop.f32.mrb[34].mxu1  ;;  %7325 = vst [vmem:[#allocation3_spill] sm:$0xff] %v6632_v29  ;;  %v4864_v55 = vpop.f32.mrb[28].mxu0  ;;  %v3574_v32 = vadd.f32 %v3573_v58, %v3572_v38  ;;  %v3428_v22 = vsel %vm3384_vm8, %v3370_v10, 0.0  ;;  %v3521_v47 = vmul.f32 %v3485_v57, %v6566_v16  ;;  %v6642_v7 = vadd.f32 %v4897_v1, %v6324_v31 }
 0x22a   : > { %v6635_v46 = vpop.f32.mrb[35].mxu1  ;;  %v3059_v2 = vpop.f32.mrb[29].mxu0  ;;  %v4899_v54 = vadd.f32 %v3046_v49, %v6537_v9  ;;  %v3429_v14 = vadd.f32 %v3428_v22, %v3427_v17  ;;  %v3575_v38 = vsel %vm3384_vm8, %v3519_v24, 0.0  ;;  %v6647_v45 = vadd.f32 %v4898_v59, %v6324_v31 }
 0x22b   : > { %v4865_v30 = vpop.f32.mrb[30].mxu0  ;;  %v4900_v13 = vadd.f32 %v4864_v55, %v6564_v3  ;;  %v3430_v60 = vsel %vm3384_vm8, %v3371_v12, 0.0  ;;  %v3576_v10 = vadd.f32 %v3575_v38, %v3574_v32  ;;  %v3372_v16 = vmul.f32 %v6587_v8, %v6642_v7  ;;  %v3311_v57 = vpop.permute.xlu0 %3310 }
 0x22c   : > { %v3062_v21 = vpop.f32.mrb[31].mxu0  ;;  %v3577_v18 = vsel %vm3384_vm8, %v3520_v27, 0.0  ;;  %v3488_v9 = vmul.f32 %v6632_v29, %v6632_v29  ;;  %v3431_v49 = vadd.f32 %v3430_v60, %v3429_v14  ;;  %v3486_v53 = vmul.f32 %v6642_v7, %v6642_v7  ;;  %v3316_v14 = vpop.permute.xlu1 %3315 }
 0x22d   : > { %v3579_v58 = vsel %vm3384_vm8, %v3521_v47, 0.0  ;;  %v3578_v3 = vadd.f32 %v3577_v18, %v3576_v10  ;;  %v3432_v1 = vsel %vm3384_vm8, %v3372_v16, 0.0  ;;  %v6661_v12 = vadd.f32 %v4899_v54, %v6324_v31 }
 0x22e   : > { %v3374_v55 = vmul.f32 %v3301_v41, %v6632_v29  ;;  %v3433_v32 = vadd.f32 %v3432_v1, %v3431_v49  ;;  %v3522_v27 = vmul.f32 %v3486_v53, %v6587_v8  ;;  %v3489_v17 = vmul.f32 %v6647_v45, %v6647_v45 }
 0x22f   : > { %v3580_v24 = vadd.f32 %v3579_v58, %v3578_v3  ;;  %v3373_v59 = vmul.f32 %v6604_v39, %v6661_v12  ;;  %v3487_v47 = vmul.f32 %v6661_v12, %v6661_v12  ;;  %v6672_v22 = vadd.f32 %v4900_v13, %v6324_v31  ;;  %v3321_v1 = vpop.permute.xlu0 %3320 }
 0x230   : > { %v3524_v38 = vmul.f32 %v3488_v9, %v3301_v41  ;;  %v3581_v60 = vsel %vm3384_vm8, %v3522_v27, 0.0  ;;  %v4901_v8 = vadd.f32 %v3059_v2, %v6572_v50  ;;  %v4902_v10 = vadd.f32 %v4865_v30, %v6580_v23 }
 0x231   : > { %v4868_v54 = vpop.f32.mrb[32].mxu0  ;;  %v3582_v18 = vadd.f32 %v3581_v60, %v3580_v24  ;;  %v3375_v49 = vmul.f32 %v3306_v6, %v6647_v45  ;;  %v3434_v53 = vsel %vm3384_vm8, %v3373_v59, 0.0  ;;  %v3523_v58 = vmul.f32 %v3487_v47, %v6604_v39 }
 0x232   : > { %v3075_v16 = vpop.f32.mrb[33].mxu0  ;;  %v3436_v13 = vsel %vm3384_vm8, %v3374_v55, 0.0  ;;  %v3525_v29 = vmul.f32 %v3489_v17, %v3306_v6  ;;  %v3435_v41 = vadd.f32 %v3434_v53, %v3433_v32  ;;  %v6682_v9 = vadd.f32 %v4901_v8, %v6324_v31  ;;  %v3326_v6 = vpop.permute.xlu1 %3325 }
 0x233   : > { %v4869_v3 = vpop.f32.mrb[34].mxu0  ;;  %v3583_v23 = vsel %vm3384_vm8, %v3523_v58, 0.0  ;;  %v3378_v2 = vmul.f32 %v3321_v1, %v6672_v22  ;;  %v4903_v30 = vadd.f32 %v3062_v21, %v6585_v25  ;;  %v4904_v27 = vadd.f32 %v4868_v54, %v6615_v19 }
 0x234   : > { %v3078_v50 = vpop.f32.mrb[35].mxu0  ;;  %v3437_v24 = vadd.f32 %v3436_v13, %v3435_v41  ;;  %v3584_v39 = vadd.f32 %v3583_v23, %v3582_v18  ;;  %v3376_v59 = vmul.f32 %v3311_v57, %v6682_v9  ;;  %v6690_v55 = vadd.f32 %v4902_v10, %v6324_v31  ;;  %v3331_v41 = vpop.permute.xlu0 %3330 }
 0x235   : > { %v3585_v32 = vsel %vm3384_vm8, %v3524_v38, 0.0  ;;  %v3438_v17 = vsel %vm3384_vm8, %v3375_v49, 0.0  ;;  %v3490_v47 = vmul.f32 %v6682_v9, %v6682_v9  ;;  %v6697_v60 = vadd.f32 %v4903_v30, %v6324_v31 }
 0x236   : > { %v3586_v25 = vadd.f32 %v3585_v32, %v3584_v39  ;;  %v3492_v19 = vmul.f32 %v6672_v22, %v6672_v22  ;;  %v3439_v21 = vadd.f32 %v3438_v17, %v3437_v24  ;;  %v3440_v54 = vsel %vm3384_vm8, %v3376_v59, 0.0  ;;  %v3336_v32 = vpop.permute.xlu1 %3335 }
 0x237   : > { %v3587_v8 = vsel %vm3384_vm8, %v3525_v29, 0.0  ;;  %v3444_v10 = vsel %vm3384_vm8, %v3378_v2, 0.0  ;;  %v3526_v38 = vmul.f32 %v3490_v47, %v3311_v57  ;;  %v3377_v18 = vmul.f32 %v3316_v14, %v6697_v60 }
 0x238   : > { %v3441_v49 = vadd.f32 %v3440_v54, %v3439_v21  ;;  %v3588_v53 = vadd.f32 %v3587_v8, %v3586_v25  ;;  %v3493_v58 = vmul.f32 %v6690_v55, %v6690_v55  ;;  %v3491_v13 = vmul.f32 %v6697_v60, %v6697_v60 }
 0x239   : > { %v3589_v23 = vsel %vm3384_vm8, %v3526_v38, 0.0  ;;  %v3379_v30 = vmul.f32 %v3326_v6, %v6690_v55  ;;  %v3442_v29 = vsel %vm3384_vm8, %v3377_v18, 0.0  ;;  %v4905_v2 = vadd.f32 %v3075_v16, %v6621_v48 }
 0x23a   : > { %v3528_v57 = vmul.f32 %v3492_v19, %v3321_v1  ;;  %v3590_v24 = vadd.f32 %v3589_v23, %v3588_v53  ;;  %v3443_v39 = vadd.f32 %v3442_v29, %v3441_v49  ;;  %v3527_v59 = vmul.f32 %v3491_v13, %v3316_v14  ;;  %v3346_v23 = vpop.permute.xlu1 %3345 }
 0x23b   : > { %v6714_v17 = vadd.f32 %v4904_v27, %v6324_v31  ;;  %v6717_v47 = vadd.f32 %v4905_v2, %v6324_v31  ;;  %v4906_v25 = vadd.f32 %v4869_v3, %v6626_v52  ;;  %v4907_v21 = vadd.f32 %v3078_v50, %v6635_v46  ;;  %v3341_v46 = vpop.permute.xlu0 %3340 }
 0x23c   : > { %v3529_v54 = vmul.f32 %v3493_v58, %v3326_v6  ;;  %v3445_v8 = vadd.f32 %v3444_v10, %v3443_v39  ;;  %v3591_v38 = vsel %vm3384_vm8, %v3527_v59, 0.0  ;;  %v3446_v48 = vsel %vm3384_vm8, %v3379_v30, 0.0 }
 0x23d   : > { %v3592_v16 = vadd.f32 %v3591_v38, %v3590_v24  ;;  %v3380_v14 = vmul.f32 %v3331_v41, %v6717_v47  ;;  %v3494_v1 = vmul.f32 %v6717_v47, %v6717_v47  ;;  %v3593_v27 = vsel %vm3384_vm8, %v3528_v57, 0.0 }
 0x23e   : > { %v3447_v19 = vadd.f32 %v3446_v48, %v3445_v8  ;;  %v6728_v18 = vadd.f32 %v4906_v25, %v6324_v31  ;;  %v6731_v52 = vadd.f32 %v4907_v21, %v6324_v31  ;;  %v3496_v50 = vmul.f32 %v6714_v17, %v6714_v17 }
 0x23f   : > { %v3594_v3 = vadd.f32 %v3593_v27, %v3592_v16  ;;  %v3448_v6 = vsel %vm3384_vm8, %v3380_v14, 0.0  ;;  %v3530_v10 = vmul.f32 %v3494_v1, %v3331_v41  ;;  %v3595_v49 = vsel %vm3384_vm8, %v3529_v54, 0.0 }
 0x240   : > { %v3382_v53 = vmul.f32 %v3341_v46, %v6714_v17  ;;  %v3449_v58 = vadd.f32 %v3448_v6, %v3447_v19  ;;  %v3381_v13 = vmul.f32 %v3336_v32, %v6731_v52  ;;  %v3497_v29 = vmul.f32 %v6728_v18, %v6728_v18 }
 0x241   : > { %v3596_v30 = vadd.f32 %v3595_v49, %v3594_v3  ;;  %v3597_v31 = vsel %vm3384_vm8, %v3530_v10, 0.0  ;;  %v3495_v2 = vmul.f32 %v6731_v52, %v6731_v52  ;;  %v3383_v57 = vmul.f32 %v3346_v23, %v6728_v18 }
 0x242   : > { %v3450_v41 = vsel %vm3384_vm8, %v3381_v13, 0.0  ;;  %v3532_v24 = vmul.f32 %v3496_v50, %v3341_v46  ;;  %v3452_v21 = vsel %vm3384_vm8, %v3382_v53, 0.0  ;;  %v3533_v54 = vmul.f32 %v3497_v29, %v3346_v23 }
 0x243   : > { %v3598_v39 = vadd.f32 %v3597_v31, %v3596_v30  ;;  %v3451_v59 = vadd.f32 %v3450_v41, %v3449_v58  ;;  %v3531_v25 = vmul.f32 %v3495_v2, %v3336_v32  ;;  %v3454_v48 = vsel %vm3384_vm8, %v3383_v57, 0.0 }
 0x244   : > { %v3601_v14 = vsel %vm3384_vm8, %v3532_v24, 0.0  ;;  %v3603_v3 = vsel %vm3384_vm8, %v3533_v54, 0.0 }
 0x245   : > { %v3599_v8 = vsel %vm3384_vm8, %v3531_v25, 0.0  ;;  %v3453_v38 = vadd.f32 %v3452_v21, %v3451_v59 }
 0x246   : > { %v3600_v16 = vadd.f32 %v3599_v8, %v3598_v39 }
 0x247   : > { %v3455_v1 = vadd.f32 %v3454_v48, %v3453_v38 }
 0x248   : > { %v3602_v27 = vadd.f32 %v3601_v14, %v3600_v16 }
 0x249   : > { %v3456_v19 = vrot.slane %v3455_v1, 4 }
 0x24a   : > { %v3604_v46 = vadd.f32 %v3603_v3, %v3602_v27 }
 0x24b   : > { %v3457_v50 = vadd.f32 %v3456_v19, %v3455_v1 }
 0x24c   : > { %v3605_v6 = vrot.slane %v3604_v46, 4 }
 0x24d   : > { %v3458_v32 = vrot.slane %v3457_v50, 2 }
 0x24e   : > { %v3606_v10 = vadd.f32 %v3605_v6, %v3604_v46 }
 0x24f   : > { %v3459_v49 = vadd.f32 %v3458_v32, %v3457_v50  ;;  %v3642_v32 = vlaneseq }
 0x250   : > { %v3607_v53 = vrot.slane %v3606_v10, 2 }
 0x251   : > { %v3460_v58 = vrot.slane %v3459_v49, 1 }
 0x252   : > { %v3608_v13 = vadd.f32 %v3607_v53, %v3606_v10  ;;  %v3643_v10 = vand.u32 127, %v3642_v32 }
 0x253   : > { %v3461_v23 = vadd.f32 %v3460_v58, %v3459_v49  ;;  %v3656_v58 = vshrl.u32 %v3642_v32, 7 }
 0x254   : > { %v3609_v30 = vrot.slane %v3608_v13, 1  ;;  %vm3644_vm10 = vcmp.lt.s32.totalorder %v3643_v10, 16 }
 0x255   : > { %3617 = vrot.lane.b32.xlu0 %v3461_v23, %s5228_s9  ;;  %v3612_v29 = vsel %vm3611_vm9, %v3461_v23, 0.0 }
 0x256   : > { %v3610_v31 = vadd.f32 %v3609_v30, %v3608_v13  ;;  %v254_v13 = vld [vmem:[%s7250_s4] sm:$0x1] }
 0x258   : > { %3632 = vrot.lane.b32.xlu1 %v3610_v31, %s5228_s9  ;;  %v3624_v2 = vsel %vm3611_vm9, %v3610_v31, 0.0  ;;  %v3657_v31 = vsub.s32 0, %v3656_v58 }
 0x274   : > { %3613 = vadd.xlane.f32.xlu0 %v3612_v29 }
 0x278   : > { %3625 = vadd.xlane.f32.xlu0 %v3624_v2 }
 0x2c7   : > { %v3618_v57 = vpop.permute.xlu0 %3617 }
 0x2c8   : > { %v3620_v41 = vsel %vm3611_vm9, %v3618_v57, 0.0  ;;  %v255_v57 = vld [vmem:[%s7251_s5] sm:$0x1] }
 0x2c9   : > { %3621 = vadd.xlane.f32.xlu1 %v3620_v41 }
 0x2ca   : > { %v3633_v24 = vpop.permute.xlu1 %3632 }
 0x2cb   : > { %v3635_v39 = vsel %vm3611_vm9, %v3633_v24, 0.0 }
 0x2cc   : > { %3636 = vadd.xlane.f32.xlu0 %v3635_v39 }
 0x301   : > { %v3614_v59 = vpop.xlane.xlu0 %3613 }
 0x302   : > { %v3615_v21 = vmul.f32 0.00024414063, %v3614_v59 }
 0x304   : > { %v3628_v8 = vmul.f32 %v3615_v21, %v3615_v21 }
 0x305   : > { %v3626_v25 = vpop.xlane.xlu0 %3625 }
 0x306   : > { %v3627_v54 = vmul.f32 0.00024414063, %v3626_v25 }
 0x308   : > { %v3629_v16 = vsub.f32 %v3627_v54, %v3628_v8 }
 0x30a   : > { %v3630_v19 = vmax.f32 %v3629_v16, 0.0 }
 0x30c   : > { %v3646_v50 = vadd.f32 1e-05, %v3630_v19 }
 0x356   : > { %v3622_v38 = vpop.xlane.xlu1 %3621 }
 0x357   : > { %v3623_v48 = vmul.f32 0.00024414063, %v3622_v38 }
 0x359   : > { %v3639_v14 = vmul.f32 %v3623_v48, %v3623_v48  ;;  %v3637_v1 = vpop.xlane.xlu0 %3636  ;;  %v3645_v29 = vsel %vm3644_vm10, %v3615_v21, %v3623_v48 }
 0x35a   : > { %v3638_v27 = vmul.f32 0.00024414063, %v3637_v1  ;;  %v7326_v1 = vld [vmem:[#allocation5_spill] sm:$0xff] }
 0x35c   : > { %v3640_v3 = vsub.f32 %v3638_v27, %v3639_v14 }
 0x35e   : > { %v3641_v46 = vmax.f32 %v3640_v3, 0.0 }
 0x360   : > { %v3648_v6 = vadd.f32 1e-05, %v3641_v46 }
 0x362   : > { %5207 = vrsqrt.f32 %v3648_v6 }
 0x363   : > { %5209 = vrsqrt.f32 %v3646_v50 }
 0x36c   : > { %v5208_v49 = vpop.eup %5207 }
 0x36d   : > { %v5210_v53 = vpop.eup %5209 }
 0x36e   : > { %v3650_v23 = vsel %vm3644_vm10, %v5210_v53, %v5208_v49 }
 0x36f   : > { %v3651_v30 = vmul.f32 %v3650_v23, %v254_v13 }
 0x371   : > { %v3652_v2 = vmul.f32 %v3651_v30, %v3645_v29  ;;  %v3658_v41 = vrot.slane %v3651_v30, %v3657_v31 }
 0x373   : > { %v3653_v24 = vsub.f32 %v255_v57, %v3652_v2  ;;  %v3660_v39 = vmul.f32 %v3658_v41, %v6334_v33  ;;  %v3661_v59 = vmul.f32 %v3658_v41, %v6346_v62  ;;  %v3662_v25 = vmul.f32 %v3658_v41, %v6331_v61 }
 0x374   : > { %v3663_v54 = vmul.f32 %v3658_v41, %v6340_v34  ;;  %v3664_v8 = vmul.f32 %v3658_v41, %v6367_v4  ;;  %v3665_v38 = vmul.f32 %v3658_v41, %v6382_v11  ;;  %v3666_v21 = vmul.f32 %v3658_v41, %v6364_v5 }
 0x375   : > { %v3667_v48 = vmul.f32 %v3658_v41, %v6379_v43  ;;  %v3668_v16 = vmul.f32 %v3658_v41, %v6417_v56  ;;  %v3669_v14 = vmul.f32 %v3658_v41, %v6448_v26  ;;  %v3670_v33 = vmul.f32 %v3658_v41, %v6414_v44 }
 0x376   : > { %v3671_v62 = vmul.f32 %v3658_v41, %v6423_v15  ;;  %v3672_v61 = vmul.f32 %v3658_v41, %v6465_v40  ;;  %v3673_v34 = vmul.f32 %v3658_v41, %v6504_v36  ;;  %v3674_v4 = vmul.f32 %v3658_v41, %v6460_v20  ;;  %v7327_v36 = vld [vmem:[#allocation4_spill] sm:$0xff] }
 0x377   : > { %v3675_v11 = vmul.f32 %v3658_v41, %v6468_v63  ;;  %v3676_v5 = vmul.f32 %v3658_v41, %v6529_v28  ;;  %v3677_v43 = vmul.f32 %v3658_v41, %v6557_v37  ;;  %v3678_v56 = vmul.f32 %v3658_v41, %v6519_v51  ;;  %v7328_v28 = vld [vmem:[#allocation3_spill] sm:$0xff] }
 0x378   : > { %v3679_v26 = vmul.f32 %v3658_v41, %v6545_v0  ;;  %v3680_v44 = vmul.f32 %v3658_v41, %v6593_v42  ;;  %v3681_v15 = vmul.f32 %v3658_v41, %v6600_v35  ;;  %v3682_v40 = vmul.f32 %v3658_v41, %v7326_v1 }
 0x379   : > { %v3700_v27 = vrot.slane %v3653_v24, %v3657_v31  ;;  %v3683_v19 = vmul.f32 %v3658_v41, %v7327_v36  ;;  %v3684_v20 = vmul.f32 %v3658_v41, %v6642_v7  ;;  %v3685_v63 = vmul.f32 %v3658_v41, %v6661_v12 }
 0x37a   : > { %v3686_v3 = vmul.f32 %v3658_v41, %v7328_v28  ;;  %v3687_v37 = vmul.f32 %v3658_v41, %v6647_v45  ;;  %v3688_v51 = vmul.f32 %v3658_v41, %v6682_v9  ;;  %v3689_v0 = vmul.f32 %v3658_v41, %v6697_v60 }
 0x37b   : > { %v3690_v42 = vmul.f32 %v3658_v41, %v6672_v22  ;;  %v3691_v35 = vmul.f32 %v3658_v41, %v6690_v55  ;;  %v3692_v46 = vmul.f32 %v3658_v41, %v6717_v47  ;;  %v3693_v50 = vmul.f32 %v3658_v41, %v6731_v52 }
 0x37c   : > { %v3694_v7 = vmul.f32 %v3658_v41, %v6714_v17  ;;  %v3695_v12 = vmul.f32 %v3658_v41, %v6728_v18  ;;  %v6793_v6 = vadd.f32 %v3700_v27, %v3660_v39  ;;  %v6795_v32 = vadd.f32 %v3700_v27, %v3661_v59 }
 0x37d   : > { %v6797_v45 = vadd.f32 %v3700_v27, %v3662_v25  ;;  %v6799_v9 = vadd.f32 %v3700_v27, %v3663_v54  ;;  %v6801_v60 = vadd.f32 %v3700_v27, %v3664_v8  ;;  %v6803_v22 = vadd.f32 %v3700_v27, %v3665_v38 }
 0x37e   : > { %v6805_v55 = vadd.f32 %v3700_v27, %v3666_v21  ;;  %v6807_v47 = vadd.f32 %v3700_v27, %v3667_v48  ;;  %v6809_v52 = vadd.f32 %v3700_v27, %v3668_v16  ;;  %v6811_v17 = vadd.f32 %v3700_v27, %v3669_v14 }
 0x37f   : > { %v6813_v18 = vadd.f32 %v3700_v27, %v3670_v33  ;;  %v6815_v10 = vadd.f32 %v3700_v27, %v3671_v62  ;;  %v6817_v49 = vadd.f32 %v3700_v27, %v3672_v61  ;;  %v6819_v53 = vadd.f32 %v3700_v27, %v3673_v34 }
 0x380   : > { %v6821_v58 = vadd.f32 %v3700_v27, %v3674_v4  ;;  %v6823_v13 = vadd.f32 %v3700_v27, %v3675_v11  ;;  %v6825_v23 = vadd.f32 %v3700_v27, %v3676_v5  ;;  %v6827_v30 = vadd.f32 %v3700_v27, %v3677_v43 }
 0x381   : > { %v6829_v31 = vadd.f32 %v3700_v27, %v3678_v56  ;;  %v6831_v29 = vadd.f32 %v3700_v27, %v3679_v26  ;;  %v6833_v2 = vadd.f32 %v3700_v27, %v3680_v44  ;;  %v6835_v57 = vadd.f32 %v3700_v27, %v3681_v15 }
 0x382   : > { %v6837_v41 = vadd.f32 %v3700_v27, %v3682_v40  ;;  %v6839_v24 = vadd.f32 %v3700_v27, %v3683_v19  ;;  %v6841_v39 = vadd.f32 %v3700_v27, %v3684_v20  ;;  %v6843_v59 = vadd.f32 %v3700_v27, %v3685_v63 }
 0x383   : > { %v6845_v25 = vadd.f32 %v3700_v27, %v3686_v3  ;;  %v6847_v54 = vadd.f32 %v3700_v27, %v3687_v37  ;;  %v6849_v8 = vadd.f32 %v3700_v27, %v3688_v51  ;;  %v6851_v38 = vadd.f32 %v3700_v27, %v3689_v0 }
 0x384   : > { %v6853_v21 = vadd.f32 %v3700_v27, %v3690_v42  ;;  %v6855_v48 = vadd.f32 %v3700_v27, %v3691_v35  ;;  %v6857_v16 = vadd.f32 %v3700_v27, %v3692_v46  ;;  %v6859_v14 = vadd.f32 %v3700_v27, %v3693_v50 }
 0x385   : > { %vm3738_vm11 = vcmp.gt.f32.partialorder %v6793_v6, 0.0  ;;  %vm3739_vm12 = vcmp.gt.f32.partialorder %v6795_v32, 0.0  ;;  %vm3740_vm13 = vcmp.gt.f32.partialorder %v6797_v45, 0.0  ;;  %vm3741_vm14 = vcmp.gt.f32.partialorder %v6799_v9, 0.0 }
 0x386   : > { %vm3742_vm15 = vcmp.gt.f32.partialorder %v6801_v60, 0.0  ;;  %vm3743_vm0 = vcmp.gt.f32.partialorder %v6803_v22, 0.0  ;;  %vm3744_vm1 = vcmp.gt.f32.partialorder %v6805_v55, 0.0  ;;  %vm3745_vm2 = vcmp.gt.f32.partialorder %v6807_v47, 0.0 }
 0x387   : > { %vm3746_vm3 = vcmp.gt.f32.partialorder %v6809_v52, 0.0  ;;  %v6870_v33 = vadd.f32 %v3700_v27, %v3694_v7  ;;  %v3774_v62 = vmul.f32 0.2, %v6793_v6  ;;  %v3775_v61 = vmul.f32 0.2, %v6795_v32 }
 0x388   : > { %v3776_v34 = vmul.f32 0.2, %v6797_v45  ;;  %v6876_v4 = vadd.f32 %v3700_v27, %v3695_v12  ;;  %vm3749_vm6 = vcmp.gt.f32.partialorder %v6815_v10, 0.0  ;;  %vm3750_vm7 = vcmp.gt.f32.partialorder %v6817_v49, 0.0 }
 0x389   : > { %v3777_v11 = vmul.f32 0.2, %v6799_v9  ;;  %v3778_v5 = vmul.f32 0.2, %v6801_v60  ;;  %v3779_v43 = vmul.f32 0.2, %v6803_v22  ;;  %v6895_v15 = vsel %vm3738_vm11, %v6793_v6, %v3774_v62 }
 0x38a   : > { %vm3755_vm5 = vcmp.gt.f32.partialorder %v6827_v30, 0.0  ;;  %v3780_v56 = vmul.f32 0.2, %v6805_v55  ;;  %v3781_v26 = vmul.f32 0.2, %v6807_v47  ;;  %vm3759_vm4 = vcmp.gt.f32.partialorder %v6835_v57, 0.0 }
 0x38b   : > { %v3782_v44 = vmul.f32 0.2, %v6809_v52  ;;  %v3783_v1 = vmul.f32 0.2, %v6811_v17  ;;  %v3784_v40 = vmul.f32 0.2, %v6813_v18  ;;  %v6907_v36 = vsel %vm3739_vm12, %v6795_v32, %v3775_v61 }
 0x38c   : > { %v3785_v27 = vmul.f32 0.2, %v6815_v10  ;;  %vm3763_vm10 = vcmp.gt.f32.partialorder %v6843_v59, 0.0  ;;  %v3786_v19 = vmul.f32 0.2, %v6817_v49  ;;  %v6919_v28 = vsel %vm3740_vm13, %v6797_v45, %v3776_v34 }
 0x38d   : > { %v3787_v20 = vmul.f32 0.2, %v6819_v53  ;;  %v3788_v63 = vmul.f32 0.2, %v6821_v58  ;;  %vm3767_vm9 = vcmp.gt.f32.partialorder %v6851_v38, 0.0  ;;  %v6931_v0 = vsel %vm3741_vm14, %v6799_v9, %v3777_v11 }
 0x38e   : > { %v3789_v3 = vmul.f32 0.2, %v6823_v13  ;;  %v3790_v37 = vmul.f32 0.2, %v6825_v23  ;;  %v3791_v51 = vmul.f32 0.2, %v6827_v30  ;;  %v6943_v50 = vsel %vm3742_vm15, %v6801_v60, %v3778_v5 }
 0x38f   : > { %vm3769_vm12 = vcmp.gt.f32.partialorder %v6855_v48, 0.0  ;;  %vm3770_vm11 = vcmp.gt.f32.partialorder %v6857_v16, 0.0  ;;  %vm3771_vm8 = vcmp.gt.f32.partialorder %v6859_v14, 0.0  ;;  %v3792_v42 = vmul.f32 0.2, %v6829_v31  ;;  %7329 = vst [vmem:[#allocation9_spill] sm:$0xff] %v6943_v50 }
 0x390   : > { %v3793_v35 = vmul.f32 0.2, %v6831_v29  ;;  %v3794_v46 = vmul.f32 0.2, %v6833_v2  ;;  %vm3772_vm14 = vcmp.gt.f32.partialorder %v6870_v33, 0.0  ;;  %vm3773_vm13 = vcmp.gt.f32.partialorder %v6876_v4, 0.0 }
 0x391   : > { %v3795_v7 = vmul.f32 0.2, %v6835_v57  ;;  %v3796_v12 = vmul.f32 0.2, %v6837_v41  ;;  %v3797_v6 = vmul.f32 0.2, %v6839_v24  ;;  %v6953_v32 = vsel %vm3743_vm0, %v6803_v22, %v3779_v43 }
 0x392   : > { %7330 = vst [vmem:[#allocation8_spill] sm:$0xff] %v6953_v32  ;;  %v3798_v45 = vmul.f32 0.2, %v6841_v39  ;;  %v3799_v9 = vmul.f32 0.2, %v6843_v59  ;;  %v6961_v62 = vsel %vm3744_vm1, %v6805_v55, %v3780_v56  ;;  %vm3990_vm15 = vcmask 257024  }
 0x393   : > { %v3800_v60 = vmul.f32 0.2, %v6845_v25  ;;  %7331 = vst [vmem:[#allocation12_spill] sm:$0xff] %v6961_v62  ;;  %v3801_v61 = vmul.f32 0.2, %v6847_v54  ;;  %v6969_v11 = vsel %vm3745_vm2, %v6807_v47, %v3781_v26  ;;  %v3818_v56 = vsel %vm3746_vm3, %v6809_v52, %v3782_v44 }
 0x394   : > { %v3802_v34 = vmul.f32 0.2, %v6849_v8  ;;  %v3803_v22 = vmul.f32 0.2, %v6851_v38  ;;  %7332 = vst [vmem:[#allocation10_spill] sm:$0xff] %v6969_v11  ;;  %vm7333_vm0 = vcmp.gt.f32.partialorder %v6811_v17, 0.0  ;;  %v3821_v11 = vsel %vm3749_vm6, %v6815_v10, %v3785_v27 }
 0x395   : > { %v3804_v5 = vmul.f32 0.2, %v6853_v21  ;;  %v3805_v43 = vmul.f32 0.2, %v6855_v48  ;;  %v3806_v55 = vmul.f32 0.2, %v6857_v16  ;;  %v3819_v47 = vsel %vm7333_vm0, %v6811_v17, %v3783_v1 }
 0x396   : > { %v3807_v62 = vmul.f32 0.2, %v6859_v14  ;;  %v3808_v32 = vmul.f32 0.2, %v6870_v33  ;;  %v3809_v50 = vmul.f32 0.2, %v6876_v4  ;;  %v3822_v52 = vsel %vm3750_vm7, %v6817_v49, %v3786_v19 }
 0x397   : > { %vm7334_vm1 = vcmp.gt.f32.partialorder %v6813_v18, 0.0  ;;  %vm7335_vm2 = vcmp.gt.f32.partialorder %v6819_v53, 0.0  ;;  %vm7336_vm3 = vcmp.gt.f32.partialorder %v6821_v58, 0.0  ;;  %vm7337_vm0 = vcmp.gt.f32.partialorder %v6823_v13, 0.0  ;;  %v7349_v1 = vld [vmem:[#allocation9_spill] sm:$0xff] }
 0x398   : > { %v3820_v26 = vsel %vm7334_vm1, %v6813_v18, %v3784_v40  ;;  %v3823_v44 = vsel %vm7335_vm2, %v6819_v53, %v3787_v20  ;;  %v6999_v17 = vsel %vm7336_vm3, %v6821_v58, %v3788_v63  ;;  %v7004_v18 = vsel %vm7337_vm0, %v6823_v13, %v3789_v3 }
 0x399   : > { %vm7338_vm6 = vcmp.gt.f32.partialorder %v6825_v23, 0.0  ;;  %v7014_v49 = vsel %vm3755_vm5, %v6827_v30, %v3791_v51  ;;  %vm7339_vm7 = vcmp.gt.f32.partialorder %v6829_v31, 0.0  ;;  %vm7340_vm1 = vcmp.gt.f32.partialorder %v6831_v29, 0.0  ;;  %v7350_v40 = vld [vmem:[#allocation8_spill] sm:$0xff] }
 0x39a   : > { %v7009_v10 = vsel %vm7338_vm6, %v6825_v23, %v3790_v37  ;;  %v7019_v53 = vsel %vm7339_vm7, %v6829_v31, %v3792_v42  ;;  %v7024_v58 = vsel %vm7340_vm1, %v6831_v29, %v3793_v35  ;;  %vm7341_vm2 = vcmp.gt.f32.partialorder %v6833_v2, 0.0 }
 0x39b   : > { %v7029_v13 = vsel %vm7341_vm2, %v6833_v2, %v3794_v46  ;;  %v7034_v23 = vsel %vm3759_vm4, %v6835_v57, %v3795_v7  ;;  %vm7342_vm5 = vcmp.gt.f32.partialorder %v6837_v41, 0.0  ;;  %vm7343_vm3 = vcmp.gt.f32.partialorder %v6839_v24, 0.0  ;;  %v7352_v20 = vld [vmem:[#allocation10_spill] sm:$0xff] }
 0x39c   : > { %v7039_v30 = vsel %vm7342_vm5, %v6837_v41, %v3796_v12  ;;  %v7044_v31 = vsel %vm7343_vm3, %v6839_v24, %v3797_v6  ;;  %vm7344_vm0 = vcmp.gt.f32.partialorder %v6841_v39, 0.0  ;;  %v7054_v2 = vsel %vm3763_vm10, %v6843_v59, %v3799_v9 }
 0x39d   : > { %v7049_v29 = vsel %vm7344_vm0, %v6841_v39, %v3798_v45  ;;  %vm7345_vm4 = vcmp.gt.f32.partialorder %v6845_v25, 0.0  ;;  %vm7346_vm6 = vcmp.gt.f32.partialorder %v6847_v54, 0.0  ;;  %vm7347_vm7 = vcmp.gt.f32.partialorder %v6849_v8, 0.0 }
 0x39e   : > { %v7059_v57 = vsel %vm7345_vm4, %v6845_v25, %v3800_v60  ;;  %v7064_v41 = vsel %vm7346_vm6, %v6847_v54, %v3801_v61  ;;  %v7069_v24 = vsel %vm7347_vm7, %v6849_v8, %v3802_v34  ;;  %v7074_v39 = vsel %vm3767_vm9, %v6851_v38, %v3803_v22 }
 0x39f   : > { %vm7348_vm10 = vcmp.gt.f32.partialorder %v6853_v21, 0.0  ;;  %v7089_v25 = vsel %vm3769_vm12, %v6855_v48, %v3805_v43  ;;  %v7094_v54 = vsel %vm3770_vm11, %v6857_v16, %v3806_v55  ;;  %v7099_v8 = vsel %vm3771_vm8, %v6859_v14, %v3807_v62 }
 0x3a0   : > { %v7084_v59 = vsel %vm7348_vm10, %v6853_v21, %v3804_v5  ;;  %v7104_v38 = vsel %vm3772_vm14, %v6870_v33, %v3808_v32  ;;  %v7109_v21 = vsel %vm3773_vm13, %v6876_v4, %v3809_v50  ;;  %v4321_v48 = vpack.c.bf16 %v6895_v15, %v6895_v15  ;;  %v7351_v15 = vld [vmem:[#allocation12_spill] sm:$0xff] }
 0x3a1   : > { %v4322_v16 = vpack.c.bf16 %v6907_v36, %v6907_v36  ;;  %v4323_v14 = vpack.c.bf16 %v6919_v28, %v6919_v28  ;;  %v4324_v33 = vpack.c.bf16 %v6931_v0, %v6931_v0  ;;  %v4325_v4 = vpack.c.bf16 %v7349_v1, %v7349_v1 }
 0x3a2   : > { %v4326_v27 = vpack.c.bf16 %v7350_v40, %v7350_v40  ;;  %v4327_v19 = vpack.c.bf16 %v7351_v15, %v7351_v15  ;;  %v4328_v36 = vpack.c.bf16 %v7352_v20, %v7352_v20  ;;  %v4329_v63 = vpack.c.bf16 %v3818_v56, %v3818_v56  ;;  %3991 = vst.msk [vmem:[%s7079_s17] sm:$0xf] %vm3990_vm15, %v4321_v48 }
 0x3a3   : > { %v4330_v28 = vpack.c.bf16 %v3819_v47, %v3819_v47  ;;  %3992 = vst.msk [vmem:[%s7079_s17 + $0x4] sm:$0xf] %vm3990_vm15, %v4322_v16  ;;  %v4331_v3 = vpack.c.bf16 %v3820_v26, %v3820_v26  ;;  %v4332_v37 = vpack.c.bf16 %v3821_v11, %v3821_v11  ;;  %v4333_v51 = vpack.c.bf16 %v3822_v52, %v3822_v52 }
 0x3a4   : > { %v4334_v0 = vpack.c.bf16 %v3823_v44, %v3823_v44  ;;  %3993 = vst.msk [vmem:[%s7079_s17 + $0x8] sm:$0xf] %vm3990_vm15, %v4323_v14  ;;  %3994 = vst.msk [vmem:[%s7079_s17 + $0xc] sm:$0xf] %vm3990_vm15, %v4324_v33  ;;  %v4335_v42 = vpack.c.bf16 %v6999_v17, %v6999_v17  ;;  %v4336_v35 = vpack.c.bf16 %v7004_v18, %v7004_v18 }
 0x3a5   : > { %3995 = vst.msk [vmem:[%s7079_s17 + $0x10] sm:$0xf] %vm3990_vm15, %v4325_v4  ;;  %3996 = vst.msk [vmem:[%s7079_s17 + $0x14] sm:$0xf] %vm3990_vm15, %v4326_v27  ;;  %v4337_v46 = vpack.c.bf16 %v7009_v10, %v7009_v10  ;;  %v4338_v50 = vpack.c.bf16 %v7014_v49, %v7014_v49  ;;  %v4339_v7 = vpack.c.bf16 %v7019_v53, %v7019_v53 }
 0x3a6   : > { %3997 = vst.msk [vmem:[%s7079_s17 + $0x18] sm:$0xf] %vm3990_vm15, %v4327_v19  ;;  %3998 = vst.msk [vmem:[%s7079_s17 + $0x1c] sm:$0xf] %vm3990_vm15, %v4328_v36  ;;  %v4340_v12 = vpack.c.bf16 %v7024_v58, %v7024_v58  ;;  %v4341_v6 = vpack.c.bf16 %v7029_v13, %v7029_v13  ;;  %v4342_v32 = vpack.c.bf16 %v7034_v23, %v7034_v23 }
 0x3a7   : > { %3999 = vst.msk [vmem:[%s7079_s17 + $0x20] sm:$0xf] %vm3990_vm15, %v4329_v63  ;;  %4000 = vst.msk [vmem:[%s7079_s17 + $0x24] sm:$0xf] %vm3990_vm15, %v4330_v28  ;;  %v4343_v45 = vpack.c.bf16 %v7039_v30, %v7039_v30  ;;  %v4344_v9 = vpack.c.bf16 %v7044_v31, %v7044_v31  ;;  %v4345_v60 = vpack.c.bf16 %v7049_v29, %v7049_v29 }
 0x3a8   : > { %4001 = vst.msk [vmem:[%s7079_s17 + $0x28] sm:$0xf] %vm3990_vm15, %v4331_v3  ;;  %4002 = vst.msk [vmem:[%s7079_s17 + $0x2c] sm:$0xf] %vm3990_vm15, %v4332_v37  ;;  %v4346_v62 = vpack.c.bf16 %v7054_v2, %v7054_v2  ;;  %v4347_v61 = vpack.c.bf16 %v7059_v57, %v7059_v57  ;;  %v4348_v34 = vpack.c.bf16 %v7064_v41, %v7064_v41 }
 0x3a9   : > { %4003 = vst.msk [vmem:[%s7079_s17 + $0x30] sm:$0xf] %vm3990_vm15, %v4333_v51  ;;  %4004 = vst.msk [vmem:[%s7079_s17 + $0x34] sm:$0xf] %vm3990_vm15, %v4334_v0  ;;  %v4349_v22 = vpack.c.bf16 %v7069_v24, %v7069_v24  ;;  %v4350_v11 = vpack.c.bf16 %v7074_v39, %v7074_v39  ;;  %v4351_v5 = vpack.c.bf16 %v7084_v59, %v7084_v59 }
 0x3aa   : > { %4005 = vst.msk [vmem:[%s7079_s17 + $0x38] sm:$0xf] %vm3990_vm15, %v4335_v42  ;;  %4006 = vst.msk [vmem:[%s7079_s17 + $0x3c] sm:$0xf] %vm3990_vm15, %v4336_v35  ;;  %v4352_v43 = vpack.c.bf16 %v7089_v25, %v7089_v25  ;;  %v4353_v55 = vpack.c.bf16 %v7094_v54, %v7094_v54  ;;  %v4354_v56 = vpack.c.bf16 %v7099_v8, %v7099_v8 }
 0x3ab   : > { %4007 = vst.msk [vmem:[%s7079_s17 + $0x40] sm:$0xf] %vm3990_vm15, %v4337_v46  ;;  %4008 = vst.msk [vmem:[%s7079_s17 + $0x44] sm:$0xf] %vm3990_vm15, %v4338_v50  ;;  %v4355_v47 = vpack.c.bf16 %v7104_v38, %v7104_v38  ;;  %v4356_v26 = vpack.c.bf16 %v7109_v21, %v7109_v21 }
 0x3ac   : > { %4009 = vst.msk [vmem:[%s7079_s17 + $0x48] sm:$0xf] %vm3990_vm15, %v4339_v7  ;;  %4010 = vst.msk [vmem:[%s7079_s17 + $0x4c] sm:$0xf] %vm3990_vm15, %v4340_v12 }
 0x3ad   : > { %4011 = vst.msk [vmem:[%s7079_s17 + $0x50] sm:$0xf] %vm3990_vm15, %v4341_v6  ;;  %4012 = vst.msk [vmem:[%s7079_s17 + $0x54] sm:$0xf] %vm3990_vm15, %v4342_v32 }
 0x3ae   : > { %4013 = vst.msk [vmem:[%s7079_s17 + $0x58] sm:$0xf] %vm3990_vm15, %v4343_v45  ;;  %4014 = vst.msk [vmem:[%s7079_s17 + $0x5c] sm:$0xf] %vm3990_vm15, %v4344_v9 }
 0x3af   : > { %4015 = vst.msk [vmem:[%s7079_s17 + $0x60] sm:$0xf] %vm3990_vm15, %v4345_v60  ;;  %4016 = vst.msk [vmem:[%s7079_s17 + $0x64] sm:$0xf] %vm3990_vm15, %v4346_v62 }
 0x3b0   : > { %4017 = vst.msk [vmem:[%s7079_s17 + $0x68] sm:$0xf] %vm3990_vm15, %v4347_v61  ;;  %4018 = vst.msk [vmem:[%s7079_s17 + $0x6c] sm:$0xf] %vm3990_vm15, %v4348_v34 }
 0x3b1   : > { %4019 = vst.msk [vmem:[%s7079_s17 + $0x70] sm:$0xf] %vm3990_vm15, %v4349_v22  ;;  %4020 = vst.msk [vmem:[%s7079_s17 + $0x74] sm:$0xf] %vm3990_vm15, %v4350_v11 }
 0x3b2   : > { %4021 = vst.msk [vmem:[%s7079_s17 + $0x78] sm:$0xf] %vm3990_vm15, %v4351_v5  ;;  %4022 = vst.msk [vmem:[%s7079_s17 + $0x7c] sm:$0xf] %vm3990_vm15, %v4352_v43 }
 0x3b3   : > { %4023 = vst.msk [vmem:[%s7079_s17 + $0x80] sm:$0xf] %vm3990_vm15, %v4353_v55  ;;  %4024 = vst.msk [vmem:[%s7079_s17 + $0x84] sm:$0xf] %vm3990_vm15, %v4354_v56 }
 0x3b4   : > { %4025 = vst.msk [vmem:[%s7079_s17 + $0x88] sm:$0xf] %vm3990_vm15, %v4355_v47  ;;  %4026 = vst.msk [vmem:[%s7079_s17 + $0x8c] sm:$0xf] %vm3990_vm15, %v4356_v26 }
 0x3b5 PF: > { %s16_s21 = sadd.s32 1, %s5225_s21  }
 0x3b6   : > { %p13_p4 = scmp.ge.s32.totalorder %s16_s21, 4  }
 0x3b8   :  { %15 = sbr.rel (!%p13_p4) target bundleno = 1 (0x1), region = 82 }

// kernel: encoder_forward.5
= control target key start
LH: loop header
LB: loop body
LE: loop exit
PB: predicated region body
PF: predicated region fallthrough
CT: control target
= control target key end

     0   :  { %s1733_s21 = smov 0   ;;  %s2169_s0 = inlined_call_operand.vmem [shape: bf16[2,90,128], index: 0, kind: input, shape index: {}]   ;;  %s2170_s1 = inlined_call_operand.vmem [shape: bf16[4,128,32], index: 1, kind: input, shape index: {}]   ;;  %s2171_s2 = inlined_call_operand.vmem [shape: f32[72,1], index: 2, kind: input, shape index: {}]   ;;  %s2172_s3 = inlined_call_operand.vmem [shape: f32[1,32], index: 3, kind: input, shape index: {}]   ;;  %s2173_s4 = inlined_call_operand.vmem [shape: f32[1,32], index: 4, kind: input, shape index: {}]   ;;  %s2174_s5 = inlined_call_operand.vmem [shape: f32[1,32], index: 5, kind: input, shape index: {}]   ;;  %s2175_s6 = inlined_call_operand.vmem [shape: bf16[2,72,32], index: 6, kind: output, shape index: {}]  }
   0x1 LB: > { %s1308_s22 = sadd.s32 4294967295, %s1692_s21   ;;  %p1312_p0 = scmp.ge.s32.totalorder %s1692_s21, 1  ;;  %s1692_s21 = sphi %s1733_s21, %s16_s21  }
   0x2   : > { %p212_p1 = scmp.lt.s32.totalorder %s1692_s21, 3 }
   0x4   : > { %p213_p2 = pnand %p1312_p0, %p212_p1 }
   0x5   : > { %v1639_v0 = vld [vmem:[%s2170_s1 + $0x40] sm:$0xff] (!%p213_p2)   ;;  %v1694_v1 = vmov (!%p213_p2), 0.0   ;;  %v1641_v3 = vld [vmem:[%s2170_s1 + $0x48] sm:$0xff] (!%p213_p2)   ;;  %vm1695_vm0 = vmmov (!%p213_p2), 0   ;;  %p242_p3 = scmp.lt.s32.totalorder (!%p213_p2), %s1308_s22, 1  ;;  %v1643_v5 = vld [vmem:[%s2170_s1 + $0x50] sm:$0xff] (!%p213_p2)  }
   0x6   : > { %216 = sbr.rel (%p213_p2) target bundleno = 652 (0x28c), region = 44  ;;  %1479 = vmatprep.subr.bf16.mxu0 (!%p213_p2), %v1694_v1  ;;  %1515 = vmatprep.subr.bf16.mxu1 (!%p213_p2), %v1694_v1  ;;  %v1640_v2 = vld [vmem:[%s2170_s1] sm:$0xff] (!%p213_p2)   ;;  %v1642_v4 = vld [vmem:[%s2170_s1 + $0x8] sm:$0xff] (!%p213_p2)   ;;  %v1696_v6 = vmov (!%p213_p2), 0   ;;  %v1644_v7 = vld [vmem:[%s2170_s1 + $0x10] sm:$0xff] (!%p213_p2)   ;;  %vm828_vm2 = vcmask (!%p213_p2), 1046528  }
   0x7   : > { %1480 = vmatpush3.bf16.msra.mxu0 (!%p213_p2), %v1639_v0  ;;  %1495 = vmatprep.mubr.msk.bf16.mxu0 (!%p213_p2), %vm1695_vm0, %v1694_v1  ;;  %v1645_v8 = vld [vmem:[%s2170_s1 + $0x58] sm:$0xff] (!%p213_p2)   ;;  %v1647_v10 = vld [vmem:[%s2170_s1 + $0x60] sm:$0xff] (!%p213_p2)   ;;  %v1649_v17 = vld [vmem:[%s2170_s1 + $0x68] sm:$0xff] (!%p213_p2)   ;;  %vm326_vm1 = vsmask.f32 (!%p213_p2), 7424  ;;  %vm1041_vm3 = vcmask (!%p213_p2), 261120  }
   0x8   : > { %1516 = vmatpush3.bf16.msra.mxu1 (!%p213_p2), %v1640_v2  ;;  %1481 = vmatprep.subr.bf16.mxu0 (!%p213_p2), %v1694_v1  ;;  %v1646_v9 = vld [vmem:[%s2170_s1 + $0x18] sm:$0xff] (!%p213_p2)   ;;  %v1648_v11 = vld [vmem:[%s2170_s1 + $0x20] sm:$0xff] (!%p213_p2)   ;;  %v1650_v19 = vld [vmem:[%s2170_s1 + $0x28] sm:$0xff] (!%p213_p2)   ;;  %s1697_s24 = smov (!%p213_p2), 112   ;;  %vm1106_vm4 = vcmask (!%p213_p2), 130048   ;;  %vm1243_vm6 = vcmask (!%p213_p2), 257024  }
   0x9   : > { %1517 = vmatprep.subr.bf16.mxu1 (!%p213_p2), %v1694_v1  ;;  %1531 = vmatprep.mubr.msk.bf16.mxu1 (!%p213_p2), %vm1695_vm0, %v1694_v1  ;;  %v1651_v21 = vld [vmem:[%s2170_s1 + $0x70] sm:$0xff] (!%p213_p2)   ;;  %v1653_v29 = vld [vmem:[%s2170_s1 + $0x78] sm:$0xff] (!%p213_p2)   ;;  %v1658_v34 = vld [vmem:[%s2170_s1 + $0x80] sm:$0xff] (!%p213_p2)  }
   0xa   : > { %1637 = vset.pattern.permute.xlu0 (!%p213_p2), %v1696_v6  ;;  %1638 = vset.pattern.permute.xlu1 (!%p213_p2), %v1696_v6  ;;  %v1652_v22 = vld [vmem:[%s2170_s1 + $0x30] sm:$0xff] (!%p213_p2)   ;;  %v1654_v30 = vld [vmem:[%s2170_s1 + $0x38] sm:$0xff] (!%p213_p2)   ;;  %v1659_v35 = vld [vmem:[%s2170_s1 + $0xc0] sm:$0xff] (!%p213_p2)  }
   0xb   : > { %1482 = vmatpush3.bf16.msra.mxu0 (!%p213_p2), %v1641_v3  ;;  %v1660_v40 = vld [vmem:[%s2170_s1 + $0x88] sm:$0xff] (!%p213_p2)   ;;  %v256_v49 = vld [vmem:[%s2171_s2] sm:$0xff] (!%p213_p2)  ;;  %v258_v51 = vld [vmem:[%s2171_s2 + $0x10] sm:$0xff] (!%p213_p2) }
   0xc   : > { %1518 = vmatpush3.bf16.msra.mxu1 (!%p213_p2), %v1642_v4  ;;  %1483 = vmatprep.subr.bf16.mxu0 (!%p213_p2), %v1694_v1  ;;  %v1663_v46 = vld [vmem:[%s2170_s1 + $0xc8] sm:$0xff] (!%p213_p2)   ;;  %v1664_v53 = vld [vmem:[%s2170_s1 + $0x90] sm:$0xff] (!%p213_p2)   ;;  %v1667_v0 = vld [vmem:[%s2170_s1 + $0x98] sm:$0xff] (!%p213_p2)  }
   0xd   : > { %s2177_s22 = smov (!%p242_p3, %s1308_s22), 1  ;;  %1519 = vmatprep.subr.bf16.mxu1 %v1694_v1  ;;  %989 = vperm.xlu0 %1637, %v256_v49   ;;  %v257_v56 = vld [vmem:[%s2171_s2 + $0x8] sm:$0xff]  ;;  %v1665_v57 = vld [vmem:[%s2170_s1 + $0xd0] sm:$0xff]   ;;  %v260_v3 = vld [vmem:[%s2171_s2 + $0x20] sm:$0xff] }
   0xe   : > { %s1623_s11 = smul.u32 48, %s2177_s22  ;;  %999 = vperm.xlu1 %1638, %v258_v51   ;;  %v1668_v4 = vld [vmem:[%s2170_s1 + $0xd8] sm:$0xff]  }
   0xf   : > { %1484 = vmatpush3.bf16.msra.mxu0 %v1643_v5  ;;  %s1624_s29 = smul.u32 36, %s2177_s22 }
  0x10   : > { %1520 = vmatpush3.bf16.msra.mxu1 %v1644_v7  ;;  %1485 = vmatprep.subr.bf16.mxu0 %v1694_v1  ;;  %s1783_s18 = scalar_lea.vmem %s2169_s0, %s1623_s11  ;;  %v259_v7 = vld [vmem:[%s2171_s2 + $0x18] sm:$0xff] }
  0x11   : > { %1521 = vmatprep.subr.bf16.mxu1 %v1694_v1  ;;  %v265_v12 = vld [vmem:[%s1783_s18] sm:$0xf]  ;;  %v1795_v13 = vld [vmem:[%s1783_s18 + $0x4] sm:$0xf]  ;;  %v1798_v14 = vld [vmem:[%s1783_s18 + $0x8] sm:$0xf]  ;;  %994 = vperm.xlu0 %1637, %v257_v56   ;;  %s251_s30 = scalar_lea.vmem %s2175_s6, %s1624_s29 }
  0x12   : > { %v1801_v15 = vld [vmem:[%s1783_s18 + $0xc] sm:$0xf]  ;;  %v1315_v16 = vcombine.low %v265_v12, %v1795_v13  ;;  %v1823_v24 = vld [vmem:[%s1783_s18 + $0x10] sm:$0xf]  ;;  %v1826_v25 = vld [vmem:[%s1783_s18 + $0x14] sm:$0xf]  ;;  %1004 = vperm.xlu1 %1638, %v259_v7  }
  0x13   : > { %1486 = vmatpush3.bf16.msra.mxu0 %v1645_v8  ;;  %v1809_v18 = vcombine.low %v1798_v14, %v1801_v15  ;;  %v1833_v28 = vcombine.low %v1823_v24, %v1826_v25  ;;  %v1853_v38 = vld [vmem:[%s1783_s18 + $0x18] sm:$0xf]  ;;  %v272_v39 = vld [vmem:[%s1783_s18 + $0x1c] sm:$0xf]  ;;  %v1862_v42 = vld [vmem:[%s1783_s18 + $0x20] sm:$0xf] }
  0x14   : > { %1522 = vmatpush3.bf16.msra.mxu1 %v1646_v9  ;;  %1487 = vmatprep.subr.bf16.mxu0 %v1694_v1  ;;  %v330_v20 = vshll.u32 %v1315_v16, 16  ;;  %v328_v23 = vshrl.u32 %v1315_v16, 16  ;;  %v1865_v44 = vcombine.low %v1853_v38, %v272_v39  ;;  %v275_v45 = vld [vmem:[%s1783_s18 + $0x28] sm:$0xf]  ;;  %v1873_v47 = vcombine.low %v272_v39, %v1862_v42  ;;  %v274_v48 = vld [vmem:[%s1783_s18 + $0x24] sm:$0xf] }
  0x15   : > { %1523 = vmatprep.subr.bf16.mxu1 %v1694_v1  ;;  %v335_v27 = vshll.u32 %v1809_v18, 16  ;;  %v343_v33 = vshll.u32 %v1833_v28, 16  ;;  %v339_v36 = vshrl.u32 %v1809_v18, 16  ;;  %v1884_v50 = vcombine.low %v274_v48, %v275_v45  ;;  %1009 = vperm.xlu0 %1637, %v260_v3  }
  0x16   : > { %v332_v26 = vrot.slane %v330_v20, 1  ;;  %v347_v54 = vshrl.u32 %v1833_v28, 16  ;;  %v351_v55 = vshll.u32 %v1865_v44, 16  ;;  %v657_v58 = vshll.u32 %v1873_v47, 16  ;;  %v1673_v20 = vld [vmem:[%s2170_s1 + $0xa8] sm:$0xff]  }
  0x17   : > { %1488 = vmatpush3.bf16.msra.mxu0 %v1647_v10  ;;  %v337_v32 = vrot.slane %v335_v27, 1  ;;  %v345_v41 = vrot.slane %v343_v33, 1  ;;  %v661_v59 = vshrl.u32 %v1873_v47, 16  ;;  %v665_v61 = vshll.u32 %v1884_v50, 16  ;;  %v1669_v10 = vld [vmem:[%s2170_s1 + $0xa0] sm:$0xff]  }
  0x18   : > { %1524 = vmatpush3.bf16.msra.mxu1 %v1648_v11  ;;  %1489 = vmatprep.subr.bf16.mxu0 %v1694_v1  ;;  %v333_v31 = vor.u32 %v332_v26, %v328_v23  ;;  %v1905_v60 = vrot.slane %v657_v58, 1  ;;  %v353_v63 = vrot.slane %v351_v55, 1  ;;  %v1913_v2 = vcombine.low %v1862_v42, %v274_v48  ;;  %v1674_v23 = vld [vmem:[%s2170_s1 + $0xe8] sm:$0xff]  }
  0x19   : > { %1525 = vmatprep.subr.bf16.mxu1 %v1694_v1  ;;  %v341_v43 = vor.u32 %v339_v36, %v337_v32  ;;  %v349_v62 = vor.u32 %v347_v54, %v345_v41  ;;  %v1924_v6 = vrot.slane %v665_v61, 1  ;;  %v355_v11 = vshrl.u32 %v1865_v44, 16 }
  0x1a   : > { %v338_v37 = vsel %vm326_vm1, %v333_v31, %v337_v32  ;;  %v663_v5 = vor.u32 %v661_v59, %v1905_v60  ;;  %v359_v12 = vshll.u32 %v1913_v2, 16  ;;  %v1353_v26 = vcombine.low %v1795_v13, %v1798_v14  ;;  %v263_v31 = vld [vmem:[%s2171_s2 + $0x38] sm:$0xff] }
  0x1b   : > { %1490 = vmatpush3.bf16.msra.mxu0 %v1649_v17  ;;  %v346_v52 = vsel %vm326_vm1, %v341_v43, %v345_v41  ;;  %v354_v9 = vsel %vm326_vm1, %v349_v62, %v353_v63  ;;  %v1670_v17 = vld [vmem:[%s2170_s1 + $0xe0] sm:$0xff]   ;;  %v1354_v13 = vcombine.low %v1801_v15, %v1823_v24  ;;  %v1678_v32 = vld [vmem:[%s2170_s1 + $0xb8] sm:$0xff]   ;;  %v1319_v33 = vcombine.low %v1862_v42, %v1862_v42 }
  0x1c   : > { %1526 = vmatpush3.bf16.msra.mxu1 %v1650_v19  ;;  %1491 = vmatprep.subr.bf16.mxu0 %v1694_v1  ;;  %v1935_v8 = vsel %vm326_vm1, %v663_v5, %v1924_v6  ;;  %v361_v19 = vrot.slane %v359_v12, 1  ;;  %v636_v14 = vshll.u32 %v1353_v26, 16  ;;  %v1679_v15 = vld [vmem:[%s2170_s1 + $0xf8] sm:$0xff]   ;;  %v829_v41 = vrot.slane %v1353_v26, 1 }
  0x1d   : > { %1527 = vmatprep.subr.bf16.mxu1 %v1694_v1  ;;  %v641_v36 = vshll.u32 %v1354_v13, 16  ;;  %v830_v42 = vrot.slane %v1354_v13, 1  ;;  %v834_v54 = vrot.slane %v1873_v47, 1  ;;  %v669_v47 = vshrl.u32 %v1884_v50, 16 }
  0x1f   : > { %1492 = vmatpush3.bf16.msra.mxu0 %v1651_v21  ;;  %v261_v21 = vld [vmem:[%s2171_s2 + $0x28] sm:$0xff]  ;;  %v643_v39 = vrot.slane %v641_v36, 1  ;;  %v671_v59 = vor.u32 %v669_v47, %v1924_v6 }
  0x20   : > { %1528 = vmatpush3.bf16.msra.mxu1 %v1652_v22  ;;  %1493 = vmatprep.subr.bf16.mxu0 %v1694_v1  ;;  %v264_v22 = vld [vmem:[%s2171_s2 + $0x40] sm:$0xff] }
  0x21   : > { %1529 = vmatprep.subr.bf16.mxu1 %v1694_v1  ;;  %1014 = vperm.xlu1 %1638, %v261_v21  }
  0x23   : > { %1494 = vmatpush3.bf16.msra.mxu0 %v1653_v29  ;;  %v1677_v29 = vld [vmem:[%s2170_s1 + $0xf0] sm:$0xff]  }
  0x24   : > { %1530 = vmatpush3.bf16.msra.mxu1 %v1654_v30  ;;  %1551 = vmatprep.subr.bf16.mxu0 %v1694_v1  ;;  %v363_v30 = vshrl.u32 %v1913_v2, 16 }
  0x25   : > { %1587 = vmatprep.subr.bf16.mxu1 %v1694_v1  ;;  %1024 = vperm.xlu1 %1638, %v263_v31  }
  0x26   : > { %1496 = vmatmul.mubr.bf16.vlgmr.msra.gmra.mrb[0].mxu0 %v338_v37  ;;  %v365_v24 = vor.u32 %v363_v30, %v361_v19 }
  0x27   : > { %1532 = vmatmul.mubr.bf16.vlgmr.msra.gmra.mrb[0].mxu1 %v1315_v16  ;;  %1552 = vmatpush3.bf16.msra.mxu0 %v1658_v34  ;;  %v262_v16 = vld [vmem:[%s2171_s2 + $0x30] sm:$0xff]  ;;  %v634_v34 = vshrl.u32 %v1353_v26, 16 }
  0x28   : > { %1588 = vmatpush3.bf16.msra.mxu1 %v1659_v35  ;;  %1553 = vmatprep.subr.bf16.mxu0 %v1694_v1  ;;  %v638_v35 = vrot.slane %v636_v14, 1 }
  0x29   : > { %1499 = vmatprep.mubr.msk.bf16.mxu0 %vm1695_vm0, %v1694_v1  ;;  %1535 = vmatprep.mubr.msk.bf16.mxu1 %vm1695_vm0, %v1694_v1 }
  0x2a   : > { %1589 = vmatprep.subr.bf16.mxu1 %v1694_v1  ;;  %1019 = vperm.xlu0 %1637, %v262_v16   ;;  %v639_v37 = vor.u32 %v638_v35, %v634_v34 }
  0x2b   : > { %1554 = vmatpush3.bf16.msra.mxu0 %v1660_v40  ;;  %v1355_v40 = vcombine.low %v1826_v25, %v1853_v38 }
  0x2c   : > { %1590 = vmatpush3.bf16.msra.mxu1 %v1663_v46  ;;  %1555 = vmatprep.subr.bf16.mxu0 %v1694_v1  ;;  %v644_v43 = vsel %vm326_vm1, %v639_v37, %v643_v39  ;;  %v831_v46 = vsel %vm828_vm2, %v829_v41, %v830_v42 }
  0x2d   : > { %1591 = vmatprep.subr.bf16.mxu1 %v1694_v1  ;;  %v649_v45 = vshll.u32 %v1355_v40, 16  ;;  %v832_v25 = vrot.slane %v1355_v40, 1  ;;  %v653_v51 = vshrl.u32 %v1355_v40, 16 }
  0x2e   : > { %1500 = vmatmul.mubr.bf16.gmra.mrb[4].mxu0 %v346_v52  ;;  %1029 = vperm.xlu0 %1637, %v264_v22  }
  0x2f   : > { %1536 = vmatmul.mubr.bf16.gmra.mrb[4].mxu1 %v1809_v18  ;;  %1556 = vmatpush3.bf16.msra.mxu0 %v1664_v53  ;;  %v357_v18 = vor.u32 %v355_v11, %v353_v63  ;;  %v651_v49 = vrot.slane %v649_v45, 1  ;;  %v833_v52 = vsel %vm828_vm2, %v830_v42, %v832_v25  ;;  %v835_v56 = vsel %vm828_vm2, %v832_v25, %v834_v54 }
  0x30   : > { %1592 = vmatpush3.bf16.msra.mxu1 %v1665_v57  ;;  %1503 = vmatprep.mubr.msk.bf16.mxu0 %vm1695_vm0, %v1694_v1  ;;  %v836_v57 = vrot.slane %v1884_v50, 1 }
  0x31   : > { %1539 = vmatprep.mubr.msk.bf16.mxu1 %vm1695_vm0, %v1694_v1  ;;  %1557 = vmatprep.subr.bf16.mxu0 %v1694_v1  ;;  %v362_v27 = vsel %vm326_vm1, %v357_v18, %v361_v19  ;;  %v655_v53 = vor.u32 %v653_v51, %v651_v49 }
  0x32   : > { %1593 = vmatprep.subr.bf16.mxu1 %v1694_v1  ;;  %v837_v58 = vsel %vm828_vm2, %v834_v54, %v836_v57 }
  0x33   : > { %1558 = vmatpush3.bf16.msra.mxu0 %v1667_v0  ;;  %v660_v55 = vsel %vm326_vm1, %v655_v53, %v1905_v60 }
  0x34   : > { %1594 = vmatpush3.bf16.msra.mxu1 %v1668_v4  ;;  %1559 = vmatprep.subr.bf16.mxu0 %v1694_v1 }
  0x35   : > { %1595 = vmatprep.subr.bf16.mxu1 %v1694_v1 }
  0x36   : > { %1504 = vmatmul.mubr.bf16.gmra.mrb[8].mxu0 %v354_v9 }
  0x37   : > { %1540 = vmatmul.mubr.bf16.gmra.mrb[8].mxu1 %v1833_v28  ;;  %1560 = vmatpush3.bf16.msra.mxu0 %v1669_v10  ;;  %v1675_v28 = vld [vmem:[%s2170_s1 + $0xb0] sm:$0xff]  }
  0x38   : > { %1507 = vmatprep.mubr.msk.bf16.mxu0 %vm1695_vm0, %v1694_v1  ;;  %1543 = vmatprep.mubr.msk.bf16.mxu1 %vm1695_vm0, %v1694_v1 }
  0x39   : > { %1596 = vmatpush3.bf16.msra.mxu1 %v1670_v17  ;;  %1561 = vmatprep.subr.bf16.mxu0 %v1694_v1 }
  0x3a   : > { %1597 = vmatprep.subr.bf16.mxu1 %v1694_v1 }
  0x3b   : > { %1562 = vmatpush3.bf16.msra.mxu0 %v1673_v20 }
  0x3c   : > { %1563 = vmatprep.subr.bf16.mxu0 %v1694_v1 }
  0x3d   : > { %1598 = vmatpush3.bf16.msra.mxu1 %v1674_v23 }
  0x3e   : > { %1508 = vmatmul.mubr.bf16.gmra.mrb[12].mxu0 %v362_v27  ;;  %1599 = vmatprep.subr.bf16.mxu1 %v1694_v1 }
  0x3f   : > { %1544 = vmatmul.mubr.bf16.gmra.mrb[12].mxu1 %v1865_v44  ;;  %1511 = vmatprep.mubr.msk.bf16.mxu0 %vm1695_vm0, %v1694_v1  ;;  %v645_v44 = vshrl.u32 %v1354_v13, 16 }
  0x40   : > { %1547 = vmatprep.mubr.msk.bf16.mxu1 %vm1695_vm0, %v1694_v1  ;;  %1564 = vmatpush3.bf16.msra.mxu0 %v1675_v28 }
  0x41   : > { %1600 = vmatpush3.bf16.msra.mxu1 %v1677_v29  ;;  %1565 = vmatprep.subr.bf16.mxu0 %v1694_v1  ;;  %v647_v48 = vor.u32 %v645_v44, %v643_v39 }
  0x42   : > { %1601 = vmatprep.subr.bf16.mxu1 %v1694_v1 }
  0x43   : > { %v652_v38 = vsel %vm326_vm1, %v647_v48, %v651_v49 }
  0x44   : > { %1566 = vmatpush3.bf16.msra.mxu0 %v1678_v32 }
  0x45   : > { %1602 = vmatpush3.bf16.msra.mxu1 %v1679_v15 }
  0x46   : > { %1512 = vmatmul.mubr.bf16.gmra.mrb[16].mxu0 %v365_v24 }
  0x47   : > { %1548 = vmatmul.mubr.bf16.gmra.mrb[16].mxu1 %v1319_v33  ;;  %1567 = vmatprep.mubr.msk.bf16.mxu0 %vm1695_vm0, %v1694_v1 }
  0x48   : > { %1603 = vmatprep.mubr.msk.bf16.mxu1 %vm1695_vm0, %v1694_v1 }
  0x4e   : > { %1568 = vmatmul.mubr.bf16.vlgmr.msra.gmra.mrb[20].mxu0 %v644_v43 }
  0x4f   : > { %1604 = vmatmul.mubr.bf16.vlgmr.msra.gmra.mrb[20].mxu1 %v831_v46  ;;  %1571 = vmatprep.mubr.msk.bf16.mxu0 %vm1695_vm0, %v1694_v1 }
  0x50   : > { %1607 = vmatprep.mubr.msk.bf16.mxu1 %vm1695_vm0, %v1694_v1 }
  0x56   : > { %1572 = vmatmul.mubr.bf16.gmra.mrb[24].mxu0 %v652_v38 }
  0x57   : > { %1608 = vmatmul.mubr.bf16.gmra.mrb[24].mxu1 %v833_v52  ;;  %1575 = vmatprep.mubr.msk.bf16.mxu0 %vm1695_vm0, %v1694_v1 }
  0x58   : > { %1611 = vmatprep.mubr.msk.bf16.mxu1 %vm1695_vm0, %v1694_v1 }
  0x5e   : > { %1576 = vmatmul.mubr.bf16.gmra.mrb[28].mxu0 %v660_v55 }
  0x5f   : > { %1612 = vmatmul.mubr.bf16.gmra.mrb[28].mxu1 %v835_v56  ;;  %1579 = vmatprep.mubr.msk.bf16.mxu0 %vm1695_vm0, %v1694_v1 }
  0x60   : > { %1615 = vmatprep.mubr.msk.bf16.mxu1 %vm1695_vm0, %v1694_v1 }
  0x66   : > { %1580 = vmatmul.mubr.bf16.gmra.mrb[32].mxu0 %v1935_v8 }
  0x67   : > { %1616 = vmatmul.mubr.bf16.gmra.mrb[32].mxu1 %v837_v58  ;;  %1583 = vmatprep.mubr.msk.bf16.mxu0 %vm1695_vm0, %v1694_v1  ;;  %v2050_v58 = vld [vmem:[%s2172_s3] ss:$0 sm:$0xff] }
  0x68   : > { %1619 = vmatprep.mubr.msk.bf16.mxu1 %vm1695_vm0, %v1694_v1 }
  0x6e   : > { %1584 = vmatmul.mubr.bf16.gmra.mrb[36].mxu0 %v671_v59 }
  0x6f   : > { %1620 = vmatmul.mubr.bf16.gmra.mrb[36].mxu1 %v836_v57 }
  0x8c   : > { %v990_v47 = vpop.permute.xlu0 %989 }
  0xf9   : > { %v453_v60 = vpop.f32.mrb[0].mxu0 }
  0xfa   : > { %v573_v61 = vpop.f32.mrb[0].mxu1  ;;  %v1497_v62 = vpop.f32.mrb[1].mxu0 }
  0xfb   : > { %v574_v63 = vadd.f32 %v573_v61, %v453_v60  ;;  %v1533_v0 = vpop.f32.mrb[1].mxu1  ;;  %v456_v2 = vpop.f32.mrb[2].mxu0 }
  0xfc   : > { %v576_v3 = vpop.f32.mrb[2].mxu1  ;;  %v1498_v4 = vpop.f32.mrb[3].mxu0 }
  0xfd   : > { %v577_v50 = vadd.f32 %v576_v3, %v456_v2  ;;  %v1534_v5 = vpop.f32.mrb[3].mxu1  ;;  %v1000_v60 = vpop.permute.xlu1 %999 }
 0x101   : > { %v461_v7 = vpop.f32.mrb[4].mxu0 }
 0x102   : > { %v581_v8 = vpop.f32.mrb[4].mxu1  ;;  %v1501_v9 = vpop.f32.mrb[5].mxu0 }
 0x103   : > { %v582_v10 = vadd.f32 %v581_v8, %v461_v7  ;;  %v1537_v11 = vpop.f32.mrb[5].mxu1  ;;  %v464_v1 = vpop.f32.mrb[6].mxu0 }
 0x104   : > { %v584_v12 = vpop.f32.mrb[6].mxu1  ;;  %v1502_v6 = vpop.f32.mrb[7].mxu0 }
 0x105   : > { %v585_v16 = vadd.f32 %v584_v12, %v464_v1  ;;  %v1538_v17 = vpop.f32.mrb[7].mxu1  ;;  %v995_v11 = vpop.permute.xlu0 %994 }
 0x109   : > { %v469_v18 = vpop.f32.mrb[8].mxu0 }
 0x10a   : > { %v589_v19 = vpop.f32.mrb[8].mxu1  ;;  %v1505_v20 = vpop.f32.mrb[9].mxu0 }
 0x10b   : > { %v2037_v21 = vadd.f32 %v589_v19, %v469_v18  ;;  %v1541_v22 = vpop.f32.mrb[9].mxu1  ;;  %v472_v23 = vpop.f32.mrb[10].mxu0 }
 0x10c   : > { %v592_v26 = vpop.f32.mrb[10].mxu1  ;;  %v1506_v27 = vpop.f32.mrb[11].mxu0 }
 0x10d   : > { %v2039_v28 = vadd.f32 %v592_v26, %v472_v23  ;;  %v1542_v29 = vpop.f32.mrb[11].mxu1  ;;  %v1005_v19 = vpop.permute.xlu1 %1004 }
 0x111   : > { %v477_v30 = vpop.f32.mrb[12].mxu0 }
 0x112   : > { %v597_v13 = vpop.f32.mrb[12].mxu1  ;;  %v1509_v14 = vpop.f32.mrb[13].mxu0 }
 0x113   : > { %v2041_v31 = vadd.f32 %v597_v13, %v477_v30  ;;  %v1545_v32 = vpop.f32.mrb[13].mxu1  ;;  %v480_v15 = vpop.f32.mrb[14].mxu0 }
 0x114   : > { %v600_v24 = vpop.f32.mrb[14].mxu1  ;;  %v1510_v33 = vpop.f32.mrb[15].mxu0 }
 0x115   : > { %v2043_v34 = vadd.f32 %v600_v24, %v480_v15  ;;  %v1546_v35 = vpop.f32.mrb[15].mxu1 }
 0x119   : > { %v485_v36 = vpop.f32.mrb[16].mxu0 }
 0x11a   : > { %v605_v37 = vpop.f32.mrb[16].mxu1  ;;  %v1513_v39 = vpop.f32.mrb[17].mxu0 }
 0x11b   : > { %v2045_v40 = vadd.f32 %v605_v37, %v485_v36  ;;  %v1549_v41 = vpop.f32.mrb[17].mxu1  ;;  %v488_v42 = vpop.f32.mrb[18].mxu0 }
 0x11c   : > { %v608_v43 = vpop.f32.mrb[18].mxu1  ;;  %v1514_v44 = vpop.f32.mrb[19].mxu0 }
 0x11d   : > { %v1550_v45 = vpop.f32.mrb[19].mxu1 }
 0x121   : > { %v759_v46 = vpop.f32.mrb[20].mxu0 }
 0x122   : > { %v797_v48 = vadd.f32 %v759_v46, %v574_v63  ;;  %v925_v49 = vpop.f32.mrb[20].mxu1  ;;  %v1569_v25 = vpop.f32.mrb[21].mxu0 }
 0x123   : > { %v1605_v38 = vpop.f32.mrb[21].mxu1  ;;  %v762_v51 = vpop.f32.mrb[22].mxu0 }
 0x124   : > { %v963_v52 = vadd.f32 %v925_v49, %v797_v48  ;;  %v798_v53 = vadd.f32 %v762_v51, %v577_v50  ;;  %v928_v54 = vpop.f32.mrb[22].mxu1  ;;  %v1570_v55 = vpop.f32.mrb[23].mxu0 }
 0x125   : > { %v1606_v56 = vpop.f32.mrb[23].mxu1  ;;  %v1010_v38 = vpop.permute.xlu0 %1009 }
 0x126   : > { %v964_v57 = vadd.f32 %v928_v54, %v798_v53  ;;  %v2056_v0 = vadd.f32 %v2050_v58, %v963_v52  ;;  %v1015_v55 = vpop.permute.xlu1 %1014 }
 0x128   : > { %v2053_v61 = vadd.f32 %v2050_v58, %v964_v57  ;;  %v1065_v6 = vmul.f32 %v2056_v0, %v2056_v0  ;;  %v1032_v22 = vmul.f32 %v990_v47, %v2056_v0 }
 0x129   : > { %v767_v59 = vpop.f32.mrb[24].mxu0 }
 0x12a   : > { %v933_v62 = vpop.f32.mrb[24].mxu1  ;;  %v1573_v63 = vpop.f32.mrb[25].mxu0  ;;  %v799_v2 = vadd.f32 %v767_v59, %v582_v10  ;;  %v1066_v1 = vmul.f32 %v2053_v61, %v2053_v61  ;;  %v1074_v30 = vmul.f32 %v1065_v6, %v990_v47  ;;  %v1042_v41 = vsel %vm1041_vm3, %v1032_v22, 0.0 }
 0x12b   : > { %v1609_v3 = vpop.f32.mrb[25].mxu1  ;;  %v770_v4 = vpop.f32.mrb[26].mxu0 }
 0x12c   : > { %v800_v50 = vadd.f32 %v770_v4, %v585_v16  ;;  %v936_v5 = vpop.f32.mrb[26].mxu1  ;;  %v1574_v7 = vpop.f32.mrb[27].mxu0  ;;  %v965_v8 = vadd.f32 %v933_v62, %v799_v2  ;;  %v1033_v16 = vmul.f32 %v995_v11, %v2053_v61  ;;  %v1075_v23 = vmul.f32 %v1066_v1, %v995_v11 }
 0x12d   : > { %v1610_v9 = vpop.f32.mrb[27].mxu1  ;;  %v1083_v44 = vsel %vm1041_vm3, %v1074_v30, 0.0 }
 0x12e   : > { %v966_v12 = vadd.f32 %v936_v5, %v800_v50  ;;  %v2063_v17 = vadd.f32 %v2050_v58, %v965_v8  ;;  %v1043_v37 = vsel %vm1041_vm3, %v1033_v16, 0.0  ;;  %v1084_v42 = vsel %vm1041_vm3, %v1075_v23, 0.0 }
 0x12f   : > { %v1044_v49 = vadd.f32 %v1043_v37, %v1042_v41  ;;  %v1085_v52 = vadd.f32 %v1084_v42, %v1083_v44 }
 0x130   : > { %v2066_v10 = vadd.f32 %v2050_v58, %v966_v12  ;;  %v1067_v18 = vmul.f32 %v2063_v17, %v2063_v17  ;;  %v1034_v13 = vmul.f32 %v1000_v60, %v2063_v17 }
 0x131   : > { %v775_v20 = vpop.f32.mrb[28].mxu0 }
 0x132   : > { %v801_v26 = vadd.f32 %v775_v20, %v2037_v21  ;;  %v941_v27 = vpop.f32.mrb[28].mxu1  ;;  %v1577_v29 = vpop.f32.mrb[29].mxu0  ;;  %v1076_v15 = vmul.f32 %v1067_v18, %v1000_v60  ;;  %v1068_v24 = vmul.f32 %v2066_v10, %v2066_v10  ;;  %v1045_v45 = vsel %vm1041_vm3, %v1034_v13, 0.0 }
 0x133   : > { %v1613_v14 = vpop.f32.mrb[29].mxu1  ;;  %v778_v32 = vpop.f32.mrb[30].mxu0  ;;  %v1035_v46 = vmul.f32 %v1005_v19, %v2066_v10  ;;  %v1046_v57 = vadd.f32 %v1045_v45, %v1044_v49 }
 0x134   : > { %v967_v33 = vadd.f32 %v941_v27, %v801_v26  ;;  %v944_v35 = vpop.f32.mrb[30].mxu1  ;;  %v1578_v36 = vpop.f32.mrb[31].mxu0  ;;  %v802_v39 = vadd.f32 %v778_v32, %v2039_v28  ;;  %v1086_v25 = vsel %vm1041_vm3, %v1076_v15, 0.0  ;;  %v1077_v28 = vmul.f32 %v1068_v24, %v1005_v19 }
 0x135   : > { %v1614_v21 = vpop.f32.mrb[31].mxu1  ;;  %v1087_v62 = vadd.f32 %v1086_v25, %v1085_v52  ;;  %v1047_v63 = vsel %vm1041_vm3, %v1035_v46, 0.0  ;;  %v1020_v20 = vpop.permute.xlu0 %1019 }
 0x136   : > { %v2081_v43 = vadd.f32 %v2050_v58, %v967_v33  ;;  %v968_v48 = vadd.f32 %v944_v35, %v802_v39  ;;  %v1088_v5 = vsel %vm1041_vm3, %v1077_v28, 0.0  ;;  %v1048_v6 = vadd.f32 %v1047_v63, %v1046_v57  ;;  %v1025_v13 = vpop.permute.xlu1 %1024 }
 0x137   : > { %v1089_v19 = vadd.f32 %v1088_v5, %v1087_v62 }
 0x138   : > { %v1069_v51 = vmul.f32 %v2081_v43, %v2081_v43  ;;  %v1036_v53 = vmul.f32 %v1010_v38, %v2081_v43  ;;  %v2091_v54 = vadd.f32 %v2050_v58, %v968_v48 }
 0x139   : > { %v783_v56 = vpop.f32.mrb[32].mxu0 }
 0x13a   : > { %v803_v47 = vadd.f32 %v783_v56, %v2041_v31  ;;  %v949_v59 = vpop.f32.mrb[32].mxu1  ;;  %v1581_v60 = vpop.f32.mrb[33].mxu0  ;;  %v1078_v2 = vmul.f32 %v1069_v51, %v1010_v38  ;;  %v1070_v3 = vmul.f32 %v2091_v54, %v2091_v54  ;;  %v1037_v31 = vmul.f32 %v1015_v55, %v2091_v54 }
 0x13b   : > { %v1617_v4 = vpop.f32.mrb[33].mxu1  ;;  %v786_v50 = vpop.f32.mrb[34].mxu0  ;;  %v1049_v1 = vsel %vm1041_vm3, %v1036_v53, 0.0 }
 0x13c   : > { %v969_v7 = vadd.f32 %v949_v59, %v803_v47  ;;  %v804_v8 = vadd.f32 %v786_v50, %v2043_v34  ;;  %v952_v9 = vpop.f32.mrb[34].mxu1  ;;  %v1582_v11 = vpop.f32.mrb[35].mxu0  ;;  %v1079_v22 = vmul.f32 %v1070_v3, %v1015_v55  ;;  %v1090_v23 = vsel %vm1041_vm3, %v1078_v2, 0.0 }
 0x13d   : > { %v1618_v12 = vpop.f32.mrb[35].mxu1  ;;  %v1050_v26 = vadd.f32 %v1049_v1, %v1048_v6  ;;  %v1051_v30 = vsel %vm1041_vm3, %v1037_v31, 0.0  ;;  %v1091_v32 = vadd.f32 %v1090_v23, %v1089_v19  ;;  %v1030_v55 = vpop.permute.xlu0 %1029 }
 0x13e   : > { %v2102_v16 = vadd.f32 %v2050_v58, %v969_v7  ;;  %v970_v18 = vadd.f32 %v952_v9, %v804_v8  ;;  %v1092_v36 = vsel %vm1041_vm3, %v1079_v22, 0.0 }
 0x13f   : > { %v1052_v44 = vadd.f32 %v1051_v30, %v1050_v26  ;;  %v1093_v28 = vadd.f32 %v1092_v36, %v1091_v32 }
 0x140   : > { %v1038_v34 = vmul.f32 %v1020_v20, %v2102_v16  ;;  %v1071_v27 = vmul.f32 %v2102_v16, %v2102_v16  ;;  %v2109_v29 = vadd.f32 %v2050_v58, %v970_v18 }
 0x141   : > { %v791_v14 = vpop.f32.mrb[36].mxu0 }
 0x142   : > { %v1080_v15 = vmul.f32 %v1071_v27, %v1020_v20  ;;  %v1072_v24 = vmul.f32 %v2109_v29, %v2109_v29  ;;  %v957_v33 = vpop.f32.mrb[36].mxu1  ;;  %v1585_v35 = vpop.f32.mrb[37].mxu0  ;;  %v1053_v37 = vsel %vm1041_vm3, %v1038_v34, 0.0  ;;  %v1039_v39 = vmul.f32 %v1025_v13, %v2109_v29 }
 0x143   : > { %v805_v21 = vadd.f32 %v791_v14, %v2045_v40  ;;  %v1621_v41 = vpop.f32.mrb[37].mxu1  ;;  %v794_v42 = vpop.f32.mrb[38].mxu0  ;;  %v1054_v51 = vadd.f32 %v1053_v37, %v1052_v44 }
 0x144   : > { %v960_v45 = vpop.f32.mrb[38].mxu1  ;;  %v1586_v46 = vpop.f32.mrb[39].mxu0  ;;  %v1094_v48 = vsel %vm1041_vm3, %v1080_v15, 0.0  ;;  %v1081_v49 = vmul.f32 %v1072_v24, %v1025_v13  ;;  %v1055_v52 = vsel %vm1041_vm3, %v1039_v39, 0.0 }
 0x145   : > { %v971_v25 = vadd.f32 %v957_v33, %v805_v21  ;;  %v1622_v38 = vpop.f32.mrb[39].mxu1  ;;  %v1095_v56 = vadd.f32 %v1094_v48, %v1093_v28  ;;  %v1056_v59 = vadd.f32 %v1055_v52, %v1054_v51  ;;  %v1137_v45 = vlaneseq }
 0x146   : > { %v1096_v40 = vsel %vm1041_vm3, %v1081_v49, 0.0 }
 0x147   : > { %v2121_v53 = vadd.f32 %v2050_v58, %v971_v25  ;;  %v1097_v2 = vadd.f32 %v1096_v40, %v1095_v56  ;;  %v1138_v46 = vand.u32 127, %v1137_v45  ;;  %v1151_v48 = vshrl.u32 %v1137_v45, 7  ;;  %v254_v25 = vld [vmem:[%s2173_s4] sm:$0x1] }
 0x148   : > { %v255_v56 = vld [vmem:[%s2174_s5] sm:$0x1] }
 0x149   : > { %v1040_v57 = vmul.f32 %v1030_v55, %v2121_v53  ;;  %v1073_v47 = vmul.f32 %v2121_v53, %v2121_v53  ;;  %vm1139_vm5 = vcmp.lt.s32.totalorder %v1138_v46, 16  ;;  %v1152_v28 = vsub.s32 0, %v1151_v48 }
 0x14b   : > { %v1057_v60 = vsel %vm1041_vm3, %v1040_v57, 0.0  ;;  %v1082_v62 = vmul.f32 %v1073_v47, %v1030_v55 }
 0x14c   : > { %v1058_v63 = vadd.f32 %v1057_v60, %v1056_v59 }
 0x14d   : > { %v1098_v3 = vsel %vm1041_vm3, %v1082_v62, 0.0 }
 0x14e   : > { %v1059_v4 = vrot.slane %v1058_v63, 4  ;;  %v1099_v58 = vadd.f32 %v1098_v3, %v1097_v2 }
 0x150   : > { %v1060_v50 = vadd.f32 %v1059_v4, %v1058_v63  ;;  %v1100_v5 = vrot.slane %v1099_v58, 4 }
 0x152   : > { %v1061_v7 = vrot.slane %v1060_v50, 2  ;;  %v1101_v8 = vadd.f32 %v1100_v5, %v1099_v58 }
 0x154   : > { %v1062_v9 = vadd.f32 %v1061_v7, %v1060_v50  ;;  %v1102_v11 = vrot.slane %v1101_v8, 2 }
 0x156   : > { %v1063_v31 = vrot.slane %v1062_v9, 1  ;;  %v1103_v1 = vadd.f32 %v1102_v11, %v1101_v8 }
 0x158   : > { %v1064_v12 = vadd.f32 %v1063_v31, %v1062_v9  ;;  %v1104_v6 = vrot.slane %v1103_v1, 1 }
 0x15a   : > { %1112 = vrot.lane.b32.xlu1 %v1064_v12, %s1697_s24  ;;  %v1105_v18 = vadd.f32 %v1104_v6, %v1103_v1  ;;  %v1107_v19 = vsel %vm1106_vm4, %v1064_v12, 0.0 }
 0x15c   : > { %1127 = vrot.lane.b32.xlu0 %v1105_v18, %s1697_s24  ;;  %v1119_v34 = vsel %vm1106_vm4, %v1105_v18, 0.0 }
 0x17e   : > { %1108 = vadd.xlane.f32.xlu1 %v1107_v19 }
 0x1cc   : > { %v1113_v20 = vpop.permute.xlu1 %1112 }
 0x1cd   : > { %v1115_v22 = vsel %vm1106_vm4, %v1113_v20, 0.0 }
 0x1ce   : > { %v1128_v23 = vpop.permute.xlu0 %1127  ;;  %1116 = vadd.xlane.f32.xlu0 %v1115_v22 }
 0x1cf   : > { %v1130_v26 = vsel %vm1106_vm4, %v1128_v23, 0.0 }
 0x1d0   : > { %1131 = vadd.xlane.f32.xlu1 %v1130_v26 }
 0x1d2   : > { %1120 = vadd.xlane.f32.xlu0 %v1119_v34 }
 0x20b   : > { %v1109_v27 = vpop.xlane.xlu1 %1108 }
 0x20c   : > { %v1110_v13 = vmul.f32 0.0009765625, %v1109_v27 }
 0x20e   : > { %v1123_v35 = vmul.f32 %v1110_v13, %v1110_v13 }
 0x25b   : > { %v1117_v30 = vpop.xlane.xlu0 %1116 }
 0x25c   : > { %v1118_v14 = vmul.f32 0.0009765625, %v1117_v30 }
 0x25d   : > { %v1132_v32 = vpop.xlane.xlu1 %1131 }
 0x25e   : > { %v1134_v15 = vmul.f32 %v1118_v14, %v1118_v14  ;;  %v1133_v24 = vmul.f32 0.0009765625, %v1132_v32  ;;  %v1140_v55 = vsel %vm1139_vm5, %v1110_v13, %v1118_v14 }
 0x25f   : > { %v1121_v33 = vpop.xlane.xlu0 %1120 }
 0x260   : > { %v1135_v36 = vsub.f32 %v1133_v24, %v1134_v15  ;;  %v1122_v37 = vmul.f32 0.0009765625, %v1121_v33 }
 0x262   : > { %v1136_v39 = vmax.f32 %v1135_v36, 0.0  ;;  %v1124_v21 = vsub.f32 %v1122_v37, %v1123_v35 }
 0x264   : > { %v1143_v41 = vadd.f32 1e-05, %v1136_v39  ;;  %v1125_v42 = vmax.f32 %v1124_v21, 0.0 }
 0x266   : > { %v1141_v44 = vadd.f32 1e-05, %v1125_v42  ;;  %1682 = vrsqrt.f32 %v1143_v41 }
 0x268   : > { %1684 = vrsqrt.f32 %v1141_v44 }
 0x270   : > { %v1683_v49 = vpop.eup %1682 }
 0x272   : > { %v1685_v38 = vpop.eup %1684 }
 0x273   : > { %v1145_v51 = vsel %vm1139_vm5, %v1685_v38, %v1683_v49 }
 0x274   : > { %v1146_v52 = vmul.f32 %v1145_v51, %v254_v25 }
 0x276   : > { %v1147_v40 = vmul.f32 %v1146_v52, %v1140_v55  ;;  %v1153_v57 = vrot.slane %v1146_v52, %v1152_v28 }
 0x278   : > { %v1148_v47 = vsub.f32 %v255_v56, %v1147_v40  ;;  %v1155_v59 = vmul.f32 %v1153_v57, %v2056_v0  ;;  %v1156_v60 = vmul.f32 %v1153_v57, %v2053_v61  ;;  %v1157_v62 = vmul.f32 %v1153_v57, %v2063_v17 }
 0x279   : > { %v1158_v63 = vmul.f32 %v1153_v57, %v2066_v10  ;;  %v1159_v2 = vmul.f32 %v1153_v57, %v2081_v43  ;;  %v1160_v4 = vmul.f32 %v1153_v57, %v2091_v54  ;;  %v1161_v58 = vmul.f32 %v1153_v57, %v2102_v16 }
 0x27a   : > { %v1168_v3 = vrot.slane %v1148_v47, %v1152_v28  ;;  %v1162_v50 = vmul.f32 %v1153_v57, %v2109_v29  ;;  %v1163_v5 = vmul.f32 %v1153_v57, %v2121_v53 }
 0x27c   : > { %v1170_v0 = vadd.f32 %v1168_v3, %v1155_v59  ;;  %v1171_v7 = vadd.f32 %v1168_v3, %v1156_v60  ;;  %v1172_v61 = vadd.f32 %v1168_v3, %v1157_v62  ;;  %v1173_v8 = vadd.f32 %v1168_v3, %v1158_v63 }
 0x27d   : > { %v1174_v17 = vadd.f32 %v1168_v3, %v1159_v2  ;;  %v1175_v9 = vadd.f32 %v1168_v3, %v1160_v4  ;;  %v1176_v10 = vadd.f32 %v1168_v3, %v1161_v58  ;;  %v1177_v11 = vadd.f32 %v1168_v3, %v1162_v50 }
 0x27e   : > { %v1178_v43 = vadd.f32 %v1168_v3, %v1163_v5  ;;  %vm1179_vm7 = vcmp.gt.f32.partialorder %v1170_v0, 0.0  ;;  %vm1180_vm8 = vcmp.gt.f32.partialorder %v1171_v7, 0.0  ;;  %vm1181_vm9 = vcmp.gt.f32.partialorder %v1172_v61, 0.0 }
 0x27f   : > { %vm1182_vm10 = vcmp.gt.f32.partialorder %v1173_v8, 0.0  ;;  %vm1183_vm11 = vcmp.gt.f32.partialorder %v1174_v17, 0.0  ;;  %vm1184_vm12 = vcmp.gt.f32.partialorder %v1175_v9, 0.0  ;;  %vm1185_vm13 = vcmp.gt.f32.partialorder %v1176_v10, 0.0 }
 0x280   : > { %vm1186_vm14 = vcmp.gt.f32.partialorder %v1177_v11, 0.0  ;;  %vm1187_vm15 = vcmp.gt.f32.partialorder %v1178_v43, 0.0  ;;  %v1188_v54 = vmul.f32 0.2, %v1170_v0  ;;  %v1189_v16 = vmul.f32 0.2, %v1171_v7 }
 0x281   : > { %v1190_v29 = vmul.f32 0.2, %v1172_v61  ;;  %v1191_v53 = vmul.f32 0.2, %v1173_v8  ;;  %v1192_v31 = vmul.f32 0.2, %v1174_v17 }
 0x282   : > { %v1193_v1 = vmul.f32 0.2, %v1175_v9  ;;  %v1194_v12 = vmul.f32 0.2, %v1176_v10  ;;  %v1195_v6 = vmul.f32 0.2, %v1177_v11  ;;  %v1197_v18 = vsel %vm1179_vm7, %v1170_v0, %v1188_v54 }
 0x283   : > { %v1196_v19 = vmul.f32 0.2, %v1178_v43  ;;  %v1198_v20 = vsel %vm1180_vm8, %v1171_v7, %v1189_v16  ;;  %v1199_v22 = vsel %vm1181_vm9, %v1172_v61, %v1190_v29  ;;  %v1200_v23 = vsel %vm1182_vm10, %v1173_v8, %v1191_v53 }
 0x284   : > { %v1201_v26 = vsel %vm1183_vm11, %v1174_v17, %v1192_v31  ;;  %v1202_v34 = vsel %vm1184_vm12, %v1175_v9, %v1193_v1  ;;  %v1203_v27 = vsel %vm1185_vm13, %v1176_v10, %v1194_v12  ;;  %v1204_v30 = vsel %vm1186_vm14, %v1177_v11, %v1195_v6 }
 0x285   : > { %v1205_v13 = vsel %vm1187_vm15, %v1178_v43, %v1196_v19  ;;  %v1418_v14 = vpack.c.bf16 %v1197_v18, %v1197_v18  ;;  %v1419_v32 = vpack.c.bf16 %v1198_v20, %v1198_v20  ;;  %v1420_v15 = vpack.c.bf16 %v1199_v22, %v1199_v22 }
 0x286   : > { %v1421_v24 = vpack.c.bf16 %v1200_v23, %v1200_v23  ;;  %v1422_v33 = vpack.c.bf16 %v1201_v26, %v1201_v26  ;;  %v1423_v35 = vpack.c.bf16 %v1202_v34, %v1202_v34  ;;  %v1424_v36 = vpack.c.bf16 %v1203_v27, %v1203_v27 }
 0x287   : > { %v1425_v37 = vpack.c.bf16 %v1204_v30, %v1204_v30  ;;  %v1426_v39 = vpack.c.bf16 %v1205_v13, %v1205_v13  ;;  %1244 = vst.msk [vmem:[%s251_s30] sm:$0xf] %vm1243_vm6, %v1418_v14  ;;  %1245 = vst.msk [vmem:[%s251_s30 + $0x4] sm:$0xf] %vm1243_vm6, %v1419_v32 }
 0x288   : > { %1246 = vst.msk [vmem:[%s251_s30 + $0x8] sm:$0xf] %vm1243_vm6, %v1420_v15  ;;  %1247 = vst.msk [vmem:[%s251_s30 + $0xc] sm:$0xf] %vm1243_vm6, %v1421_v24 }
 0x289   : > { %1248 = vst.msk [vmem:[%s251_s30 + $0x10] sm:$0xf] %vm1243_vm6, %v1422_v33  ;;  %1249 = vst.msk [vmem:[%s251_s30 + $0x14] sm:$0xf] %vm1243_vm6, %v1423_v35 }
 0x28a   : > { %1250 = vst.msk [vmem:[%s251_s30 + $0x18] sm:$0xf] %vm1243_vm6, %v1424_v36  ;;  %1251 = vst.msk [vmem:[%s251_s30 + $0x1c] sm:$0xf] %vm1243_vm6, %v1425_v37 }
 0x28b   : > { %1252 = vst.msk [vmem:[%s251_s30 + $0x20] sm:$0xf] %vm1243_vm6, %v1426_v39 }
 0x28c PF: > { %s16_s21 = sadd.s32 1, %s1692_s21  }
 0x28d   : > { %p13_p4 = scmp.ge.s32.totalorder %s16_s21, 4  }
 0x28f   :  { %15 = sbr.rel (!%p13_p4) target bundleno = 1 (0x1), region = 77 }

// kernel: encoder_forward.6
= control target key start
LH: loop header
LB: loop body
LE: loop exit
PB: predicated region body
PF: predicated region fallthrough
CT: control target
= control target key end

     0   :  { %s2399_s21 = smov 0   ;;  %s3062_s0 = inlined_call_operand.vmem [shape: bf16[2,110,32], index: 0, kind: input, shape index: {}]   ;;  %s3063_s1 = inlined_call_operand.vmem [shape: bf16[9,32,32], index: 1, kind: input, shape index: {}]   ;;  %s3064_s2 = inlined_call_operand.vmem [shape: f32[80,1], index: 2, kind: input, shape index: {}]   ;;  %s3065_s3 = inlined_call_operand.vmem [shape: f32[1,32], index: 3, kind: input, shape index: {}]   ;;  %s3066_s4 = inlined_call_operand.vmem [shape: f32[1,32], index: 4, kind: input, shape index: {}]   ;;  %s3067_s5 = inlined_call_operand.vmem [shape: f32[1,32], index: 5, kind: input, shape index: {}]   ;;  %s3068_s6 = inlined_call_operand.vmem [shape: bf16[2,80,32], index: 6, kind: output, shape index: {}]  }
   0x1 LB: > { %s1878_s22 = sadd.s32 4294967295, %s2358_s21   ;;  %p1882_p0 = scmp.ge.s32.totalorder %s2358_s21, 1  ;;  %s2358_s21 = sphi %s2399_s21, %s16_s21  }
   0x2   : > { %p212_p1 = scmp.lt.s32.totalorder %s2358_s21, 3 }
   0x4   : > { %p213_p2 = pnand %p1882_p0, %p212_p1 }
   0x5   : > { %v2316_v0 = vld [vmem:[%s3063_s1 + $0x10] sm:$0xff] (!%p213_p2)   ;;  %v2360_v1 = vmov (!%p213_p2), 0.0   ;;  %v2317_v2 = vld [vmem:[%s3063_s1 + $0x18] sm:$0xff] (!%p213_p2)   ;;  %p242_p3 = scmp.lt.s32.totalorder (!%p213_p2), %s1878_s22, 1  ;;  %vm2361_vm0 = vmmov (!%p213_p2), 0   ;;  %vm364_vm2 = vcmask (!%p213_p2), 261120  }
   0x6   : > { %216 = sbr.rel (%p213_p2) target bundleno = 744 (0x2e8), region = 44  ;;  %2080 = vmatprep.subr.bf16.mxu0 (!%p213_p2), %v2360_v1  ;;  %2296 = vmatprep.subr.bf16.mxu1 (!%p213_p2), %v2360_v1  ;;  %vm307_vm1 = vsmask.f32 (!%p213_p2), 7424  ;;  %v2323_v31 = vld [vmem:[%s3063_s1 + $0x20] sm:$0xff] (!%p213_p2)   ;;  %v2329_v45 = vld [vmem:[%s3063_s1 + $0x28] sm:$0xff] (!%p213_p2)   ;;  %vm559_vm3 = vcmask (!%p213_p2), 1046528  }
   0x7   : > { %2081 = vmatpush3.bf16.msra.mxu0 (!%p213_p2), %v2316_v0  ;;  %2298 = vmatpush3.bf16.msra.mxu1 (!%p213_p2), %v2316_v0  ;;  %v2324_v36 = vld [vmem:[%s3063_s1] sm:$0xff] (!%p213_p2)   ;;  %v2330_v48 = vld [vmem:[%s3063_s1 + $0x8] sm:$0xff] (!%p213_p2)   ;;  %vm993_vm4 = vcmask (!%p213_p2), 1045504   ;;  %vm824_vm5 = vsmask.f32 (!%p213_p2), 6400  ;;  %vm1399_vm7 = vcmask (!%p213_p2), 1044480  }
   0x8   : > { %2082 = vmatprep.subr.bf16.mxu0 (!%p213_p2), %v2360_v1  ;;  %2297 = vmatprep.subr.bf16.mxu1 (!%p213_p2), %v2360_v1  ;;  %vm1250_vm6 = vsmask.f32 (!%p213_p2), 5376  ;;  %s2363_s17 = smov (!%p213_p2), 112   ;;  %vm1667_vm8 = vcmask (!%p213_p2), 130048   ;;  %vm1812_vm10 = vcmask (!%p213_p2), 257024  }
   0x9   : > { %2084 = vmatprep.mubr.msk.bf16.mxu0 (!%p213_p2), %vm2361_vm0, %v2360_v1  ;;  %2096 = vmatprep.mubr.msk.bf16.mxu1 (!%p213_p2), %vm2361_vm0, %v2360_v1 }
   0xb   : > { %2083 = vmatpush3.bf16.msra.mxu0 (!%p213_p2), %v2317_v2  ;;  %2299 = vmatpush3.bf16.msra.mxu1 (!%p213_p2), %v2317_v2 }
   0xc   : > { %2128 = vmatprep.subr.bf16.mxu0 (!%p213_p2), %v2360_v1  ;;  %2104 = vmatprep.subr.bf16.mxu1 (!%p213_p2), %v2360_v1 }
   0xd   : > { %s3070_s22 = smov (!%p242_p3, %s1878_s22), 1 }
   0xe   : > { %s2300_s27 = smul.u32 56, %s3070_s22 }
   0xf   : > { %s2301_s24 = smul.u32 40, %s3070_s22 }
  0x10   : > { %s2429_s30 = scalar_lea.vmem %s3062_s0, %s2300_s27 }
  0x11   : > { %v266_v3 = vld [vmem:[%s2429_s30] sm:$0xf]  ;;  %v2433_v4 = vld [vmem:[%s2429_s30 + $0x4] sm:$0xf]  ;;  %v2436_v5 = vld [vmem:[%s2429_s30 + $0x8] sm:$0xf]  ;;  %s251_s26 = scalar_lea.vmem %s3068_s6, %s2301_s24 }
  0x12   : > { %v2439_v6 = vld [vmem:[%s2429_s30 + $0xc] sm:$0xf]  ;;  %v2442_v7 = vcombine.low %v266_v3, %v2433_v4  ;;  %v272_v8 = vld [vmem:[%s2429_s30 + $0x18] sm:$0xf]  ;;  %v273_v9 = vld [vmem:[%s2429_s30 + $0x1c] sm:$0xf] }
  0x13   : > { %v2448_v10 = vcombine.low %v2436_v5, %v2439_v6  ;;  %v274_v11 = vld [vmem:[%s2429_s30 + $0x20] sm:$0xf]  ;;  %v275_v12 = vld [vmem:[%s2429_s30 + $0x24] sm:$0xf]  ;;  %v2452_v13 = vcombine.low %v272_v8, %v273_v9  ;;  %v2455_v14 = vld [vmem:[%s2429_s30 + $0x10] sm:$0xf] }
  0x14   : > { %v309_v15 = vshrl.u32 %v2442_v7, 16  ;;  %v311_v16 = vshll.u32 %v2442_v7, 16  ;;  %v2459_v17 = vcombine.low %v274_v11, %v275_v12  ;;  %v271_v18 = vld [vmem:[%s2429_s30 + $0x14] sm:$0xf]  ;;  %v276_v19 = vld [vmem:[%s2429_s30 + $0x28] sm:$0xf]  ;;  %v2521_v53 = vcombine.low %v273_v9, %v274_v11 }
  0x15   : > { %v316_v20 = vshll.u32 %v2448_v10, 16  ;;  %v332_v21 = vshll.u32 %v2452_v13, 16  ;;  %v336_v22 = vshrl.u32 %v2452_v13, 16  ;;  %v2467_v23 = vcombine.low %v2455_v14, %v271_v18  ;;  %v277_v34 = vld [vmem:[%s2429_s30 + $0x2c] sm:$0xf] }
  0x16   : > { %v313_v24 = vrot.slane %v311_v16, 1  ;;  %v340_v25 = vshll.u32 %v2459_v17, 16  ;;  %v2470_v26 = vcombine.low %v276_v19, %v276_v19  ;;  %v320_v32 = vshrl.u32 %v2448_v10, 16 }
  0x17   : > { %v318_v27 = vrot.slane %v316_v20, 1  ;;  %v2474_v28 = vrot.slane %v332_v21, 1  ;;  %v324_v33 = vshll.u32 %v2467_v23, 16  ;;  %v344_v37 = vshrl.u32 %v2459_v17, 16 }
  0x18   : > { %v314_v29 = vor.u32 %v313_v24, %v309_v15  ;;  %v342_v30 = vrot.slane %v340_v25, 1  ;;  %v348_v39 = vshll.u32 %v2470_v26, 16  ;;  %v2493_v40 = vcombine.low %v275_v12, %v276_v19 }
  0x19   : > { %v338_v35 = vor.u32 %v336_v22, %v2474_v28  ;;  %v2497_v42 = vcombine.low %v276_v19, %v277_v34  ;;  %v322_v43 = vor.u32 %v320_v32, %v318_v27  ;;  %v326_v44 = vrot.slane %v324_v33, 1 }
  0x1a   : > { %v319_v38 = vsel %vm307_vm1, %v314_v29, %v318_v27  ;;  %v346_v46 = vor.u32 %v344_v37, %v342_v30  ;;  %v350_v47 = vrot.slane %v348_v39, 1  ;;  %v328_v50 = vshrl.u32 %v2467_v23, 16  ;;  %v2331_v29 = vld [vmem:[%s3063_s1 + $0x30] sm:$0xff]  }
  0x1b   : > { %2085 = vmatmul.mubr.msk.bf16.vlgmr.msra.gmra.mrb[0].mxu0 %vm364_vm2, %v319_v38  ;;  %v343_v41 = vsel %vm307_vm1, %v338_v35, %v342_v30  ;;  %v327_v49 = vsel %vm307_vm1, %v322_v43, %v326_v44  ;;  %v2516_v51 = vcombine.low %v271_v18, %v272_v8  ;;  %v2524_v55 = vrot.slane %v316_v20, 3 }
  0x1c   : > { %2097 = vmatmul.mubr.msk.bf16.vlgmr.msra.gmra.mrb[0].mxu1 %vm364_vm2, %v343_v41  ;;  %2129 = vmatpush3.bf16.msra.mxu0 %v2323_v31  ;;  %v351_v52 = vsel %vm307_vm1, %v346_v46, %v350_v47  ;;  %v2527_v56 = vrot.slane %v320_v32, 2  ;;  %v2529_v57 = vrot.slane %v324_v33, 3  ;;  %v330_v58 = vor.u32 %v328_v50, %v326_v44  ;;  %v2577_v47 = vld [vmem:[%s2429_s30 + $0x30] ss:$0 sps:$4 sm:$0xff]  }
  0x1d   : > { %2105 = vmatpush3.bf16.msra.mxu1 %v2324_v36  ;;  %2088 = vmatprep.mubr.msk.bf16.mxu0 %vm2361_vm0, %v2360_v1  ;;  %v843_v54 = vshrl.u32 %v2516_v51, 16  ;;  %v701_v59 = vrot.slane %v2516_v51, 1  ;;  %v703_v60 = vrot.slane %v2521_v53, 1  ;;  %v846_v61 = vshll.u32 %v2516_v51, 16 }
  0x1e   : > { %2100 = vmatprep.mubr.msk.bf16.mxu1 %vm2361_vm0, %v2360_v1  ;;  %2130 = vmatprep.subr.bf16.mxu0 %v2360_v1  ;;  %v560_v62 = vrot.slane %v2442_v7, 1  ;;  %v705_v0 = vrot.slane %v2493_v40, 1  ;;  %v852_v2 = vshrl.u32 %v2521_v53, 16  ;;  %v855_v9 = vshll.u32 %v2521_v53, 16 }
  0x1f   : > { %2106 = vmatprep.subr.bf16.mxu1 %v2360_v1  ;;  %v845_v63 = vrot.slane %v843_v54, 1  ;;  %v2545_v3 = vsel %vm559_vm3, %v701_v59, %v703_v60  ;;  %v848_v8 = vrot.slane %v846_v61, 2  ;;  %v1925_v11 = vcombine.low %v277_v34, %v277_v34 }
  0x20   : > { %2131 = vmatpush3.bf16.msra.mxu0 %v2329_v45  ;;  %v561_v12 = vrot.slane %v2448_v10, 1  ;;  %v2550_v15 = vsel %vm559_vm3, %v703_v60, %v705_v0  ;;  %v854_v16 = vrot.slane %v852_v2, 1  ;;  %v861_v18 = vshrl.u32 %v2493_v40, 16  ;;  %v2332_v2 = vld [vmem:[%s3063_s1 + $0x40] sm:$0xff]  }
  0x21   : > { %2107 = vmatpush3.bf16.msra.mxu1 %v2330_v48  ;;  %2176 = vmatprep.subr.bf16.mxu0 %v2360_v1  ;;  %v335_v19 = vsel %vm307_vm1, %v330_v58, %v2474_v28  ;;  %v857_v20 = vrot.slane %v855_v9, 2  ;;  %v707_v24 = vrot.slane %v1925_v11, 1  ;;  %v864_v27 = vshll.u32 %v2493_v40, 16  ;;  %v2333_v48 = vld [vmem:[%s3063_s1 + $0x38] sm:$0xff]  }
  0x22   : > { %2152 = vmatprep.subr.bf16.mxu1 %v2360_v1  ;;  %v563_v30 = vrot.slane %v2467_v23, 1  ;;  %v863_v31 = vrot.slane %v861_v18, 1  ;;  %v870_v32 = vshrl.u32 %v1925_v11, 16  ;;  %v873_v33 = vshll.u32 %v1925_v11, 16 }
  0x23   : > { %2089 = vmatmul.mubr.msk.bf16.gmra.mrb[4].mxu0 %vm364_vm2, %v327_v49  ;;  %v2560_v34 = vor.u32 %v848_v8, %v845_v63  ;;  %v858_v35 = vor.u32 %v857_v20, %v854_v16  ;;  %v2563_v36 = vsel %vm559_vm3, %v705_v0, %v707_v24  ;;  %v866_v28 = vrot.slane %v864_v27, 2 }
  0x24   : > { %2101 = vmatmul.mubr.msk.bf16.gmra.mrb[4].mxu1 %vm364_vm2, %v351_v52  ;;  %2092 = vmatprep.mubr.msk.bf16.mxu0 %vm2361_vm0, %v2360_v1  ;;  %v1254_v38 = vrot.slane %v328_v50, 2  ;;  %v872_v39 = vrot.slane %v870_v32, 1  ;;  %v875_v41 = vrot.slane %v873_v33, 2  ;;  %v1124_v45 = vrot.slane %v2448_v10, 2 }
  0x25   : > { %2108 = vmatprep.mubr.msk.bf16.mxu1 %vm2361_vm0, %v2360_v1  ;;  %v2572_v43 = vsel %vm824_vm5, %v2560_v34, %v858_v35  ;;  %v867_v44 = vor.u32 %v866_v28, %v863_v31  ;;  %v1125_v46 = vrot.slane %v2467_v23, 2  ;;  %v997_v50 = vrot.slane %v2516_v51, 2  ;;  %v257_v51 = vld [vmem:[%s3064_s2 + $0x8] sm:$0xff] }
  0x26   : > { %v876_v49 = vor.u32 %v875_v41, %v872_v39  ;;  %v999_v52 = vrot.slane %v2521_v53, 2  ;;  %v1127_v60 = vrot.slane %v2452_v13, 2  ;;  %v1001_v61 = vrot.slane %v2493_v40, 2 }
  0x27   : > { %v2591_v54 = vsel %vm824_vm5, %v858_v35, %v867_v44  ;;  %v2594_v58 = vsel %vm993_vm4, %v1124_v45, %v1125_v46  ;;  %v1129_v53 = vrot.slane %v2459_v17, 2  ;;  %v1003_v0 = vrot.slane %v1925_v11, 2 }
  0x28   : > { %v2604_v63 = vsel %vm993_vm4, %v997_v50, %v999_v52  ;;  %v2611_v8 = vsel %vm993_vm4, %v1125_v46, %v1127_v60  ;;  %v2614_v40 = vsel %vm993_vm4, %v999_v52, %v1001_v61  ;;  %v1131_v9 = vrot.slane %v2497_v42, 2 }
  0x29   : > { %v1133_v16 = vrot.slane %v2577_v47, 2  ;;  %v2619_v18 = vsel %vm993_vm4, %v1127_v60, %v1129_v53  ;;  %v2622_v11 = vsel %vm993_vm4, %v1001_v61, %v1003_v0  ;;  %v1256_v27 = vor.u32 %v2529_v57, %v1254_v38  ;;  %v2334_v57 = vld [vmem:[%s3063_s1 + $0x48] sm:$0xff]  }
  0x2a   : > { %v2628_v20 = vsel %vm993_vm4, %v1129_v53, %v1131_v9  ;;  %v1259_v31 = vrot.slane %v332_v21, 3  ;;  %v1262_v32 = vrot.slane %v344_v37, 2  ;;  %v1263_v21 = vrot.slane %v340_v25, 3 }
  0x2b   : > { %2093 = vmatmul.mubr.msk.bf16.gmra.mrb[8].mxu0 %vm364_vm2, %v335_v19  ;;  %v1253_v19 = vor.u32 %v2524_v55, %v2527_v56  ;;  %v2631_v24 = vsel %vm993_vm4, %v1131_v9, %v1133_v16  ;;  %v1400_v55 = vrot.slane %v2448_v10, 3  ;;  %v1401_v56 = vrot.slane %v2467_v23, 3 }
  0x2c   : > { %2109 = vmatmul.mubr.msk.bf16.vlgmr.msra.gmra.mrb[8].mxu1 %vm364_vm2, %v2442_v7  ;;  %2132 = vmatprep.mubr.msk.bf16.mxu0 %vm2361_vm0, %v2360_v1  ;;  %v562_v7 = vsel %vm559_vm3, %v560_v62, %v561_v12  ;;  %v2599_v62 = vsel %vm824_vm5, %v867_v44, %v876_v49  ;;  %v1403_v33 = vrot.slane %v2452_v13, 3  ;;  %v1267_v38 = vshrl.u32 %v2497_v42, 16 }
  0x2d   : > { %2153 = vmatpush3.bf16.msra.mxu1 %v2331_v29  ;;  %2112 = vmatprep.mubr.msk.bf16.mxu1 %vm2361_vm0, %v2360_v1  ;;  %v1258_v29 = vrot.slane %v336_v22, 2  ;;  %v2647_v22 = vsel %vm1250_vm6, %v1253_v19, %v1256_v27  ;;  %v2659_v28 = vsel %vm1399_vm7, %v1400_v55, %v1401_v56  ;;  %v1270_v39 = vshll.u32 %v2497_v42, 16 }
  0x2e   : > { %2154 = vmatprep.subr.bf16.mxu1 %v2360_v1  ;;  %v1264_v37 = vor.u32 %v1263_v21, %v1262_v32  ;;  %v2665_v25 = vsel %vm1399_vm7, %v1401_v56, %v1403_v33  ;;  %v1269_v44 = vrot.slane %v1267_v38, 2  ;;  %v564_v46 = vsel %vm559_vm3, %v561_v12, %v563_v30 }
  0x2f   : > { %v1260_v35 = vor.u32 %v1259_v31, %v1258_v29  ;;  %v1272_v45 = vrot.slane %v1270_v39, 3  ;;  %v1405_v49 = vrot.slane %v2459_v17, 3  ;;  %v1276_v12 = vshrl.u32 %v2577_v47, 16 }
  0x30   : > { %v1279_v61 = vshll.u32 %v2577_v47, 16  ;;  %v1407_v16 = vrot.slane %v2497_v42, 3  ;;  %v1920_v31 = vcombine.low %v2433_v4, %v2436_v5  ;;  %v569_v55 = vrot.slane %v2470_v26, 1 }
  0x31   : > { %2155 = vmatpush3.bf16.msra.mxu1 %v2333_v48  ;;  %v2668_v41 = vsel %vm1250_vm6, %v1256_v27, %v1260_v35  ;;  %v1273_v48 = vor.u32 %v1272_v45, %v1269_v44  ;;  %v2685_v60 = vsel %vm1399_vm7, %v1403_v33, %v1405_v49  ;;  %v1278_v53 = vrot.slane %v1276_v12, 2  ;;  %v2338_v45 = vld [vmem:[%s3063_s1 + $0x60] sm:$0xff]   ;;  %v258_v12 = vld [vmem:[%s3064_s2 + $0x10] sm:$0xff] }
  0x32   : > { %2200 = vmatprep.subr.bf16.mxu1 %v2360_v1  ;;  %v1281_v0 = vrot.slane %v1279_v61, 3  ;;  %v2705_v27 = vsel %vm1399_vm7, %v1405_v49, %v1407_v16  ;;  %v829_v56 = vshll.u32 %v1920_v31, 16  ;;  %v698_v5 = vrot.slane %v1920_v31, 1  ;;  %v260_v61 = vld [vmem:[%s3064_s2 + $0x20] sm:$0xff] }
  0x33   : > { %2133 = vmatmul.mubr.msk.bf16.vlgmr.msra.gmra.mrb[12].mxu0 %vm364_vm2, %v562_v7  ;;  %v2676_v7 = vsel %vm1250_vm6, %v1260_v35, %v1264_v37  ;;  %v2682_v52 = vsel %vm1250_vm6, %v1264_v37, %v1273_v48  ;;  %v2336_v35 = vld [vmem:[%s3063_s1 + $0x50] sm:$0xff]   ;;  %v2340_v37 = vld [vmem:[%s3063_s1 + $0x58] sm:$0xff]   ;;  %v2362_v49 = vmov 0  }
  0x34   : > { %2113 = vmatmul.mubr.msk.bf16.gmra.mrb[12].mxu1 %vm364_vm2, %v2448_v10  ;;  %2177 = vmatpush3.bf16.msra.mxu0 %v2332_v2  ;;  %v565_v10 = vrot.slane %v2452_v13, 1  ;;  %v1282_v9 = vor.u32 %v1281_v0, %v1278_v53  ;;  %v831_v32 = vrot.slane %v829_v56, 2  ;;  %v261_v53 = vld [vmem:[%s3064_s2 + $0x28] sm:$0xff]  ;;  %v262_v0 = vld [vmem:[%s3064_s2 + $0x30] sm:$0xff] }
  0x35   : > { %2116 = vmatprep.mubr.msk.bf16.mxu1 %vm2361_vm0, %v2360_v1  ;;  %2136 = vmatprep.mubr.msk.bf16.mxu0 %vm2361_vm0, %v2360_v1 }
  0x36   : > { %2178 = vmatprep.subr.bf16.mxu0 %v2360_v1  ;;  %v566_v2 = vsel %vm559_vm3, %v563_v30, %v565_v10  ;;  %v2702_v19 = vsel %vm1250_vm6, %v1273_v48, %v1282_v9  ;;  %v1409_v30 = vrot.slane %v2577_v47, 3  ;;  %v826_v47 = vshrl.u32 %v1920_v31, 16  ;;  %v2341_v48 = vld [vmem:[%s3063_s1 + $0x68] sm:$0xff]   ;;  %2314 = vset.pattern.permute.xlu0 %v2362_v49 }
  0x37   : > { %2315 = vset.pattern.permute.xlu1 %v2362_v49 }
  0x38   : > { %2179 = vmatpush3.bf16.msra.mxu0 %v2334_v57  ;;  %v2716_v42 = vsel %vm1399_vm7, %v1407_v16, %v1409_v30  ;;  %v828_v26 = vrot.slane %v826_v47, 1  ;;  %1549 = vperm.xlu1 %2315, %v258_v12  }
  0x39   : > { %2224 = vmatprep.subr.bf16.mxu0 %v2360_v1 }
  0x3a   : > { %v832_v38 = vor.u32 %v831_v32, %v828_v26 }
  0x3b   : > { %2137 = vmatmul.mubr.msk.bf16.gmra.mrb[16].mxu0 %vm364_vm2, %v564_v46 }
  0x3c   : > { %2117 = vmatmul.mubr.msk.bf16.gmra.mrb[16].mxu1 %vm364_vm2, %v2467_v23  ;;  %2140 = vmatprep.mubr.msk.bf16.mxu0 %vm2361_vm0, %v2360_v1  ;;  %v567_v23 = vrot.slane %v2459_v17, 1 }
  0x3d   : > { %2120 = vmatprep.mubr.msk.bf16.mxu1 %vm2361_vm0, %v2360_v1 }
  0x3e   : > { %v568_v29 = vsel %vm559_vm3, %v565_v10, %v567_v23  ;;  %v256_v10 = vld [vmem:[%s3064_s2] sm:$0xff] }
  0x3f   : > { %1539 = vperm.xlu0 %2314, %v256_v10  }
  0x43   : > { %2141 = vmatmul.mubr.msk.bf16.gmra.mrb[20].mxu0 %vm364_vm2, %v566_v2  ;;  %1544 = vperm.xlu0 %2314, %v257_v51   ;;  %v264_v2 = vld [vmem:[%s3064_s2 + $0x40] sm:$0xff] }
  0x44   : > { %2121 = vmatmul.mubr.msk.bf16.gmra.mrb[20].mxu1 %vm364_vm2, %v2452_v13  ;;  %2144 = vmatprep.mubr.msk.bf16.mxu0 %vm2361_vm0, %v2360_v1  ;;  %v2723_v13 = vcombine.low %v2439_v6, %v2455_v14  ;;  %v570_v14 = vsel %vm559_vm3, %v567_v23, %v569_v55 }
  0x45   : > { %2124 = vmatprep.mubr.msk.bf16.mxu1 %vm2361_vm0, %v2360_v1 }
  0x46   : > { %v834_v57 = vshrl.u32 %v2723_v13, 16  ;;  %v837_v4 = vshll.u32 %v2723_v13, 16  ;;  %v699_v6 = vrot.slane %v2723_v13, 1 }
  0x47   : > { %1559 = vperm.xlu0 %2314, %v260_v61  }
  0x48   : > { %v839_v21 = vrot.slane %v837_v4, 2  ;;  %v700_v33 = vsel %vm559_vm3, %v698_v5, %v699_v6  ;;  %v702_v46 = vsel %vm559_vm3, %v699_v6, %v701_v59 }
  0x4b   : > { %2145 = vmatmul.mubr.msk.bf16.gmra.mrb[24].mxu0 %vm364_vm2, %v568_v29  ;;  %1569 = vperm.xlu0 %2314, %v262_v0  }
  0x4c   : > { %2125 = vmatmul.mubr.msk.bf16.gmra.mrb[24].mxu1 %vm364_vm2, %v2459_v17  ;;  %2148 = vmatprep.mubr.msk.bf16.mxu0 %vm2361_vm0, %v2360_v1  ;;  %v836_v17 = vrot.slane %v834_v57, 1 }
  0x4d   : > { %2156 = vmatprep.mubr.msk.bf16.mxu1 %vm2361_vm0, %v2360_v1 }
  0x4e   : > { %v840_v39 = vor.u32 %v839_v21, %v836_v17 }
  0x4f   : > { %1579 = vperm.xlu0 %2314, %v264_v2  }
  0x50   : > { %v841_v44 = vsel %vm824_vm5, %v832_v38, %v840_v39  ;;  %v850_v59 = vsel %vm824_vm5, %v840_v39, %v2560_v34 }
  0x53   : > { %2149 = vmatmul.mubr.msk.bf16.gmra.mrb[28].mxu0 %vm364_vm2, %v570_v14 }
  0x54   : > { %2157 = vmatmul.mubr.msk.bf16.vlgmr.msra.gmra.mrb[28].mxu1 %vm364_vm2, %v700_v33  ;;  %2180 = vmatprep.mubr.msk.bf16.mxu0 %vm2361_vm0, %v2360_v1 }
  0x55   : > { %2201 = vmatpush3.bf16.msra.mxu1 %v2336_v35  ;;  %2160 = vmatprep.mubr.msk.bf16.mxu1 %vm2361_vm0, %v2360_v1 }
  0x56   : > { %2202 = vmatprep.subr.bf16.mxu1 %v2360_v1 }
  0x59   : > { %2203 = vmatpush3.bf16.msra.mxu1 %v2340_v37 }
  0x5a   : > { %2248 = vmatprep.subr.bf16.mxu1 %v2360_v1 }
  0x5b   : > { %2181 = vmatmul.mubr.msk.bf16.vlgmr.msra.gmra.mrb[32].mxu0 %vm364_vm2, %v841_v44 }
  0x5c   : > { %2161 = vmatmul.mubr.msk.bf16.gmra.mrb[32].mxu1 %vm364_vm2, %v702_v46  ;;  %2225 = vmatpush3.bf16.msra.mxu0 %v2338_v45 }
  0x5d   : > { %2164 = vmatprep.mubr.msk.bf16.mxu1 %vm2361_vm0, %v2360_v1  ;;  %2184 = vmatprep.mubr.msk.bf16.mxu0 %vm2361_vm0, %v2360_v1 }
  0x5e   : > { %2226 = vmatprep.subr.bf16.mxu0 %v2360_v1 }
  0x60   : > { %2227 = vmatpush3.bf16.msra.mxu0 %v2341_v48 }
  0x61   : > { %2272 = vmatprep.subr.bf16.mxu0 %v2360_v1 }
  0x63   : > { %2185 = vmatmul.mubr.msk.bf16.gmra.mrb[36].mxu0 %vm364_vm2, %v850_v59 }
  0x64   : > { %2165 = vmatmul.mubr.msk.bf16.gmra.mrb[36].mxu1 %vm364_vm2, %v2545_v3  ;;  %2188 = vmatprep.mubr.msk.bf16.mxu0 %vm2361_vm0, %v2360_v1  ;;  %v994_v3 = vrot.slane %v1920_v31, 2 }
  0x65   : > { %2168 = vmatprep.mubr.msk.bf16.mxu1 %vm2361_vm0, %v2360_v1 }
  0x6b   : > { %2189 = vmatmul.mubr.msk.bf16.gmra.mrb[40].mxu0 %vm364_vm2, %v2572_v43  ;;  %v2343_v43 = vld [vmem:[%s3063_s1 + $0x70] sm:$0xff]  }
  0x6c   : > { %2169 = vmatmul.mubr.msk.bf16.gmra.mrb[40].mxu1 %vm364_vm2, %v2550_v15  ;;  %2192 = vmatprep.mubr.msk.bf16.mxu0 %vm2361_vm0, %v2360_v1  ;;  %v995_v15 = vrot.slane %v2723_v13, 2 }
  0x6d   : > { %2172 = vmatprep.mubr.msk.bf16.mxu1 %vm2361_vm0, %v2360_v1 }
  0x6e   : > { %v996_v34 = vsel %vm993_vm4, %v994_v3, %v995_v15 }
  0x73   : > { %2193 = vmatmul.mubr.msk.bf16.gmra.mrb[44].mxu0 %vm364_vm2, %v2591_v54  ;;  %v2344_v54 = vld [vmem:[%s3063_s1 + $0x80] sm:$0xff]  }
  0x74   : > { %2173 = vmatmul.mubr.msk.bf16.gmra.mrb[44].mxu1 %vm364_vm2, %v2563_v36  ;;  %2196 = vmatprep.mubr.msk.bf16.mxu0 %vm2361_vm0, %v2360_v1  ;;  %v2345_v36 = vld [vmem:[%s3063_s1 + $0x78] sm:$0xff]  }
  0x75   : > { %2204 = vmatprep.mubr.msk.bf16.mxu1 %vm2361_vm0, %v2360_v1 }
  0x7b   : > { %2197 = vmatmul.mubr.msk.bf16.gmra.mrb[48].mxu0 %vm364_vm2, %v2599_v62  ;;  %v998_v62 = vsel %vm993_vm4, %v995_v15, %v997_v50  ;;  %v2346_v50 = vld [vmem:[%s3063_s1 + $0x88] sm:$0xff]  }
  0x7c   : > { %2205 = vmatmul.mubr.msk.bf16.vlgmr.msra.gmra.mrb[48].mxu1 %vm364_vm2, %v996_v34  ;;  %2228 = vmatprep.mubr.msk.bf16.mxu0 %vm2361_vm0, %v2360_v1 }
  0x7d   : > { %2249 = vmatpush3.bf16.msra.mxu1 %v2343_v43  ;;  %2208 = vmatprep.mubr.msk.bf16.mxu1 %vm2361_vm0, %v2360_v1 }
  0x7e   : > { %2250 = vmatprep.subr.bf16.mxu1 %v2360_v1 }
  0x81   : > { %2251 = vmatpush3.bf16.msra.mxu1 %v2345_v36 }
  0x83   : > { %2229 = vmatmul.mubr.msk.bf16.vlgmr.msra.gmra.mrb[52].mxu0 %vm364_vm2, %v2594_v58  ;;  %v259_v58 = vld [vmem:[%s3064_s2 + $0x18] sm:$0xff] }
  0x84   : > { %2209 = vmatmul.mubr.msk.bf16.gmra.mrb[52].mxu1 %vm364_vm2, %v998_v62  ;;  %2273 = vmatpush3.bf16.msra.mxu0 %v2344_v54 }
  0x85   : > { %2212 = vmatprep.mubr.msk.bf16.mxu1 %vm2361_vm0, %v2360_v1  ;;  %2232 = vmatprep.mubr.msk.bf16.mxu0 %vm2361_vm0, %v2360_v1 }
  0x86   : > { %2274 = vmatprep.subr.bf16.mxu0 %v2360_v1  ;;  %1554 = vperm.xlu1 %2315, %v259_v58  }
  0x88   : > { %2275 = vmatpush3.bf16.msra.mxu0 %v2346_v50 }
  0x8a   : > { %1564 = vperm.xlu1 %2315, %v261_v53  }
  0x8b   : > { %2233 = vmatmul.mubr.msk.bf16.gmra.mrb[56].mxu0 %vm364_vm2, %v2611_v8  ;;  %v263_v8 = vld [vmem:[%s3064_s2 + $0x38] sm:$0xff] }
  0x8c   : > { %2213 = vmatmul.mubr.msk.bf16.gmra.mrb[56].mxu1 %vm364_vm2, %v2604_v63  ;;  %2236 = vmatprep.mubr.msk.bf16.mxu0 %vm2361_vm0, %v2360_v1  ;;  %v265_v63 = vld [vmem:[%s3064_s2 + $0x48] sm:$0xff] }
  0x8d   : > { %2216 = vmatprep.mubr.msk.bf16.mxu1 %vm2361_vm0, %v2360_v1 }
  0x8e   : > { %1574 = vperm.xlu1 %2315, %v263_v8  }
  0x92   : > { %1584 = vperm.xlu1 %2315, %v265_v63  }
  0x93   : > { %2237 = vmatmul.mubr.msk.bf16.gmra.mrb[60].mxu0 %vm364_vm2, %v2619_v18 }
  0x94   : > { %2217 = vmatmul.mubr.msk.bf16.gmra.mrb[60].mxu1 %vm364_vm2, %v2614_v40  ;;  %2240 = vmatprep.mubr.msk.bf16.mxu0 %vm2361_vm0, %v2360_v1 }
  0x95   : > { %2220 = vmatprep.mubr.msk.bf16.mxu1 %vm2361_vm0, %v2360_v1 }
  0x9b   : > { %2241 = vmatmul.mubr.msk.bf16.gmra.mrb[64].mxu0 %vm364_vm2, %v2628_v20 }
  0x9c   : > { %2221 = vmatmul.mubr.msk.bf16.gmra.mrb[64].mxu1 %vm364_vm2, %v2622_v11  ;;  %2244 = vmatprep.mubr.msk.bf16.mxu0 %vm2361_vm0, %v2360_v1 }
  0x9d   : > { %2252 = vmatprep.mubr.msk.bf16.mxu1 %vm2361_vm0, %v2360_v1 }
  0xa3   : > { %2245 = vmatmul.mubr.msk.bf16.gmra.mrb[68].mxu0 %vm364_vm2, %v2631_v24 }
  0xa4   : > { %2253 = vmatmul.mubr.msk.bf16.vlgmr.msra.gmra.mrb[68].mxu1 %vm364_vm2, %v2647_v22  ;;  %2276 = vmatprep.mubr.msk.bf16.mxu0 %vm2361_vm0, %v2360_v1 }
  0xa5   : > { %2256 = vmatprep.mubr.msk.bf16.mxu1 %vm2361_vm0, %v2360_v1 }
  0xab   : > { %2277 = vmatmul.mubr.msk.bf16.vlgmr.msra.gmra.mrb[72].mxu0 %vm364_vm2, %v2659_v28 }
  0xac   : > { %2257 = vmatmul.mubr.msk.bf16.gmra.mrb[72].mxu1 %vm364_vm2, %v2668_v41  ;;  %2280 = vmatprep.mubr.msk.bf16.mxu0 %vm2361_vm0, %v2360_v1 }
  0xad   : > { %2260 = vmatprep.mubr.msk.bf16.mxu1 %vm2361_vm0, %v2360_v1 }
  0xb3   : > { %2281 = vmatmul.mubr.msk.bf16.gmra.mrb[76].mxu0 %vm364_vm2, %v2665_v25 }
  0xb4   : > { %2261 = vmatmul.mubr.msk.bf16.gmra.mrb[76].mxu1 %vm364_vm2, %v2676_v7  ;;  %2284 = vmatprep.mubr.msk.bf16.mxu0 %vm2361_vm0, %v2360_v1 }
  0xb5   : > { %2264 = vmatprep.mubr.msk.bf16.mxu1 %vm2361_vm0, %v2360_v1 }
  0xbb   : > { %2285 = vmatmul.mubr.msk.bf16.gmra.mrb[80].mxu0 %vm364_vm2, %v2685_v60 }
  0xbc   : > { %2265 = vmatmul.mubr.msk.bf16.gmra.mrb[80].mxu1 %vm364_vm2, %v2682_v52  ;;  %2288 = vmatprep.mubr.msk.bf16.mxu0 %vm2361_vm0, %v2360_v1 }
  0xbd   : > { %2268 = vmatprep.mubr.msk.bf16.mxu1 %vm2361_vm0, %v2360_v1 }
  0xc3   : > { %2289 = vmatmul.mubr.msk.bf16.gmra.mrb[84].mxu0 %vm364_vm2, %v2705_v27 }
  0xc4   : > { %2269 = vmatmul.mubr.msk.bf16.gmra.mrb[84].mxu1 %vm364_vm2, %v2702_v19  ;;  %2292 = vmatprep.mubr.msk.bf16.mxu0 %vm2361_vm0, %v2360_v1 }
  0xcb   : > { %2293 = vmatmul.mubr.msk.bf16.gmra.mrb[88].mxu0 %vm364_vm2, %v2716_v42 }
  0xee   : > { %v414_v40 = vpop.f32.mrb[0].mxu0 }
  0xef   : > { %v2086_v18 = vpop.f32.mrb[1].mxu0  ;;  %v438_v11 = vpop.f32.mrb[0].mxu1 }
  0xf0   : > { %v417_v20 = vpop.f32.mrb[2].mxu0  ;;  %v2098_v24 = vpop.f32.mrb[1].mxu1 }
  0xf1   : > { %v2087_v22 = vpop.f32.mrb[3].mxu0  ;;  %v441_v28 = vpop.f32.mrb[2].mxu1 }
  0xf2   : > { %v2099_v25 = vpop.f32.mrb[3].mxu1 }
  0xf6   : > { %v422_v41 = vpop.f32.mrb[4].mxu0 }
  0xf7   : > { %v2090_v7 = vpop.f32.mrb[5].mxu0  ;;  %v446_v52 = vpop.f32.mrb[4].mxu1 }
  0xf8   : > { %v425_v60 = vpop.f32.mrb[6].mxu0  ;;  %v2102_v9 = vpop.f32.mrb[5].mxu1 }
  0xf9   : > { %v2091_v16 = vpop.f32.mrb[7].mxu0  ;;  %v449_v19 = vpop.f32.mrb[6].mxu1 }
  0xfa   : > { %v2103_v27 = vpop.f32.mrb[7].mxu1 }
  0xfe   : > { %v430_v1 = vpop.f32.mrb[8].mxu0 }
  0xff   : > { %v509_v23 = vpop.f32.mrb[8].mxu1  ;;  %v2094_v30 = vpop.f32.mrb[9].mxu0 }
 0x100   : > { %v510_v42 = vadd.f32 %v509_v23, %v414_v40  ;;  %v2110_v29 = vpop.f32.mrb[9].mxu1  ;;  %v433_v31 = vpop.f32.mrb[10].mxu0 }
 0x101   : > { %v512_v13 = vpop.f32.mrb[10].mxu1  ;;  %v2095_v55 = vpop.f32.mrb[11].mxu0 }
 0x102   : > { %v513_v47 = vadd.f32 %v512_v13, %v417_v20  ;;  %v2111_v56 = vpop.f32.mrb[11].mxu1 }
 0x106   : > { %v632_v57 = vpop.f32.mrb[12].mxu0 }
 0x107   : > { %v517_v4 = vpop.f32.mrb[12].mxu1  ;;  %v671_v5 = vadd.f32 %v632_v57, %v510_v42  ;;  %v2134_v6 = vpop.f32.mrb[13].mxu0 }
 0x108   : > { %v518_v14 = vadd.f32 %v517_v4, %v422_v41  ;;  %v2114_v26 = vpop.f32.mrb[13].mxu1  ;;  %v635_v32 = vpop.f32.mrb[14].mxu0 }
 0x109   : > { %v520_v17 = vpop.f32.mrb[14].mxu1  ;;  %v672_v21 = vadd.f32 %v635_v32, %v513_v47  ;;  %v2135_v33 = vpop.f32.mrb[15].mxu0 }
 0x10a   : > { %v521_v35 = vadd.f32 %v520_v17, %v425_v60  ;;  %v2115_v38 = vpop.f32.mrb[15].mxu1 }
 0x10e   : > { %v640_v39 = vpop.f32.mrb[16].mxu0 }
 0x10f   : > { %v525_v37 = vpop.f32.mrb[16].mxu1  ;;  %v673_v44 = vadd.f32 %v640_v39, %v518_v14  ;;  %v2138_v45 = vpop.f32.mrb[17].mxu0 }
 0x110   : > { %v526_v46 = vadd.f32 %v525_v37, %v430_v1  ;;  %v2118_v48 = vpop.f32.mrb[17].mxu1  ;;  %v643_v59 = vpop.f32.mrb[18].mxu0 }
 0x111   : > { %v528_v3 = vpop.f32.mrb[18].mxu1  ;;  %v674_v15 = vadd.f32 %v643_v59, %v521_v35  ;;  %v2139_v34 = vpop.f32.mrb[19].mxu0 }
 0x112   : > { %v529_v43 = vadd.f32 %v528_v3, %v433_v31  ;;  %v2119_v36 = vpop.f32.mrb[19].mxu1 }
 0x116   : > { %v648_v54 = vpop.f32.mrb[20].mxu0 }
 0x117   : > { %v533_v62 = vpop.f32.mrb[20].mxu1  ;;  %v675_v49 = vadd.f32 %v648_v54, %v526_v46  ;;  %v2142_v10 = vpop.f32.mrb[21].mxu0 }
 0x118   : > { %v534_v12 = vadd.f32 %v533_v62, %v438_v11  ;;  %v2122_v51 = vpop.f32.mrb[21].mxu1  ;;  %v651_v50 = vpop.f32.mrb[22].mxu0 }
 0x119   : > { %v536_v58 = vpop.f32.mrb[22].mxu1  ;;  %v676_v61 = vadd.f32 %v651_v50, %v529_v43  ;;  %v2143_v53 = vpop.f32.mrb[23].mxu0 }
 0x11a   : > { %v537_v0 = vadd.f32 %v536_v58, %v441_v28  ;;  %v2123_v8 = vpop.f32.mrb[23].mxu1 }
 0x11e   : > { %v656_v2 = vpop.f32.mrb[24].mxu0 }
 0x11f   : > { %v541_v63 = vpop.f32.mrb[24].mxu1  ;;  %v677_v40 = vadd.f32 %v656_v2, %v534_v12  ;;  %v2146_v18 = vpop.f32.mrb[25].mxu0 }
 0x120   : > { %v542_v20 = vadd.f32 %v541_v63, %v446_v52  ;;  %v2126_v24 = vpop.f32.mrb[25].mxu1  ;;  %v659_v22 = vpop.f32.mrb[26].mxu0 }
 0x121   : > { %v544_v25 = vpop.f32.mrb[26].mxu1  ;;  %v678_v41 = vadd.f32 %v659_v22, %v537_v0  ;;  %v2147_v7 = vpop.f32.mrb[27].mxu0 }
 0x122   : > { %v545_v60 = vadd.f32 %v544_v25, %v449_v19  ;;  %v2127_v9 = vpop.f32.mrb[27].mxu1 }
 0x126   : > { %v664_v11 = vpop.f32.mrb[28].mxu0 }
 0x127   : > { %v679_v16 = vadd.f32 %v664_v11, %v542_v20  ;;  %v770_v27 = vpop.f32.mrb[28].mxu1  ;;  %v2150_v1 = vpop.f32.mrb[29].mxu0 }
 0x128   : > { %v809_v23 = vadd.f32 %v770_v27, %v671_v5  ;;  %v2158_v30 = vpop.f32.mrb[29].mxu1  ;;  %v667_v28 = vpop.f32.mrb[30].mxu0 }
 0x129   : > { %v680_v42 = vadd.f32 %v667_v28, %v545_v60  ;;  %v773_v29 = vpop.f32.mrb[30].mxu1  ;;  %v2151_v31 = vpop.f32.mrb[31].mxu0 }
 0x12a   : > { %v810_v13 = vadd.f32 %v773_v29, %v672_v21  ;;  %v2159_v55 = vpop.f32.mrb[31].mxu1 }
 0x12e   : > { %v939_v52 = vpop.f32.mrb[32].mxu0 }
 0x12f   : > { %v778_v47 = vpop.f32.mrb[32].mxu1  ;;  %v978_v56 = vadd.f32 %v939_v52, %v809_v23  ;;  %v2182_v57 = vpop.f32.mrb[33].mxu0 }
 0x130   : > { %v811_v4 = vadd.f32 %v778_v47, %v673_v44  ;;  %v2162_v6 = vpop.f32.mrb[33].mxu1  ;;  %v942_v19 = vpop.f32.mrb[34].mxu0 }
 0x131   : > { %v781_v14 = vpop.f32.mrb[34].mxu1  ;;  %v979_v26 = vadd.f32 %v942_v19, %v810_v13  ;;  %v2183_v32 = vpop.f32.mrb[35].mxu0 }
 0x132   : > { %v812_v17 = vadd.f32 %v781_v14, %v674_v15  ;;  %v2163_v33 = vpop.f32.mrb[35].mxu1 }
 0x136   : > { %v947_v5 = vpop.f32.mrb[36].mxu0 }
 0x137   : > { %v786_v35 = vpop.f32.mrb[36].mxu1  ;;  %v980_v38 = vadd.f32 %v947_v5, %v811_v4  ;;  %v2186_v39 = vpop.f32.mrb[37].mxu0 }
 0x138   : > { %v813_v37 = vadd.f32 %v786_v35, %v675_v49  ;;  %v2166_v45 = vpop.f32.mrb[37].mxu1  ;;  %v950_v21 = vpop.f32.mrb[38].mxu0 }
 0x139   : > { %v789_v46 = vpop.f32.mrb[38].mxu1  ;;  %v981_v48 = vadd.f32 %v950_v21, %v812_v17  ;;  %v2187_v59 = vpop.f32.mrb[39].mxu0 }
 0x13a   : > { %v814_v3 = vadd.f32 %v789_v46, %v676_v61  ;;  %v2167_v34 = vpop.f32.mrb[39].mxu1 }
 0x13e   : > { %v955_v44 = vpop.f32.mrb[40].mxu0 }
 0x13f   : > { %v794_v43 = vpop.f32.mrb[40].mxu1  ;;  %v982_v36 = vadd.f32 %v955_v44, %v813_v37  ;;  %v2190_v54 = vpop.f32.mrb[41].mxu0 }
 0x140   : > { %v815_v62 = vadd.f32 %v794_v43, %v677_v40  ;;  %v2170_v10 = vpop.f32.mrb[41].mxu1  ;;  %v958_v15 = vpop.f32.mrb[42].mxu0 }
 0x141   : > { %v797_v12 = vpop.f32.mrb[42].mxu1  ;;  %v983_v51 = vadd.f32 %v958_v15, %v814_v3  ;;  %v2191_v50 = vpop.f32.mrb[43].mxu0 }
 0x142   : > { %v816_v58 = vadd.f32 %v797_v12, %v678_v41  ;;  %v2171_v53 = vpop.f32.mrb[43].mxu1 }
 0x146   : > { %v963_v49 = vpop.f32.mrb[44].mxu0 }
 0x147   : > { %v802_v0 = vpop.f32.mrb[44].mxu1  ;;  %v984_v8 = vadd.f32 %v963_v49, %v815_v62  ;;  %v2194_v2 = vpop.f32.mrb[45].mxu0 }
 0x148   : > { %v817_v63 = vadd.f32 %v802_v0, %v679_v16  ;;  %v2174_v18 = vpop.f32.mrb[45].mxu1  ;;  %v966_v61 = vpop.f32.mrb[46].mxu0 }
 0x149   : > { %v805_v20 = vpop.f32.mrb[46].mxu1  ;;  %v985_v24 = vadd.f32 %v966_v61, %v816_v58  ;;  %v2195_v22 = vpop.f32.mrb[47].mxu0 }
 0x14a   : > { %v818_v25 = vadd.f32 %v805_v20, %v680_v42  ;;  %v2175_v7 = vpop.f32.mrb[47].mxu1 }
 0x14e   : > { %v971_v40 = vpop.f32.mrb[48].mxu0 }
 0x14f   : > { %v986_v60 = vadd.f32 %v971_v40, %v817_v63  ;;  %v1066_v9 = vpop.f32.mrb[48].mxu1  ;;  %v2198_v11 = vpop.f32.mrb[49].mxu0 }
 0x150   : > { %v1105_v27 = vadd.f32 %v1066_v9, %v978_v56  ;;  %v2206_v1 = vpop.f32.mrb[49].mxu1  ;;  %v974_v41 = vpop.f32.mrb[50].mxu0 }
 0x151   : > { %v987_v23 = vadd.f32 %v974_v41, %v818_v25  ;;  %v1069_v30 = vpop.f32.mrb[50].mxu1  ;;  %v2199_v28 = vpop.f32.mrb[51].mxu0 }
 0x152   : > { %v1106_v29 = vadd.f32 %v1069_v30, %v979_v26  ;;  %v2207_v31 = vpop.f32.mrb[51].mxu1 }
 0x156   : > { %v1196_v16 = vpop.f32.mrb[52].mxu0 }
 0x157   : > { %v1074_v13 = vpop.f32.mrb[52].mxu1  ;;  %v1235_v55 = vadd.f32 %v1196_v16, %v1105_v27  ;;  %v2230_v52 = vpop.f32.mrb[53].mxu0 }
 0x158   : > { %v1107_v47 = vadd.f32 %v1074_v13, %v980_v38  ;;  %v2210_v57 = vpop.f32.mrb[53].mxu1  ;;  %v1199_v42 = vpop.f32.mrb[54].mxu0 }
 0x159   : > { %v1077_v4 = vpop.f32.mrb[54].mxu1  ;;  %v1236_v6 = vadd.f32 %v1199_v42, %v1106_v29  ;;  %v2231_v19 = vpop.f32.mrb[55].mxu0 }
 0x15a   : > { %v1108_v14 = vadd.f32 %v1077_v4, %v981_v48  ;;  %v2211_v32 = vpop.f32.mrb[55].mxu1  ;;  %v1540_v29 = vpop.permute.xlu0 %1539 }
 0x15b   : > { %v1550_v32 = vpop.permute.xlu1 %1549 }
 0x15e   : > { %v1204_v56 = vpop.f32.mrb[56].mxu0 }
 0x15f   : > { %v1082_v17 = vpop.f32.mrb[56].mxu1  ;;  %v1237_v33 = vadd.f32 %v1204_v56, %v1107_v47  ;;  %v2234_v5 = vpop.f32.mrb[57].mxu0 }
 0x160   : > { %v1109_v35 = vadd.f32 %v1082_v17, %v982_v36  ;;  %v2214_v39 = vpop.f32.mrb[57].mxu1  ;;  %v1207_v26 = vpop.f32.mrb[58].mxu0 }
 0x161   : > { %v1085_v37 = vpop.f32.mrb[58].mxu1  ;;  %v1238_v45 = vadd.f32 %v1207_v26, %v1108_v14  ;;  %v2235_v21 = vpop.f32.mrb[59].mxu0  ;;  %v2933_v14 = vld [vmem:[%s3065_s3] ss:$0 sm:$0xff] }
 0x162   : > { %v1110_v46 = vadd.f32 %v1085_v37, %v983_v51  ;;  %v2215_v59 = vpop.f32.mrb[59].mxu1  ;;  %v1545_v17 = vpop.permute.xlu0 %1544 }
 0x166   : > { %v1212_v38 = vpop.f32.mrb[60].mxu0 }
 0x167   : > { %v1090_v3 = vpop.f32.mrb[60].mxu1  ;;  %v1239_v34 = vadd.f32 %v1212_v38, %v1109_v35  ;;  %v2238_v44 = vpop.f32.mrb[61].mxu0 }
 0x168   : > { %v1111_v43 = vadd.f32 %v1090_v3, %v984_v8  ;;  %v2218_v54 = vpop.f32.mrb[61].mxu1  ;;  %v1215_v48 = vpop.f32.mrb[62].mxu0 }
 0x169   : > { %v1093_v62 = vpop.f32.mrb[62].mxu1  ;;  %v1240_v10 = vadd.f32 %v1215_v48, %v1110_v46  ;;  %v2239_v15 = vpop.f32.mrb[63].mxu0 }
 0x16a   : > { %v1112_v12 = vadd.f32 %v1093_v62, %v985_v24  ;;  %v2219_v50 = vpop.f32.mrb[63].mxu1 }
 0x16e   : > { %v1220_v36 = vpop.f32.mrb[64].mxu0 }
 0x16f   : > { %v1098_v58 = vpop.f32.mrb[64].mxu1  ;;  %v2922_v53 = vadd.f32 %v1220_v36, %v1111_v43  ;;  %v2242_v49 = vpop.f32.mrb[65].mxu0 }
 0x170   : > { %v1113_v0 = vadd.f32 %v1098_v58, %v986_v60  ;;  %v2222_v51 = vpop.f32.mrb[65].mxu1  ;;  %v1223_v2 = vpop.f32.mrb[66].mxu0 }
 0x171   : > { %v1101_v63 = vpop.f32.mrb[66].mxu1  ;;  %v2924_v18 = vadd.f32 %v1223_v2, %v1112_v12  ;;  %v2243_v61 = vpop.f32.mrb[67].mxu0 }
 0x172   : > { %v1114_v8 = vadd.f32 %v1101_v63, %v987_v23  ;;  %v2223_v20 = vpop.f32.mrb[67].mxu1  ;;  %v1555_v49 = vpop.permute.xlu1 %1554 }
 0x176   : > { %v1228_v22 = vpop.f32.mrb[68].mxu0 }
 0x177   : > { %v2926_v25 = vadd.f32 %v1228_v22, %v1113_v0  ;;  %v1345_v7 = vpop.f32.mrb[68].mxu1  ;;  %v2246_v24 = vpop.f32.mrb[69].mxu0 }
 0x178   : > { %v1384_v40 = vadd.f32 %v1345_v7, %v1235_v55  ;;  %v2254_v9 = vpop.f32.mrb[69].mxu1  ;;  %v1231_v11 = vpop.f32.mrb[70].mxu0 }
 0x179   : > { %v2928_v27 = vadd.f32 %v1231_v11, %v1114_v8  ;;  %v1348_v1 = vpop.f32.mrb[70].mxu1  ;;  %v2247_v60 = vpop.f32.mrb[71].mxu0 }
 0x17a   : > { %v1385_v41 = vadd.f32 %v1348_v1, %v1236_v6  ;;  %v2255_v30 = vpop.f32.mrb[71].mxu1 }
 0x17e   : > { %v1472_v28 = vpop.f32.mrb[72].mxu0 }
 0x17f   : > { %v1353_v31 = vpop.f32.mrb[72].mxu1  ;;  %v1511_v16 = vadd.f32 %v1472_v28, %v1384_v40  ;;  %v2278_v23 = vpop.f32.mrb[73].mxu0 }
 0x180   : > { %v1386_v13 = vadd.f32 %v1353_v31, %v1237_v33  ;;  %v2258_v52 = vpop.f32.mrb[73].mxu1  ;;  %v1475_v47 = vpop.f32.mrb[74].mxu0 }
 0x181   : > { %v1356_v57 = vpop.f32.mrb[74].mxu1  ;;  %v1512_v42 = vadd.f32 %v1475_v47, %v1385_v41  ;;  %v2279_v4 = vpop.f32.mrb[75].mxu0  ;;  %v2939_v56 = vadd.f32 %v2933_v14, %v1511_v16 }
 0x182   : > { %v1387_v55 = vadd.f32 %v1356_v57, %v1238_v45  ;;  %v2259_v19 = vpop.f32.mrb[75].mxu1  ;;  %v1560_v31 = vpop.permute.xlu0 %1559 }
 0x183   : > { %v2936_v6 = vadd.f32 %v2933_v14, %v1512_v42  ;;  %v1622_v44 = vmul.f32 %v2939_v56, %v2939_v56  ;;  %v1587_v15 = vmul.f32 %v1540_v29, %v2939_v56 }
 0x185   : > { %v1623_v26 = vmul.f32 %v2936_v6, %v2936_v6  ;;  %v1588_v48 = vmul.f32 %v1545_v17, %v2936_v6  ;;  %v1632_v36 = vmul.f32 %v1622_v44, %v1540_v29  ;;  %v1597_v8 = vsel %vm364_vm2, %v1587_v15, 0.0 }
 0x186   : > { %v1480_v33 = vpop.f32.mrb[76].mxu0 }
 0x187   : > { %v1361_v5 = vpop.f32.mrb[76].mxu1  ;;  %v1513_v35 = vadd.f32 %v1480_v33, %v1386_v13  ;;  %v2282_v39 = vpop.f32.mrb[77].mxu0  ;;  %v1633_v12 = vmul.f32 %v1623_v26, %v1545_v17  ;;  %v1642_v30 = vsel %vm364_vm2, %v1632_v36, 0.0 }
 0x188   : > { %v1388_v37 = vadd.f32 %v1361_v5, %v1239_v34  ;;  %v2262_v45 = vpop.f32.mrb[77].mxu1  ;;  %v1483_v21 = vpop.f32.mrb[78].mxu0 }
 0x189   : > { %v2944_v46 = vadd.f32 %v2933_v14, %v1513_v35  ;;  %v1364_v59 = vpop.f32.mrb[78].mxu1  ;;  %v1514_v38 = vadd.f32 %v1483_v21, %v1387_v55  ;;  %v2283_v3 = vpop.f32.mrb[79].mxu0  ;;  %v1643_v20 = vsel %vm364_vm2, %v1633_v12, 0.0 }
 0x18a   : > { %v1389_v43 = vadd.f32 %v1364_v59, %v1240_v10  ;;  %v2263_v54 = vpop.f32.mrb[79].mxu1  ;;  %v1598_v10 = vsel %vm364_vm2, %v1588_v48, 0.0  ;;  %v1644_v57 = vadd.f32 %v1643_v20, %v1642_v30  ;;  %v1570_v12 = vpop.permute.xlu0 %1569 }
 0x18b   : > { %v1624_v62 = vmul.f32 %v2944_v46, %v2944_v46  ;;  %v2952_v34 = vadd.f32 %v2933_v14, %v1514_v38  ;;  %v1589_v50 = vmul.f32 %v1550_v32, %v2944_v46  ;;  %v1599_v28 = vadd.f32 %v1598_v10, %v1597_v8 }
 0x18d   : > { %v1634_v58 = vmul.f32 %v1624_v62, %v1550_v32  ;;  %v1625_v51 = vmul.f32 %v2952_v34, %v2952_v34  ;;  %v1600_v40 = vsel %vm364_vm2, %v1589_v50, 0.0  ;;  %v1590_v9 = vmul.f32 %v1555_v49, %v2952_v34 }
 0x18e   : > { %v1488_v0 = vpop.f32.mrb[80].mxu0  ;;  %v1601_v42 = vadd.f32 %v1600_v40, %v1599_v28 }
 0x18f   : > { %v1369_v2 = vpop.f32.mrb[80].mxu1  ;;  %v1515_v63 = vadd.f32 %v1488_v0, %v1388_v37  ;;  %v2286_v61 = vpop.f32.mrb[81].mxu0  ;;  %v1645_v29 = vsel %vm364_vm2, %v1634_v58, 0.0  ;;  %v1635_v23 = vmul.f32 %v1625_v51, %v1555_v49  ;;  %v1602_v4 = vsel %vm364_vm2, %v1590_v9, 0.0 }
 0x190   : > { %v1390_v22 = vadd.f32 %v1369_v2, %v2922_v53  ;;  %v2266_v7 = vpop.f32.mrb[81].mxu1  ;;  %v1491_v24 = vpop.f32.mrb[82].mxu0  ;;  %v1646_v32 = vadd.f32 %v1645_v29, %v1644_v57  ;;  %v1603_v45 = vadd.f32 %v1602_v4, %v1601_v42 }
 0x191   : > { %v2965_v11 = vadd.f32 %v2933_v14, %v1515_v63  ;;  %v1372_v1 = vpop.f32.mrb[82].mxu1  ;;  %v1516_v60 = vadd.f32 %v1491_v24, %v1389_v43  ;;  %v2287_v41 = vpop.f32.mrb[83].mxu0  ;;  %v1647_v33 = vsel %vm364_vm2, %v1635_v23, 0.0 }
 0x192   : > { %v1391_v53 = vadd.f32 %v1372_v1, %v2924_v18  ;;  %v2267_v16 = vpop.f32.mrb[83].mxu1  ;;  %v1565_v18 = vpop.permute.xlu1 %1564  ;;  %v1648_v15 = vadd.f32 %v1647_v33, %v1646_v32 }
 0x193   : > { %v1591_v13 = vmul.f32 %v1560_v31, %v2965_v11  ;;  %v1626_v52 = vmul.f32 %v2965_v11, %v2965_v11  ;;  %v2974_v47 = vadd.f32 %v2933_v14, %v1516_v60  ;;  %v1580_v16 = vpop.permute.xlu0 %1579 }
 0x195   : > { %v1636_v55 = vmul.f32 %v1626_v52, %v1560_v31  ;;  %v1627_v19 = vmul.f32 %v2974_v47, %v2974_v47  ;;  %v1604_v5 = vsel %vm364_vm2, %v1591_v13, 0.0  ;;  %v1592_v35 = vmul.f32 %v1565_v18, %v2974_v47 }
 0x196   : > { %v1496_v17 = vpop.f32.mrb[84].mxu0  ;;  %v1605_v50 = vadd.f32 %v1604_v5, %v1603_v45  ;;  %v1575_v2 = vpop.permute.xlu1 %1574 }
 0x197   : > { %v1377_v39 = vpop.f32.mrb[84].mxu1  ;;  %v1517_v26 = vadd.f32 %v1496_v17, %v1390_v22  ;;  %v2290_v37 = vpop.f32.mrb[85].mxu0  ;;  %v1637_v21 = vmul.f32 %v1627_v19, %v1565_v18  ;;  %v1649_v44 = vsel %vm364_vm2, %v1636_v55, 0.0  ;;  %v1606_v49 = vsel %vm364_vm2, %v1592_v35, 0.0 }
 0x198   : > { %v1392_v59 = vadd.f32 %v1377_v39, %v2926_v25  ;;  %v2270_v38 = vpop.f32.mrb[85].mxu1  ;;  %v1499_v3 = vpop.f32.mrb[86].mxu0  ;;  %v1650_v51 = vadd.f32 %v1649_v44, %v1648_v15  ;;  %v1607_v22 = vadd.f32 %v1606_v49, %v1605_v50 }
 0x199   : > { %v2985_v43 = vadd.f32 %v2933_v14, %v1517_v26  ;;  %v1380_v54 = vpop.f32.mrb[86].mxu1  ;;  %v1518_v48 = vadd.f32 %v1499_v3, %v1391_v53  ;;  %v2291_v62 = vpop.f32.mrb[87].mxu0  ;;  %v1651_v63 = vsel %vm364_vm2, %v1637_v21, 0.0 }
 0x19a   : > { %v1393_v36 = vadd.f32 %v1380_v54, %v2928_v27  ;;  %v2271_v58 = vpop.f32.mrb[87].mxu1  ;;  %v1652_v60 = vadd.f32 %v1651_v63, %v1650_v51  ;;  %v1585_v4 = vpop.permute.xlu1 %1584 }
 0x19b   : > { %v1593_v25 = vmul.f32 %v1570_v12, %v2985_v43  ;;  %v1628_v0 = vmul.f32 %v2985_v43, %v2985_v43  ;;  %v2993_v10 = vadd.f32 %v2933_v14, %v1518_v48 }
 0x19d   : > { %v1608_v61 = vsel %vm364_vm2, %v1593_v25, 0.0  ;;  %v1638_v8 = vmul.f32 %v1628_v0, %v1570_v12  ;;  %v1594_v27 = vmul.f32 %v1575_v2, %v2993_v10  ;;  %v1629_v20 = vmul.f32 %v2993_v10, %v2993_v10 }
 0x19e   : > { %v1504_v7 = vpop.f32.mrb[88].mxu0  ;;  %v1609_v41 = vadd.f32 %v1608_v61, %v1607_v22 }
 0x19f   : > { %v1653_v24 = vsel %vm364_vm2, %v1638_v8, 0.0  ;;  %v1639_v40 = vmul.f32 %v1629_v20, %v1575_v2  ;;  %v1519_v9 = vadd.f32 %v1504_v7, %v1392_v59  ;;  %v2294_v1 = vpop.f32.mrb[89].mxu0  ;;  %v1610_v28 = vsel %vm364_vm2, %v1594_v27, 0.0 }
 0x1a0   : > { %v1507_v30 = vpop.f32.mrb[90].mxu0  ;;  %v1654_v23 = vadd.f32 %v1653_v24, %v1652_v60  ;;  %v1611_v55 = vadd.f32 %v1610_v28, %v1609_v41 }
 0x1a1   : > { %v3003_v29 = vadd.f32 %v2933_v14, %v1519_v9  ;;  %v1520_v31 = vadd.f32 %v1507_v30, %v1393_v36  ;;  %v2295_v53 = vpop.f32.mrb[91].mxu0  ;;  %v1655_v13 = vsel %vm364_vm2, %v1639_v40, 0.0 }
 0x1a2   : > { %v1656_v33 = vadd.f32 %v1655_v13, %v1654_v23 }
 0x1a3   : > { %v1595_v52 = vmul.f32 %v1580_v16, %v3003_v29  ;;  %v1630_v57 = vmul.f32 %v3003_v29, %v3003_v29  ;;  %v3010_v42 = vadd.f32 %v2933_v14, %v1520_v31 }
 0x1a5   : > { %v1612_v19 = vsel %vm364_vm2, %v1595_v52, 0.0  ;;  %v1640_v32 = vmul.f32 %v1630_v57, %v1580_v16  ;;  %v1596_v18 = vmul.f32 %v1585_v4, %v3010_v42  ;;  %v1631_v17 = vmul.f32 %v3010_v42, %v3010_v42  ;;  %v254_v57 = vld [vmem:[%s3066_s4] sm:$0x1] }
 0x1a6   : > { %v1613_v5 = vadd.f32 %v1612_v19, %v1611_v55  ;;  %v1698_v16 = vlaneseq }
 0x1a7   : > { %v1657_v35 = vsel %vm364_vm2, %v1640_v32, 0.0  ;;  %v1614_v39 = vsel %vm364_vm2, %v1596_v18, 0.0  ;;  %v1641_v26 = vmul.f32 %v1631_v17, %v1585_v4  ;;  %v255_v17 = vld [vmem:[%s3067_s5] sm:$0x1] }
 0x1a8   : > { %v1615_v37 = vadd.f32 %v1614_v39, %v1613_v5  ;;  %v1658_v14 = vadd.f32 %v1657_v35, %v1656_v33  ;;  %v1699_v23 = vand.u32 127, %v1698_v16  ;;  %v1712_v13 = vshrl.u32 %v1698_v16, 7 }
 0x1a9   : > { %v1659_v45 = vsel %vm364_vm2, %v1641_v26, 0.0 }
 0x1aa   : > { %v1616_v21 = vrot.slane %v1615_v37, 4  ;;  %v1660_v59 = vadd.f32 %v1659_v45, %v1658_v14  ;;  %vm1700_vm9 = vcmp.lt.s32.totalorder %v1699_v23, 16  ;;  %v1713_v55 = vsub.s32 0, %v1712_v13 }
 0x1ac   : > { %v1617_v38 = vadd.f32 %v1616_v21, %v1615_v37  ;;  %v1661_v3 = vrot.slane %v1660_v59, 4 }
 0x1ae   : > { %v1618_v44 = vrot.slane %v1617_v38, 2  ;;  %v1662_v54 = vadd.f32 %v1661_v3, %v1660_v59 }
 0x1b0   : > { %v1619_v48 = vadd.f32 %v1618_v44, %v1617_v38  ;;  %v1663_v62 = vrot.slane %v1662_v54, 2 }
 0x1b2   : > { %v1620_v15 = vrot.slane %v1619_v48, 1  ;;  %v1664_v12 = vadd.f32 %v1663_v62, %v1662_v54 }
 0x1b4   : > { %v1621_v50 = vadd.f32 %v1620_v15, %v1619_v48  ;;  %v1665_v36 = vrot.slane %v1664_v12, 1 }
 0x1b6   : > { %1673 = vrot.lane.b32.xlu0 %v1621_v50, %s2363_s17  ;;  %v1666_v58 = vadd.f32 %v1665_v36, %v1664_v12  ;;  %v1668_v49 = vsel %vm1667_vm8, %v1621_v50, 0.0 }
 0x1b8   : > { %1688 = vrot.lane.b32.xlu1 %v1666_v58, %s2363_s17  ;;  %v1680_v25 = vsel %vm1667_vm8, %v1666_v58, 0.0 }
 0x1d5   : > { %1669 = vadd.xlane.f32.xlu0 %v1668_v49 }
 0x1d9   : > { %1681 = vadd.xlane.f32.xlu0 %v1680_v25 }
 0x228   : > { %v1674_v0 = vpop.permute.xlu0 %1673 }
 0x229   : > { %v1676_v51 = vsel %vm1667_vm8, %v1674_v0, 0.0 }
 0x22a   : > { %v1689_v2 = vpop.permute.xlu1 %1688  ;;  %1677 = vadd.xlane.f32.xlu1 %v1676_v51 }
 0x22b   : > { %v1691_v63 = vsel %vm1667_vm8, %v1689_v2, 0.0 }
 0x22c   : > { %1692 = vadd.xlane.f32.xlu0 %v1691_v63 }
 0x262   : > { %v1670_v61 = vpop.xlane.xlu0 %1669 }
 0x263   : > { %v1671_v27 = vmul.f32 0.0009765625, %v1670_v61 }
 0x265   : > { %v1684_v22 = vmul.f32 %v1671_v27, %v1671_v27 }
 0x266   : > { %v1682_v8 = vpop.xlane.xlu0 %1681 }
 0x267   : > { %v1683_v20 = vmul.f32 0.0009765625, %v1682_v8 }
 0x269   : > { %v1685_v7 = vsub.f32 %v1683_v20, %v1684_v22 }
 0x26b   : > { %v1686_v9 = vmax.f32 %v1685_v7, 0.0 }
 0x26d   : > { %v1702_v28 = vadd.f32 1e-05, %v1686_v9 }
 0x26f   : > { %2348 = vrsqrt.f32 %v1702_v28 }
 0x279   : > { %v2349_v52 = vpop.eup %2348 }
 0x2b7   : > { %v1678_v24 = vpop.xlane.xlu1 %1677 }
 0x2b8   : > { %v1679_v40 = vmul.f32 0.0009765625, %v1678_v24 }
 0x2b9   : > { %v1693_v1 = vpop.xlane.xlu0 %1692 }
 0x2ba   : > { %v1695_v60 = vmul.f32 %v1679_v40, %v1679_v40  ;;  %v1694_v41 = vmul.f32 0.0009765625, %v1693_v1  ;;  %v1701_v18 = vsel %vm1700_vm9, %v1671_v27, %v1679_v40 }
 0x2bc   : > { %v1696_v30 = vsub.f32 %v1694_v41, %v1695_v60 }
 0x2be   : > { %v1697_v31 = vmax.f32 %v1696_v30, 0.0 }
 0x2c0   : > { %v1704_v53 = vadd.f32 1e-05, %v1697_v31 }
 0x2c2   : > { %2350 = vrsqrt.f32 %v1704_v53 }
 0x2cc   : > { %v2351_v4 = vpop.eup %2350 }
 0x2cd   : > { %v1706_v19 = vsel %vm1700_vm9, %v2349_v52, %v2351_v4 }
 0x2ce   : > { %v1707_v32 = vmul.f32 %v1706_v19, %v254_v57 }
 0x2d0   : > { %v1708_v33 = vmul.f32 %v1707_v32, %v1701_v18  ;;  %v1714_v5 = vrot.slane %v1707_v32, %v1713_v55 }
 0x2d2   : > { %v1709_v35 = vsub.f32 %v255_v17, %v1708_v33  ;;  %v1716_v39 = vmul.f32 %v1714_v5, %v2939_v56  ;;  %v1717_v26 = vmul.f32 %v1714_v5, %v2936_v6  ;;  %v1718_v37 = vmul.f32 %v1714_v5, %v2944_v46 }
 0x2d3   : > { %v1719_v14 = vmul.f32 %v1714_v5, %v2952_v34  ;;  %v1720_v45 = vmul.f32 %v1714_v5, %v2965_v11  ;;  %v1721_v21 = vmul.f32 %v1714_v5, %v2974_v47  ;;  %v1722_v38 = vmul.f32 %v1714_v5, %v2985_v43 }
 0x2d4   : > { %v1730_v59 = vrot.slane %v1709_v35, %v1713_v55  ;;  %v1723_v3 = vmul.f32 %v1714_v5, %v2993_v10  ;;  %v1724_v44 = vmul.f32 %v1714_v5, %v3003_v29  ;;  %v1725_v54 = vmul.f32 %v1714_v5, %v3010_v42 }
 0x2d6   : > { %v1732_v56 = vadd.f32 %v1730_v59, %v1716_v39  ;;  %v1733_v48 = vadd.f32 %v1730_v59, %v1717_v26  ;;  %v1734_v6 = vadd.f32 %v1730_v59, %v1718_v37  ;;  %v1735_v46 = vadd.f32 %v1730_v59, %v1719_v14 }
 0x2d7   : > { %v1736_v34 = vadd.f32 %v1730_v59, %v1720_v45  ;;  %v1737_v62 = vadd.f32 %v1730_v59, %v1721_v21  ;;  %v1738_v11 = vadd.f32 %v1730_v59, %v1722_v38  ;;  %v1739_v15 = vadd.f32 %v1730_v59, %v1723_v3 }
 0x2d8   : > { %v1740_v47 = vadd.f32 %v1730_v59, %v1724_v44  ;;  %v1741_v12 = vadd.f32 %v1730_v59, %v1725_v54  ;;  %vm1742_vm11 = vcmp.gt.f32.partialorder %v1732_v56, 0.0  ;;  %vm1743_vm12 = vcmp.gt.f32.partialorder %v1733_v48, 0.0 }
 0x2d9   : > { %vm1744_vm13 = vcmp.gt.f32.partialorder %v1734_v6, 0.0  ;;  %vm1745_vm14 = vcmp.gt.f32.partialorder %v1735_v46, 0.0  ;;  %vm1746_vm15 = vcmp.gt.f32.partialorder %v1736_v34, 0.0  ;;  %vm1747_vm0 = vcmp.gt.f32.partialorder %v1737_v62, 0.0 }
 0x2da   : > { %vm1748_vm1 = vcmp.gt.f32.partialorder %v1738_v11, 0.0  ;;  %vm1749_vm2 = vcmp.gt.f32.partialorder %v1739_v15, 0.0  ;;  %vm1750_vm3 = vcmp.gt.f32.partialorder %v1740_v47, 0.0  ;;  %vm1751_vm4 = vcmp.gt.f32.partialorder %v1741_v12, 0.0 }
 0x2db   : > { %v1752_v43 = vmul.f32 0.2, %v1732_v56  ;;  %v1753_v10 = vmul.f32 0.2, %v1733_v48  ;;  %v1754_v29 = vmul.f32 0.2, %v1734_v6 }
 0x2dc   : > { %v1755_v42 = vmul.f32 0.2, %v1735_v46  ;;  %v1756_v50 = vmul.f32 0.2, %v1736_v34  ;;  %v1757_v36 = vmul.f32 0.2, %v1737_v62 }
 0x2dd   : > { %v1758_v58 = vmul.f32 0.2, %v1738_v11  ;;  %v1759_v49 = vmul.f32 0.2, %v1739_v15  ;;  %v1760_v25 = vmul.f32 0.2, %v1740_v47  ;;  %v1762_v0 = vsel %vm1742_vm11, %v1732_v56, %v1752_v43 }
 0x2de   : > { %v1761_v51 = vmul.f32 0.2, %v1741_v12  ;;  %v1763_v2 = vsel %vm1743_vm12, %v1733_v48, %v1753_v10  ;;  %v1764_v63 = vsel %vm1744_vm13, %v1734_v6, %v1754_v29  ;;  %v1765_v61 = vsel %vm1745_vm14, %v1735_v46, %v1755_v42 }
 0x2df   : > { %v1766_v8 = vsel %vm1746_vm15, %v1736_v34, %v1756_v50  ;;  %v1767_v27 = vsel %vm1747_vm0, %v1737_v62, %v1757_v36  ;;  %v1768_v20 = vsel %vm1748_vm1, %v1738_v11, %v1758_v58  ;;  %v1769_v22 = vsel %vm1749_vm2, %v1739_v15, %v1759_v49 }
 0x2e0   : > { %v1770_v7 = vsel %vm1750_vm3, %v1740_v47, %v1760_v25  ;;  %v1771_v24 = vsel %vm1751_vm4, %v1741_v12, %v1761_v51  ;;  %v2007_v40 = vpack.c.bf16 %v1762_v0, %v1762_v0  ;;  %v2008_v9 = vpack.c.bf16 %v1763_v2, %v1763_v2 }
 0x2e1   : > { %v2009_v1 = vpack.c.bf16 %v1764_v63, %v1764_v63  ;;  %v2010_v60 = vpack.c.bf16 %v1765_v61, %v1765_v61  ;;  %v2011_v41 = vpack.c.bf16 %v1766_v8, %v1766_v8  ;;  %v2012_v30 = vpack.c.bf16 %v1767_v27, %v1767_v27 }
 0x2e2   : > { %v2013_v28 = vpack.c.bf16 %v1768_v20, %v1768_v20  ;;  %v2014_v31 = vpack.c.bf16 %v1769_v22, %v1769_v22  ;;  %v2015_v53 = vpack.c.bf16 %v1770_v7, %v1770_v7  ;;  %v2016_v16 = vpack.c.bf16 %v1771_v24, %v1771_v24  ;;  %1813 = vst.msk [vmem:[%s251_s26] sm:$0xf] %vm1812_vm10, %v2007_v40 }
 0x2e3   : > { %1814 = vst.msk [vmem:[%s251_s26 + $0x4] sm:$0xf] %vm1812_vm10, %v2008_v9  ;;  %1815 = vst.msk [vmem:[%s251_s26 + $0x8] sm:$0xf] %vm1812_vm10, %v2009_v1 }
 0x2e4   : > { %1816 = vst.msk [vmem:[%s251_s26 + $0xc] sm:$0xf] %vm1812_vm10, %v2010_v60  ;;  %1817 = vst.msk [vmem:[%s251_s26 + $0x10] sm:$0xf] %vm1812_vm10, %v2011_v41 }
 0x2e5   : > { %1818 = vst.msk [vmem:[%s251_s26 + $0x14] sm:$0xf] %vm1812_vm10, %v2012_v30  ;;  %1819 = vst.msk [vmem:[%s251_s26 + $0x18] sm:$0xf] %vm1812_vm10, %v2013_v28 }
 0x2e6   : > { %1820 = vst.msk [vmem:[%s251_s26 + $0x1c] sm:$0xf] %vm1812_vm10, %v2014_v31  ;;  %1821 = vst.msk [vmem:[%s251_s26 + $0x20] sm:$0xf] %vm1812_vm10, %v2015_v53 }
 0x2e7   : > { %1822 = vst.msk [vmem:[%s251_s26 + $0x24] sm:$0xf] %vm1812_vm10, %v2016_v16 }
 0x2e8 PF: > { %s16_s21 = sadd.s32 1, %s2358_s21  }
 0x2e9   : > { %p13_p4 = scmp.ge.s32.totalorder %s16_s21, 4  }
 0x2eb   :  { %15 = sbr.rel (!%p13_p4) target bundleno = 1 (0x1), region = 82 }

// kernel: encoder_forward.7
= control target key start
LH: loop header
LB: loop body
LE: loop exit
PB: predicated region body
PF: predicated region fallthrough
CT: control target
= control target key end

     0   :  { %s1285_s21 = smov 0   ;;  %s1451_s0 = inlined_call_operand.vmem [shape: bf16[2,30,128], index: 0, kind: input, shape index: {}]   ;;  %s1452_s1 = inlined_call_operand.vmem [shape: bf16[4,128,32], index: 1, kind: input, shape index: {}]   ;;  %s1453_s2 = inlined_call_operand.vmem [shape: f32[20,1], index: 2, kind: input, shape index: {}]   ;;  %s1454_s3 = inlined_call_operand.vmem [shape: f32[1,32], index: 3, kind: input, shape index: {}]   ;;  %s1455_s4 = inlined_call_operand.vmem [shape: f32[1,32], index: 4, kind: input, shape index: {}]   ;;  %s1456_s5 = inlined_call_operand.vmem [shape: f32[1,32], index: 5, kind: input, shape index: {}]   ;;  %s1457_s6 = inlined_call_operand.vmem [shape: bf16[2,20,32], index: 6, kind: output, shape index: {}]  }
   0x1 LB: > { %s967_s22 = sadd.s32 4294967295, %s1246_s21   ;;  %p971_p0 = scmp.ge.s32.totalorder %s1246_s21, 1  ;;  %s1246_s21 = sphi %s1285_s21, %s16_s21  }
   0x2   : > { %p212_p1 = scmp.lt.s32.totalorder %s1246_s21, 3 }
   0x4   : > { %p213_p2 = pnand %p971_p0, %p212_p1 }
   0x5   : > { %v1201_v0 = vld [vmem:[%s1452_s1 + $0x40] sm:$0xff] (!%p213_p2)   ;;  %v1203_v2 = vld [vmem:[%s1452_s1 + $0x48] sm:$0xff] (!%p213_p2)   ;;  %p242_p3 = scmp.lt.s32.totalorder (!%p213_p2), %s967_s22, 1  ;;  %v1205_v4 = vld [vmem:[%s1452_s1 + $0x50] sm:$0xff] (!%p213_p2)   ;;  %v1248_v6 = vmov (!%p213_p2), 0   ;;  %vm663_vm1 = vcmask (!%p213_p2), 1044480  }
   0x6   : > { %216 = sbr.rel (%p213_p2) target bundleno = 610 (0x262), region = 44  ;;  %v1202_v1 = vld [vmem:[%s1452_s1] sm:$0xff] (!%p213_p2)   ;;  %1108 = vmatprep.subr.bf16.mxu0 (!%p213_p2), %v1201_v0  ;;  %v1204_v3 = vld [vmem:[%s1452_s1 + $0x8] sm:$0xff] (!%p213_p2)   ;;  %v1206_v5 = vld [vmem:[%s1452_s1 + $0x10] sm:$0xff] (!%p213_p2)   ;;  %1199 = vset.pattern.permute.xlu0 (!%p213_p2), %v1248_v6  ;;  %vm302_vm0 = vsmask.f32 (!%p213_p2), 7424 }
   0x7   : > { %1128 = vmatprep.subr.bf16.mxu1 (!%p213_p2), %v1202_v1  ;;  %1109 = vmatpush3.bf16.msra.mxu0 (!%p213_p2), %v1201_v0  ;;  %v1207_v7 = vld [vmem:[%s1452_s1 + $0x58] sm:$0xff] (!%p213_p2)   ;;  %v1209_v9 = vld [vmem:[%s1452_s1 + $0x60] sm:$0xff] (!%p213_p2)   ;;  %v1211_v11 = vld [vmem:[%s1452_s1 + $0x68] sm:$0xff] (!%p213_p2)   ;;  %vm530_vm2 = vsmask.f32 (!%p213_p2), 5376  ;;  %vm795_vm3 = vcmask (!%p213_p2), 261120  }
   0x8   : > { %1129 = vmatpush3.bf16.msra.mxu1 (!%p213_p2), %v1202_v1  ;;  %1110 = vmatprep.subr.bf16.mxu0 (!%p213_p2), %v1203_v2  ;;  %v1208_v8 = vld [vmem:[%s1452_s1 + $0x18] sm:$0xff] (!%p213_p2)   ;;  %v1210_v10 = vld [vmem:[%s1452_s1 + $0x20] sm:$0xff] (!%p213_p2)   ;;  %v1212_v13 = vld [vmem:[%s1452_s1 + $0x28] sm:$0xff] (!%p213_p2)   ;;  %vm799_vm4 = vcmask (!%p213_p2), 257024   ;;  %s1249_s9 = smov (!%p213_p2), 112   ;;  %vm825_vm5 = vcmask (!%p213_p2), 130048  }
   0x9   : > { %1130 = vmatprep.subr.bf16.mxu1 (!%p213_p2), %v1204_v3  ;;  %1200 = vset.pattern.permute.xlu1 (!%p213_p2), %v1248_v6  ;;  %v1213_v17 = vld [vmem:[%s1452_s1 + $0x70] sm:$0xff] (!%p213_p2)   ;;  %v1215_v27 = vld [vmem:[%s1452_s1 + $0x78] sm:$0xff] (!%p213_p2)   ;;  %v1220_v35 = vld [vmem:[%s1452_s1 + $0x80] sm:$0xff] (!%p213_p2)   ;;  %vm910_vm10 = vcmask (!%p213_p2), 254976  }
   0xa   : > { %v1214_v22 = vld [vmem:[%s1452_s1 + $0x30] sm:$0xff] (!%p213_p2)   ;;  %v1216_v28 = vld [vmem:[%s1452_s1 + $0x38] sm:$0xff] (!%p213_p2)   ;;  %v1221_v37 = vld [vmem:[%s1452_s1 + $0xc0] sm:$0xff] (!%p213_p2)  }
   0xb   : > { %1111 = vmatpush3.bf16.msra.mxu0 (!%p213_p2), %v1203_v2  ;;  %v1222_v43 = vld [vmem:[%s1452_s1 + $0x88] sm:$0xff] (!%p213_p2)   ;;  %v256_v47 = vld [vmem:[%s1453_s2] sm:$0xff] (!%p213_p2)  ;;  %v1224_v48 = vld [vmem:[%s1452_s1 + $0x90] sm:$0xff] (!%p213_p2)  }
   0xc   : > { %1131 = vmatpush3.bf16.msra.mxu1 (!%p213_p2), %v1204_v3  ;;  %1112 = vmatprep.subr.bf16.mxu0 (!%p213_p2), %v1205_v4  ;;  %v1223_v44 = vld [vmem:[%s1452_s1 + $0xc8] sm:$0xff] (!%p213_p2)   ;;  %v258_v49 = vld [vmem:[%s1453_s2 + $0x10] sm:$0xf] (!%p213_p2)  ;;  %v1226_v52 = vld [vmem:[%s1452_s1 + $0x98] sm:$0xff] (!%p213_p2)  }
   0xd   : > { %s1459_s22 = smov (!%p242_p3, %s967_s22), 1  ;;  %1132 = vmatprep.subr.bf16.mxu1 %v1206_v5  ;;  %v1225_v50 = vld [vmem:[%s1452_s1 + $0xd0] sm:$0xff]   ;;  %779 = vperm.xlu0 %1199, %v256_v47   ;;  %v257_v51 = vld [vmem:[%s1453_s2 + $0x8] sm:$0xff]  ;;  %v1227_v53 = vld [vmem:[%s1452_s1 + $0xd8] sm:$0xff]  }
   0xe   : > { %s1064_s15 = sshll.u32 %s1459_s22, 4  ;;  %789 = vperm.xlu1 %1200, %v258_v49   ;;  %v1228_v54 = vld [vmem:[%s1452_s1 + $0xa0] sm:$0xff]   ;;  %v1230_v56 = vld [vmem:[%s1452_s1 + $0xa8] sm:$0xff]   ;;  %v1232_v58 = vld [vmem:[%s1452_s1 + $0xb0] sm:$0xff]   ;;  %s1188_s14 = smul.u32 12, %s1459_s22 }
   0xf   : > { %1113 = vmatpush3.bf16.msra.mxu0 %v1205_v4  ;;  %s246_s24 = scalar_lea.vmem %s1451_s0, %s1064_s15  ;;  %v1229_v55 = vld [vmem:[%s1452_s1 + $0xe0] sm:$0xff]   ;;  %v1231_v57 = vld [vmem:[%s1452_s1 + $0xe8] sm:$0xff]   ;;  %v1233_v59 = vld [vmem:[%s1452_s1 + $0xf0] sm:$0xff]  }
  0x10   : > { %1133 = vmatpush3.bf16.msra.mxu1 %v1206_v5  ;;  %1114 = vmatprep.subr.bf16.mxu0 %v1207_v7  ;;  %v261_v12 = vld [vmem:[%s246_s24 + $0x8] sm:$0xf]  ;;  %v262_v14 = vld [vmem:[%s246_s24 + $0xc] sm:$0x7]  ;;  %v1217_v15 = vld [vmem:[%s246_s24] sm:$0xff]   ;;  %s251_s17 = scalar_lea.vmem %s1457_s6, %s1188_s14 }
  0x11   : > { %1134 = vmatprep.subr.bf16.mxu1 %v1208_v8  ;;  %v976_v16 = vcombine.low %v261_v12, %v261_v12  ;;  %v304_v18 = vshrl.u32 %v1217_v15, 16  ;;  %v306_v19 = vshll.u32 %v1217_v15, 16  ;;  %v1338_v21 = vcombine.low %v261_v12, %v262_v14  ;;  %1144 = vmatprep.mubr.bf16.mxu1 %v1217_v15  ;;  %v1234_v60 = vld [vmem:[%s1452_s1 + $0xb8] sm:$0xff]   ;;  %v1058_v14 = vld [vmem:[%s1454_s3] ss:$0 sm:$0xff] }
  0x12   : > { %v664_v41 = vrot.slane %v1217_v15, 3  ;;  %784 = vperm.xlu0 %1199, %v257_v51   ;;  %v1235_v61 = vld [vmem:[%s1452_s1 + $0xf8] sm:$0xff]  }
  0x13   : > { %1115 = vmatpush3.bf16.msra.mxu0 %v1207_v7  ;;  %v311_v20 = vshll.u32 %v976_v16, 16  ;;  %v308_v23 = vrot.slane %v306_v19, 1  ;;  %v535_v26 = vshrl.u32 %v1338_v21, 16  ;;  %v315_v30 = vshrl.u32 %v976_v16, 16 }
  0x14   : > { %1135 = vmatpush3.bf16.msra.mxu1 %v1208_v8  ;;  %1116 = vmatprep.subr.bf16.mxu0 %v1209_v9  ;;  %v531_v31 = vrot.slane %v304_v18, 2  ;;  %v538_v32 = vshll.u32 %v1338_v21, 16  ;;  %v532_v33 = vrot.slane %v306_v19, 3  ;;  %v665_v42 = vrot.slane %v1338_v21, 3 }
  0x15   : > { %1136 = vmatprep.subr.bf16.mxu1 %v1210_v10  ;;  %v313_v24 = vrot.slane %v311_v20, 1  ;;  %v309_v25 = vor.u32 %v308_v23, %v304_v18  ;;  %v537_v34 = vrot.slane %v535_v26, 2 }
  0x16   : > { %v540_v36 = vrot.slane %v538_v32, 3  ;;  %v533_v39 = vor.u32 %v532_v33, %v531_v31  ;;  %v666_v46 = vsel %vm663_vm1, %v664_v41, %v665_v42 }
  0x17   : > { %1117 = vmatpush3.bf16.msra.mxu0 %v1209_v9  ;;  %v314_v29 = vsel %vm302_vm0, %v309_v25, %v313_v24  ;;  %v317_v38 = vor.u32 %v315_v30, %v313_v24 }
  0x18   : > { %1137 = vmatpush3.bf16.msra.mxu1 %v1210_v10  ;;  %1118 = vmatprep.subr.bf16.mxu0 %v1211_v11  ;;  %v1357_v40 = vor.u32 %v540_v36, %v537_v34 }
  0x19   : > { %1138 = vmatprep.subr.bf16.mxu1 %v1212_v13  ;;  %1124 = vmatprep.mubr.bf16.mxu0 %v314_v29 }
  0x1a   : > { %v542_v45 = vsel %vm530_vm2, %v533_v39, %v1357_v40 }
  0x1b   : > { %1119 = vmatpush3.bf16.msra.mxu0 %v1211_v11 }
  0x1c   : > { %1139 = vmatpush3.bf16.msra.mxu1 %v1212_v13  ;;  %1120 = vmatprep.subr.bf16.mxu0 %v1213_v17 }
  0x1d   : > { %1140 = vmatprep.subr.bf16.mxu1 %v1214_v22 }
  0x1f   : > { %1121 = vmatpush3.bf16.msra.mxu0 %v1213_v17 }
  0x20   : > { %1141 = vmatpush3.bf16.msra.mxu1 %v1214_v22  ;;  %1122 = vmatprep.subr.bf16.mxu0 %v1215_v27 }
  0x21   : > { %1142 = vmatprep.subr.bf16.mxu1 %v1216_v28 }
  0x23   : > { %1123 = vmatpush3.bf16.msra.mxu0 %v1215_v27 }
  0x24   : > { %1143 = vmatpush3.bf16.msra.mxu1 %v1216_v28  ;;  %1148 = vmatprep.subr.bf16.mxu0 %v1220_v35 }
  0x25   : > { %1168 = vmatprep.subr.bf16.mxu1 %v1221_v37 }
  0x26   : > { %1125 = vmatmul.mubr.bf16.vlgmr.msra.gmra.mrb[0].mxu0 %v317_v38 }
  0x27   : > { %1145 = vmatmul.mubr.bf16.vlgmr.msra.gmra.mrb[0].mxu1 %v976_v16  ;;  %1149 = vmatpush3.bf16.msra.mxu0 %v1220_v35 }
  0x28   : > { %1169 = vmatpush3.bf16.msra.mxu1 %v1221_v37  ;;  %1150 = vmatprep.subr.bf16.mxu0 %v1222_v43 }
  0x29   : > { %1170 = vmatprep.subr.bf16.mxu1 %v1223_v44  ;;  %1164 = vmatprep.mubr.bf16.mxu0 %v542_v45 }
  0x2a   : > { %1184 = vmatprep.mubr.bf16.mxu1 %v666_v46 }
  0x2b   : > { %1151 = vmatpush3.bf16.msra.mxu0 %v1222_v43 }
  0x2c   : > { %1171 = vmatpush3.bf16.msra.mxu1 %v1223_v44  ;;  %1152 = vmatprep.subr.bf16.mxu0 %v1224_v48 }
  0x2d   : > { %1172 = vmatprep.subr.bf16.mxu1 %v1225_v50 }
  0x2f   : > { %1153 = vmatpush3.bf16.msra.mxu0 %v1224_v48 }
  0x30   : > { %1173 = vmatpush3.bf16.msra.mxu1 %v1225_v50  ;;  %1154 = vmatprep.subr.bf16.mxu0 %v1226_v52 }
  0x31   : > { %1174 = vmatprep.subr.bf16.mxu1 %v1227_v53 }
  0x33   : > { %1155 = vmatpush3.bf16.msra.mxu0 %v1226_v52 }
  0x34   : > { %1175 = vmatpush3.bf16.msra.mxu1 %v1227_v53  ;;  %1156 = vmatprep.subr.bf16.mxu0 %v1228_v54 }
  0x35   : > { %1176 = vmatprep.subr.bf16.mxu1 %v1229_v55 }
  0x37   : > { %1157 = vmatpush3.bf16.msra.mxu0 %v1228_v54 }
  0x38   : > { %1177 = vmatpush3.bf16.msra.mxu1 %v1229_v55  ;;  %1158 = vmatprep.subr.bf16.mxu0 %v1230_v56 }
  0x39   : > { %1178 = vmatprep.subr.bf16.mxu1 %v1231_v57 }
  0x3b   : > { %1159 = vmatpush3.bf16.msra.mxu0 %v1230_v56 }
  0x3c   : > { %1179 = vmatpush3.bf16.msra.mxu1 %v1231_v57  ;;  %1160 = vmatprep.subr.bf16.mxu0 %v1232_v58 }
  0x3d   : > { %1180 = vmatprep.subr.bf16.mxu1 %v1233_v59 }
  0x3f   : > { %1161 = vmatpush3.bf16.msra.mxu0 %v1232_v58 }
  0x40   : > { %1181 = vmatpush3.bf16.msra.mxu1 %v1233_v59  ;;  %1162 = vmatprep.subr.bf16.mxu0 %v1234_v60 }
  0x41   : > { %1182 = vmatprep.subr.bf16.mxu1 %v1235_v61 }
  0x43   : > { %1163 = vmatpush3.bf16.msra.mxu0 %v1234_v60 }
  0x44   : > { %1183 = vmatpush3.bf16.msra.mxu1 %v1235_v61 }
  0x46   : > { %1165 = vmatmul.mubr.bf16.vlgmr.msra.gmra.mrb[4].mxu0 %v1357_v40 }
  0x47   : > { %1185 = vmatmul.mubr.bf16.vlgmr.msra.gmra.mrb[4].mxu1 %v665_v42 }
  0x8c   : > { %v780_v10 = vpop.permute.xlu0 %779 }
  0x8d   : > { %v790_v27 = vpop.permute.xlu1 %789 }
  0x91   : > { %v785_v32 = vpop.permute.xlu0 %784 }
  0xf9   : > { %v1126_v62 = vpop.f32.mrb[0].mxu0 }
  0xfa   : > { %v1146_v63 = vpop.f32.mrb[0].mxu1  ;;  %v402_v0 = vpop.f32.mrb[1].mxu0 }
  0xfb   : > { %v507_v1 = vadd.f32 %v1146_v63, %v1126_v62  ;;  %v498_v2 = vpop.f32.mrb[1].mxu1  ;;  %v1127_v3 = vpop.f32.mrb[2].mxu0 }
  0xfc   : > { %v499_v4 = vadd.f32 %v498_v2, %v402_v0  ;;  %v1147_v5 = vpop.f32.mrb[2].mxu1  ;;  %v405_v6 = vpop.f32.mrb[3].mxu0 }
  0xfd   : > { %v501_v7 = vpop.f32.mrb[3].mxu1 }
  0xfe   : > { %v502_v8 = vadd.f32 %v501_v7, %v405_v6 }
 0x119   : > { %v1166_v9 = vpop.f32.mrb[4].mxu0 }
 0x11a   : > { %v643_v11 = vadd.f32 %v1166_v9, %v507_v1  ;;  %v1186_v12 = vpop.f32.mrb[4].mxu1  ;;  %v627_v13 = vpop.f32.mrb[5].mxu0 }
 0x11b   : > { %v641_v15 = vadd.f32 %v627_v13, %v499_v4  ;;  %v751_v16 = vpop.f32.mrb[5].mxu1  ;;  %v1167_v17 = vpop.f32.mrb[6].mxu0 }
 0x11c   : > { %v767_v18 = vadd.f32 %v1186_v12, %v643_v11  ;;  %v1187_v19 = vpop.f32.mrb[6].mxu1  ;;  %v630_v20 = vpop.f32.mrb[7].mxu0 }
 0x11d   : > { %v765_v21 = vadd.f32 %v751_v16, %v641_v15  ;;  %v642_v22 = vadd.f32 %v630_v20, %v502_v8  ;;  %v754_v23 = vpop.f32.mrb[7].mxu1  ;;  %v856_v19 = vlaneseq }
 0x11e   : > { %v1416_v24 = vadd.f32 %v1058_v14, %v767_v18 }
 0x11f   : > { %v1418_v25 = vadd.f32 %v1058_v14, %v765_v21  ;;  %v766_v26 = vadd.f32 %v754_v23, %v642_v22  ;;  %v857_v20 = vand.u32 127, %v856_v19  ;;  %v870_v21 = vshrl.u32 %v856_v19, 7  ;;  %v254_v23 = vld [vmem:[%s1455_s4] sm:$0x1] }
 0x120   : > { %v810_v31 = vmul.f32 %v1416_v24, %v1416_v24  ;;  %v794_v36 = vmul.f32 %v790_v27, %v1416_v24 }
 0x121   : > { %v792_v28 = vmul.f32 %v780_v10, %v1418_v25  ;;  %v808_v29 = vmul.f32 %v1418_v25, %v1418_v25  ;;  %v1423_v30 = vadd.f32 %v1058_v14, %v766_v26  ;;  %vm858_vm6 = vcmp.lt.s32.totalorder %v857_v20, 16 }
 0x122   : > { %v813_v40 = vmul.f32 %v810_v31, %v790_v27  ;;  %v800_v44 = vsel %vm799_vm4, %v794_v36, 0.0  ;;  %v871_v27 = vsub.s32 0, %v870_v21 }
 0x123   : > { %v793_v33 = vmul.f32 %v785_v32, %v1423_v30  ;;  %v809_v34 = vmul.f32 %v1423_v30, %v1423_v30  ;;  %v811_v35 = vmul.f32 %v808_v29, %v780_v10  ;;  %v796_v37 = vsel %vm795_vm3, %v792_v28, 0.0 }
 0x124   : > { %v817_v47 = vsel %vm799_vm4, %v813_v40, 0.0 }
 0x125   : > { %v797_v38 = vsel %vm795_vm3, %v793_v33, 0.0  ;;  %v812_v39 = vmul.f32 %v809_v34, %v785_v32  ;;  %v814_v42 = vsel %vm795_vm3, %v811_v35, 0.0  ;;  %v255_v32 = vld [vmem:[%s1456_s5] sm:$0x1] }
 0x126   : > { %v798_v41 = vadd.f32 %v797_v38, %v796_v37 }
 0x127   : > { %v815_v43 = vsel %vm795_vm3, %v812_v39, 0.0 }
 0x128   : > { %v816_v45 = vadd.f32 %v815_v43, %v814_v42  ;;  %v801_v46 = vadd.f32 %v800_v44, %v798_v41 }
 0x12a   : > { %v802_v48 = vrot.slane %v801_v46, 4  ;;  %v818_v49 = vadd.f32 %v817_v47, %v816_v45 }
 0x12c   : > { %v803_v50 = vadd.f32 %v802_v48, %v801_v46  ;;  %v819_v51 = vrot.slane %v818_v49, 4 }
 0x12e   : > { %v820_v52 = vadd.f32 %v819_v51, %v818_v49  ;;  %v804_v53 = vrot.slane %v803_v50, 2 }
 0x130   : > { %v805_v54 = vadd.f32 %v804_v53, %v803_v50  ;;  %v821_v55 = vrot.slane %v820_v52, 2 }
 0x132   : > { %v806_v56 = vrot.slane %v805_v54, 1  ;;  %v822_v57 = vadd.f32 %v821_v55, %v820_v52 }
 0x134   : > { %v807_v58 = vadd.f32 %v806_v56, %v805_v54  ;;  %v823_v59 = vrot.slane %v822_v57, 1 }
 0x136   : > { %831 = vrot.lane.b32.xlu1 %v807_v58, %s1249_s9  ;;  %v824_v60 = vadd.f32 %v823_v59, %v822_v57  ;;  %v826_v61 = vsel %vm825_vm5, %v807_v58, 0.0 }
 0x138   : > { %846 = vrot.lane.b32.xlu0 %v824_v60, %s1249_s9  ;;  %v838_v2 = vsel %vm825_vm5, %v824_v60, 0.0 }
 0x15a   : > { %827 = vadd.xlane.f32.xlu1 %v826_v61 }
 0x1a8   : > { %v832_v62 = vpop.permute.xlu1 %831 }
 0x1a9   : > { %v834_v63 = vsel %vm825_vm5, %v832_v62, 0.0 }
 0x1aa   : > { %v847_v0 = vpop.permute.xlu0 %846  ;;  %835 = vadd.xlane.f32.xlu0 %v834_v63 }
 0x1ab   : > { %v849_v1 = vsel %vm825_vm5, %v847_v0, 0.0 }
 0x1ac   : > { %850 = vadd.xlane.f32.xlu1 %v849_v1 }
 0x1ae   : > { %839 = vadd.xlane.f32.xlu0 %v838_v2 }
 0x1e7   : > { %v828_v3 = vpop.xlane.xlu1 %827 }
 0x1e8   : > { %v829_v5 = vmul.f32 0.00390625, %v828_v3 }
 0x1ea   : > { %v842_v11 = vmul.f32 %v829_v5, %v829_v5 }
 0x237   : > { %v836_v4 = vpop.xlane.xlu0 %835 }
 0x238   : > { %v837_v6 = vmul.f32 0.00390625, %v836_v4 }
 0x239   : > { %v851_v7 = vpop.xlane.xlu1 %850 }
 0x23a   : > { %v853_v8 = vmul.f32 %v837_v6, %v837_v6  ;;  %v852_v9 = vmul.f32 0.00390625, %v851_v7  ;;  %v859_v31 = vsel %vm858_vm6, %v829_v5, %v837_v6 }
 0x23b   : > { %v840_v10 = vpop.xlane.xlu0 %839 }
 0x23c   : > { %v854_v12 = vsub.f32 %v852_v9, %v853_v8  ;;  %v841_v13 = vmul.f32 0.00390625, %v840_v10 }
 0x23e   : > { %v855_v14 = vmax.f32 %v854_v12, 0.0  ;;  %v843_v15 = vsub.f32 %v841_v13, %v842_v11 }
 0x240   : > { %v862_v16 = vadd.f32 1e-05, %v855_v14  ;;  %v844_v17 = vmax.f32 %v843_v15, 0.0 }
 0x242   : > { %v860_v18 = vadd.f32 1e-05, %v844_v17  ;;  %1236 = vrsqrt.f32 %v862_v16 }
 0x244   : > { %1238 = vrsqrt.f32 %v860_v18 }
 0x24c   : > { %v1237_v22 = vpop.eup %1236 }
 0x24e   : > { %v1239_v26 = vpop.eup %1238 }
 0x24f   : > { %v864_v28 = vsel %vm858_vm6, %v1239_v26, %v1237_v22 }
 0x250   : > { %v865_v29 = vmul.f32 %v864_v28, %v254_v23 }
 0x252   : > { %v866_v33 = vmul.f32 %v865_v29, %v859_v31  ;;  %v872_v34 = vrot.slane %v865_v29, %v871_v27 }
 0x254   : > { %v867_v35 = vsub.f32 %v255_v32, %v866_v33  ;;  %v874_v36 = vmul.f32 %v872_v34, %v1418_v25  ;;  %v875_v37 = vmul.f32 %v872_v34, %v1423_v30  ;;  %v876_v38 = vmul.f32 %v872_v34, %v1416_v24 }
 0x256   : > { %v881_v39 = vrot.slane %v867_v35, %v871_v27 }
 0x258   : > { %v883_v40 = vadd.f32 %v881_v39, %v874_v36  ;;  %v884_v41 = vadd.f32 %v881_v39, %v875_v37  ;;  %v885_v42 = vadd.f32 %v881_v39, %v876_v38 }
 0x25a   : > { %vm886_vm7 = vcmp.gt.f32.partialorder %v883_v40, 0.0  ;;  %vm887_vm8 = vcmp.gt.f32.partialorder %v884_v41, 0.0  ;;  %vm888_vm9 = vcmp.gt.f32.partialorder %v885_v42, 0.0  ;;  %v889_v43 = vmul.f32 0.2, %v883_v40 }
 0x25b   : > { %v890_v44 = vmul.f32 0.2, %v884_v41  ;;  %v891_v45 = vmul.f32 0.2, %v885_v42 }
 0x25c   : > { %v892_v25 = vsel %vm886_vm7, %v883_v40, %v889_v43 }
 0x25d   : > { %v893_v30 = vsel %vm887_vm8, %v884_v41, %v890_v44  ;;  %v894_v46 = vsel %vm888_vm9, %v885_v42, %v891_v45  ;;  %v1065_v24 = vpack.c.bf16 %v892_v25, %v892_v25 }
 0x25e   : > { %v1066_v47 = vpack.c.bf16 %v893_v30, %v893_v30  ;;  %v1067_v48 = vpack.c.bf16 %v894_v46, %v894_v46 }
 0x25f   : > { %908 = vst.msk [vmem:[%s251_s17] sm:$0xf] %vm799_vm4, %v1065_v24 }
 0x260   : > { %909 = vst.msk [vmem:[%s251_s17 + $0x4] sm:$0xf] %vm799_vm4, %v1066_v47 }
 0x261   : > { %911 = vst.msk [vmem:[%s251_s17 + $0x8] sm:$0x3] %vm910_vm10, %v1067_v48 }
 0x262 PF: > { %s16_s21 = sadd.s32 1, %s1246_s21  }
 0x263   : > { %p13_p4 = scmp.ge.s32.totalorder %s16_s21, 4  }
 0x265   :  { %15 = sbr.rel (!%p13_p4) target bundleno = 1 (0x1), region = 77 }

</bundles_post_ra>
